<compile_context>
chip_gen: v7x
topology: tpu7x:2x2x1
jax: 0.10.0
libtpu: 0.0.40
codegen_flags: <defaults>
</compile_context>

<pallas_src>
import numpy as np

import jax
import jax.numpy as jnp
from jax import lax
from jax.experimental import pallas as pl
from jax.experimental.pallas import tpu as pltpu

MXU_DTYPE = jnp.bfloat16          # MXU feed dtype; accumulation is always f32.
_VMEM_LIMIT = 32 * 1024 * 1024    # conservative: fits v5e/v6e/v7x scoped VMEM.


def _round_up(x, m):
    return (x + m - 1) // m * m


# ---------------------------------------------------------------------------
# Fused conv5x5(pad=2) + bias + ReLU + maxpool2x2 kernel (one image per step)
# ---------------------------------------------------------------------------

def _make_conv_relu_pool_kernel(H, W, Cin, Cout):
    """Kernel factory with static geometry baked in.

    Flat layouts (row stride S = W + 4, zero border of 2 pixels):
      x_ref  : (1, Cin, Lin)  spatially padded image, lane-dense
      w_ref  : (Cout, 25) if Cin == 1 else (25, Cout, Cin)
      b_ref  : (Cout, 1)
      sel_ref: (Lm, Lout) constant 0/1 matrix picking the stride-2 pool
               anchors and scattering them into the next stage's layout
      o_ref  : (1, Cout, Lout)
      y_ref  : (Cout, Lconv) f32 scratch holding the pre-pool activation
    """
    S = W + 4
    Lconv = (H - 1) * S + W            # conv outputs live at p = h*S + w
    Lm = (H - 2) * S + W - 1           # pool anchors live at p = 2*ho*S + 2*wo

    def kernel(x_ref, w_ref, b_ref, sel_ref, o_ref, y_ref):
        acc = jnp.zeros((Cout, Lconv), jnp.float32)
        # In-VMEM im2col: 25 static lane-shifted reads of the padded slab.
        for kh in range(5):
            for kw in range(5):
                off = kh * S + kw
                t = kh * 5 + kw
                if Cin == 1:
                    # conv1: K = 1 -> cheaper on the VPU than a K=1 matmul.
                    xs = x_ref[0, :, pl.ds(off, Lconv)].astype(jnp.float32)
                    wt = w_ref[:, pl.ds(t, 1)].astype(jnp.float32)  # (Cout, 1)
                    acc = acc + wt * xs
                else:
                    xs = x_ref[0, :, pl.ds(off, Lconv)]             # (Cin, L)
                    acc = acc + jnp.dot(w_ref[t], xs,               # MXU, f32 acc
                                        preferred_element_type=jnp.float32)
        # Fused epilogue: bias + ReLU (f32).
        y_ref[...] = jnp.maximum(acc + b_ref[...], 0.0)
        # Fused 2x2 max-pool: elementwise max of the 4 lane-shifted copies ...
        m = jnp.maximum(
            jnp.maximum(y_ref[:, pl.ds(0, Lm)], y_ref[:, pl.ds(1, Lm)]),
            jnp.maximum(y_ref[:, pl.ds(S, Lm)], y_ref[:, pl.ds(S + 1, Lm)]))
        # ... then compact the stride-2 anchors straight into the next stage's
        # flat layout with a tiny constant selection matmul (no lane gathers).
        o_ref[0] = jnp.dot(m, sel_ref[...],
                           preferred_element_type=jnp.float32).astype(o_ref.dtype)

    return kernel


def conv5x5_relu_pool(x_flat, w, b, sel, *, H, W, Cin, Cout, out_dtype):
    """x_flat: (B, Cin, (H+4)*(W+4)) padded flat images -> (B, Cout, Lout)."""
    B, _, Lin = x_flat.shape
    Lout = sel.shape[1]
    Lconv = (H - 1) * (W + 4) + W
    kernel = _make_conv_relu_pool_kernel(H, W, Cin, Cout)
    return pl.pallas_call(
        kernel,
        out_shape=jax.ShapeDtypeStruct((B, Cout, Lout), out_dtype),
        grid=(B,),
        in_specs=[
            pl.BlockSpec((1, Cin, Lin), lambda i: (i, 0, 0)),
            pl.BlockSpec(w.shape, lambda i: (0,) * w.ndim),   # resident weights
            pl.BlockSpec((Cout, 1), lambda i: (0, 0)),
            pl.BlockSpec(sel.shape, lambda i: (0, 0)),        # resident constant
        ],
        out_specs=pl.BlockSpec((1, Cout, Lout), lambda i: (i, 0, 0)),
        scratch_shapes=[pltpu.VMEM((Cout, Lconv), jnp.float32)],
        compiler_params=pltpu.CompilerParams(
            dimension_semantics=("parallel",),
            vmem_limit_bytes=_VMEM_LIMIT),
    )(x_flat, w, b, sel)


# ---------------------------------------------------------------------------
# Linear head: M-tiled matmul + bias, N padded to 128 for unmasked stores
# ---------------------------------------------------------------------------

def _linear_kernel(a_ref, w_ref, b_ref, o_ref):
    a = a_ref[...].astype(w_ref.dtype)
    o_ref[...] = (jnp.dot(a, w_ref[...], preferred_element_type=jnp.float32)
                  + b_ref[...])


def linear(x, w_pad, b_pad, n_valid):
    """x: (B, K) f32, w_pad: (K, Npad) MXU dtype, b_pad: (1, Npad) f32."""
    B, K = x.shape
    Npad = w_pad.shape[1]
    tm = 128 if B >= 128 else _round_up(B, 8)
    Mpad = _round_up(B, tm)
    if Mpad != B:
        x = jnp.pad(x, ((0, Mpad - B), (0, 0)))
    out = pl.pallas_call(
        _linear_kernel,
        out_shape=jax.ShapeDtypeStruct((Mpad, Npad), jnp.float32),
        grid=(Mpad // tm,),
        in_specs=[
            pl.BlockSpec((tm, K), lambda i: (i, 0)),
            pl.BlockSpec((K, Npad), lambda i: (0, 0)),
            pl.BlockSpec((1, Npad), lambda i: (0, 0)),
        ],
        out_specs=pl.BlockSpec((tm, Npad), lambda i: (i, 0)),
        compiler_params=pltpu.CompilerParams(
            dimension_semantics=("parallel",),
            vmem_limit_bytes=_VMEM_LIMIT),
    )(x, w_pad, b_pad)
    return out[:B, :n_valid]


# ---------------------------------------------------------------------------
# Parameters (PyTorch layout) and one-time repack for the kernels
# ---------------------------------------------------------------------------

def init_params(key):
    """Matches PyTorch Conv2d/Linear default init U(-1/sqrt(fan_in), +)."""
    k = jax.random.split(key, 6)

    def uniform(kk, shape, fan_in):
        bound = 1.0 / float(np.sqrt(fan_in))
        return jax.random.uniform(kk, shape, jnp.float32, -bound, bound)

    return {
        "w1": uniform(k[0], (16, 1, 5, 5), 1 * 25),
        "b1": uniform(k[1], (16,), 1 * 25),
        "w2": uniform(k[2], (32, 16, 5, 5), 16 * 25),
        "b2": uniform(k[3], (32,), 16 * 25),
        "wout": uniform(k[4], (10, 32 * 7 * 7), 32 * 7 * 7),   # PyTorch (out, in)
        "bout": uniform(k[5], (10,), 32 * 7 * 7),
    }


def _pool_select_matrix(H, W, n_out_cols, out_index):
    """(Lm, n_out_cols) 0/1 matrix: row p=2*ho*S+2*wo -> column out_index(ho,wo)."""
    S = W + 4
    Lm = (H - 2) * S + W - 1
    sel = np.zeros((Lm, n_out_cols), np.float32)
    for ho in range(H // 2):
        for wo in range(W // 2):
            sel[2 * ho * S + 2 * wo, out_index(ho, wo)] = 1.0
    return jnp.asarray(sel)


# Lane widths (all multiples of 128 so every store is unmasked).
_L1_OUT = _round_up(18 * 18, 128)   # conv1 output slab: 18x18 padded map -> 384
_L2_OUT = 128                       # conv2 output slab: 7x7 map in first 49 lanes


def prepare_params(params):
    """One-time repack of PyTorch-layout weights (outside the hot path)."""
    w1 = params["w1"].reshape(16, 25).astype(jnp.float32)          # (Cout, kh*5+kw)
    b1 = params["b1"].reshape(16, 1).astype(jnp.float32)
    w2 = jnp.transpose(params["w2"].reshape(32, 16, 25),
                       (2, 0, 1)).astype(MXU_DTYPE)                # (25, Cout, Cin)
    b2 = params["b2"].reshape(32, 1).astype(jnp.float32)

    # conv1 pool output is written directly in conv2's padded 18x18 flat layout
    # (2-pixel zero border, lane-padded to 384), so there is no relayout glue
    # between the stages and all stores are unmasked.
    sel1 = _pool_select_matrix(28, 28, _L1_OUT,
                               lambda ho, wo: (ho + 2) * 18 + (wo + 2))
    # conv2 pool output: compact (c, ho, wo) NCHW order, lane-padded 49 -> 128.
    sel2 = _pool_select_matrix(14, 14, _L2_OUT, lambda ho, wo: ho * 7 + wo)

    wout = jnp.zeros((32 * 7 * 7, 128), MXU_DTYPE)
    wout = wout.at[:, :10].set(params["wout"].T.astype(MXU_DTYPE))
    bout = jnp.zeros((1, 128), jnp.float32).at[0, :10].set(params["bout"])

    return {"w1": w1, "b1": b1, "sel1": sel1,
            "w2": w2, "b2": b2, "sel2": sel2,
            "wout": wout, "bout": bout}


# ---------------------------------------------------------------------------
# Forward pass
# ---------------------------------------------------------------------------

@jax.jit
def cnn_forward(x, prep):
    """x: (B, 1, 28, 28) f32 -> (logits (B, 10), features (B, 1568))."""
    B = x.shape[0]
    # Stage-1 input: zero-pad (padding=2) and flatten; lane axis = 32*32 = 1024.
    x1 = jnp.pad(x, ((0, 0), (0, 0), (2, 2), (2, 2))).reshape(B, 1, 32 * 32)
    # conv1 + ReLU + pool -> (B, 16, 384) bf16, already in conv2's input layout.
    h1 = conv5x5_relu_pool(x1, prep["w1"], prep["b1"], prep["sel1"],
                           H=28, W=28, Cin=1, Cout=16, out_dtype=MXU_DTYPE)
    # conv2 + ReLU + pool -> (B, 32, 128) f32, first 49 lanes = the 7x7 map.
    h2 = conv5x5_relu_pool(h1, prep["w2"], prep["b2"], prep["sel2"],
                           H=14, W=14, Cin=16, Cout=32, out_dtype=jnp.float32)
    feats = h2[:, :, :49].reshape(B, 32 * 7 * 7)   # NCHW flatten, like x.view()
    logits = linear(feats, prep["wout"], prep["bout"], 10)
    return logits, feats


def _reference_forward(x, params):
    """Pure-XLA reference identical to the PyTorch module (f32)."""
    def conv_relu(h, w, b):
        y = lax.conv_general_dilated(h, w, (1, 1), ((2, 2), (2, 2)),
                                     dimension_numbers=("NCHW", "OIHW", "NCHW"))
        return jnp.maximum(y + b[None, :, None, None], 0.0)

    def pool(h):
        return lax.reduce_window(h, -jnp.inf, lax.max,
                                 (1, 1, 2, 2), (1, 1, 2, 2), "VALID")

    h = pool(conv_relu(x, params["w1"], params["b1"]))
    h = pool(conv_relu(h, params["w2"], params["b2"]))
    flat = h.reshape(x.shape[0], -1)
    return flat @ params["wout"].T + params["bout"], flat


if __name__ == "__main__":
    key = jax.random.PRNGKey(0)
    kx, kp = jax.random.split(key)
    # MNIST-shaped input: the 32*7*7 flatten implies 28x28 spatial.
    x = jax.random.normal(kx, (2, 1, 28, 28), dtype=jnp.float32)

    params = init_params(kp)
    prep = prepare_params(params)

    logits, feats = cnn_forward(x, prep)
    jax.block_until_ready((logits, feats))

    assert logits.shape == (2, 10), logits.shape
    assert feats.shape == (2, 32 * 7 * 7), feats.shape

    # Loose-tolerance sanity check vs the XLA reference (bf16 MXU feed ~1e-3 err).
    ref_logits, ref_feats = _reference_forward(x, params)
    assert jnp.allclose(feats, ref_feats, atol=5e-2, rtol=5e-2), (
        float(jnp.max(jnp.abs(feats - ref_feats))))
    assert jnp.allclose(logits, ref_logits, atol=5e-2, rtol=5e-2), (
        float(jnp.max(jnp.abs(logits - ref_logits))))

    print("KERNEL_OK")
</pallas_src>

<mosaic_0001>
module attributes {stable_mosaic.version = 11 : i64} {
  func.func @kernel(%arg0: i32, %arg1: memref<1x1x1024xf32, #tpu.memory_space<vmem>>, %arg2: memref<16x25xf32, #tpu.memory_space<vmem>>, %arg3: memref<16x1xf32, #tpu.memory_space<vmem>>, %arg4: memref<859x384xf32, #tpu.memory_space<vmem>>, %arg5: memref<1x16x384xbf16, #tpu.memory_space<vmem>>, %arg6: memref<16x892xf32, #tpu.memory_space<vmem>>) attributes {dimension_semantics = [#tpu.dimension_semantics<parallel>], iteration_bounds = array<i64: 2>, scalar_prefetch = 0 : i64, scratch_operands = 1 : i64, tpu.core_type = #tpu.core_type<tc>, window_params = [{transform_indices = @transform_0, window_bounds = array<i64: 1, 1, 1024>}, {pipeline_mode = #tpu.pipeline_mode<synchronous>, transform_indices = @transform_1, window_bounds = array<i64: 16, 25>}, {pipeline_mode = #tpu.pipeline_mode<synchronous>, transform_indices = @transform_2, window_bounds = array<i64: 16, 1>}, {pipeline_mode = #tpu.pipeline_mode<synchronous>, transform_indices = @transform_3, window_bounds = array<i64: 859, 384>}, {transform_indices = @transform_4, window_bounds = array<i64: 1, 16, 384>}]} {
    %cst = arith.constant 0.000000e+00 : f32
    %0 = vector.broadcast %cst : f32 to vector<16x892xf32>
    %c0 = arith.constant 0 : index
    %c0_0 = arith.constant 0 : index
    %c0_1 = arith.constant 0 : index
    %1 = vector.load %arg1[%c0, %c0_0, %c0_1] : memref<1x1x1024xf32, #tpu.memory_space<vmem>>, vector<1x1x892xf32>
    %2 = vector.shape_cast %1 : vector<1x1x892xf32> to vector<1x892xf32>
    %c0_2 = arith.constant 0 : index
    %c0_3 = arith.constant 0 : index
    %3 = vector.load %arg2[%c0_2, %c0_3] : memref<16x25xf32, #tpu.memory_space<vmem>>, vector<16x1xf32>
    %4 = vector.broadcast %3 : vector<16x1xf32> to vector<16x892xf32>
    %5 = vector.broadcast %2 : vector<1x892xf32> to vector<16x892xf32>
    %6 = arith.mulf %4, %5 : vector<16x892xf32>
    %7 = arith.addf %0, %6 : vector<16x892xf32>
    %c0_4 = arith.constant 0 : index
    %c0_5 = arith.constant 0 : index
    %c1 = arith.constant 1 : index
    %8 = vector.load %arg1[%c0_4, %c0_5, %c1] : memref<1x1x1024xf32, #tpu.memory_space<vmem>>, vector<1x1x892xf32>
    %9 = vector.shape_cast %8 : vector<1x1x892xf32> to vector<1x892xf32>
    %c0_6 = arith.constant 0 : index
    %c1_7 = arith.constant 1 : index
    %10 = vector.load %arg2[%c0_6, %c1_7] : memref<16x25xf32, #tpu.memory_space<vmem>>, vector<16x1xf32>
    %11 = vector.broadcast %10 : vector<16x1xf32> to vector<16x892xf32>
    %12 = vector.broadcast %9 : vector<1x892xf32> to vector<16x892xf32>
    %13 = arith.mulf %11, %12 : vector<16x892xf32>
    %14 = arith.addf %7, %13 : vector<16x892xf32>
    %c0_8 = arith.constant 0 : index
    %c0_9 = arith.constant 0 : index
    %c2 = arith.constant 2 : index
    %15 = vector.load %arg1[%c0_8, %c0_9, %c2] : memref<1x1x1024xf32, #tpu.memory_space<vmem>>, vector<1x1x892xf32>
    %16 = vector.shape_cast %15 : vector<1x1x892xf32> to vector<1x892xf32>
    %c0_10 = arith.constant 0 : index
    %c2_11 = arith.constant 2 : index
    %17 = vector.load %arg2[%c0_10, %c2_11] : memref<16x25xf32, #tpu.memory_space<vmem>>, vector<16x1xf32>
    %18 = vector.broadcast %17 : vector<16x1xf32> to vector<16x892xf32>
    %19 = vector.broadcast %16 : vector<1x892xf32> to vector<16x892xf32>
    %20 = arith.mulf %18, %19 : vector<16x892xf32>
    %21 = arith.addf %14, %20 : vector<16x892xf32>
    %c0_12 = arith.constant 0 : index
    %c0_13 = arith.constant 0 : index
    %c3 = arith.constant 3 : index
    %22 = vector.load %arg1[%c0_12, %c0_13, %c3] : memref<1x1x1024xf32, #tpu.memory_space<vmem>>, vector<1x1x892xf32>
    %23 = vector.shape_cast %22 : vector<1x1x892xf32> to vector<1x892xf32>
    %c0_14 = arith.constant 0 : index
    %c3_15 = arith.constant 3 : index
    %24 = vector.load %arg2[%c0_14, %c3_15] : memref<16x25xf32, #tpu.memory_space<vmem>>, vector<16x1xf32>
    %25 = vector.broadcast %24 : vector<16x1xf32> to vector<16x892xf32>
    %26 = vector.broadcast %23 : vector<1x892xf32> to vector<16x892xf32>
    %27 = arith.mulf %25, %26 : vector<16x892xf32>
    %28 = arith.addf %21, %27 : vector<16x892xf32>
    %c0_16 = arith.constant 0 : index
    %c0_17 = arith.constant 0 : index
    %c4 = arith.constant 4 : index
    %29 = vector.load %arg1[%c0_16, %c0_17, %c4] : memref<1x1x1024xf32, #tpu.memory_space<vmem>>, vector<1x1x892xf32>
    %30 = vector.shape_cast %29 : vector<1x1x892xf32> to vector<1x892xf32>
    %c0_18 = arith.constant 0 : index
    %c4_19 = arith.constant 4 : index
    %31 = vector.load %arg2[%c0_18, %c4_19] : memref<16x25xf32, #tpu.memory_space<vmem>>, vector<16x1xf32>
    %32 = vector.broadcast %31 : vector<16x1xf32> to vector<16x892xf32>
    %33 = vector.broadcast %30 : vector<1x892xf32> to vector<16x892xf32>
    %34 = arith.mulf %32, %33 : vector<16x892xf32>
    %35 = arith.addf %28, %34 : vector<16x892xf32>
    %c0_20 = arith.constant 0 : index
    %c0_21 = arith.constant 0 : index
    %c32 = arith.constant 32 : index
    %36 = vector.load %arg1[%c0_20, %c0_21, %c32] : memref<1x1x1024xf32, #tpu.memory_space<vmem>>, vector<1x1x892xf32>
    %37 = vector.shape_cast %36 : vector<1x1x892xf32> to vector<1x892xf32>
    %c0_22 = arith.constant 0 : index
    %c5 = arith.constant 5 : index
    %38 = vector.load %arg2[%c0_22, %c5] : memref<16x25xf32, #tpu.memory_space<vmem>>, vector<16x1xf32>
    %39 = vector.broadcast %38 : vector<16x1xf32> to vector<16x892xf32>
    %40 = vector.broadcast %37 : vector<1x892xf32> to vector<16x892xf32>
    %41 = arith.mulf %39, %40 : vector<16x892xf32>
    %42 = arith.addf %35, %41 : vector<16x892xf32>
    %c0_23 = arith.constant 0 : index
    %c0_24 = arith.constant 0 : index
    %c33 = arith.constant 33 : index
    %43 = vector.load %arg1[%c0_23, %c0_24, %c33] : memref<1x1x1024xf32, #tpu.memory_space<vmem>>, vector<1x1x892xf32>
    %44 = vector.shape_cast %43 : vector<1x1x892xf32> to vector<1x892xf32>
    %c0_25 = arith.constant 0 : index
    %c6 = arith.constant 6 : index
    %45 = vector.load %arg2[%c0_25, %c6] : memref<16x25xf32, #tpu.memory_space<vmem>>, vector<16x1xf32>
    %46 = vector.broadcast %45 : vector<16x1xf32> to vector<16x892xf32>
    %47 = vector.broadcast %44 : vector<1x892xf32> to vector<16x892xf32>
    %48 = arith.mulf %46, %47 : vector<16x892xf32>
    %49 = arith.addf %42, %48 : vector<16x892xf32>
    %c0_26 = arith.constant 0 : index
    %c0_27 = arith.constant 0 : index
    %c34 = arith.constant 34 : index
    %50 = vector.load %arg1[%c0_26, %c0_27, %c34] : memref<1x1x1024xf32, #tpu.memory_space<vmem>>, vector<1x1x892xf32>
    %51 = vector.shape_cast %50 : vector<1x1x892xf32> to vector<1x892xf32>
    %c0_28 = arith.constant 0 : index
    %c7 = arith.constant 7 : index
    %52 = vector.load %arg2[%c0_28, %c7] : memref<16x25xf32, #tpu.memory_space<vmem>>, vector<16x1xf32>
    %53 = vector.broadcast %52 : vector<16x1xf32> to vector<16x892xf32>
    %54 = vector.broadcast %51 : vector<1x892xf32> to vector<16x892xf32>
    %55 = arith.mulf %53, %54 : vector<16x892xf32>
    %56 = arith.addf %49, %55 : vector<16x892xf32>
    %c0_29 = arith.constant 0 : index
    %c0_30 = arith.constant 0 : index
    %c35 = arith.constant 35 : index
    %57 = vector.load %arg1[%c0_29, %c0_30, %c35] : memref<1x1x1024xf32, #tpu.memory_space<vmem>>, vector<1x1x892xf32>
    %58 = vector.shape_cast %57 : vector<1x1x892xf32> to vector<1x892xf32>
    %c0_31 = arith.constant 0 : index
    %c8 = arith.constant 8 : index
    %59 = vector.load %arg2[%c0_31, %c8] : memref<16x25xf32, #tpu.memory_space<vmem>>, vector<16x1xf32>
    %60 = vector.broadcast %59 : vector<16x1xf32> to vector<16x892xf32>
    %61 = vector.broadcast %58 : vector<1x892xf32> to vector<16x892xf32>
    %62 = arith.mulf %60, %61 : vector<16x892xf32>
    %63 = arith.addf %56, %62 : vector<16x892xf32>
    %c0_32 = arith.constant 0 : index
    %c0_33 = arith.constant 0 : index
    %c36 = arith.constant 36 : index
    %64 = vector.load %arg1[%c0_32, %c0_33, %c36] : memref<1x1x1024xf32, #tpu.memory_space<vmem>>, vector<1x1x892xf32>
    %65 = vector.shape_cast %64 : vector<1x1x892xf32> to vector<1x892xf32>
    %c0_34 = arith.constant 0 : index
    %c9 = arith.constant 9 : index
    %66 = vector.load %arg2[%c0_34, %c9] : memref<16x25xf32, #tpu.memory_space<vmem>>, vector<16x1xf32>
    %67 = vector.broadcast %66 : vector<16x1xf32> to vector<16x892xf32>
    %68 = vector.broadcast %65 : vector<1x892xf32> to vector<16x892xf32>
    %69 = arith.mulf %67, %68 : vector<16x892xf32>
    %70 = arith.addf %63, %69 : vector<16x892xf32>
    %c0_35 = arith.constant 0 : index
    %c0_36 = arith.constant 0 : index
    %c64 = arith.constant 64 : index
    %71 = vector.load %arg1[%c0_35, %c0_36, %c64] : memref<1x1x1024xf32, #tpu.memory_space<vmem>>, vector<1x1x892xf32>
    %72 = vector.shape_cast %71 : vector<1x1x892xf32> to vector<1x892xf32>
    %c0_37 = arith.constant 0 : index
    %c10 = arith.constant 10 : index
    %73 = vector.load %arg2[%c0_37, %c10] : memref<16x25xf32, #tpu.memory_space<vmem>>, vector<16x1xf32>
    %74 = vector.broadcast %73 : vector<16x1xf32> to vector<16x892xf32>
    %75 = vector.broadcast %72 : vector<1x892xf32> to vector<16x892xf32>
    %76 = arith.mulf %74, %75 : vector<16x892xf32>
    %77 = arith.addf %70, %76 : vector<16x892xf32>
    %c0_38 = arith.constant 0 : index
    %c0_39 = arith.constant 0 : index
    %c65 = arith.constant 65 : index
    %78 = vector.load %arg1[%c0_38, %c0_39, %c65] : memref<1x1x1024xf32, #tpu.memory_space<vmem>>, vector<1x1x892xf32>
    %79 = vector.shape_cast %78 : vector<1x1x892xf32> to vector<1x892xf32>
    %c0_40 = arith.constant 0 : index
    %c11 = arith.constant 11 : index
    %80 = vector.load %arg2[%c0_40, %c11] : memref<16x25xf32, #tpu.memory_space<vmem>>, vector<16x1xf32>
    %81 = vector.broadcast %80 : vector<16x1xf32> to vector<16x892xf32>
    %82 = vector.broadcast %79 : vector<1x892xf32> to vector<16x892xf32>
    %83 = arith.mulf %81, %82 : vector<16x892xf32>
    %84 = arith.addf %77, %83 : vector<16x892xf32>
    %c0_41 = arith.constant 0 : index
    %c0_42 = arith.constant 0 : index
    %c66 = arith.constant 66 : index
    %85 = vector.load %arg1[%c0_41, %c0_42, %c66] : memref<1x1x1024xf32, #tpu.memory_space<vmem>>, vector<1x1x892xf32>
    %86 = vector.shape_cast %85 : vector<1x1x892xf32> to vector<1x892xf32>
    %c0_43 = arith.constant 0 : index
    %c12 = arith.constant 12 : index
    %87 = vector.load %arg2[%c0_43, %c12] : memref<16x25xf32, #tpu.memory_space<vmem>>, vector<16x1xf32>
    %88 = vector.broadcast %87 : vector<16x1xf32> to vector<16x892xf32>
    %89 = vector.broadcast %86 : vector<1x892xf32> to vector<16x892xf32>
    %90 = arith.mulf %88, %89 : vector<16x892xf32>
    %91 = arith.addf %84, %90 : vector<16x892xf32>
    %c0_44 = arith.constant 0 : index
    %c0_45 = arith.constant 0 : index
    %c67 = arith.constant 67 : index
    %92 = vector.load %arg1[%c0_44, %c0_45, %c67] : memref<1x1x1024xf32, #tpu.memory_space<vmem>>, vector<1x1x892xf32>
    %93 = vector.shape_cast %92 : vector<1x1x892xf32> to vector<1x892xf32>
    %c0_46 = arith.constant 0 : index
    %c13 = arith.constant 13 : index
    %94 = vector.load %arg2[%c0_46, %c13] : memref<16x25xf32, #tpu.memory_space<vmem>>, vector<16x1xf32>
    %95 = vector.broadcast %94 : vector<16x1xf32> to vector<16x892xf32>
    %96 = vector.broadcast %93 : vector<1x892xf32> to vector<16x892xf32>
    %97 = arith.mulf %95, %96 : vector<16x892xf32>
    %98 = arith.addf %91, %97 : vector<16x892xf32>
    %c0_47 = arith.constant 0 : index
    %c0_48 = arith.constant 0 : index
    %c68 = arith.constant 68 : index
    %99 = vector.load %arg1[%c0_47, %c0_48, %c68] : memref<1x1x1024xf32, #tpu.memory_space<vmem>>, vector<1x1x892xf32>
    %100 = vector.shape_cast %99 : vector<1x1x892xf32> to vector<1x892xf32>
    %c0_49 = arith.constant 0 : index
    %c14 = arith.constant 14 : index
    %101 = vector.load %arg2[%c0_49, %c14] : memref<16x25xf32, #tpu.memory_space<vmem>>, vector<16x1xf32>
    %102 = vector.broadcast %101 : vector<16x1xf32> to vector<16x892xf32>
    %103 = vector.broadcast %100 : vector<1x892xf32> to vector<16x892xf32>
    %104 = arith.mulf %102, %103 : vector<16x892xf32>
    %105 = arith.addf %98, %104 : vector<16x892xf32>
    %c0_50 = arith.constant 0 : index
    %c0_51 = arith.constant 0 : index
    %c96 = arith.constant 96 : index
    %106 = vector.load %arg1[%c0_50, %c0_51, %c96] : memref<1x1x1024xf32, #tpu.memory_space<vmem>>, vector<1x1x892xf32>
    %107 = vector.shape_cast %106 : vector<1x1x892xf32> to vector<1x892xf32>
    %c0_52 = arith.constant 0 : index
    %c15 = arith.constant 15 : index
    %108 = vector.load %arg2[%c0_52, %c15] : memref<16x25xf32, #tpu.memory_space<vmem>>, vector<16x1xf32>
    %109 = vector.broadcast %108 : vector<16x1xf32> to vector<16x892xf32>
    %110 = vector.broadcast %107 : vector<1x892xf32> to vector<16x892xf32>
    %111 = arith.mulf %109, %110 : vector<16x892xf32>
    %112 = arith.addf %105, %111 : vector<16x892xf32>
    %c0_53 = arith.constant 0 : index
    %c0_54 = arith.constant 0 : index
    %c97 = arith.constant 97 : index
    %113 = vector.load %arg1[%c0_53, %c0_54, %c97] : memref<1x1x1024xf32, #tpu.memory_space<vmem>>, vector<1x1x892xf32>
    %114 = vector.shape_cast %113 : vector<1x1x892xf32> to vector<1x892xf32>
    %c0_55 = arith.constant 0 : index
    %c16 = arith.constant 16 : index
    %115 = vector.load %arg2[%c0_55, %c16] : memref<16x25xf32, #tpu.memory_space<vmem>>, vector<16x1xf32>
    %116 = vector.broadcast %115 : vector<16x1xf32> to vector<16x892xf32>
    %117 = vector.broadcast %114 : vector<1x892xf32> to vector<16x892xf32>
    %118 = arith.mulf %116, %117 : vector<16x892xf32>
    %119 = arith.addf %112, %118 : vector<16x892xf32>
    %c0_56 = arith.constant 0 : index
    %c0_57 = arith.constant 0 : index
    %c98 = arith.constant 98 : index
    %120 = vector.load %arg1[%c0_56, %c0_57, %c98] : memref<1x1x1024xf32, #tpu.memory_space<vmem>>, vector<1x1x892xf32>
    %121 = vector.shape_cast %120 : vector<1x1x892xf32> to vector<1x892xf32>
    %c0_58 = arith.constant 0 : index
    %c17 = arith.constant 17 : index
    %122 = vector.load %arg2[%c0_58, %c17] : memref<16x25xf32, #tpu.memory_space<vmem>>, vector<16x1xf32>
    %123 = vector.broadcast %122 : vector<16x1xf32> to vector<16x892xf32>
    %124 = vector.broadcast %121 : vector<1x892xf32> to vector<16x892xf32>
    %125 = arith.mulf %123, %124 : vector<16x892xf32>
    %126 = arith.addf %119, %125 : vector<16x892xf32>
    %c0_59 = arith.constant 0 : index
    %c0_60 = arith.constant 0 : index
    %c99 = arith.constant 99 : index
    %127 = vector.load %arg1[%c0_59, %c0_60, %c99] : memref<1x1x1024xf32, #tpu.memory_space<vmem>>, vector<1x1x892xf32>
    %128 = vector.shape_cast %127 : vector<1x1x892xf32> to vector<1x892xf32>
    %c0_61 = arith.constant 0 : index
    %c18 = arith.constant 18 : index
    %129 = vector.load %arg2[%c0_61, %c18] : memref<16x25xf32, #tpu.memory_space<vmem>>, vector<16x1xf32>
    %130 = vector.broadcast %129 : vector<16x1xf32> to vector<16x892xf32>
    %131 = vector.broadcast %128 : vector<1x892xf32> to vector<16x892xf32>
    %132 = arith.mulf %130, %131 : vector<16x892xf32>
    %133 = arith.addf %126, %132 : vector<16x892xf32>
    %c0_62 = arith.constant 0 : index
    %c0_63 = arith.constant 0 : index
    %c100 = arith.constant 100 : index
    %134 = vector.load %arg1[%c0_62, %c0_63, %c100] : memref<1x1x1024xf32, #tpu.memory_space<vmem>>, vector<1x1x892xf32>
    %135 = vector.shape_cast %134 : vector<1x1x892xf32> to vector<1x892xf32>
    %c0_64 = arith.constant 0 : index
    %c19 = arith.constant 19 : index
    %136 = vector.load %arg2[%c0_64, %c19] : memref<16x25xf32, #tpu.memory_space<vmem>>, vector<16x1xf32>
    %137 = vector.broadcast %136 : vector<16x1xf32> to vector<16x892xf32>
    %138 = vector.broadcast %135 : vector<1x892xf32> to vector<16x892xf32>
    %139 = arith.mulf %137, %138 : vector<16x892xf32>
    %140 = arith.addf %133, %139 : vector<16x892xf32>
    %c0_65 = arith.constant 0 : index
    %c0_66 = arith.constant 0 : index
    %c128 = arith.constant 128 : index
    %141 = vector.load %arg1[%c0_65, %c0_66, %c128] : memref<1x1x1024xf32, #tpu.memory_space<vmem>>, vector<1x1x892xf32>
    %142 = vector.shape_cast %141 : vector<1x1x892xf32> to vector<1x892xf32>
    %c0_67 = arith.constant 0 : index
    %c20 = arith.constant 20 : index
    %143 = vector.load %arg2[%c0_67, %c20] : memref<16x25xf32, #tpu.memory_space<vmem>>, vector<16x1xf32>
    %144 = vector.broadcast %143 : vector<16x1xf32> to vector<16x892xf32>
    %145 = vector.broadcast %142 : vector<1x892xf32> to vector<16x892xf32>
    %146 = arith.mulf %144, %145 : vector<16x892xf32>
    %147 = arith.addf %140, %146 : vector<16x892xf32>
    %c0_68 = arith.constant 0 : index
    %c0_69 = arith.constant 0 : index
    %c129 = arith.constant 129 : index
    %148 = vector.load %arg1[%c0_68, %c0_69, %c129] : memref<1x1x1024xf32, #tpu.memory_space<vmem>>, vector<1x1x892xf32>
    %149 = vector.shape_cast %148 : vector<1x1x892xf32> to vector<1x892xf32>
    %c0_70 = arith.constant 0 : index
    %c21 = arith.constant 21 : index
    %150 = vector.load %arg2[%c0_70, %c21] : memref<16x25xf32, #tpu.memory_space<vmem>>, vector<16x1xf32>
    %151 = vector.broadcast %150 : vector<16x1xf32> to vector<16x892xf32>
    %152 = vector.broadcast %149 : vector<1x892xf32> to vector<16x892xf32>
    %153 = arith.mulf %151, %152 : vector<16x892xf32>
    %154 = arith.addf %147, %153 : vector<16x892xf32>
    %c0_71 = arith.constant 0 : index
    %c0_72 = arith.constant 0 : index
    %c130 = arith.constant 130 : index
    %155 = vector.load %arg1[%c0_71, %c0_72, %c130] : memref<1x1x1024xf32, #tpu.memory_space<vmem>>, vector<1x1x892xf32>
    %156 = vector.shape_cast %155 : vector<1x1x892xf32> to vector<1x892xf32>
    %c0_73 = arith.constant 0 : index
    %c22 = arith.constant 22 : index
    %157 = vector.load %arg2[%c0_73, %c22] : memref<16x25xf32, #tpu.memory_space<vmem>>, vector<16x1xf32>
    %158 = vector.broadcast %157 : vector<16x1xf32> to vector<16x892xf32>
    %159 = vector.broadcast %156 : vector<1x892xf32> to vector<16x892xf32>
    %160 = arith.mulf %158, %159 : vector<16x892xf32>
    %161 = arith.addf %154, %160 : vector<16x892xf32>
    %c0_74 = arith.constant 0 : index
    %c0_75 = arith.constant 0 : index
    %c131 = arith.constant 131 : index
    %162 = vector.load %arg1[%c0_74, %c0_75, %c131] : memref<1x1x1024xf32, #tpu.memory_space<vmem>>, vector<1x1x892xf32>
    %163 = vector.shape_cast %162 : vector<1x1x892xf32> to vector<1x892xf32>
    %c0_76 = arith.constant 0 : index
    %c23 = arith.constant 23 : index
    %164 = vector.load %arg2[%c0_76, %c23] : memref<16x25xf32, #tpu.memory_space<vmem>>, vector<16x1xf32>
    %165 = vector.broadcast %164 : vector<16x1xf32> to vector<16x892xf32>
    %166 = vector.broadcast %163 : vector<1x892xf32> to vector<16x892xf32>
    %167 = arith.mulf %165, %166 : vector<16x892xf32>
    %168 = arith.addf %161, %167 : vector<16x892xf32>
    %c0_77 = arith.constant 0 : index
    %c0_78 = arith.constant 0 : index
    %c132 = arith.constant 132 : index
    %169 = vector.load %arg1[%c0_77, %c0_78, %c132] : memref<1x1x1024xf32, #tpu.memory_space<vmem>>, vector<1x1x892xf32>
    %170 = vector.shape_cast %169 : vector<1x1x892xf32> to vector<1x892xf32>
    %c0_79 = arith.constant 0 : index
    %c24 = arith.constant 24 : index
    %171 = vector.load %arg2[%c0_79, %c24] : memref<16x25xf32, #tpu.memory_space<vmem>>, vector<16x1xf32>
    %172 = vector.broadcast %171 : vector<16x1xf32> to vector<16x892xf32>
    %173 = vector.broadcast %170 : vector<1x892xf32> to vector<16x892xf32>
    %174 = arith.mulf %172, %173 : vector<16x892xf32>
    %175 = arith.addf %168, %174 : vector<16x892xf32>
    %c0_80 = arith.constant 0 : index
    %c0_81 = arith.constant 0 : index
    %176 = vector.load %arg3[%c0_80, %c0_81] : memref<16x1xf32, #tpu.memory_space<vmem>>, vector<16x1xf32>
    %177 = vector.broadcast %176 : vector<16x1xf32> to vector<16x892xf32>
    %178 = arith.addf %175, %177 : vector<16x892xf32>
    %cst_82 = arith.constant 0.000000e+00 : f32
    %179 = vector.broadcast %cst_82 : f32 to vector<16x892xf32>
    %180 = arith.maximumf %178, %179 : vector<16x892xf32>
    %c0_83 = arith.constant 0 : index
    %c0_84 = arith.constant 0 : index
    %181 = vector.load %arg6[%c0_83, %c0_84] : memref<16x892xf32, #tpu.memory_space<vmem>>, vector<16x892xf32>
    tpu.vector_store %arg6[%c0_83, %c0_84], %180 {strides = array<i32>} : memref<16x892xf32, #tpu.memory_space<vmem>>, vector<16x892xf32>,
    %c0_85 = arith.constant 0 : index
    %c0_86 = arith.constant 0 : index
    %182 = vector.load %arg6[%c0_85, %c0_86] : memref<16x892xf32, #tpu.memory_space<vmem>>, vector<16x859xf32>
    %c0_87 = arith.constant 0 : index
    %c1_88 = arith.constant 1 : index
    %183 = vector.load %arg6[%c0_87, %c1_88] : memref<16x892xf32, #tpu.memory_space<vmem>>, vector<16x859xf32>
    %184 = arith.maximumf %182, %183 : vector<16x859xf32>
    %c0_89 = arith.constant 0 : index
    %c32_90 = arith.constant 32 : index
    %185 = vector.load %arg6[%c0_89, %c32_90] : memref<16x892xf32, #tpu.memory_space<vmem>>, vector<16x859xf32>
    %c0_91 = arith.constant 0 : index
    %c33_92 = arith.constant 33 : index
    %186 = vector.load %arg6[%c0_91, %c33_92] : memref<16x892xf32, #tpu.memory_space<vmem>>, vector<16x859xf32>
    %187 = arith.maximumf %185, %186 : vector<16x859xf32>
    %188 = arith.maximumf %184, %187 : vector<16x859xf32>
    %c0_93 = arith.constant 0 : index
    %c0_94 = arith.constant 0 : index
    %189 = vector.load %arg4[%c0_93, %c0_94] : memref<859x384xf32, #tpu.memory_space<vmem>>, vector<859x384xf32>
    %cst_95 = arith.constant dense<0.000000e+00> : vector<16x384xf32>
    %190 = tpu.matmul %188, %189, %cst_95 {dimension_numbers = #tpu.dot_dimension_numbers<[1], [0], [0], [1], [0, 0, 1, 1], [], []>} : vector<16x859xf32>, vector<859x384xf32>, vector<16x384xf32> -> vector<16x384xf32>
    %191 = arith.truncf %190 : vector<16x384xf32> to vector<16x384xbf16>
    %c0_96 = arith.constant 0 : index
    %c0_97 = arith.constant 0 : index
    %c0_98 = arith.constant 0 : index
    %192 = vector.load %arg5[%c0_96, %c0_97, %c0_98] : memref<1x16x384xbf16, #tpu.memory_space<vmem>>, vector<1x16x384xbf16>
    %193 = vector.shape_cast %192 : vector<1x16x384xbf16> to vector<16x384xbf16>
    %194 = vector.shape_cast %191 : vector<16x384xbf16> to vector<1x16x384xbf16>
    tpu.vector_store %arg5[%c0_96, %c0_97, %c0_98], %194 {strides = array<i32>} : memref<1x16x384xbf16, #tpu.memory_space<vmem>>, vector<1x16x384xbf16>,
    return
  }
  func.func @transform_0(%arg0: i32) -> (i32, i32, i32) {
    %c0_i32 = arith.constant 0 : i32
    %c0_i32_0 = arith.constant 0 : i32
    %c0_i32_1 = arith.constant 0 : i32
    return %arg0, %c0_i32, %c0_i32_0 : i32, i32, i32
  }
  func.func @transform_1(%arg0: i32) -> (i32, i32) {
    %c0_i32 = arith.constant 0 : i32
    %c0_i32_0 = arith.constant 0 : i32
    %c0_i32_1 = arith.constant 0 : i32
    return %c0_i32, %c0_i32_0 : i32, i32
  }
  func.func @transform_2(%arg0: i32) -> (i32, i32) {
    %c0_i32 = arith.constant 0 : i32
    %c0_i32_0 = arith.constant 0 : i32
    %c0_i32_1 = arith.constant 0 : i32
    return %c0_i32, %c0_i32_0 : i32, i32
  }
  func.func @transform_3(%arg0: i32) -> (i32, i32) {
    %c0_i32 = arith.constant 0 : i32
    %c0_i32_0 = arith.constant 0 : i32
    %c0_i32_1 = arith.constant 0 : i32
    return %c0_i32, %c0_i32_0 : i32, i32
  }
  func.func @transform_4(%arg0: i32) -> (i32, i32, i32) {
    %c0_i32 = arith.constant 0 : i32
    %c0_i32_0 = arith.constant 0 : i32
    %c0_i32_1 = arith.constant 0 : i32
    return %arg0, %c0_i32, %c0_i32_0 : i32, i32, i32
  }
}

module attributes {stable_mosaic.version = 11 : i64} {
  func.func @kernel(%arg0: i32, %arg1: memref<1x16x384xbf16, #tpu.memory_space<vmem>>, %arg2: memref<25x32x16xbf16, #tpu.memory_space<vmem>>, %arg3: memref<32x1xf32, #tpu.memory_space<vmem>>, %arg4: memref<229x128xf32, #tpu.memory_space<vmem>>, %arg5: memref<1x32x128xf32, #tpu.memory_space<vmem>>, %arg6: memref<32x248xf32, #tpu.memory_space<vmem>>) attributes {dimension_semantics = [#tpu.dimension_semantics<parallel>], iteration_bounds = array<i64: 2>, scalar_prefetch = 0 : i64, scratch_operands = 1 : i64, tpu.core_type = #tpu.core_type<tc>, window_params = [{transform_indices = @transform_0, window_bounds = array<i64: 1, 16, 384>}, {pipeline_mode = #tpu.pipeline_mode<synchronous>, transform_indices = @transform_1, window_bounds = array<i64: 25, 32, 16>}, {pipeline_mode = #tpu.pipeline_mode<synchronous>, transform_indices = @transform_2, window_bounds = array<i64: 32, 1>}, {pipeline_mode = #tpu.pipeline_mode<synchronous>, transform_indices = @transform_3, window_bounds = array<i64: 229, 128>}, {transform_indices = @transform_4, window_bounds = array<i64: 1, 32, 128>}]} {
    %cst = arith.constant 0.000000e+00 : f32
    %0 = vector.broadcast %cst : f32 to vector<32x248xf32>
    %c0 = arith.constant 0 : index
    %c0_0 = arith.constant 0 : index
    %c0_1 = arith.constant 0 : index
    %1 = vector.load %arg1[%c0, %c0_0, %c0_1] : memref<1x16x384xbf16, #tpu.memory_space<vmem>>, vector<1x16x248xbf16>
    %2 = vector.shape_cast %1 : vector<1x16x248xbf16> to vector<16x248xbf16>
    %c0_2 = arith.constant 0 : index
    %c0_3 = arith.constant 0 : index
    %c0_4 = arith.constant 0 : index
    %3 = vector.load %arg2[%c0_2, %c0_3, %c0_4] : memref<25x32x16xbf16, #tpu.memory_space<vmem>>, vector<1x32x16xbf16>
    %4 = vector.shape_cast %3 : vector<1x32x16xbf16> to vector<32x16xbf16>
    %cst_5 = arith.constant dense<0.000000e+00> : vector<32x248xf32>
    %5 = tpu.matmul %4, %2, %cst_5 {dimension_numbers = #tpu.dot_dimension_numbers<[1], [0], [0], [1], [0, 0, 1, 1], [], []>} : vector<32x16xbf16>, vector<16x248xbf16>, vector<32x248xf32> -> vector<32x248xf32>
    %6 = arith.addf %0, %5 : vector<32x248xf32>
    %c0_6 = arith.constant 0 : index
    %c0_7 = arith.constant 0 : index
    %c1 = arith.constant 1 : index
    %7 = vector.load %arg1[%c0_6, %c0_7, %c1] : memref<1x16x384xbf16, #tpu.memory_space<vmem>>, vector<1x16x248xbf16>
    %8 = vector.shape_cast %7 : vector<1x16x248xbf16> to vector<16x248xbf16>
    %c1_8 = arith.constant 1 : index
    %c0_9 = arith.constant 0 : index
    %c0_10 = arith.constant 0 : index
    %9 = vector.load %arg2[%c1_8, %c0_9, %c0_10] : memref<25x32x16xbf16, #tpu.memory_space<vmem>>, vector<1x32x16xbf16>
    %10 = vector.shape_cast %9 : vector<1x32x16xbf16> to vector<32x16xbf16>
    %cst_11 = arith.constant dense<0.000000e+00> : vector<32x248xf32>
    %11 = tpu.matmul %10, %8, %cst_11 {dimension_numbers = #tpu.dot_dimension_numbers<[1], [0], [0], [1], [0, 0, 1, 1], [], []>} : vector<32x16xbf16>, vector<16x248xbf16>, vector<32x248xf32> -> vector<32x248xf32>
    %12 = arith.addf %6, %11 : vector<32x248xf32>
    %c0_12 = arith.constant 0 : index
    %c0_13 = arith.constant 0 : index
    %c2 = arith.constant 2 : index
    %13 = vector.load %arg1[%c0_12, %c0_13, %c2] : memref<1x16x384xbf16, #tpu.memory_space<vmem>>, vector<1x16x248xbf16>
    %14 = vector.shape_cast %13 : vector<1x16x248xbf16> to vector<16x248xbf16>
    %c2_14 = arith.constant 2 : index
    %c0_15 = arith.constant 0 : index
    %c0_16 = arith.constant 0 : index
    %15 = vector.load %arg2[%c2_14, %c0_15, %c0_16] : memref<25x32x16xbf16, #tpu.memory_space<vmem>>, vector<1x32x16xbf16>
    %16 = vector.shape_cast %15 : vector<1x32x16xbf16> to vector<32x16xbf16>
    %cst_17 = arith.constant dense<0.000000e+00> : vector<32x248xf32>
    %17 = tpu.matmul %16, %14, %cst_17 {dimension_numbers = #tpu.dot_dimension_numbers<[1], [0], [0], [1], [0, 0, 1, 1], [], []>} : vector<32x16xbf16>, vector<16x248xbf16>, vector<32x248xf32> -> vector<32x248xf32>
    %18 = arith.addf %12, %17 : vector<32x248xf32>
    %c0_18 = arith.constant 0 : index
    %c0_19 = arith.constant 0 : index
    %c3 = arith.constant 3 : index
    %19 = vector.load %arg1[%c0_18, %c0_19, %c3] : memref<1x16x384xbf16, #tpu.memory_space<vmem>>, vector<1x16x248xbf16>
    %20 = vector.shape_cast %19 : vector<1x16x248xbf16> to vector<16x248xbf16>
    %c3_20 = arith.constant 3 : index
    %c0_21 = arith.constant 0 : index
    %c0_22 = arith.constant 0 : index
    %21 = vector.load %arg2[%c3_20, %c0_21, %c0_22] : memref<25x32x16xbf16, #tpu.memory_space<vmem>>, vector<1x32x16xbf16>
    %22 = vector.shape_cast %21 : vector<1x32x16xbf16> to vector<32x16xbf16>
    %cst_23 = arith.constant dense<0.000000e+00> : vector<32x248xf32>
    %23 = tpu.matmul %22, %20, %cst_23 {dimension_numbers = #tpu.dot_dimension_numbers<[1], [0], [0], [1], [0, 0, 1, 1], [], []>} : vector<32x16xbf16>, vector<16x248xbf16>, vector<32x248xf32> -> vector<32x248xf32>
    %24 = arith.addf %18, %23 : vector<32x248xf32>
    %c0_24 = arith.constant 0 : index
    %c0_25 = arith.constant 0 : index
    %c4 = arith.constant 4 : index
    %25 = vector.load %arg1[%c0_24, %c0_25, %c4] : memref<1x16x384xbf16, #tpu.memory_space<vmem>>, vector<1x16x248xbf16>
    %26 = vector.shape_cast %25 : vector<1x16x248xbf16> to vector<16x248xbf16>
    %c4_26 = arith.constant 4 : index
    %c0_27 = arith.constant 0 : index
    %c0_28 = arith.constant 0 : index
    %27 = vector.load %arg2[%c4_26, %c0_27, %c0_28] : memref<25x32x16xbf16, #tpu.memory_space<vmem>>, vector<1x32x16xbf16>
    %28 = vector.shape_cast %27 : vector<1x32x16xbf16> to vector<32x16xbf16>
    %cst_29 = arith.constant dense<0.000000e+00> : vector<32x248xf32>
    %29 = tpu.matmul %28, %26, %cst_29 {dimension_numbers = #tpu.dot_dimension_numbers<[1], [0], [0], [1], [0, 0, 1, 1], [], []>} : vector<32x16xbf16>, vector<16x248xbf16>, vector<32x248xf32> -> vector<32x248xf32>
    %30 = arith.addf %24, %29 : vector<32x248xf32>
    %c0_30 = arith.constant 0 : index
    %c0_31 = arith.constant 0 : index
    %c18 = arith.constant 18 : index
    %31 = vector.load %arg1[%c0_30, %c0_31, %c18] : memref<1x16x384xbf16, #tpu.memory_space<vmem>>, vector<1x16x248xbf16>
    %32 = vector.shape_cast %31 : vector<1x16x248xbf16> to vector<16x248xbf16>
    %c5 = arith.constant 5 : index
    %c0_32 = arith.constant 0 : index
    %c0_33 = arith.constant 0 : index
    %33 = vector.load %arg2[%c5, %c0_32, %c0_33] : memref<25x32x16xbf16, #tpu.memory_space<vmem>>, vector<1x32x16xbf16>
    %34 = vector.shape_cast %33 : vector<1x32x16xbf16> to vector<32x16xbf16>
    %cst_34 = arith.constant dense<0.000000e+00> : vector<32x248xf32>
    %35 = tpu.matmul %34, %32, %cst_34 {dimension_numbers = #tpu.dot_dimension_numbers<[1], [0], [0], [1], [0, 0, 1, 1], [], []>} : vector<32x16xbf16>, vector<16x248xbf16>, vector<32x248xf32> -> vector<32x248xf32>
    %36 = arith.addf %30, %35 : vector<32x248xf32>
    %c0_35 = arith.constant 0 : index
    %c0_36 = arith.constant 0 : index
    %c19 = arith.constant 19 : index
    %37 = vector.load %arg1[%c0_35, %c0_36, %c19] : memref<1x16x384xbf16, #tpu.memory_space<vmem>>, vector<1x16x248xbf16>
    %38 = vector.shape_cast %37 : vector<1x16x248xbf16> to vector<16x248xbf16>
    %c6 = arith.constant 6 : index
    %c0_37 = arith.constant 0 : index
    %c0_38 = arith.constant 0 : index
    %39 = vector.load %arg2[%c6, %c0_37, %c0_38] : memref<25x32x16xbf16, #tpu.memory_space<vmem>>, vector<1x32x16xbf16>
    %40 = vector.shape_cast %39 : vector<1x32x16xbf16> to vector<32x16xbf16>
    %cst_39 = arith.constant dense<0.000000e+00> : vector<32x248xf32>
    %41 = tpu.matmul %40, %38, %cst_39 {dimension_numbers = #tpu.dot_dimension_numbers<[1], [0], [0], [1], [0, 0, 1, 1], [], []>} : vector<32x16xbf16>, vector<16x248xbf16>, vector<32x248xf32> -> vector<32x248xf32>
    %42 = arith.addf %36, %41 : vector<32x248xf32>
    %c0_40 = arith.constant 0 : index
    %c0_41 = arith.constant 0 : index
    %c20 = arith.constant 20 : index
    %43 = vector.load %arg1[%c0_40, %c0_41, %c20] : memref<1x16x384xbf16, #tpu.memory_space<vmem>>, vector<1x16x248xbf16>
    %44 = vector.shape_cast %43 : vector<1x16x248xbf16> to vector<16x248xbf16>
    %c7 = arith.constant 7 : index
    %c0_42 = arith.constant 0 : index
    %c0_43 = arith.constant 0 : index
    %45 = vector.load %arg2[%c7, %c0_42, %c0_43] : memref<25x32x16xbf16, #tpu.memory_space<vmem>>, vector<1x32x16xbf16>
    %46 = vector.shape_cast %45 : vector<1x32x16xbf16> to vector<32x16xbf16>
    %cst_44 = arith.constant dense<0.000000e+00> : vector<32x248xf32>
    %47 = tpu.matmul %46, %44, %cst_44 {dimension_numbers = #tpu.dot_dimension_numbers<[1], [0], [0], [1], [0, 0, 1, 1], [], []>} : vector<32x16xbf16>, vector<16x248xbf16>, vector<32x248xf32> -> vector<32x248xf32>
    %48 = arith.addf %42, %47 : vector<32x248xf32>
    %c0_45 = arith.constant 0 : index
    %c0_46 = arith.constant 0 : index
    %c21 = arith.constant 21 : index
    %49 = vector.load %arg1[%c0_45, %c0_46, %c21] : memref<1x16x384xbf16, #tpu.memory_space<vmem>>, vector<1x16x248xbf16>
    %50 = vector.shape_cast %49 : vector<1x16x248xbf16> to vector<16x248xbf16>
    %c8 = arith.constant 8 : index
    %c0_47 = arith.constant 0 : index
    %c0_48 = arith.constant 0 : index
    %51 = vector.load %arg2[%c8, %c0_47, %c0_48] : memref<25x32x16xbf16, #tpu.memory_space<vmem>>, vector<1x32x16xbf16>
    %52 = vector.shape_cast %51 : vector<1x32x16xbf16> to vector<32x16xbf16>
    %cst_49 = arith.constant dense<0.000000e+00> : vector<32x248xf32>
    %53 = tpu.matmul %52, %50, %cst_49 {dimension_numbers = #tpu.dot_dimension_numbers<[1], [0], [0], [1], [0, 0, 1, 1], [], []>} : vector<32x16xbf16>, vector<16x248xbf16>, vector<32x248xf32> -> vector<32x248xf32>
    %54 = arith.addf %48, %53 : vector<32x248xf32>
    %c0_50 = arith.constant 0 : index
    %c0_51 = arith.constant 0 : index
    %c22 = arith.constant 22 : index
    %55 = vector.load %arg1[%c0_50, %c0_51, %c22] : memref<1x16x384xbf16, #tpu.memory_space<vmem>>, vector<1x16x248xbf16>
    %56 = vector.shape_cast %55 : vector<1x16x248xbf16> to vector<16x248xbf16>
    %c9 = arith.constant 9 : index
    %c0_52 = arith.constant 0 : index
    %c0_53 = arith.constant 0 : index
    %57 = vector.load %arg2[%c9, %c0_52, %c0_53] : memref<25x32x16xbf16, #tpu.memory_space<vmem>>, vector<1x32x16xbf16>
    %58 = vector.shape_cast %57 : vector<1x32x16xbf16> to vector<32x16xbf16>
    %cst_54 = arith.constant dense<0.000000e+00> : vector<32x248xf32>
    %59 = tpu.matmul %58, %56, %cst_54 {dimension_numbers = #tpu.dot_dimension_numbers<[1], [0], [0], [1], [0, 0, 1, 1], [], []>} : vector<32x16xbf16>, vector<16x248xbf16>, vector<32x248xf32> -> vector<32x248xf32>
    %60 = arith.addf %54, %59 : vector<32x248xf32>
    %c0_55 = arith.constant 0 : index
    %c0_56 = arith.constant 0 : index
    %c36 = arith.constant 36 : index
    %61 = vector.load %arg1[%c0_55, %c0_56, %c36] : memref<1x16x384xbf16, #tpu.memory_space<vmem>>, vector<1x16x248xbf16>
    %62 = vector.shape_cast %61 : vector<1x16x248xbf16> to vector<16x248xbf16>
    %c10 = arith.constant 10 : index
    %c0_57 = arith.constant 0 : index
    %c0_58 = arith.constant 0 : index
    %63 = vector.load %arg2[%c10, %c0_57, %c0_58] : memref<25x32x16xbf16, #tpu.memory_space<vmem>>, vector<1x32x16xbf16>
    %64 = vector.shape_cast %63 : vector<1x32x16xbf16> to vector<32x16xbf16>
    %cst_59 = arith.constant dense<0.000000e+00> : vector<32x248xf32>
    %65 = tpu.matmul %64, %62, %cst_59 {dimension_numbers = #tpu.dot_dimension_numbers<[1], [0], [0], [1], [0, 0, 1, 1], [], []>} : vector<32x16xbf16>, vector<16x248xbf16>, vector<32x248xf32> -> vector<32x248xf32>
    %66 = arith.addf %60, %65 : vector<32x248xf32>
    %c0_60 = arith.constant 0 : index
    %c0_61 = arith.constant 0 : index
    %c37 = arith.constant 37 : index
    %67 = vector.load %arg1[%c0_60, %c0_61, %c37] : memref<1x16x384xbf16, #tpu.memory_space<vmem>>, vector<1x16x248xbf16>
    %68 = vector.shape_cast %67 : vector<1x16x248xbf16> to vector<16x248xbf16>
    %c11 = arith.constant 11 : index
    %c0_62 = arith.constant 0 : index
    %c0_63 = arith.constant 0 : index
    %69 = vector.load %arg2[%c11, %c0_62, %c0_63] : memref<25x32x16xbf16, #tpu.memory_space<vmem>>, vector<1x32x16xbf16>
    %70 = vector.shape_cast %69 : vector<1x32x16xbf16> to vector<32x16xbf16>
    %cst_64 = arith.constant dense<0.000000e+00> : vector<32x248xf32>
    %71 = tpu.matmul %70, %68, %cst_64 {dimension_numbers = #tpu.dot_dimension_numbers<[1], [0], [0], [1], [0, 0, 1, 1], [], []>} : vector<32x16xbf16>, vector<16x248xbf16>, vector<32x248xf32> -> vector<32x248xf32>
    %72 = arith.addf %66, %71 : vector<32x248xf32>
    %c0_65 = arith.constant 0 : index
    %c0_66 = arith.constant 0 : index
    %c38 = arith.constant 38 : index
    %73 = vector.load %arg1[%c0_65, %c0_66, %c38] : memref<1x16x384xbf16, #tpu.memory_space<vmem>>, vector<1x16x248xbf16>
    %74 = vector.shape_cast %73 : vector<1x16x248xbf16> to vector<16x248xbf16>
    %c12 = arith.constant 12 : index
    %c0_67 = arith.constant 0 : index
    %c0_68 = arith.constant 0 : index
    %75 = vector.load %arg2[%c12, %c0_67, %c0_68] : memref<25x32x16xbf16, #tpu.memory_space<vmem>>, vector<1x32x16xbf16>
    %76 = vector.shape_cast %75 : vector<1x32x16xbf16> to vector<32x16xbf16>
    %cst_69 = arith.constant dense<0.000000e+00> : vector<32x248xf32>
    %77 = tpu.matmul %76, %74, %cst_69 {dimension_numbers = #tpu.dot_dimension_numbers<[1], [0], [0], [1], [0, 0, 1, 1], [], []>} : vector<32x16xbf16>, vector<16x248xbf16>, vector<32x248xf32> -> vector<32x248xf32>
    %78 = arith.addf %72, %77 : vector<32x248xf32>
    %c0_70 = arith.constant 0 : index
    %c0_71 = arith.constant 0 : index
    %c39 = arith.constant 39 : index
    %79 = vector.load %arg1[%c0_70, %c0_71, %c39] : memref<1x16x384xbf16, #tpu.memory_space<vmem>>, vector<1x16x248xbf16>
    %80 = vector.shape_cast %79 : vector<1x16x248xbf16> to vector<16x248xbf16>
    %c13 = arith.constant 13 : index
    %c0_72 = arith.constant 0 : index
    %c0_73 = arith.constant 0 : index
    %81 = vector.load %arg2[%c13, %c0_72, %c0_73] : memref<25x32x16xbf16, #tpu.memory_space<vmem>>, vector<1x32x16xbf16>
    %82 = vector.shape_cast %81 : vector<1x32x16xbf16> to vector<32x16xbf16>
    %cst_74 = arith.constant dense<0.000000e+00> : vector<32x248xf32>
    %83 = tpu.matmul %82, %80, %cst_74 {dimension_numbers = #tpu.dot_dimension_numbers<[1], [0], [0], [1], [0, 0, 1, 1], [], []>} : vector<32x16xbf16>, vector<16x248xbf16>, vector<32x248xf32> -> vector<32x248xf32>
    %84 = arith.addf %78, %83 : vector<32x248xf32>
    %c0_75 = arith.constant 0 : index
    %c0_76 = arith.constant 0 : index
    %c40 = arith.constant 40 : index
    %85 = vector.load %arg1[%c0_75, %c0_76, %c40] : memref<1x16x384xbf16, #tpu.memory_space<vmem>>, vector<1x16x248xbf16>
    %86 = vector.shape_cast %85 : vector<1x16x248xbf16> to vector<16x248xbf16>
    %c14 = arith.constant 14 : index
    %c0_77 = arith.constant 0 : index
    %c0_78 = arith.constant 0 : index
    %87 = vector.load %arg2[%c14, %c0_77, %c0_78] : memref<25x32x16xbf16, #tpu.memory_space<vmem>>, vector<1x32x16xbf16>
    %88 = vector.shape_cast %87 : vector<1x32x16xbf16> to vector<32x16xbf16>
    %cst_79 = arith.constant dense<0.000000e+00> : vector<32x248xf32>
    %89 = tpu.matmul %88, %86, %cst_79 {dimension_numbers = #tpu.dot_dimension_numbers<[1], [0], [0], [1], [0, 0, 1, 1], [], []>} : vector<32x16xbf16>, vector<16x248xbf16>, vector<32x248xf32> -> vector<32x248xf32>
    %90 = arith.addf %84, %89 : vector<32x248xf32>
    %c0_80 = arith.constant 0 : index
    %c0_81 = arith.constant 0 : index
    %c54 = arith.constant 54 : index
    %91 = vector.load %arg1[%c0_80, %c0_81, %c54] : memref<1x16x384xbf16, #tpu.memory_space<vmem>>, vector<1x16x248xbf16>
    %92 = vector.shape_cast %91 : vector<1x16x248xbf16> to vector<16x248xbf16>
    %c15 = arith.constant 15 : index
    %c0_82 = arith.constant 0 : index
    %c0_83 = arith.constant 0 : index
    %93 = vector.load %arg2[%c15, %c0_82, %c0_83] : memref<25x32x16xbf16, #tpu.memory_space<vmem>>, vector<1x32x16xbf16>
    %94 = vector.shape_cast %93 : vector<1x32x16xbf16> to vector<32x16xbf16>
    %cst_84 = arith.constant dense<0.000000e+00> : vector<32x248xf32>
    %95 = tpu.matmul %94, %92, %cst_84 {dimension_numbers = #tpu.dot_dimension_numbers<[1], [0], [0], [1], [0, 0, 1, 1], [], []>} : vector<32x16xbf16>, vector<16x248xbf16>, vector<32x248xf32> -> vector<32x248xf32>
    %96 = arith.addf %90, %95 : vector<32x248xf32>
    %c0_85 = arith.constant 0 : index
    %c0_86 = arith.constant 0 : index
    %c55 = arith.constant 55 : index
    %97 = vector.load %arg1[%c0_85, %c0_86, %c55] : memref<1x16x384xbf16, #tpu.memory_space<vmem>>, vector<1x16x248xbf16>
    %98 = vector.shape_cast %97 : vector<1x16x248xbf16> to vector<16x248xbf16>
    %c16 = arith.constant 16 : index
    %c0_87 = arith.constant 0 : index
    %c0_88 = arith.constant 0 : index
    %99 = vector.load %arg2[%c16, %c0_87, %c0_88] : memref<25x32x16xbf16, #tpu.memory_space<vmem>>, vector<1x32x16xbf16>
    %100 = vector.shape_cast %99 : vector<1x32x16xbf16> to vector<32x16xbf16>
    %cst_89 = arith.constant dense<0.000000e+00> : vector<32x248xf32>
    %101 = tpu.matmul %100, %98, %cst_89 {dimension_numbers = #tpu.dot_dimension_numbers<[1], [0], [0], [1], [0, 0, 1, 1], [], []>} : vector<32x16xbf16>, vector<16x248xbf16>, vector<32x248xf32> -> vector<32x248xf32>
    %102 = arith.addf %96, %101 : vector<32x248xf32>
    %c0_90 = arith.constant 0 : index
    %c0_91 = arith.constant 0 : index
    %c56 = arith.constant 56 : index
    %103 = vector.load %arg1[%c0_90, %c0_91, %c56] : memref<1x16x384xbf16, #tpu.memory_space<vmem>>, vector<1x16x248xbf16>
    %104 = vector.shape_cast %103 : vector<1x16x248xbf16> to vector<16x248xbf16>
    %c17 = arith.constant 17 : index
    %c0_92 = arith.constant 0 : index
    %c0_93 = arith.constant 0 : index
    %105 = vector.load %arg2[%c17, %c0_92, %c0_93] : memref<25x32x16xbf16, #tpu.memory_space<vmem>>, vector<1x32x16xbf16>
    %106 = vector.shape_cast %105 : vector<1x32x16xbf16> to vector<32x16xbf16>
    %cst_94 = arith.constant dense<0.000000e+00> : vector<32x248xf32>
    %107 = tpu.matmul %106, %104, %cst_94 {dimension_numbers = #tpu.dot_dimension_numbers<[1], [0], [0], [1], [0, 0, 1, 1], [], []>} : vector<32x16xbf16>, vector<16x248xbf16>, vector<32x248xf32> -> vector<32x248xf32>
    %108 = arith.addf %102, %107 : vector<32x248xf32>
    %c0_95 = arith.constant 0 : index
    %c0_96 = arith.constant 0 : index
    %c57 = arith.constant 57 : index
    %109 = vector.load %arg1[%c0_95, %c0_96, %c57] : memref<1x16x384xbf16, #tpu.memory_space<vmem>>, vector<1x16x248xbf16>
    %110 = vector.shape_cast %109 : vector<1x16x248xbf16> to vector<16x248xbf16>
    %c18_97 = arith.constant 18 : index
    %c0_98 = arith.constant 0 : index
    %c0_99 = arith.constant 0 : index
    %111 = vector.load %arg2[%c18_97, %c0_98, %c0_99] : memref<25x32x16xbf16, #tpu.memory_space<vmem>>, vector<1x32x16xbf16>
    %112 = vector.shape_cast %111 : vector<1x32x16xbf16> to vector<32x16xbf16>
    %cst_100 = arith.constant dense<0.000000e+00> : vector<32x248xf32>
    %113 = tpu.matmul %112, %110, %cst_100 {dimension_numbers = #tpu.dot_dimension_numbers<[1], [0], [0], [1], [0, 0, 1, 1], [], []>} : vector<32x16xbf16>, vector<16x248xbf16>, vector<32x248xf32> -> vector<32x248xf32>
    %114 = arith.addf %108, %113 : vector<32x248xf32>
    %c0_101 = arith.constant 0 : index
    %c0_102 = arith.constant 0 : index
    %c58 = arith.constant 58 : index
    %115 = vector.load %arg1[%c0_101, %c0_102, %c58] : memref<1x16x384xbf16, #tpu.memory_space<vmem>>, vector<1x16x248xbf16>
    %116 = vector.shape_cast %115 : vector<1x16x248xbf16> to vector<16x248xbf16>
    %c19_103 = arith.constant 19 : index
    %c0_104 = arith.constant 0 : index
    %c0_105 = arith.constant 0 : index
    %117 = vector.load %arg2[%c19_103, %c0_104, %c0_105] : memref<25x32x16xbf16, #tpu.memory_space<vmem>>, vector<1x32x16xbf16>
    %118 = vector.shape_cast %117 : vector<1x32x16xbf16> to vector<32x16xbf16>
    %cst_106 = arith.constant dense<0.000000e+00> : vector<32x248xf32>
    %119 = tpu.matmul %118, %116, %cst_106 {dimension_numbers = #tpu.dot_dimension_numbers<[1], [0], [0], [1], [0, 0, 1, 1], [], []>} : vector<32x16xbf16>, vector<16x248xbf16>, vector<32x248xf32> -> vector<32x248xf32>
    %120 = arith.addf %114, %119 : vector<32x248xf32>
    %c0_107 = arith.constant 0 : index
    %c0_108 = arith.constant 0 : index
    %c72 = arith.constant 72 : index
    %121 = vector.load %arg1[%c0_107, %c0_108, %c72] : memref<1x16x384xbf16, #tpu.memory_space<vmem>>, vector<1x16x248xbf16>
    %122 = vector.shape_cast %121 : vector<1x16x248xbf16> to vector<16x248xbf16>
    %c20_109 = arith.constant 20 : index
    %c0_110 = arith.constant 0 : index
    %c0_111 = arith.constant 0 : index
    %123 = vector.load %arg2[%c20_109, %c0_110, %c0_111] : memref<25x32x16xbf16, #tpu.memory_space<vmem>>, vector<1x32x16xbf16>
    %124 = vector.shape_cast %123 : vector<1x32x16xbf16> to vector<32x16xbf16>
    %cst_112 = arith.constant dense<0.000000e+00> : vector<32x248xf32>
    %125 = tpu.matmul %124, %122, %cst_112 {dimension_numbers = #tpu.dot_dimension_numbers<[1], [0], [0], [1], [0, 0, 1, 1], [], []>} : vector<32x16xbf16>, vector<16x248xbf16>, vector<32x248xf32> -> vector<32x248xf32>
    %126 = arith.addf %120, %125 : vector<32x248xf32>
    %c0_113 = arith.constant 0 : index
    %c0_114 = arith.constant 0 : index
    %c73 = arith.constant 73 : index
    %127 = vector.load %arg1[%c0_113, %c0_114, %c73] : memref<1x16x384xbf16, #tpu.memory_space<vmem>>, vector<1x16x248xbf16>
    %128 = vector.shape_cast %127 : vector<1x16x248xbf16> to vector<16x248xbf16>
    %c21_115 = arith.constant 21 : index
    %c0_116 = arith.constant 0 : index
    %c0_117 = arith.constant 0 : index
    %129 = vector.load %arg2[%c21_115, %c0_116, %c0_117] : memref<25x32x16xbf16, #tpu.memory_space<vmem>>, vector<1x32x16xbf16>
    %130 = vector.shape_cast %129 : vector<1x32x16xbf16> to vector<32x16xbf16>
    %cst_118 = arith.constant dense<0.000000e+00> : vector<32x248xf32>
    %131 = tpu.matmul %130, %128, %cst_118 {dimension_numbers = #tpu.dot_dimension_numbers<[1], [0], [0], [1], [0, 0, 1, 1], [], []>} : vector<32x16xbf16>, vector<16x248xbf16>, vector<32x248xf32> -> vector<32x248xf32>
    %132 = arith.addf %126, %131 : vector<32x248xf32>
    %c0_119 = arith.constant 0 : index
    %c0_120 = arith.constant 0 : index
    %c74 = arith.constant 74 : index
    %133 = vector.load %arg1[%c0_119, %c0_120, %c74] : memref<1x16x384xbf16, #tpu.memory_space<vmem>>, vector<1x16x248xbf16>
    %134 = vector.shape_cast %133 : vector<1x16x248xbf16> to vector<16x248xbf16>
    %c22_121 = arith.constant 22 : index
    %c0_122 = arith.constant 0 : index
    %c0_123 = arith.constant 0 : index
    %135 = vector.load %arg2[%c22_121, %c0_122, %c0_123] : memref<25x32x16xbf16, #tpu.memory_space<vmem>>, vector<1x32x16xbf16>
    %136 = vector.shape_cast %135 : vector<1x32x16xbf16> to vector<32x16xbf16>
    %cst_124 = arith.constant dense<0.000000e+00> : vector<32x248xf32>
    %137 = tpu.matmul %136, %134, %cst_124 {dimension_numbers = #tpu.dot_dimension_numbers<[1], [0], [0], [1], [0, 0, 1, 1], [], []>} : vector<32x16xbf16>, vector<16x248xbf16>, vector<32x248xf32> -> vector<32x248xf32>
    %138 = arith.addf %132, %137 : vector<32x248xf32>
    %c0_125 = arith.constant 0 : index
    %c0_126 = arith.constant 0 : index
    %c75 = arith.constant 75 : index
    %139 = vector.load %arg1[%c0_125, %c0_126, %c75] : memref<1x16x384xbf16, #tpu.memory_space<vmem>>, vector<1x16x248xbf16>
    %140 = vector.shape_cast %139 : vector<1x16x248xbf16> to vector<16x248xbf16>
    %c23 = arith.constant 23 : index
    %c0_127 = arith.constant 0 : index
    %c0_128 = arith.constant 0 : index
    %141 = vector.load %arg2[%c23, %c0_127, %c0_128] : memref<25x32x16xbf16, #tpu.memory_space<vmem>>, vector<1x32x16xbf16>
    %142 = vector.shape_cast %141 : vector<1x32x16xbf16> to vector<32x16xbf16>
    %cst_129 = arith.constant dense<0.000000e+00> : vector<32x248xf32>
    %143 = tpu.matmul %142, %140, %cst_129 {dimension_numbers = #tpu.dot_dimension_numbers<[1], [0], [0], [1], [0, 0, 1, 1], [], []>} : vector<32x16xbf16>, vector<16x248xbf16>, vector<32x248xf32> -> vector<32x248xf32>
    %144 = arith.addf %138, %143 : vector<32x248xf32>
    %c0_130 = arith.constant 0 : index
    %c0_131 = arith.constant 0 : index
    %c76 = arith.constant 76 : index
    %145 = vector.load %arg1[%c0_130, %c0_131, %c76] : memref<1x16x384xbf16, #tpu.memory_space<vmem>>, vector<1x16x248xbf16>
    %146 = vector.shape_cast %145 : vector<1x16x248xbf16> to vector<16x248xbf16>
    %c24 = arith.constant 24 : index
    %c0_132 = arith.constant 0 : index
    %c0_133 = arith.constant 0 : index
    %147 = vector.load %arg2[%c24, %c0_132, %c0_133] : memref<25x32x16xbf16, #tpu.memory_space<vmem>>, vector<1x32x16xbf16>
    %148 = vector.shape_cast %147 : vector<1x32x16xbf16> to vector<32x16xbf16>
    %cst_134 = arith.constant dense<0.000000e+00> : vector<32x248xf32>
    %149 = tpu.matmul %148, %146, %cst_134 {dimension_numbers = #tpu.dot_dimension_numbers<[1], [0], [0], [1], [0, 0, 1, 1], [], []>} : vector<32x16xbf16>, vector<16x248xbf16>, vector<32x248xf32> -> vector<32x248xf32>
    %150 = arith.addf %144, %149 : vector<32x248xf32>
    %c0_135 = arith.constant 0 : index
    %c0_136 = arith.constant 0 : index
    %151 = vector.load %arg3[%c0_135, %c0_136] : memref<32x1xf32, #tpu.memory_space<vmem>>, vector<32x1xf32>
    %152 = vector.broadcast %151 : vector<32x1xf32> to vector<32x248xf32>
    %153 = arith.addf %150, %152 : vector<32x248xf32>
    %cst_137 = arith.constant 0.000000e+00 : f32
    %154 = vector.broadcast %cst_137 : f32 to vector<32x248xf32>
    %155 = arith.maximumf %153, %154 : vector<32x248xf32>
    %c0_138 = arith.constant 0 : index
    %c0_139 = arith.constant 0 : index
    %156 = vector.load %arg6[%c0_138, %c0_139] : memref<32x248xf32, #tpu.memory_space<vmem>>, vector<32x248xf32>
    tpu.vector_store %arg6[%c0_138, %c0_139], %155 {strides = array<i32>} : memref<32x248xf32, #tpu.memory_space<vmem>>, vector<32x248xf32>,
    %c0_140 = arith.constant 0 : index
    %c0_141 = arith.constant 0 : index
    %157 = vector.load %arg6[%c0_140, %c0_141] : memref<32x248xf32, #tpu.memory_space<vmem>>, vector<32x229xf32>
    %c0_142 = arith.constant 0 : index
    %c1_143 = arith.constant 1 : index
    %158 = vector.load %arg6[%c0_142, %c1_143] : memref<32x248xf32, #tpu.memory_space<vmem>>, vector<32x229xf32>
    %159 = arith.maximumf %157, %158 : vector<32x229xf32>
    %c0_144 = arith.constant 0 : index
    %c18_145 = arith.constant 18 : index
    %160 = vector.load %arg6[%c0_144, %c18_145] : memref<32x248xf32, #tpu.memory_space<vmem>>, vector<32x229xf32>
    %c0_146 = arith.constant 0 : index
    %c19_147 = arith.constant 19 : index
    %161 = vector.load %arg6[%c0_146, %c19_147] : memref<32x248xf32, #tpu.memory_space<vmem>>, vector<32x229xf32>
    %162 = arith.maximumf %160, %161 : vector<32x229xf32>
    %163 = arith.maximumf %159, %162 : vector<32x229xf32>
    %c0_148 = arith.constant 0 : index
    %c0_149 = arith.constant 0 : index
    %164 = vector.load %arg4[%c0_148, %c0_149] : memref<229x128xf32, #tpu.memory_space<vmem>>, vector<229x128xf32>
    %cst_150 = arith.constant dense<0.000000e+00> : vector<32x128xf32>
    %165 = tpu.matmul %163, %164, %cst_150 {dimension_numbers = #tpu.dot_dimension_numbers<[1], [0], [0], [1], [0, 0, 1, 1], [], []>} : vector<32x229xf32>, vector<229x128xf32>, vector<32x128xf32> -> vector<32x128xf32>
    %c0_151 = arith.constant 0 : index
    %c0_152 = arith.constant 0 : index
    %c0_153 = arith.constant 0 : index
    %166 = vector.load %arg5[%c0_151, %c0_152, %c0_153] : memref<1x32x128xf32, #tpu.memory_space<vmem>>, vector<1x32x128xf32>
    %167 = vector.shape_cast %166 : vector<1x32x128xf32> to vector<32x128xf32>
    %168 = vector.shape_cast %165 : vector<32x128xf32> to vector<1x32x128xf32>
    tpu.vector_store %arg5[%c0_151, %c0_152, %c0_153], %168 {strides = array<i32>} : memref<1x32x128xf32, #tpu.memory_space<vmem>>, vector<1x32x128xf32>,
    return
  }
  func.func @transform_0(%arg0: i32) -> (i32, i32, i32) {
    %c0_i32 = arith.constant 0 : i32
    %c0_i32_0 = arith.constant 0 : i32
    %c0_i32_1 = arith.constant 0 : i32
    return %arg0, %c0_i32, %c0_i32_0 : i32, i32, i32
  }
  func.func @transform_1(%arg0: i32) -> (i32, i32, i32) {
    %c0_i32 = arith.constant 0 : i32
    %c0_i32_0 = arith.constant 0 : i32
    %c0_i32_1 = arith.constant 0 : i32
    %c0_i32_2 = arith.constant 0 : i32
    return %c0_i32, %c0_i32_0, %c0_i32_1 : i32, i32, i32
  }
  func.func @transform_2(%arg0: i32) -> (i32, i32) {
    %c0_i32 = arith.constant 0 : i32
    %c0_i32_0 = arith.constant 0 : i32
    %c0_i32_1 = arith.constant 0 : i32
    return %c0_i32, %c0_i32_0 : i32, i32
  }
  func.func @transform_3(%arg0: i32) -> (i32, i32) {
    %c0_i32 = arith.constant 0 : i32
    %c0_i32_0 = arith.constant 0 : i32
    %c0_i32_1 = arith.constant 0 : i32
    return %c0_i32, %c0_i32_0 : i32, i32
  }
  func.func @transform_4(%arg0: i32) -> (i32, i32, i32) {
    %c0_i32 = arith.constant 0 : i32
    %c0_i32_0 = arith.constant 0 : i32
    %c0_i32_1 = arith.constant 0 : i32
    return %arg0, %c0_i32, %c0_i32_0 : i32, i32, i32
  }
}

module attributes {stable_mosaic.version = 11 : i64} {
  func.func @_linear_kernel(%arg0: i32, %arg1: memref<8x1568xf32, #tpu.memory_space<vmem>>, %arg2: memref<1568x128xbf16, #tpu.memory_space<vmem>>, %arg3: memref<1x128xf32, #tpu.memory_space<vmem>>, %arg4: memref<8x128xf32, #tpu.memory_space<vmem>>) attributes {dimension_semantics = [#tpu.dimension_semantics<parallel>], iteration_bounds = array<i64: 1>, scalar_prefetch = 0 : i64, scratch_operands = 0 : i64, tpu.core_type = #tpu.core_type<tc>, window_params = [{transform_indices = @transform_0, window_bounds = array<i64: 8, 1568>}, {pipeline_mode = #tpu.pipeline_mode<synchronous>, transform_indices = @transform_1, window_bounds = array<i64: 1568, 128>}, {pipeline_mode = #tpu.pipeline_mode<synchronous>, transform_indices = @transform_2, window_bounds = array<i64: 1, 128>}, {transform_indices = @transform_3, window_bounds = array<i64: 8, 128>}]} {
    %c0 = arith.constant 0 : index
    %c0_0 = arith.constant 0 : index
    %0 = vector.load %arg1[%c0, %c0_0] : memref<8x1568xf32, #tpu.memory_space<vmem>>, vector<8x1568xf32>
    %1 = arith.truncf %0 : vector<8x1568xf32> to vector<8x1568xbf16>
    %c0_1 = arith.constant 0 : index
    %c0_2 = arith.constant 0 : index
    %2 = vector.load %arg2[%c0_1, %c0_2] : memref<1568x128xbf16, #tpu.memory_space<vmem>>, vector<1568x128xbf16>
    %cst = arith.constant dense<0.000000e+00> : vector<8x128xf32>
    %3 = tpu.matmul %1, %2, %cst {dimension_numbers = #tpu.dot_dimension_numbers<[1], [0], [0], [1], [0, 0, 1, 1], [], []>} : vector<8x1568xbf16>, vector<1568x128xbf16>, vector<8x128xf32> -> vector<8x128xf32>
    %c0_3 = arith.constant 0 : index
    %c0_4 = arith.constant 0 : index
    %4 = vector.load %arg3[%c0_3, %c0_4] : memref<1x128xf32, #tpu.memory_space<vmem>>, vector<1x128xf32>
    %5 = vector.broadcast %4 : vector<1x128xf32> to vector<8x128xf32>
    %6 = arith.addf %3, %5 : vector<8x128xf32>
    %c0_5 = arith.constant 0 : index
    %c0_6 = arith.constant 0 : index
    %7 = vector.load %arg4[%c0_5, %c0_6] : memref<8x128xf32, #tpu.memory_space<vmem>>, vector<8x128xf32>
    tpu.vector_store %arg4[%c0_5, %c0_6], %6 {strides = array<i32>} : memref<8x128xf32, #tpu.memory_space<vmem>>, vector<8x128xf32>,
    return
  }
  func.func @transform_0(%arg0: i32) -> (i32, i32) {
    %c0_i32 = arith.constant 0 : i32
    %c0_i32_0 = arith.constant 0 : i32
    return %arg0, %c0_i32 : i32, i32
  }
  func.func @transform_1(%arg0: i32) -> (i32, i32) {
    %c0_i32 = arith.constant 0 : i32
    %c0_i32_0 = arith.constant 0 : i32
    %c0_i32_1 = arith.constant 0 : i32
    return %c0_i32, %c0_i32_0 : i32, i32
  }
  func.func @transform_2(%arg0: i32) -> (i32, i32) {
    %c0_i32 = arith.constant 0 : i32
    %c0_i32_0 = arith.constant 0 : i32
    %c0_i32_1 = arith.constant 0 : i32
    return %c0_i32, %c0_i32_0 : i32, i32
  }
  func.func @transform_3(%arg0: i32) -> (i32, i32) {
    %c0_i32 = arith.constant 0 : i32
    %c0_i32_0 = arith.constant 0 : i32
    return %arg0, %c0_i32 : i32, i32
  }
}

</mosaic_0001>

<bundles_post_ra>
// kernel: cnn_forward.5
= control target key start
LH: loop header
LB: loop body
LE: loop exit
PB: predicated region body
PF: predicated region fallthrough
CT: control target
= control target key end

     0   :  { %vm1465_vm0 = vmmov 0   ;;  %vm832_vm1 = vcmask 261120   ;;  %s1825_s1 = inlined_call_operand.vmem [shape: bf16[1568,128], index: 1, kind: input, shape index: {}]   ;;  %s1826_s0 = inlined_call_operand.vmem [shape: f32[8,1568], index: 0, kind: input, shape index: {}]   ;;  %s1827_s2 = inlined_call_operand.vmem [shape: f32[1,128], index: 2, kind: input, shape index: {}]   ;;  %s1828_s3 = inlined_call_operand.vmem [shape: f32[8,128], index: 3, kind: output, shape index: {}]  }
   0x1   :  { %v1366_v0 = vld [vmem:[%s1825_s1 + $0x40] sm:$0xff]   ;;  %v1370_v4 = vld [vmem:[%s1825_s1 + $0x48] sm:$0xff]   ;;  %v1374_v8 = vld [vmem:[%s1825_s1 + $0x50] sm:$0xff]  }
   0x2   :  { %v1367_v1 = vld [vmem:[%s1825_s1] sm:$0xff]   ;;  %1221 = vmatprep.subr.bf16.mxu0 %v1366_v0  ;;  %v1371_v5 = vld [vmem:[%s1825_s1 + $0x8] sm:$0xff]   ;;  %v1375_v9 = vld [vmem:[%s1825_s1 + $0x10] sm:$0xff]  }
   0x3   :  { %v1368_v2 = vld [vmem:[%s1825_s1 + $0xc0] sm:$0xff]   ;;  %1222 = vmatpush3.bf16.msra.mxu0 %v1367_v1  ;;  %v1372_v6 = vld [vmem:[%s1825_s1 + $0xc8] sm:$0xff]   ;;  %v1376_v10 = vld [vmem:[%s1825_s1 + $0xd0] sm:$0xff]  }
   0x4   :  { %v1369_v3 = vld [vmem:[%s1825_s1 + $0x80] sm:$0xff]   ;;  %1243 = vmatprep.subr.bf16.mxu1 %v1368_v2  ;;  %1223 = vmatprep.subr.bf16.mxu0 %v1370_v4  ;;  %v1373_v7 = vld [vmem:[%s1825_s1 + $0x88] sm:$0xff]   ;;  %v1377_v11 = vld [vmem:[%s1825_s1 + $0x90] sm:$0xff]  }
   0x5   :  { %1244 = vmatpush3.bf16.msra.mxu1 %v1369_v3  ;;  %v1378_v12 = vld [vmem:[%s1825_s1 + $0x58] sm:$0xff]   ;;  %v1382_v16 = vld [vmem:[%s1825_s1 + $0x60] sm:$0xff]   ;;  %v1386_v20 = vld [vmem:[%s1825_s1 + $0x68] sm:$0xff]  }
   0x6   :  { %1245 = vmatprep.subr.bf16.mxu1 %v1372_v6  ;;  %v1379_v13 = vld [vmem:[%s1825_s1 + $0x18] sm:$0xff]   ;;  %v1383_v17 = vld [vmem:[%s1825_s1 + $0x20] sm:$0xff]   ;;  %v1387_v21 = vld [vmem:[%s1825_s1 + $0x28] sm:$0xff]  }
   0x7   :  { %1224 = vmatpush3.bf16.msra.mxu0 %v1371_v5  ;;  %v1380_v14 = vld [vmem:[%s1825_s1 + $0xd8] sm:$0xff]   ;;  %v1384_v18 = vld [vmem:[%s1825_s1 + $0xe0] sm:$0xff]   ;;  %v1388_v22 = vld [vmem:[%s1825_s1 + $0xe8] sm:$0xff]  }
   0x8   :  { %1225 = vmatprep.subr.bf16.mxu0 %v1374_v8  ;;  %v1381_v15 = vld [vmem:[%s1825_s1 + $0x98] sm:$0xff]   ;;  %v1385_v19 = vld [vmem:[%s1825_s1 + $0xa0] sm:$0xff]   ;;  %v1389_v23 = vld [vmem:[%s1825_s1 + $0xa8] sm:$0xff]  }
   0x9   :  { %1246 = vmatpush3.bf16.msra.mxu1 %v1373_v7  ;;  %v1390_v24 = vld [vmem:[%s1825_s1 + $0x70] sm:$0xff]   ;;  %v1394_v28 = vld [vmem:[%s1825_s1 + $0x78] sm:$0xff]   ;;  %v16_v32 = vld [vmem:[%s1826_s0 + $0x8] sm:$0xff] }
   0xa   :  { %1247 = vmatprep.subr.bf16.mxu1 %v1376_v10  ;;  %v1391_v25 = vld [vmem:[%s1825_s1 + $0x30] sm:$0xff]   ;;  %v1395_v29 = vld [vmem:[%s1825_s1 + $0x38] sm:$0xff]   ;;  %v15_v33 = vld [vmem:[%s1826_s0] sm:$0xff]  ;;  %v29_v34 = vpack.c.bf16 %v16_v32, %v16_v32 }
   0xb   :  { %1226 = vmatpush3.bf16.msra.mxu0 %v1375_v9  ;;  %v1392_v26 = vld [vmem:[%s1825_s1 + $0xf0] sm:$0xff]   ;;  %v1396_v30 = vld [vmem:[%s1825_s1 + $0xf8] sm:$0xff]   ;;  %v28_v35 = vpack.c.bf16 %v15_v33, %v15_v33  ;;  %v1398_v36 = vld [vmem:[%s1825_s1 + $0x140] sm:$0xff]  }
   0xc   :  { %1227 = vmatprep.subr.bf16.mxu0 %v1378_v12  ;;  %v1393_v27 = vld [vmem:[%s1825_s1 + $0xb0] sm:$0xff]   ;;  %v1397_v31 = vld [vmem:[%s1825_s1 + $0xb8] sm:$0xff]   ;;  %v1399_v39 = vld [vmem:[%s1825_s1 + $0x100] sm:$0xff]   ;;  %868 = vmatprep.mubr.bf16.mxu0 %v29_v34 }
   0xd   :  { %1248 = vmatpush3.bf16.msra.mxu1 %v1377_v11  ;;  %v18_v37 = vld [vmem:[%s1826_s0 + $0x18] sm:$0xff]  ;;  %v1400_v40 = vld [vmem:[%s1825_s1 + $0x1c0] sm:$0xff]   ;;  %v17_v41 = vld [vmem:[%s1826_s0 + $0x10] sm:$0xff] }
   0xe   :  { %1249 = vmatprep.subr.bf16.mxu1 %v1380_v14  ;;  %v31_v38 = vpack.c.bf16 %v18_v37, %v18_v37  ;;  %v30_v42 = vpack.c.bf16 %v17_v41, %v17_v41  ;;  %v1401_v43 = vld [vmem:[%s1825_s1 + $0x180] sm:$0xff]   ;;  %v1402_v44 = vld [vmem:[%s1825_s1 + $0x148] sm:$0xff]   ;;  %v1406_v48 = vld [vmem:[%s1825_s1 + $0x150] sm:$0xff]  }
   0xf   :  { %1228 = vmatpush3.bf16.msra.mxu0 %v1379_v13  ;;  %v1403_v45 = vld [vmem:[%s1825_s1 + $0x108] sm:$0xff]   ;;  %v1407_v49 = vld [vmem:[%s1825_s1 + $0x110] sm:$0xff]   ;;  %v1410_v52 = vld [vmem:[%s1825_s1 + $0x158] sm:$0xff]  }
  0x10   :  { %1229 = vmatprep.subr.bf16.mxu0 %v1382_v16  ;;  %908 = vmatprep.mubr.bf16.mxu1 %v31_v38  ;;  %v1404_v46 = vld [vmem:[%s1825_s1 + $0x1c8] sm:$0xff]   ;;  %v1408_v50 = vld [vmem:[%s1825_s1 + $0x1d0] sm:$0xff]   ;;  %v1411_v53 = vld [vmem:[%s1825_s1 + $0x118] sm:$0xff]  }
  0x11   :  { %1250 = vmatpush3.bf16.msra.mxu1 %v1381_v15  ;;  %v1405_v47 = vld [vmem:[%s1825_s1 + $0x188] sm:$0xff]   ;;  %v1409_v51 = vld [vmem:[%s1825_s1 + $0x190] sm:$0xff]   ;;  %v1412_v54 = vld [vmem:[%s1825_s1 + $0x1d8] sm:$0xff]  }
  0x12   :  { %1251 = vmatprep.subr.bf16.mxu1 %v1384_v18  ;;  %v1413_v55 = vld [vmem:[%s1825_s1 + $0x198] sm:$0xff]   ;;  %v1414_v56 = vld [vmem:[%s1825_s1 + $0x160] sm:$0xff]   ;;  %v1418_v60 = vld [vmem:[%s1825_s1 + $0x168] sm:$0xff]  }
  0x13   :  { %1230 = vmatpush3.bf16.msra.mxu0 %v1383_v17  ;;  %v1415_v57 = vld [vmem:[%s1825_s1 + $0x120] sm:$0xff]   ;;  %v1419_v61 = vld [vmem:[%s1825_s1 + $0x128] sm:$0xff]   ;;  %v1422_v0 = vld [vmem:[%s1825_s1 + $0x170] sm:$0xff]  }
  0x14   :  { %1231 = vmatprep.subr.bf16.mxu0 %v1386_v20  ;;  %v1416_v58 = vld [vmem:[%s1825_s1 + $0x1e0] sm:$0xff]   ;;  %v1420_v62 = vld [vmem:[%s1825_s1 + $0x1e8] sm:$0xff]   ;;  %v1423_v1 = vld [vmem:[%s1825_s1 + $0x130] sm:$0xff]  }
  0x15   :  { %1252 = vmatpush3.bf16.msra.mxu1 %v1385_v19  ;;  %v1417_v59 = vld [vmem:[%s1825_s1 + $0x1a0] sm:$0xff]   ;;  %v1421_v63 = vld [vmem:[%s1825_s1 + $0x1a8] sm:$0xff]   ;;  %v1424_v2 = vld [vmem:[%s1825_s1 + $0x1f0] sm:$0xff]  }
  0x16   :  { %1253 = vmatprep.subr.bf16.mxu1 %v1388_v22  ;;  %v1425_v3 = vld [vmem:[%s1825_s1 + $0x1b0] sm:$0xff]   ;;  %v1426_v4 = vld [vmem:[%s1825_s1 + $0x178] sm:$0xff]   ;;  %v20_v8 = vld [vmem:[%s1826_s0 + $0x28] sm:$0xff] }
  0x17   :  { %1232 = vmatpush3.bf16.msra.mxu0 %v1387_v21  ;;  %v1427_v5 = vld [vmem:[%s1825_s1 + $0x138] sm:$0xff]   ;;  %v19_v9 = vld [vmem:[%s1826_s0 + $0x20] sm:$0xff]  ;;  %v33_v10 = vpack.c.bf16 %v20_v8, %v20_v8  ;;  %v21_v17 = vld [vmem:[%s1826_s0 + $0x30] sm:$0xff] }
  0x18   :  { %1233 = vmatprep.subr.bf16.mxu0 %v1390_v24  ;;  %v1428_v6 = vld [vmem:[%s1825_s1 + $0x1f8] sm:$0xff]   ;;  %v32_v11 = vpack.c.bf16 %v19_v9, %v19_v9  ;;  %v1430_v12 = vld [vmem:[%s1825_s1 + $0x240] sm:$0xff]   ;;  %v34_v18 = vpack.c.bf16 %v21_v17, %v21_v17  ;;  %v1434_v20 = vld [vmem:[%s1825_s1 + $0x248] sm:$0xff]  }
  0x19   :  { %1254 = vmatpush3.bf16.msra.mxu1 %v1389_v23  ;;  %v1429_v7 = vld [vmem:[%s1825_s1 + $0x1b8] sm:$0xff]   ;;  %v1431_v15 = vld [vmem:[%s1825_s1 + $0x200] sm:$0xff]   ;;  %v1435_v21 = vld [vmem:[%s1825_s1 + $0x208] sm:$0xff]  }
  0x1a   :  { %1255 = vmatprep.subr.bf16.mxu1 %v1392_v26  ;;  %v22_v13 = vld [vmem:[%s1826_s0 + $0x38] sm:$0xff]  ;;  %v1432_v16 = vld [vmem:[%s1825_s1 + $0x2c0] sm:$0xff]   ;;  %v1436_v22 = vld [vmem:[%s1825_s1 + $0x2c8] sm:$0xff]  }
  0x1b   :  { %1234 = vmatpush3.bf16.msra.mxu0 %v1391_v25  ;;  %v35_v14 = vpack.c.bf16 %v22_v13, %v22_v13  ;;  %v1433_v19 = vld [vmem:[%s1825_s1 + $0x280] sm:$0xff]   ;;  %v1437_v23 = vld [vmem:[%s1825_s1 + $0x288] sm:$0xff]   ;;  %v1438_v24 = vld [vmem:[%s1825_s1 + $0x250] sm:$0xff]  }
  0x1c   :  { %1235 = vmatprep.subr.bf16.mxu0 %v1394_v28  ;;  %v1439_v25 = vld [vmem:[%s1825_s1 + $0x210] sm:$0xff]   ;;  %v1442_v28 = vld [vmem:[%s1825_s1 + $0x258] sm:$0xff]   ;;  %v1446_v32 = vld [vmem:[%s1825_s1 + $0x260] sm:$0xff]  }
  0x1d   :  { %1256 = vmatpush3.bf16.msra.mxu1 %v1393_v27  ;;  %v1440_v26 = vld [vmem:[%s1825_s1 + $0x2d0] sm:$0xff]   ;;  %v1447_v33 = vld [vmem:[%s1825_s1 + $0x220] sm:$0xff]   ;;  %v1451_v37 = vld [vmem:[%s1825_s1 + $0x228] sm:$0xff]  }
  0x1e   :  { %1257 = vmatprep.subr.bf16.mxu1 %v1396_v30  ;;  %v1441_v27 = vld [vmem:[%s1825_s1 + $0x290] sm:$0xff]   ;;  %v1444_v30 = vld [vmem:[%s1825_s1 + $0x2d8] sm:$0xff]   ;;  %v1448_v34 = vld [vmem:[%s1825_s1 + $0x2e0] sm:$0xff]  }
  0x1f   :  { %1236 = vmatpush3.bf16.msra.mxu0 %v1395_v29  ;;  %v1443_v29 = vld [vmem:[%s1825_s1 + $0x218] sm:$0xff]   ;;  %v1452_v38 = vld [vmem:[%s1825_s1 + $0x2e8] sm:$0xff]   ;;  %v1455_v41 = vld [vmem:[%s1825_s1 + $0x230] sm:$0xff]  }
  0x20   :  { %1265 = vmatprep.subr.bf16.mxu0 %v1398_v36  ;;  %v1450_v36 = vld [vmem:[%s1825_s1 + $0x268] sm:$0xff]  }
  0x21   :  { %1258 = vmatpush3.bf16.msra.mxu1 %v1397_v31  ;;  %v1445_v31 = vld [vmem:[%s1825_s1 + $0x298] sm:$0xff]  }
  0x22   :  { %869 = vmatmul.mubr.bf16.vlgmr.msra.gmra.mrb[0].mxu0 %v28_v35  ;;  %1287 = vmatprep.subr.bf16.mxu1 %v1400_v40  ;;  %v1449_v35 = vld [vmem:[%s1825_s1 + $0x2a0] sm:$0xff]   ;;  %v1454_v40 = vld [vmem:[%s1825_s1 + $0x270] sm:$0xff]  }
  0x23   :  { %1266 = vmatpush3.bf16.msra.mxu0 %v1399_v39  ;;  %948 = vmatprep.mubr.bf16.mxu0 %v33_v10  ;;  %v1453_v39 = vld [vmem:[%s1825_s1 + $0x2a8] sm:$0xff]  }
  0x24   :  { %909 = vmatmul.mubr.bf16.vlgmr.msra.gmra.mrb[0].mxu1 %v30_v42  ;;  %1267 = vmatprep.subr.bf16.mxu0 %v1402_v44  ;;  %v1456_v42 = vld [vmem:[%s1825_s1 + $0x2f0] sm:$0xff]   ;;  %v1458_v44 = vld [vmem:[%s1825_s1 + $0x278] sm:$0xff]  }
  0x25   :  { %1288 = vmatpush3.bf16.msra.mxu1 %v1401_v43  ;;  %988 = vmatprep.mubr.bf16.mxu1 %v35_v14  ;;  %v1457_v43 = vld [vmem:[%s1825_s1 + $0x2b0] sm:$0xff]  }
  0x26   :  { %1289 = vmatprep.subr.bf16.mxu1 %v1404_v46  ;;  %v1460_v46 = vld [vmem:[%s1825_s1 + $0x2f8] sm:$0xff]  }
  0x27   :  { %1268 = vmatpush3.bf16.msra.mxu0 %v1403_v45  ;;  %v1459_v45 = vld [vmem:[%s1825_s1 + $0x238] sm:$0xff]  }
  0x28   :  { %1269 = vmatprep.subr.bf16.mxu0 %v1406_v48  ;;  %v24_v48 = vld [vmem:[%s1826_s0 + $0x48] sm:$0xff] }
  0x29   :  { %1290 = vmatpush3.bf16.msra.mxu1 %v1405_v47  ;;  %v1461_v47 = vld [vmem:[%s1825_s1 + $0x2b8] sm:$0xff]  }
  0x2a   :  { %1291 = vmatprep.subr.bf16.mxu1 %v1408_v50  ;;  %v23_v50 = vld [vmem:[%s1826_s0 + $0x40] sm:$0xff] }
  0x2b   :  { %1270 = vmatpush3.bf16.msra.mxu0 %v1407_v49  ;;  %v37_v49 = vpack.c.bf16 %v24_v48, %v24_v48 }
  0x2c   :  { %1271 = vmatprep.subr.bf16.mxu0 %v1410_v52  ;;  %v1464_v52 = vmov 0.0  }
  0x2d   :  { %1292 = vmatpush3.bf16.msra.mxu1 %v1409_v51  ;;  %v26_v51 = vld [vmem:[%s1826_s0 + $0x58] sm:$0xff] }
  0x2e   :  { %1293 = vmatprep.subr.bf16.mxu1 %v1412_v54  ;;  %v36_v54 = vpack.c.bf16 %v23_v50, %v23_v50 }
  0x2f   :  { %1272 = vmatpush3.bf16.msra.mxu0 %v1411_v53  ;;  %v25_v53 = vld [vmem:[%s1826_s0 + $0x50] sm:$0xff] }
  0x30   :  { %1273 = vmatprep.subr.bf16.mxu0 %v1414_v56  ;;  %v38_v56 = vpack.c.bf16 %v25_v53, %v25_v53 }
  0x31   :  { %1294 = vmatpush3.bf16.msra.mxu1 %v1413_v55  ;;  %v39_v55 = vpack.c.bf16 %v26_v51, %v26_v51 }
  0x32   :  { %1295 = vmatprep.subr.bf16.mxu1 %v1416_v58  ;;  %v1463_v58 = vld [vmem:[%s1825_s1 + $0x308] sm:$0xff]  }
  0x33   :  { %1274 = vmatpush3.bf16.msra.mxu0 %v1415_v57  ;;  %v1462_v57 = vld [vmem:[%s1825_s1 + $0x300] sm:$0xff]  }
  0x34   :  { %1275 = vmatprep.subr.bf16.mxu0 %v1418_v60 }
  0x35   :  { %1296 = vmatpush3.bf16.msra.mxu1 %v1417_v59  ;;  %v27_v59 = vld [vmem:[%s1826_s0 + $0x60] sm:$0xff] }
  0x36   :  { %1297 = vmatprep.subr.bf16.mxu1 %v1420_v62  ;;  %v40_v60 = vpack.c.bf16 %v27_v59, %v27_v59  ;;  %v1121_v62 = vld [vmem:[%s1827_s2] ss:$0 sm:$0xff] }
  0x37   :  { %1276 = vmatpush3.bf16.msra.mxu0 %v1419_v61 }
  0x38   :  { %1277 = vmatprep.subr.bf16.mxu0 %v1422_v0 }
  0x39   :  { %1298 = vmatpush3.bf16.msra.mxu1 %v1421_v63 }
  0x3a   :  { %1299 = vmatprep.subr.bf16.mxu1 %v1424_v2 }
  0x3b   :  { %1278 = vmatpush3.bf16.msra.mxu0 %v1423_v1 }
  0x3c   :  { %1279 = vmatprep.subr.bf16.mxu0 %v1426_v4 }
  0x3d   :  { %1300 = vmatpush3.bf16.msra.mxu1 %v1425_v3 }
  0x3e   :  { %1301 = vmatprep.subr.bf16.mxu1 %v1428_v6 }
  0x3f   :  { %1280 = vmatpush3.bf16.msra.mxu0 %v1427_v5 }
  0x40   :  { %1309 = vmatprep.subr.bf16.mxu0 %v1430_v12 }
  0x41   :  { %1302 = vmatpush3.bf16.msra.mxu1 %v1429_v7 }
  0x42   :  { %949 = vmatmul.mubr.bf16.vlgmr.msra.gmra.mrb[4].mxu0 %v32_v11  ;;  %1331 = vmatprep.subr.bf16.mxu1 %v1432_v16 }
  0x43   :  { %1310 = vmatpush3.bf16.msra.mxu0 %v1431_v15  ;;  %1028 = vmatprep.mubr.bf16.mxu0 %v37_v49 }
  0x44   :  { %989 = vmatmul.mubr.bf16.vlgmr.msra.gmra.mrb[4].mxu1 %v34_v18  ;;  %1311 = vmatprep.subr.bf16.mxu0 %v1434_v20 }
  0x45   :  { %1332 = vmatpush3.bf16.msra.mxu1 %v1433_v19  ;;  %1068 = vmatprep.mubr.bf16.mxu1 %v39_v55 }
  0x46   :  { %1333 = vmatprep.subr.bf16.mxu1 %v1436_v22 }
  0x47   :  { %1312 = vmatpush3.bf16.msra.mxu0 %v1435_v21 }
  0x48   :  { %1313 = vmatprep.subr.bf16.mxu0 %v1438_v24 }
  0x49   :  { %1334 = vmatpush3.bf16.msra.mxu1 %v1437_v23 }
  0x4a   :  { %1335 = vmatprep.subr.bf16.mxu1 %v1440_v26 }
  0x4b   :  { %1314 = vmatpush3.bf16.msra.mxu0 %v1439_v25 }
  0x4c   :  { %1315 = vmatprep.subr.bf16.mxu0 %v1442_v28 }
  0x4d   :  { %1336 = vmatpush3.bf16.msra.mxu1 %v1441_v27 }
  0x4e   :  { %1337 = vmatprep.subr.bf16.mxu1 %v1444_v30 }
  0x4f   :  { %1316 = vmatpush3.bf16.msra.mxu0 %v1443_v29 }
  0x50   :  { %1317 = vmatprep.subr.bf16.mxu0 %v1446_v32 }
  0x51   :  { %1338 = vmatpush3.bf16.msra.mxu1 %v1445_v31 }
  0x52   :  { %1339 = vmatprep.subr.bf16.mxu1 %v1448_v34 }
  0x53   :  { %1318 = vmatpush3.bf16.msra.mxu0 %v1447_v33 }
  0x54   :  { %1319 = vmatprep.subr.bf16.mxu0 %v1450_v36 }
  0x55   :  { %1340 = vmatpush3.bf16.msra.mxu1 %v1449_v35 }
  0x56   :  { %1341 = vmatprep.subr.bf16.mxu1 %v1452_v38 }
  0x57   :  { %1320 = vmatpush3.bf16.msra.mxu0 %v1451_v37 }
  0x58   :  { %1321 = vmatprep.subr.bf16.mxu0 %v1454_v40 }
  0x59   :  { %1342 = vmatpush3.bf16.msra.mxu1 %v1453_v39 }
  0x5a   :  { %1343 = vmatprep.subr.bf16.mxu1 %v1456_v42 }
  0x5b   :  { %1322 = vmatpush3.bf16.msra.mxu0 %v1455_v41 }
  0x5c   :  { %1323 = vmatprep.subr.bf16.mxu0 %v1458_v44 }
  0x5d   :  { %1344 = vmatpush3.bf16.msra.mxu1 %v1457_v43 }
  0x5e   :  { %1345 = vmatprep.subr.bf16.mxu1 %v1460_v46 }
  0x5f   :  { %1324 = vmatpush3.bf16.msra.mxu0 %v1459_v45 }
  0x60   :  { %1356 = vmatprep.subr.bf16.mxu0 %v1464_v52 }
  0x61   :  { %1346 = vmatpush3.bf16.msra.mxu1 %v1461_v47 }
  0x62   :  { %1029 = vmatmul.mubr.bf16.vlgmr.msra.gmra.mrb[8].mxu0 %v36_v54 }
  0x63   :  { %1357 = vmatpush3.bf16.msra.mxu0 %v1462_v57  ;;  %1360 = vmatprep.mubr.msk.bf16.mxu0 %vm1465_vm0, %v1464_v52 }
  0x64   :  { %1069 = vmatmul.mubr.bf16.vlgmr.msra.gmra.mrb[8].mxu1 %v38_v56  ;;  %1358 = vmatprep.subr.bf16.mxu0 %v1464_v52 }
  0x67   :  { %1359 = vmatpush3.bf16.msra.mxu0 %v1463_v58 }
  0x6a   :  { %1361 = vmatmul.mubr.msk.bf16.vlgmr.msra.gmra.mrb[12].mxu0 %vm832_vm1, %v40_v60 }
  0xf5   :  { %v1237_v61 = vpop.f32.mrb[0].mxu0 }
  0xf6   :  { %v1238_v63 = vpop.f32.mrb[1].mxu0 }
  0xf7   :  { %v1239_v0 = vadd.f32 %v1238_v63, %v1237_v61  ;;  %v1240_v1 = vpop.f32.mrb[2].mxu0  ;;  %v1259_v2 = vpop.f32.mrb[0].mxu1 }
  0xf8   :  { %v1241_v3 = vpop.f32.mrb[3].mxu0  ;;  %v1260_v5 = vpop.f32.mrb[1].mxu1 }
  0xf9   :  { %v871_v4 = vadd.f32 %v1239_v0, %v1121_v62  ;;  %v1261_v6 = vadd.f32 %v1260_v5, %v1259_v2  ;;  %v1262_v7 = vpop.f32.mrb[2].mxu1 }
  0xfa   :  { %v1263_v8 = vpop.f32.mrb[3].mxu1 }
  0xfb   :  { %v911_v9 = vadd.f32 %v1261_v6, %v871_v4 }
 0x115   :  { %v1281_v10 = vpop.f32.mrb[4].mxu0 }
 0x116   :  { %v1282_v11 = vpop.f32.mrb[5].mxu0 }
 0x117   :  { %v1283_v12 = vadd.f32 %v1282_v11, %v1281_v10  ;;  %v1284_v13 = vpop.f32.mrb[6].mxu0  ;;  %v1303_v14 = vpop.f32.mrb[4].mxu1 }
 0x118   :  { %v1285_v15 = vpop.f32.mrb[7].mxu0  ;;  %v1304_v17 = vpop.f32.mrb[5].mxu1 }
 0x119   :  { %v951_v16 = vadd.f32 %v1283_v12, %v911_v9  ;;  %v1305_v18 = vadd.f32 %v1304_v17, %v1303_v14  ;;  %v1306_v19 = vpop.f32.mrb[6].mxu1 }
 0x11a   :  { %v1307_v20 = vpop.f32.mrb[7].mxu1 }
 0x11b   :  { %v991_v21 = vadd.f32 %v1305_v18, %v951_v16 }
 0x135   :  { %v1325_v22 = vpop.f32.mrb[8].mxu0 }
 0x136   :  { %v1326_v23 = vpop.f32.mrb[9].mxu0 }
 0x137   :  { %v1327_v24 = vadd.f32 %v1326_v23, %v1325_v22  ;;  %v1347_v25 = vpop.f32.mrb[8].mxu1  ;;  %v1328_v26 = vpop.f32.mrb[10].mxu0 }
 0x138   :  { %v1348_v27 = vpop.f32.mrb[9].mxu1  ;;  %v1329_v28 = vpop.f32.mrb[11].mxu0 }
 0x139   :  { %v1031_v29 = vadd.f32 %v1327_v24, %v991_v21  ;;  %v1349_v30 = vadd.f32 %v1348_v27, %v1347_v25  ;;  %v1350_v31 = vpop.f32.mrb[10].mxu1 }
 0x13a   :  { %v1351_v32 = vpop.f32.mrb[11].mxu1 }
 0x13b   :  { %v1071_v33 = vadd.f32 %v1349_v30, %v1031_v29 }
 0x13d   :  { %v1110_v34 = vpop.f32.mrb[12].mxu0 }
 0x13e   :  { %v1111_v35 = vadd.f32 %v1110_v34, %v1071_v33  ;;  %v1362_v36 = vpop.f32.mrb[13].mxu0 }
 0x13f   :  { %v1113_v37 = vpop.f32.mrb[14].mxu0 }
 0x140   :  { %1116 = vst [vmem:[%s1828_s3] sm:$0xff] %v1111_v35  ;;  %v1363_v38 = vpop.f32.mrb[15].mxu0 }

// kernel: cnn_forward.4
= control target key start
LH: loop header
LB: loop body
LE: loop exit
PB: predicated region body
PF: predicated region fallthrough
CT: control target
= control target key end

     0   :  { %s3456_s15 = smov 0   ;;  %s4114_s0 = inlined_call_operand.vmem [shape: bf16[2,16,384], index: 0, kind: input, shape index: {}]   ;;  %s4115_s1 = inlined_call_operand.vmem [shape: bf16[25,32,16], index: 1, kind: input, shape index: {}]   ;;  %s4116_s2 = inlined_call_operand.vmem [shape: f32[32,1], index: 2, kind: input, shape index: {}]   ;;  %s4117_s3 = inlined_call_operand.vmem [shape: f32[229,128], index: 3, kind: input, shape index: {}]   ;;  %s4118_s4 = inlined_call_operand.vmem [shape: f32[2,32,128], index: 4, kind: output, shape index: {}]  }
   0x1 LB: > { %s2851_s16 = sadd.s32 4294967295, %s3402_s15   ;;  %p2855_p0 = scmp.ge.s32.totalorder %s3402_s15, 1  ;;  %s3402_s15 = sphi %s3456_s15, %s14_s15  }
   0x2   : > { %p162_p1 = scmp.lt.s32.totalorder %s3402_s15, 3 }
   0x4   : > { %p163_p2 = pnand %p2855_p0, %p162_p1 }
   0x5   : > { %p188_p3 = scmp.lt.s32.totalorder (!%p163_p2), %s2851_s16, 1  ;;  %v3404_v0 = vmov (!%p163_p2), 0   ;;  %s3405_s21 = smov (!%p163_p2), 91   ;;  %vm1233_vm0 = vcmask (!%p163_p2), 744448   ;;  %vm232_vm1 = vcmask (!%p163_p2), 1039360   ;;  %v3346_v10 = vld [vmem:[%s4115_s1 + $0x10] sm:$0xff] (!%p163_p2)  }
   0x6   : > { %166 = sbr.rel (%p163_p2) target bundleno = 1045 (0x415), region = 36  ;;  %275 = vmatprep.mubr.bf16.mxu0 (!%p163_p2), %v3404_v0  ;;  %285 = vmatprep.mubr.bf16.mxu1 (!%p163_p2), %v3404_v0  ;;  %s3406_s22 = smov (!%p163_p2), 127   ;;  %v3347_v11 = vld [vmem:[%s4115_s1 + $0x18] sm:$0xff] (!%p163_p2)   ;;  %vm236_vm2 = vcmask (!%p163_p2), 130048   ;;  %vm1326_vm3 = vcmask (!%p163_p2), 736256   ;;  %v3348_v18 = vld [vmem:[%s4115_s1 + $0xb0] sm:$0xff] (!%p163_p2)  }
   0x7   : > { %3340 = vset.pattern.permute.xlu0 (!%p163_p2), %v3404_v0  ;;  %3341 = vset.pattern.permute.xlu1 (!%p163_p2), %v3404_v0  ;;  %s3407_s23 = smov (!%p163_p2), 90   ;;  %s3408_s24 = smov (!%p163_p2), 89   ;;  %v3349_v19 = vld [vmem:[%s4115_s1] sm:$0xff] (!%p163_p2)   ;;  %vm1419_vm4 = vcmask (!%p163_p2), 728064   ;;  %v3350_v26 = vld [vmem:[%s4115_s1 + $0xb8] sm:$0xff] (!%p163_p2)   ;;  %v3351_v27 = vld [vmem:[%s4115_s1 + $0x8] sm:$0xff] (!%p163_p2)  }
   0x8   : > { %s3409_s25 = smov (!%p163_p2), 88   ;;  %s3410_s26 = smov (!%p163_p2), 74   ;;  %vm1512_vm5 = vcmask (!%p163_p2), 719872   ;;  %v3352_v32 = vld [vmem:[%s4115_s1 + $0xc0] sm:$0xff] (!%p163_p2)   ;;  %vm386_vm6 = vcmask (!%p163_p2), 1031168   ;;  %v3354_v41 = vld [vmem:[%s4115_s1 + $0xc8] sm:$0xff] (!%p163_p2)  }
   0x9   : > { %s3411_s27 = smov (!%p163_p2), 126   ;;  %s3412_s28 = smov (!%p163_p2), 73   ;;  %v3353_v40 = vld [vmem:[%s4115_s1 + $0x20] sm:$0xff] (!%p163_p2)   ;;  %vm476_vm7 = vcmask (!%p163_p2), 1022976   ;;  %vm1605_vm8 = vcmask (!%p163_p2), 605184   ;;  %v3355_v46 = vld [vmem:[%s4115_s1 + $0x28] sm:$0xff] (!%p163_p2)  }
   0xa   : > { %s3413_s29 = smov (!%p163_p2), 125   ;;  %s3414_s30 = smov (!%p163_p2), 72   ;;  %v3356_v47 = vld [vmem:[%s4115_s1 + $0xd0] sm:$0xff] (!%p163_p2)   ;;  %v3358_v56 = vld [vmem:[%s4115_s1 + $0xd8] sm:$0xff] (!%p163_p2)   ;;  %vm566_vm9 = vcmask (!%p163_p2), 1014784   ;;  %vm1698_vm10 = vcmask (!%p163_p2), 596992  }
   0xb   : > { %s3415_s5 = smov (!%p163_p2), 124   ;;  %s3416_s6 = smov (!%p163_p2), 71   ;;  %v3357_v55 = vld [vmem:[%s4115_s1 + $0x30] sm:$0xff] (!%p163_p2)   ;;  %v3359_v62 = vld [vmem:[%s4115_s1 + $0x38] sm:$0xff] (!%p163_p2)   ;;  %v3360_v63 = vld [vmem:[%s4115_s1 + $0xe0] sm:$0xff] (!%p163_p2)   ;;  %vm675_vm11 = vcmask (!%p163_p2), 900096  }
   0xc   : > { %s3417_s7 = smov (!%p163_p2), 110   ;;  %s3418_s8 = smov (!%p163_p2), 70   ;;  %vm768_vm12 = vcmask (!%p163_p2), 891904   ;;  %vm1791_vm13 = vcmask (!%p163_p2), 588800   ;;  %vm861_vm14 = vcmask (!%p163_p2), 883712   ;;  %vm1884_vm15 = vcmask (!%p163_p2), 580608  }
   0xd   : > { %s4120_s16 = smov (!%p188_p3, %s2851_s16), 1  ;;  %s3419_s9 = smov 109  }
   0xe   : > { %s3304_s17 = smul.u32 24, %s4120_s16  ;;  %s3420_s10 = smov 56  }
   0xf   : > { %s3421_s11 = smov 108   ;;  %s3422_s12 = smov 55  }
  0x10   : > { %s192_s20 = scalar_lea.vmem %s4114_s0, %s3304_s17  ;;  %s3423_s13 = smov 107  }
  0x11   : > { %v3474_v1 = vld [vmem:[%s192_s20 + $0x4] ss:$12 sps:$4 sm:$0xff]   ;;  %v3476_v2 = vld [vmem:[%s192_s20] ss:$12 sps:$4 sm:$0xff]   ;;  %v3479_v3 = vld [vmem:[%s192_s20 + $0x8] ss:$12 sps:$4 sm:$0xff]  }
  0x12   : > { %1229 = vrot.lane.b32.xlu1 %v3474_v1, %s3405_s21  ;;  %228 = vrot.lane.b32.xlu0 %v3476_v2, %s3406_s22  ;;  %s3424_s14 = smov 54   ;;  %s3425_s17 = smov 106  }
  0x13   : > { %s3426_s18 = smov 53  }
  0x16   : > { %1231 = vrot.lane.b32.xlu1 %v3479_v3, %s3405_s21  ;;  %230 = vrot.lane.b32.xlu0 %v3474_v1, %s3406_s22 }
  0x1a   : > { %1322 = vrot.lane.b32.xlu1 %v3474_v1, %s3407_s23  ;;  %1227 = vrot.lane.b32.xlu0 %v3476_v2, %s3405_s21 }
  0x1e   : > { %1320 = vrot.lane.b32.xlu1 %v3476_v2, %s3407_s23  ;;  %1324 = vrot.lane.b32.xlu0 %v3479_v3, %s3407_s23 }
  0x22   : > { %1417 = vrot.lane.b32.xlu1 %v3479_v3, %s3408_s24  ;;  %1415 = vrot.lane.b32.xlu0 %v3474_v1, %s3408_s24 }
  0x26   : > { %1508 = vrot.lane.b32.xlu1 %v3474_v1, %s3409_s25  ;;  %1413 = vrot.lane.b32.xlu0 %v3476_v2, %s3408_s24  ;;  %s3427_s24 = smov 92  }
  0x2a   : > { %1506 = vrot.lane.b32.xlu1 %v3476_v2, %s3409_s25  ;;  %1510 = vrot.lane.b32.xlu0 %v3479_v3, %s3409_s25 }
  0x2e   : > { %1603 = vrot.lane.b32.xlu1 %v3479_v3, %s3410_s26  ;;  %1601 = vrot.lane.b32.xlu0 %v3474_v1, %s3410_s26 }
  0x32   : > { %382 = vrot.lane.b32.xlu1 %v3476_v2, %s3411_s27  ;;  %1599 = vrot.lane.b32.xlu0 %v3476_v2, %s3410_s26 }
  0x36   : > { %1694 = vrot.lane.b32.xlu1 %v3474_v1, %s3412_s28  ;;  %384 = vrot.lane.b32.xlu0 %v3474_v1, %s3411_s27 }
  0x3a   : > { %1692 = vrot.lane.b32.xlu1 %v3476_v2, %s3412_s28  ;;  %1696 = vrot.lane.b32.xlu0 %v3479_v3, %s3412_s28 }
  0x3e   : > { %474 = vrot.lane.b32.xlu1 %v3474_v1, %s3413_s29  ;;  %472 = vrot.lane.b32.xlu0 %v3476_v2, %s3413_s29  ;;  %s3428_s29 = smov 52  }
  0x42   : > { %1789 = vrot.lane.b32.xlu1 %v3479_v3, %s3414_s30  ;;  %1787 = vrot.lane.b32.xlu0 %v3474_v1, %s3414_s30 }
  0x46   : > { %562 = vrot.lane.b32.xlu1 %v3476_v2, %s3415_s5  ;;  %1785 = vrot.lane.b32.xlu0 %v3476_v2, %s3414_s30 }
  0x4a   : > { %1880 = vrot.lane.b32.xlu1 %v3474_v1, %s3416_s6  ;;  %564 = vrot.lane.b32.xlu0 %v3474_v1, %s3415_s5 }
  0x4e   : > { %1878 = vrot.lane.b32.xlu1 %v3476_v2, %s3416_s6  ;;  %1882 = vrot.lane.b32.xlu0 %v3479_v3, %s3416_s6 }
  0x52   : > { %673 = vrot.lane.b32.xlu1 %v3479_v3, %s3417_s7  ;;  %671 = vrot.lane.b32.xlu0 %v3474_v1, %s3417_s7 }
  0x56   : > { %1973 = vrot.lane.b32.xlu1 %v3474_v1, %s3418_s8  ;;  %669 = vrot.lane.b32.xlu0 %v3476_v2, %s3417_s7 }
  0x5a   : > { %1971 = vrot.lane.b32.xlu1 %v3476_v2, %s3418_s8  ;;  %1975 = vrot.lane.b32.xlu0 %v3479_v3, %s3418_s8 }
  0x5e   : > { %766 = vrot.lane.b32.xlu1 %v3479_v3, %s3419_s9  ;;  %764 = vrot.lane.b32.xlu0 %v3474_v1, %s3419_s9 }
  0x62   : > { %2066 = vrot.lane.b32.xlu1 %v3474_v1, %s3420_s10  ;;  %762 = vrot.lane.b32.xlu0 %v3476_v2, %s3419_s9 }
  0x66   : > { %2064 = vrot.lane.b32.xlu1 %v3476_v2, %s3420_s10  ;;  %2068 = vrot.lane.b32.xlu0 %v3479_v3, %s3420_s10 }
  0x6a   : > { %859 = vrot.lane.b32.xlu1 %v3479_v3, %s3421_s11  ;;  %857 = vrot.lane.b32.xlu0 %v3474_v1, %s3421_s11 }
  0x6e   : > { %2159 = vrot.lane.b32.xlu1 %v3474_v1, %s3422_s12  ;;  %855 = vrot.lane.b32.xlu0 %v3476_v2, %s3421_s11 }
  0x72   : > { %2157 = vrot.lane.b32.xlu1 %v3476_v2, %s3422_s12  ;;  %2161 = vrot.lane.b32.xlu0 %v3479_v3, %s3422_s12 }
  0x76   : > { %952 = vrot.lane.b32.xlu1 %v3479_v3, %s3423_s13  ;;  %950 = vrot.lane.b32.xlu0 %v3474_v1, %s3423_s13 }
  0x7a   : > { %2252 = vrot.lane.b32.xlu1 %v3474_v1, %s3424_s14  ;;  %948 = vrot.lane.b32.xlu0 %v3476_v2, %s3423_s13 }
  0x7e   : > { %2250 = vrot.lane.b32.xlu1 %v3476_v2, %s3424_s14  ;;  %2254 = vrot.lane.b32.xlu0 %v3479_v3, %s3424_s14 }
  0x82   : > { %1045 = vrot.lane.b32.xlu1 %v3479_v3, %s3425_s17  ;;  %1043 = vrot.lane.b32.xlu0 %v3474_v1, %s3425_s17 }
  0x84   : > { %v1230_v4 = vpop.permute.xlu1 %1229  ;;  %v229_v5 = vpop.permute.xlu0 %228 }
  0x86   : > { %2345 = vrot.lane.b32.xlu1 %v3474_v1, %s3426_s18  ;;  %1041 = vrot.lane.b32.xlu0 %v3476_v2, %s3425_s17 }
  0x88   : > { %v1232_v6 = vpop.permute.xlu1 %1231  ;;  %v231_v7 = vpop.permute.xlu0 %230 }
  0x89   : > { %v1235_v8 = vsel %vm1233_vm0, %v1230_v4, %v1232_v6  ;;  %243 = vmatprep.subr.bf16.mxu0 %v231_v7  ;;  %3110 = vmatprep.subr.bf16.mxu1 %v231_v7  ;;  %v233_v9 = vsel %vm232_vm1, %v229_v5, %v231_v7 }
  0x8a   : > { %244 = vmatpush1.bf16.msra.mxu0 %v233_v9  ;;  %3111 = vmatpush1.bf16.msra.mxu1 %v233_v9  ;;  %v3362_v9 = vld [vmem:[%s4115_s1 + $0xe8] sm:$0xff]  }
  0x8b   : > { %1244 = vmatprep.subr.bf16.mxu0 %v1235_v8  ;;  %314 = vmatprep.subr.bf16.mxu1 %v3474_v1  ;;  %v3361_v8 = vld [vmem:[%s4115_s1 + $0x40] sm:$0xff]  }
  0x8c   : > { %v1323_v12 = vpop.permute.xlu1 %1322  ;;  %v1228_v13 = vpop.permute.xlu0 %1227  ;;  %2347 = vrot.lane.b32.xlu0 %v3479_v3, %s3426_s18  ;;  %2343 = vrot.lane.b32.xlu1 %v3476_v2, %s3426_s18 }
  0x8d   : > { %v1234_v14 = vsel %vm1233_vm0, %v1228_v13, %v1230_v4  ;;  %2867 = vmatmul.mubr.msk.bf16.vlgmr.msra.gmra.mrb[0].mxu0 %vm236_vm2, %v3346_v10  ;;  %2868 = vmatmul.mubr.msk.bf16.vlgmr.msra.gmra.mrb[0].mxu1 %vm236_vm2, %v3347_v11  ;;  %vm954_vm0 = vcmask 875520  }
  0x8e   : > { %1245 = vmatpush1.bf16.msra.mxu0 %v1234_v14  ;;  %1276 = vmatprep.mubr.bf16.mxu0 %v3404_v0 }
  0x8f   : > { %315 = vmatpush1.bf16.msra.mxu1 %v3476_v2  ;;  %346 = vmatprep.mubr.bf16.mxu1 %v3404_v0 }
  0x90   : > { %v1321_v15 = vpop.permute.xlu1 %1320  ;;  %v1325_v16 = vpop.permute.xlu0 %1324  ;;  %1136 = vrot.lane.b32.xlu0 %v3474_v1, %s3427_s24  ;;  %1138 = vrot.lane.b32.xlu1 %v3479_v3, %s3427_s24 }
  0x91   : > { %v1328_v17 = vsel %vm1326_vm3, %v1323_v12, %v1325_v16  ;;  %v1327_v20 = vsel %vm1326_vm3, %v1321_v15, %v1323_v12  ;;  %v3363_v15 = vld [vmem:[%s4115_s1 + $0x48] sm:$0xff]   ;;  %v3364_v16 = vld [vmem:[%s4115_s1 + $0xf0] sm:$0xff]   ;;  %vm1977_vm3 = vcmask 572416  }
  0x92   : > { %1337 = vmatprep.subr.bf16.mxu0 %v1328_v17 }
  0x94   : > { %v1418_v21 = vpop.permute.xlu1 %1417  ;;  %v1416_v22 = vpop.permute.xlu0 %1415  ;;  %1134 = vrot.lane.b32.xlu0 %v3476_v2, %s3427_s24  ;;  %2438 = vrot.lane.b32.xlu1 %v3474_v1, %s3428_s29 }
  0x95   : > { %2954 = vmatmul.mubr.msk.bf16.vlgmr.msra.gmra.mrb[4].mxu0 %vm236_vm2, %v3348_v18  ;;  %2871 = vmatmul.mubr.msk.bf16.vlgmr.msra.gmra.mrb[4].mxu1 %vm236_vm2, %v3349_v19  ;;  %v1421_v23 = vsel %vm1419_vm4, %v1416_v22, %v1418_v21 }
  0x96   : > { %1338 = vmatpush1.bf16.msra.mxu0 %v1327_v20  ;;  %1286 = vmatprep.mubr.bf16.mxu0 %v3404_v0 }
  0x97   : > { %1430 = vmatprep.subr.bf16.mxu0 %v1421_v23  ;;  %356 = vmatprep.mubr.bf16.mxu1 %v3404_v0 }
  0x98   : > { %v1509_v24 = vpop.permute.xlu1 %1508  ;;  %v1414_v25 = vpop.permute.xlu0 %1413  ;;  %2436 = vrot.lane.b32.xlu1 %v3476_v2, %s3428_s29  ;;  %2440 = vrot.lane.b32.xlu0 %v3479_v3, %s3428_s29 }
  0x99   : > { %v1420_v33 = vsel %vm1419_vm4, %v1414_v25, %v1416_v22  ;;  %v3366_v25 = vld [vmem:[%s4115_s1 + $0xf8] sm:$0xff]   ;;  %vm1047_vm4 = vcmask 867328  }
  0x9c   : > { %v1507_v28 = vpop.permute.xlu1 %1506  ;;  %v1511_v29 = vpop.permute.xlu0 %1510 }
  0x9d   : > { %2955 = vmatmul.mubr.msk.bf16.gmra.mrb[8].mxu0 %vm236_vm2, %v3350_v26  ;;  %2872 = vmatmul.mubr.msk.bf16.gmra.mrb[0].mxu1 %vm236_vm2, %v3351_v27  ;;  %v1514_v36 = vsel %vm1512_vm5, %v1509_v24, %v1511_v29  ;;  %v1513_v49 = vsel %vm1512_vm5, %v1507_v28, %v1509_v24  ;;  %v3365_v24 = vld [vmem:[%s4115_s1 + $0x50] sm:$0xff]   ;;  %vm2070_vm5 = vcmask 457728  }
  0x9e   : > { %1369 = vmatprep.mubr.bf16.mxu0 %v3404_v0  ;;  %428 = vmatprep.mubr.bf16.mxu1 %v3404_v0 }
  0xa0   : > { %v1604_v30 = vpop.permute.xlu1 %1603  ;;  %v3589_v31 = vpop.permute.xlu0 %1601 }
  0xa1   : > { %v1607_v52 = vsel %vm1605_vm8, %v3589_v31, %v1604_v30 }
  0xa4   : > { %v383_v34 = vpop.permute.xlu1 %382  ;;  %v1600_v35 = vpop.permute.xlu0 %1599 }
  0xa5   : > { %2962 = vmatmul.mubr.msk.bf16.vlgmr.msra.gmra.mrb[4].mxu0 %vm236_vm2, %v3352_v32  ;;  %v1606_v1 = vsel %vm1605_vm8, %v1600_v35, %v3589_v31  ;;  %v3367_v31 = vld [vmem:[%s4115_s1 + $0x58] sm:$0xff]   ;;  %v3368_v32 = vld [vmem:[%s4115_s1 + $0x100] sm:$0xff]   ;;  %vm2256_vm8 = vcmask 441344  }
  0xa6   : > { %1431 = vmatpush1.bf16.msra.mxu0 %v1420_v33  ;;  %1379 = vmatprep.mubr.bf16.mxu0 %v3404_v0 }
  0xa7   : > { %1523 = vmatprep.subr.bf16.mxu0 %v1514_v36 }
  0xa8   : > { %v3598_v37 = vpop.permute.xlu1 %1694  ;;  %v385_v38 = vpop.permute.xlu0 %384 }
  0xa9   : > { %v387_v39 = vsel %vm386_vm6, %v383_v34, %v385_v38  ;;  %396 = vmatprep.subr.bf16.mxu1 %v385_v38  ;;  %v3369_v38 = vld [vmem:[%s4115_s1 + $0x60] sm:$0xff]   ;;  %vm1140_vm6 = vcmask 752640  }
  0xaa   : > { %397 = vmatpush1.bf16.msra.mxu1 %v387_v39  ;;  %v3370_v39 = vld [vmem:[%s4115_s1 + $0x108] sm:$0xff]  }
  0xac   : > { %v3606_v42 = vpop.permute.xlu1 %1692  ;;  %v1697_v43 = vpop.permute.xlu0 %1696 }
  0xad   : > { %2879 = vmatmul.mubr.msk.bf16.vlgmr.msra.gmra.mrb[4].mxu1 %vm236_vm2, %v3353_v40  ;;  %2963 = vmatmul.mubr.msk.bf16.gmra.mrb[8].mxu0 %vm236_vm2, %v3354_v41  ;;  %v1700_v3 = vsel %vm1698_vm10, %v3598_v37, %v1697_v43  ;;  %v1699_v18 = vsel %vm1698_vm10, %v3606_v42, %v3598_v37  ;;  %vm2442_vm10 = vcmask 424960  }
  0xae   : > { %438 = vmatprep.mubr.bf16.mxu1 %v3404_v0  ;;  %1462 = vmatprep.mubr.bf16.mxu0 %v3404_v0 }
  0xb0   : > { %v475_v44 = vpop.permute.xlu1 %474  ;;  %v473_v45 = vpop.permute.xlu0 %472 }
  0xb1   : > { %486 = vmatprep.subr.bf16.mxu1 %v475_v44  ;;  %v477_v48 = vsel %vm476_vm7, %v473_v45, %v475_v44  ;;  %v2514_v44 = vld [vmem:[%s4116_s2] sm:$0xff]  ;;  %v2515_v45 = vld [vmem:[%s4116_s2 + $0x8] sm:$0xff]  ;;  %vm2163_vm7 = vcmask 449536  }
  0xb2   : > { %487 = vmatpush1.bf16.msra.mxu1 %v477_v48  ;;  %2520 = vperm.xlu0 %3340, %v2514_v44   ;;  %v3371_v48 = vld [vmem:[%s4115_s1 + $0x68] sm:$0xff]   ;;  %v3394_v44 = vld [vmem:[%s4115_s1 + $0x180] sm:$0xff]  }
  0xb3   : > { %2525 = vperm.xlu1 %3341, %v2515_v45  }
  0xb4   : > { %v3619_v50 = vpop.permute.xlu1 %1789  ;;  %v3621_v51 = vpop.permute.xlu0 %1787 }
  0xb5   : > { %2880 = vmatmul.mubr.msk.bf16.gmra.mrb[0].mxu1 %vm236_vm2, %v3355_v46  ;;  %2970 = vmatmul.mubr.msk.bf16.vlgmr.msra.gmra.mrb[4].mxu0 %vm236_vm2, %v3356_v47  ;;  %v1793_v20 = vsel %vm1791_vm13, %v3621_v51, %v3619_v50  ;;  %v2517_v47 = vld [vmem:[%s4116_s2 + $0x18] sm:$0xff]  ;;  %v2516_v50 = vld [vmem:[%s4116_s2 + $0x10] sm:$0xff] }
  0xb6   : > { %1524 = vmatpush1.bf16.msra.mxu0 %v1513_v49  ;;  %518 = vmatprep.mubr.bf16.mxu1 %v3404_v0  ;;  %v3372_v49 = vld [vmem:[%s4115_s1 + $0x110] sm:$0xff]  }
  0xb7   : > { %1472 = vmatprep.mubr.bf16.mxu0 %v3404_v0  ;;  %1616 = vmatprep.subr.bf16.mxu0 %v1607_v52 }
  0xb8   : > { %v563_v53 = vpop.permute.xlu1 %562  ;;  %v3629_v54 = vpop.permute.xlu0 %1785  ;;  %2535 = vperm.xlu0 %3340, %v2517_v47   ;;  %2530 = vperm.xlu1 %3341, %v2516_v50   ;;  %v3395_v47 = vld [vmem:[%s4115_s1 + $0x188] sm:$0xff]  }
  0xb9   : > { %v1792_v34 = vsel %vm1791_vm13, %v3629_v54, %v3621_v51  ;;  %vm2690_vm13 = vcmask 826368  }
  0xbc   : > { %v3637_v57 = vpop.permute.xlu1 %1880  ;;  %v565_v58 = vpop.permute.xlu0 %564 }
  0xbd   : > { %2887 = vmatmul.mubr.msk.bf16.vlgmr.msra.gmra.mrb[4].mxu1 %vm236_vm2, %v3357_v55  ;;  %2971 = vmatmul.mubr.msk.bf16.gmra.mrb[8].mxu0 %vm236_vm2, %v3358_v56  ;;  %v567_v59 = vsel %vm566_vm9, %v563_v53, %v565_v58  ;;  %v3373_v56 = vld [vmem:[%s4115_s1 + $0x70] sm:$0xff]   ;;  %vm2349_vm9 = vcmask 433152  }
  0xbe   : > { %528 = vmatprep.mubr.bf16.mxu1 %v3404_v0  ;;  %1555 = vmatprep.mubr.bf16.mxu0 %v3404_v0 }
  0xbf   : > { %576 = vmatprep.subr.bf16.mxu1 %v565_v58 }
  0xc0   : > { %v3643_v60 = vpop.permute.xlu1 %1878  ;;  %577 = vmatpush1.bf16.msra.mxu1 %v567_v59  ;;  %v3645_v61 = vpop.permute.xlu0 %1882 }
  0xc1   : > { %v1886_v35 = vsel %vm1884_vm15, %v3637_v57, %v3645_v61  ;;  %v1885_v52 = vsel %vm1884_vm15, %v3643_v60, %v3637_v57  ;;  %v3374_v57 = vld [vmem:[%s4115_s1 + $0x118] sm:$0xff]  }
  0xc4   : > { %v674_v2 = vpop.permute.xlu1 %673  ;;  %v672_v4 = vpop.permute.xlu0 %671 }
  0xc5   : > { %2888 = vmatmul.mubr.msk.bf16.gmra.mrb[0].mxu1 %vm236_vm2, %v3359_v62  ;;  %2978 = vmatmul.mubr.msk.bf16.vlgmr.msra.gmra.mrb[4].mxu0 %vm236_vm2, %v3360_v63  ;;  %v677_v5 = vsel %vm675_vm11, %v672_v4, %v674_v2  ;;  %v3375_v63 = vld [vmem:[%s4115_s1 + $0x78] sm:$0xff]  }
  0xc6   : > { %1617 = vmatpush1.bf16.msra.mxu0 %v1606_v1  ;;  %608 = vmatprep.mubr.bf16.mxu1 %v3404_v0  ;;  %v3376_v1 = vld [vmem:[%s4115_s1 + $0x120] sm:$0xff]  }
  0xc7   : > { %1565 = vmatprep.mubr.bf16.mxu0 %v3404_v0  ;;  %1709 = vmatprep.subr.bf16.mxu0 %v1700_v3 }
  0xc8   : > { %v3662_v6 = vpop.permute.xlu1 %1973  ;;  %v670_v7 = vpop.permute.xlu0 %669  ;;  %686 = vmatprep.subr.bf16.mxu1 %v677_v5 }
  0xc9   : > { %v676_v11 = vsel %vm675_vm11, %v670_v7, %v672_v4 }
  0xcc   : > { %v3670_v10 = vpop.permute.xlu1 %1971  ;;  %v3673_v12 = vpop.permute.xlu0 %1975 }
  0xcd   : > { %2895 = vmatmul.mubr.msk.bf16.vlgmr.msra.gmra.mrb[4].mxu1 %vm236_vm2, %v3361_v8  ;;  %2979 = vmatmul.mubr.msk.bf16.gmra.mrb[8].mxu0 %vm236_vm2, %v3362_v9  ;;  %v1979_v53 = vsel %vm1977_vm3, %v3662_v6, %v3673_v12  ;;  %v1978_v3 = vsel %vm1977_vm3, %v3670_v10, %v3662_v6  ;;  %v3377_v6 = vld [vmem:[%s4115_s1 + $0x80] sm:$0xff]   ;;  %v3378_v8 = vld [vmem:[%s4115_s1 + $0x128] sm:$0xff]  }
  0xce   : > { %618 = vmatprep.mubr.bf16.mxu1 %v3404_v0  ;;  %1648 = vmatprep.mubr.bf16.mxu0 %v3404_v0 }
  0xcf   : > { %687 = vmatpush1.bf16.msra.mxu1 %v676_v11 }
  0xd0   : > { %v767_v13 = vpop.permute.xlu1 %766  ;;  %v765_v14 = vpop.permute.xlu0 %764 }
  0xd1   : > { %v770_v17 = vsel %vm768_vm12, %v765_v14, %v767_v13  ;;  %v3379_v13 = vld [vmem:[%s4115_s1 + $0x88] sm:$0xff]  }
  0xd2   : > { %779 = vmatprep.subr.bf16.mxu1 %v770_v17  ;;  %v3381_v17 = vld [vmem:[%s4115_s1 + $0x90] sm:$0xff]  }
  0xd4   : > { %v3689_v19 = vpop.permute.xlu1 %2066  ;;  %v763_v21 = vpop.permute.xlu0 %762 }
  0xd5   : > { %2896 = vmatmul.mubr.msk.bf16.gmra.mrb[0].mxu1 %vm236_vm2, %v3363_v15  ;;  %2986 = vmatmul.mubr.msk.bf16.vlgmr.msra.gmra.mrb[4].mxu0 %vm236_vm2, %v3364_v16  ;;  %v769_v27 = vsel %vm768_vm12, %v763_v21, %v765_v14  ;;  %v3380_v14 = vld [vmem:[%s4115_s1 + $0x130] sm:$0xff]   ;;  %v3383_v21 = vld [vmem:[%s4115_s1 + $0x98] sm:$0xff]   ;;  %vm2703_vm12 = vcmask 1044480  }
  0xd6   : > { %1710 = vmatpush1.bf16.msra.mxu0 %v1699_v18  ;;  %718 = vmatprep.mubr.bf16.mxu1 %v3404_v0  ;;  %v3382_v18 = vld [vmem:[%s4115_s1 + $0x138] sm:$0xff]  }
  0xd7   : > { %1658 = vmatprep.mubr.bf16.mxu0 %v3404_v0  ;;  %1802 = vmatprep.subr.bf16.mxu0 %v1793_v20 }
  0xd8   : > { %v3698_v22 = vpop.permute.xlu1 %2064  ;;  %v3700_v23 = vpop.permute.xlu0 %2068 }
  0xd9   : > { %v2072_v4 = vsel %vm2070_vm5, %v3689_v19, %v3700_v23  ;;  %v2071_v15 = vsel %vm2070_vm5, %v3698_v22, %v3689_v19  ;;  %v3384_v22 = vld [vmem:[%s4115_s1 + $0x140] sm:$0xff]  }
  0xdc   : > { %v860_v26 = vpop.permute.xlu1 %859  ;;  %v858_v28 = vpop.permute.xlu0 %857 }
  0xdd   : > { %2906 = vmatmul.mubr.msk.bf16.vlgmr.msra.gmra.mrb[4].mxu1 %vm236_vm2, %v3365_v24  ;;  %2987 = vmatmul.mubr.msk.bf16.gmra.mrb[8].mxu0 %vm236_vm2, %v3366_v25  ;;  %v863_v29 = vsel %vm861_vm14, %v858_v28, %v860_v26  ;;  %v3385_v25 = vld [vmem:[%s4115_s1 + $0xa0] sm:$0xff]   ;;  %v3386_v26 = vld [vmem:[%s4115_s1 + $0x148] sm:$0xff]  }
  0xde   : > { %728 = vmatprep.mubr.bf16.mxu1 %v3404_v0  ;;  %1741 = vmatprep.mubr.bf16.mxu0 %v3404_v0 }
  0xdf   : > { %780 = vmatpush1.bf16.msra.mxu1 %v769_v27  ;;  %v3387_v27 = vld [vmem:[%s4115_s1 + $0xa8] sm:$0xff]  }
  0xe0   : > { %v3714_v30 = vpop.permute.xlu1 %2159  ;;  %872 = vmatprep.subr.bf16.mxu1 %v863_v29  ;;  %v856_v33 = vpop.permute.xlu0 %855 }
  0xe1   : > { %v862_v41 = vsel %vm861_vm14, %v856_v33, %v858_v28  ;;  %v3388_v28 = vld [vmem:[%s4115_s1 + $0x150] sm:$0xff]  }
  0xe4   : > { %v3728_v36 = vpop.permute.xlu1 %2157  ;;  %v3733_v37 = vpop.permute.xlu0 %2161 }
  0xe5   : > { %2907 = vmatmul.mubr.msk.bf16.gmra.mrb[0].mxu1 %vm236_vm2, %v3367_v31  ;;  %2994 = vmatmul.mubr.msk.bf16.vlgmr.msra.gmra.mrb[4].mxu0 %vm236_vm2, %v3368_v32  ;;  %v2165_v16 = vsel %vm2163_vm7, %v3714_v30, %v3733_v37  ;;  %v2164_v23 = vsel %vm2163_vm7, %v3728_v36, %v3714_v30  ;;  %v3389_v31 = vld [vmem:[%s4115_s1 + $0x158] sm:$0xff]   ;;  %v3390_v32 = vld [vmem:[%s4115_s1 + $0x160] sm:$0xff]   ;;  %v3391_v37 = vld [vmem:[%s4115_s1 + $0x168] sm:$0xff]  }
  0xe6   : > { %1803 = vmatpush1.bf16.msra.mxu0 %v1792_v34  ;;  %811 = vmatprep.mubr.bf16.mxu1 %v3404_v0 }
  0xe7   : > { %1751 = vmatprep.mubr.bf16.mxu0 %v3404_v0  ;;  %1895 = vmatprep.subr.bf16.mxu0 %v1886_v35 }
  0xe8   : > { %v953_v40 = vpop.permute.xlu1 %952  ;;  %v951_v42 = vpop.permute.xlu0 %950 }
  0xe9   : > { %v956_v43 = vsel %vm954_vm0, %v951_v42, %v953_v40 }
  0xec   : > { %v3754_v46 = vpop.permute.xlu1 %2252  ;;  %v949_v51 = vpop.permute.xlu0 %948 }
  0xed   : > { %2914 = vmatmul.mubr.msk.bf16.vlgmr.msra.gmra.mrb[4].mxu1 %vm236_vm2, %v3369_v38  ;;  %2995 = vmatmul.mubr.msk.bf16.gmra.mrb[8].mxu0 %vm236_vm2, %v3370_v39  ;;  %v955_v59 = vsel %vm954_vm0, %v949_v51, %v951_v42  ;;  %v3392_v39 = vld [vmem:[%s4115_s1 + $0x170] sm:$0xff]  }
  0xee   : > { %821 = vmatprep.mubr.bf16.mxu1 %v3404_v0  ;;  %1834 = vmatprep.mubr.bf16.mxu0 %v3404_v0 }
  0xef   : > { %873 = vmatpush1.bf16.msra.mxu1 %v862_v41  ;;  %v3393_v41 = vld [vmem:[%s4115_s1 + $0x178] sm:$0xff]  }
  0xf0   : > { %965 = vmatprep.subr.bf16.mxu1 %v956_v43  ;;  %v3774_v54 = vpop.permute.xlu1 %2250  ;;  %v3779_v55 = vpop.permute.xlu0 %2254 }
  0xf1   : > { %v2258_v24 = vsel %vm2256_vm8, %v3754_v46, %v3779_v55  ;;  %v2257_v29 = vsel %vm2256_vm8, %v3774_v54, %v3754_v46 }
  0xf4   : > { %v1046_v58 = vpop.permute.xlu1 %1045  ;;  %v1044_v60 = vpop.permute.xlu0 %1043 }
  0xf5   : > { %2915 = vmatmul.mubr.msk.bf16.gmra.mrb[0].mxu1 %vm236_vm2, %v3371_v48  ;;  %3002 = vmatmul.mubr.msk.bf16.vlgmr.msra.gmra.mrb[4].mxu0 %vm236_vm2, %v3372_v49  ;;  %v1049_v61 = vsel %vm1047_vm4, %v1044_v60, %v1046_v58 }
  0xf6   : > { %1896 = vmatpush1.bf16.msra.mxu0 %v1885_v52  ;;  %904 = vmatprep.mubr.bf16.mxu1 %v3404_v0 }
  0xf7   : > { %1844 = vmatprep.mubr.bf16.mxu0 %v3404_v0  ;;  %1988 = vmatprep.subr.bf16.mxu0 %v1979_v53 }
  0xf8   : > { %v3794_v62 = vpop.permute.xlu1 %2345  ;;  %v1042_v2 = vpop.permute.xlu0 %1041 }
  0xf9   : > { %v1048_v10 = vsel %vm1047_vm4, %v1042_v2, %v1044_v60 }
  0xfd   : > { %2922 = vmatmul.mubr.msk.bf16.vlgmr.msra.gmra.mrb[4].mxu1 %vm236_vm2, %v3373_v56  ;;  %3003 = vmatmul.mubr.msk.bf16.gmra.mrb[8].mxu0 %vm236_vm2, %v3374_v57 }
  0xfe   : > { %914 = vmatprep.mubr.bf16.mxu1 %v3404_v0  ;;  %1927 = vmatprep.mubr.bf16.mxu0 %v3404_v0  ;;  %v3808_v5 = vpop.permute.xlu1 %2343  ;;  %v2348_v7 = vpop.permute.xlu0 %2347 }
  0xff   : > { %966 = vmatpush1.bf16.msra.mxu1 %v955_v59  ;;  %v2351_v30 = vsel %vm2349_vm9, %v3794_v62, %v2348_v7  ;;  %v2350_v34 = vsel %vm2349_vm9, %v3808_v5, %v3794_v62 }
 0x100   : > { %1058 = vmatprep.subr.bf16.mxu1 %v1049_v61 }
 0x102   : > { %v1139_v9 = vpop.permute.xlu1 %1138  ;;  %v1137_v11 = vpop.permute.xlu0 %1136 }
 0x103   : > { %v1142_v12 = vsel %vm1140_vm6, %v1137_v11, %v1139_v9 }
 0x105   : > { %2923 = vmatmul.mubr.msk.bf16.gmra.mrb[0].mxu1 %vm236_vm2, %v3375_v63  ;;  %3010 = vmatmul.mubr.msk.bf16.vlgmr.msra.gmra.mrb[4].mxu0 %vm236_vm2, %v3376_v1 }
 0x106   : > { %1989 = vmatpush1.bf16.msra.mxu0 %v1978_v3  ;;  %997 = vmatprep.mubr.bf16.mxu1 %v3404_v0  ;;  %v1135_v19 = vpop.permute.xlu0 %1134  ;;  %v2439_v35 = vpop.permute.xlu1 %2438 }
 0x107   : > { %1937 = vmatprep.mubr.bf16.mxu0 %v3404_v0  ;;  %2081 = vmatprep.subr.bf16.mxu0 %v2072_v4  ;;  %v1141_v20 = vsel %vm1140_vm6, %v1135_v19, %v1137_v11 }
 0x10a   : > { %v2441_v33 = vpop.permute.xlu0 %2440  ;;  %v2437_v38 = vpop.permute.xlu1 %2436 }
 0x10b   : > { %v2444_v36 = vsel %vm2442_vm10, %v2439_v35, %v2441_v33  ;;  %v2443_v40 = vsel %vm2442_vm10, %v2437_v38, %v2439_v35  ;;  %v2661_v33 = vld [vmem:[%s4117_s3] sm:$0xff]  ;;  %v2663_v35 = vld [vmem:[%s4117_s3 + $0x10] sm:$0xff] }
 0x10d   : > { %2930 = vmatmul.mubr.msk.bf16.vlgmr.msra.gmra.mrb[4].mxu1 %vm236_vm2, %v3377_v6  ;;  %3011 = vmatmul.mubr.msk.bf16.gmra.mrb[8].mxu0 %vm236_vm2, %v3378_v8 }
 0x10e   : > { %1007 = vmatprep.mubr.bf16.mxu1 %v3404_v0  ;;  %2020 = vmatprep.mubr.bf16.mxu0 %v3404_v0 }
 0x10f   : > { %1059 = vmatpush1.bf16.msra.mxu1 %v1048_v10 }
 0x110   : > { %1151 = vmatprep.subr.bf16.mxu1 %v1142_v12 }
 0x115   : > { %2931 = vmatmul.mubr.msk.bf16.gmra.mrb[0].mxu1 %vm236_vm2, %v3379_v13  ;;  %3018 = vmatmul.mubr.msk.bf16.vlgmr.msra.gmra.mrb[4].mxu0 %vm236_vm2, %v3380_v14 }
 0x116   : > { %2082 = vmatpush1.bf16.msra.mxu0 %v2071_v15  ;;  %1090 = vmatprep.mubr.bf16.mxu1 %v3404_v0 }
 0x117   : > { %2030 = vmatprep.mubr.bf16.mxu0 %v3404_v0  ;;  %2174 = vmatprep.subr.bf16.mxu0 %v2165_v16 }
 0x11d   : > { %2938 = vmatmul.mubr.msk.bf16.vlgmr.msra.gmra.mrb[4].mxu1 %vm236_vm2, %v3381_v17  ;;  %3019 = vmatmul.mubr.msk.bf16.gmra.mrb[8].mxu0 %vm236_vm2, %v3382_v18 }
 0x11e   : > { %1100 = vmatprep.mubr.bf16.mxu1 %v3404_v0  ;;  %2113 = vmatprep.mubr.bf16.mxu0 %v3404_v0 }
 0x11f   : > { %1152 = vmatpush1.bf16.msra.mxu1 %v1141_v20 }
 0x125   : > { %2939 = vmatmul.mubr.msk.bf16.gmra.mrb[0].mxu1 %vm236_vm2, %v3383_v21  ;;  %3026 = vmatmul.mubr.msk.bf16.vlgmr.msra.gmra.mrb[4].mxu0 %vm236_vm2, %v3384_v22 }
 0x126   : > { %2175 = vmatpush1.bf16.msra.mxu0 %v2164_v23  ;;  %1183 = vmatprep.mubr.bf16.mxu1 %v3404_v0 }
 0x127   : > { %2123 = vmatprep.mubr.bf16.mxu0 %v3404_v0  ;;  %2267 = vmatprep.subr.bf16.mxu0 %v2258_v24 }
 0x12d   : > { %2946 = vmatmul.mubr.msk.bf16.vlgmr.msra.gmra.mrb[4].mxu1 %vm236_vm2, %v3385_v25  ;;  %3027 = vmatmul.mubr.msk.bf16.gmra.mrb[8].mxu0 %vm236_vm2, %v3386_v26 }
 0x12e   : > { %1193 = vmatprep.mubr.bf16.mxu1 %v3404_v0  ;;  %2206 = vmatprep.mubr.bf16.mxu0 %v3404_v0 }
 0x131   : > { %v2521_v61 = vpop.permute.xlu0 %2520 }
 0x132   : > { %v2526_v2 = vpop.permute.xlu1 %2525 }
 0x135   : > { %2947 = vmatmul.mubr.msk.bf16.gmra.mrb[0].mxu1 %vm236_vm2, %v3387_v27  ;;  %3034 = vmatmul.mubr.msk.bf16.vlgmr.msra.gmra.mrb[4].mxu0 %vm236_vm2, %v3388_v28 }
 0x136   : > { %2268 = vmatpush1.bf16.msra.mxu0 %v2257_v29  ;;  %2216 = vmatprep.mubr.bf16.mxu0 %v3404_v0 }
 0x137   : > { %2360 = vmatprep.subr.bf16.mxu0 %v2351_v30  ;;  %v2531_v17 = vpop.permute.xlu1 %2530  ;;  %v2536_v23 = vpop.permute.xlu0 %2535 }
 0x13d   : > { %3035 = vmatmul.mubr.msk.bf16.gmra.mrb[8].mxu0 %vm236_vm2, %v3389_v31 }
 0x13e   : > { %2299 = vmatprep.mubr.bf16.mxu0 %v3404_v0 }
 0x145   : > { %3042 = vmatmul.mubr.msk.bf16.vlgmr.msra.gmra.mrb[4].mxu0 %vm236_vm2, %v3390_v32 }
 0x146   : > { %2361 = vmatpush1.bf16.msra.mxu0 %v2350_v34  ;;  %2309 = vmatprep.mubr.bf16.mxu0 %v3404_v0  ;;  %v2662_v34 = vld [vmem:[%s4117_s3 + $0x8] sm:$0xff] }
 0x147   : > { %2453 = vmatprep.subr.bf16.mxu0 %v2444_v36  ;;  %v3069_v38 = vpack.c.bf16 %v2662_v34, %v2661_v33 }
 0x14d   : > { %3043 = vmatmul.mubr.msk.bf16.gmra.mrb[8].mxu0 %vm236_vm2, %v3391_v37  ;;  %v3429_v37 = vmov 0.0|0.0  }
 0x14e   : > { %2392 = vmatprep.mubr.bf16.mxu0 %v3404_v0  ;;  %3068 = vmatprep.subr.bf16.mxu1 %v3429_v37 }
 0x14f   : > { %3070 = vmatpush1.bf16.msra.mxu1 %v3069_v38 }
 0x150   : > { %3071 = vmatprep.subr.bf16.mxu1 %v3429_v37 }
 0x155   : > { %3050 = vmatmul.mubr.msk.bf16.vlgmr.msra.gmra.mrb[4].mxu0 %vm236_vm2, %v3392_v39  ;;  %v2664_v39 = vld [vmem:[%s4117_s3 + $0x18] sm:$0xff] }
 0x156   : > { %2454 = vmatpush1.bf16.msra.mxu0 %v2443_v40  ;;  %2402 = vmatprep.mubr.bf16.mxu0 %v3404_v0  ;;  %v3072_v40 = vpack.c.bf16 %v2664_v39, %v2663_v35 }
 0x158   : > { %3073 = vmatpush1.bf16.msra.mxu1 %v3072_v40 }
 0x159   : > { %3074 = vmatprep.subr.bf16.mxu1 %v3429_v37 }
 0x15d   : > { %3051 = vmatmul.mubr.msk.bf16.gmra.mrb[8].mxu0 %vm236_vm2, %v3393_v41  ;;  %v2665_v41 = vld [vmem:[%s4117_s3 + $0x20] sm:$0xff] }
 0x15e   : > { %2485 = vmatprep.mubr.bf16.mxu0 %v3404_v0 }
 0x160   : > { %v277_v42 = vpop.f32.mrb[0].mxu0 }
 0x161   : > { %v279_v43 = vpop.f32.mrb[1].mxu0 }
 0x162   : > { %v281_v45 = vpop.f32.mrb[2].mxu0 }
 0x163   : > { %v283_v46 = vpop.f32.mrb[3].mxu0 }
 0x165   : > { %3058 = vmatmul.mubr.msk.bf16.vlgmr.msra.gmra.mrb[4].mxu0 %vm236_vm2, %v3394_v44 }
 0x166   : > { %2495 = vmatprep.mubr.bf16.mxu0 %v3404_v0 }
 0x16d   : > { %3059 = vmatmul.mubr.msk.bf16.gmra.mrb[8].mxu0 %vm236_vm2, %v3395_v47  ;;  %vm2555_vm2 = vcmask 982016  }
 0x200   : > { %v1185_v48 = vpop.f32.mrb[4].mxu1 }
 0x201   : > { %v3112_v49 = vadd.f32 %v1185_v48, %v277_v42  ;;  %v1187_v50 = vpop.f32.mrb[5].mxu1  ;;  %v2666_v42 = vld [vmem:[%s4117_s3 + $0x28] sm:$0xff] }
 0x202   : > { %v3114_v51 = vadd.f32 %v1187_v50, %v279_v43  ;;  %v1189_v52 = vpop.f32.mrb[6].mxu1  ;;  %v3075_v44 = vpack.c.bf16 %v2666_v42, %v2665_v41  ;;  %v2670_v50 = vld [vmem:[%s4117_s3 + $0x48] sm:$0xff] }
 0x203   : > { %v3116_v53 = vadd.f32 %v1189_v52, %v281_v45  ;;  %v1191_v54 = vpop.f32.mrb[7].mxu1  ;;  %v2667_v45 = vld [vmem:[%s4117_s3 + $0x30] sm:$0xff] }
 0x204   : > { %v3118_v55 = vadd.f32 %v1191_v54, %v283_v46  ;;  %v2668_v46 = vld [vmem:[%s4117_s3 + $0x38] sm:$0xff]  ;;  %3076 = vmatpush1.bf16.msra.mxu1 %v3075_v44  ;;  %v2671_v52 = vld [vmem:[%s4117_s3 + $0x50] sm:$0xff] }
 0x205   : > { %v3078_v48 = vpack.c.bf16 %v2668_v46, %v2667_v45  ;;  %3077 = vmatprep.subr.bf16.mxu1 %v3429_v37 }
 0x208   : > { %v1195_v56 = vpop.f32.mrb[0].mxu1  ;;  %3079 = vmatpush1.bf16.msra.mxu1 %v3078_v48 }
 0x209   : > { %v1197_v57 = vpop.f32.mrb[1].mxu1  ;;  %3080 = vmatprep.subr.bf16.mxu1 %v3429_v37 }
 0x20a   : > { %v1199_v58 = vpop.f32.mrb[2].mxu1 }
 0x20b   : > { %v1201_v59 = vpop.f32.mrb[3].mxu1 }
 0x238   : > { %v2487_v60 = vpop.f32.mrb[4].mxu0 }
 0x239   : > { %v3113_v0 = vadd.f32 %v3112_v49, %v2487_v60  ;;  %v2489_v62 = vpop.f32.mrb[5].mxu0  ;;  %v2669_v49 = vld [vmem:[%s4117_s3 + $0x40] sm:$0xff] }
 0x23a   : > { %v3115_v63 = vadd.f32 %v3114_v51, %v2489_v62  ;;  %v2491_v1 = vpop.f32.mrb[6].mxu0  ;;  %v3081_v51 = vpack.c.bf16 %v2670_v50, %v2669_v49 }
 0x23b   : > { %v3930_v3 = vadd.f32 %v3113_v0, %v2521_v61  ;;  %v3117_v4 = vadd.f32 %v3116_v53, %v2491_v1  ;;  %v2493_v5 = vpop.f32.mrb[7].mxu0  ;;  %v2672_v53 = vld [vmem:[%s4117_s3 + $0x58] sm:$0xff]  ;;  %v2677_v0 = vld [vmem:[%s4117_s3 + $0x80] sm:$0xff] }
 0x23c   : > { %v2539_v7 = vadd.f32 %v3115_v63, %v2521_v61  ;;  %v3119_v6 = vadd.f32 %v3118_v55, %v2493_v5  ;;  %3082 = vmatpush1.bf16.msra.mxu1 %v3081_v51  ;;  %v3084_v54 = vpack.c.bf16 %v2672_v53, %v2671_v52  ;;  %v2673_v55 = vld [vmem:[%s4117_s3 + $0x60] sm:$0xff]  ;;  %v2678_v61 = vld [vmem:[%s4117_s3 + $0x88] sm:$0xff]  ;;  %v2679_v63 = vld [vmem:[%s4117_s3 + $0x90] sm:$0xff] }
 0x23d   : > { %v2546_v8 = vmax.f32 %v3930_v3, 0.0  ;;  %v3933_v9 = vadd.f32 %v3117_v4, %v2526_v2  ;;  %3083 = vmatprep.subr.bf16.mxu1 %v3429_v37  ;;  %v3093_v62 = vpack.c.bf16 %v2678_v61, %v2677_v0  ;;  %v2680_v1 = vld [vmem:[%s4117_s3 + $0x98] sm:$0xff]  ;;  %v2681_v4 = vld [vmem:[%s4117_s3 + $0xa0] sm:$0xff]  ;;  %v2682_v5 = vld [vmem:[%s4117_s3 + $0xa8] sm:$0xff] }
 0x23e   : > { %v2547_v10 = vmax.f32 %v2539_v7, 0.0  ;;  %v2541_v11 = vadd.f32 %v3119_v6, %v2526_v2  ;;  %v3096_v2 = vpack.c.bf16 %v2680_v1, %v2679_v63  ;;  %v3099_v7 = vpack.c.bf16 %v2682_v5, %v2681_v4  ;;  %v2683_v6 = vld [vmem:[%s4117_s3 + $0xb0] sm:$0xff] }
 0x23f   : > { %v2548_v12 = vmax.f32 %v3933_v9, 0.0  ;;  %2579 = vrot.lane.b32.xlu1 %v2546_v8, %s3406_s22 }
 0x240   : > { %2556 = vst.msk [vmem:[#allocation2 + $0x8] sm:$0xff] %vm2555_vm2, %v2547_v10  ;;  %v2549_v13 = vmax.f32 %v2541_v11, 0.0  ;;  %v2497_v14 = vpop.f32.mrb[8].mxu0  ;;  %3085 = vmatpush1.bf16.msra.mxu1 %v3084_v54  ;;  %v2684_v10 = vld [vmem:[%s4117_s3 + $0xb8] sm:$0xff] }
 0x241   : > { %v3120_v15 = vadd.f32 %v2497_v14, %v1195_v56  ;;  %v2499_v16 = vpop.f32.mrb[9].mxu0  ;;  %v2674_v56 = vld [vmem:[%s4117_s3 + $0x68] sm:$0xff]  ;;  %3086 = vmatprep.subr.bf16.mxu1 %v3429_v37  ;;  %v3102_v11 = vpack.c.bf16 %v2684_v10, %v2683_v6 }
 0x242   : > { %2558 = vst.msk [vmem:[#allocation2 + $0x18] sm:$0xff] %vm2555_vm2, %v2549_v13  ;;  %v3121_v18 = vadd.f32 %v2499_v16, %v1197_v57  ;;  %v2501_v19 = vpop.f32.mrb[10].mxu0  ;;  %v3087_v57 = vpack.c.bf16 %v2674_v56, %v2673_v55  ;;  %v2685_v13 = vld [vmem:[%s4117_s3 + $0xc0] sm:$0xff]  ;;  %v2686_v14 = vld [vmem:[%s4117_s3 + $0xc8] sm:$0xff]  ;;  %v2687_v16 = vld [vmem:[%s4117_s3 + $0xd0] sm:$0xff] }
 0x243   : > { %v3941_v20 = vadd.f32 %v3120_v15, %v2531_v17  ;;  %v3122_v21 = vadd.f32 %v2501_v19, %v1199_v58  ;;  %v2503_v22 = vpop.f32.mrb[11].mxu0  ;;  %2583 = vrot.lane.b32.xlu1 %v2548_v12, %s3406_s22  ;;  %v2675_v58 = vld [vmem:[%s4117_s3 + $0x70] sm:$0xff]  ;;  %v3105_v15 = vpack.c.bf16 %v2686_v14, %v2685_v13  ;;  %v3430_v19 = vmov 0.0  }
 0x244   : > { %v2543_v24 = vadd.f32 %v3121_v18, %v2531_v17  ;;  %v3123_v25 = vadd.f32 %v2503_v22, %v1201_v59  ;;  %v2676_v59 = vld [vmem:[%s4117_s3 + $0x78] sm:$0xff]  ;;  %3088 = vmatpush1.bf16.msra.mxu1 %v3087_v57 }
 0x245   : > { %v2550_v26 = vmax.f32 %v3941_v20, 0.0  ;;  %v3947_v27 = vadd.f32 %v3122_v21, %v2536_v23  ;;  %v3090_v60 = vpack.c.bf16 %v2676_v59, %v2675_v58  ;;  %3089 = vmatprep.subr.bf16.mxu1 %v3429_v37  ;;  %v2688_v17 = vld [vmem:[%s4117_s3 + $0xd8] sm:$0xff]  ;;  %v2689_v21 = vld [vmem:[%s4117_s3 + $0xe0] sm:$0x1f] }
 0x246   : > { %v2551_v28 = vmax.f32 %v2543_v24, 0.0  ;;  %v2545_v29 = vadd.f32 %v3123_v25, %v2536_v23  ;;  %v3108_v18 = vpack.c.bf16 %v2688_v17, %v2687_v16 }
 0x247   : > { %v2552_v30 = vmax.f32 %v3947_v27, 0.0  ;;  %v3950_v31 = vld [vmem:[#allocation2 + $0x8] sm:$0xff]  ;;  %2587 = vrot.lane.b32.xlu1 %v2550_v26, %s3406_s22 }
 0x248   : > { %2560 = vst.msk [vmem:[#allocation2 + $0x28] sm:$0xff] %vm2555_vm2, %v2551_v28  ;;  %v2553_v32 = vmax.f32 %v2545_v29, 0.0  ;;  %2581 = vrot.lane.b32.xlu0 %v3950_v31, %s3406_s22  ;;  %3091 = vmatpush1.bf16.msra.mxu1 %v3090_v60 }
 0x249   : > { %v3968_v36 = vld [vmem:[#allocation2 + $0x18] sm:$0xff]  ;;  %3092 = vmatprep.subr.bf16.mxu1 %v3429_v37 }
 0x24a   : > { %2562 = vst.msk [vmem:[#allocation2 + $0x38] sm:$0xff] %vm2555_vm2, %v2553_v32 }
 0x24b   : > { %2591 = vrot.lane.b32.xlu1 %v2552_v30, %s3406_s22 }
 0x24c   : > { %2585 = vrot.lane.b32.xlu0 %v3968_v36, %s3406_s22  ;;  %3094 = vmatpush1.bf16.msra.mxu1 %v3093_v62 }
 0x24d   : > { %3095 = vmatprep.subr.bf16.mxu1 %v3429_v37 }
 0x24f   : > { %v3986_v43 = vld [vmem:[#allocation2 + $0x28] sm:$0xff] }
 0x250   : > { %2589 = vrot.lane.b32.xlu0 %v3986_v43, %s3406_s22  ;;  %3097 = vmatpush1.bf16.msra.mxu1 %v3096_v2 }
 0x251   : > { %v3997_v47 = vld [vmem:[#allocation2 + $0x38] sm:$0xff]  ;;  %3098 = vmatprep.subr.bf16.mxu1 %v3429_v37 }
 0x254   : > { %2593 = vrot.lane.b32.xlu0 %v3997_v47, %s3406_s22  ;;  %3100 = vmatpush1.bf16.msra.mxu1 %v3099_v7 }
 0x255   : > { %3101 = vmatprep.subr.bf16.mxu1 %v3429_v37 }
 0x258   : > { %3103 = vmatpush1.bf16.msra.mxu1 %v3102_v11 }
 0x259   : > { %3104 = vmatprep.subr.bf16.mxu1 %v3429_v37 }
 0x25c   : > { %3106 = vmatpush1.bf16.msra.mxu1 %v3105_v15 }
 0x25d   : > { %3107 = vmatprep.subr.bf16.mxu1 %v3429_v37 }
 0x260   : > { %3109 = vmatpush1.bf16.msra.mxu1 %v3108_v18 }
 0x261   : > { %2763 = vmatprep.subr.mxu1 %v3430_v19 }
 0x264   : > { %3060 = vmatpush1.msk.msra.mxu1 %vm2703_vm12, %v2689_v21 }
 0x2b1   : > { %v2580_v22 = vpop.permute.xlu1 %2579 }
 0x2b5   : > { %v2584_v24 = vpop.permute.xlu1 %2583 }
 0x2b9   : > { %v2588_v37 = vpop.permute.xlu1 %2587 }
 0x2ba   : > { %v2582_v23 = vpop.permute.xlu0 %2581 }
 0x2bb   : > { %v2596_v25 = vsel %vm232_vm1, %v2580_v22, %v2582_v23  ;;  %v2609_v28 = vmax.f32 %v3950_v31, %v2582_v23 }
 0x2bc   : > { %v2608_v29 = vmax.f32 %v2546_v8, %v2596_v25 }
 0x2bd   : > { %2626 = vrot.lane.b32.xlu0 %v2609_v28, %s3417_s7  ;;  %v2592_v39 = vpop.permute.xlu1 %2591 }
 0x2be   : > { %2624 = vrot.lane.b32.xlu1 %v2608_v29, %s3417_s7  ;;  %v2586_v32 = vpop.permute.xlu0 %2585 }
 0x2bf   : > { %v2597_v33 = vsel %vm232_vm1, %v2584_v24, %v2586_v32  ;;  %v2611_v34 = vmax.f32 %v3968_v36, %v2586_v32 }
 0x2c0   : > { %v2610_v35 = vmax.f32 %v2548_v12, %v2597_v33 }
 0x2c1   : > { %2630 = vrot.lane.b32.xlu0 %v2611_v34, %s3417_s7 }
 0x2c2   : > { %2628 = vrot.lane.b32.xlu1 %v2610_v35, %s3417_s7  ;;  %v2590_v31 = vpop.permute.xlu0 %2589 }
 0x2c3   : > { %v2598_v3 = vsel %vm232_vm1, %v2588_v37, %v2590_v31  ;;  %v2613_v8 = vmax.f32 %v3986_v43, %v2590_v31 }
 0x2c4   : > { %v2612_v38 = vmax.f32 %v2550_v26, %v2598_v3 }
 0x2c5   : > { %2634 = vrot.lane.b32.xlu0 %v2613_v8, %s3417_s7 }
 0x2c6   : > { %2632 = vrot.lane.b32.xlu1 %v2612_v38, %s3417_s7  ;;  %v2594_v9 = vpop.permute.xlu0 %2593 }
 0x2c7   : > { %v2599_v12 = vsel %vm232_vm1, %v2592_v39, %v2594_v9  ;;  %v2615_v36 = vmax.f32 %v3997_v47, %v2594_v9 }
 0x2c8   : > { %v2614_v40 = vmax.f32 %v2552_v30, %v2599_v12 }
 0x2c9   : > { %2638 = vrot.lane.b32.xlu0 %v2615_v36, %s3417_s7 }
 0x2ca   : > { %2636 = vrot.lane.b32.xlu1 %v2614_v40, %s3417_s7  ;;  %s3067_s7 = sshll.u32 %s4120_s16, 5 }
 0x2cb   : > { %s197_s9 = scalar_lea.vmem %s4118_s4, %s3067_s7 }
 0x32f   : > { %v2627_v41 = vpop.permute.xlu0 %2626 }
 0x330   : > { %v2654_v20 = vmax.f32 %v2609_v28, %v2627_v41  ;;  %v2625_v26 = vpop.permute.xlu1 %2624 }
 0x331   : > { %v2641_v42 = vsel %vm675_vm11, %v2625_v26, %v2627_v41 }
 0x332   : > { %v2653_v43 = vmax.f32 %v2608_v29, %v2641_v42  ;;  %3061 = vmatprep.mubr.msk.f32.mxu1 %vm2690_vm13, %v2654_v20 }
 0x333   : > { %v2631_v44 = vpop.permute.xlu0 %2630 }
 0x334   : > { %v2656_v45 = vmax.f32 %v2611_v34, %v2631_v44  ;;  %v2629_v46 = vpop.permute.xlu1 %2628  ;;  %2772 = vmatmul.mubr.f32.vlgmr.msra.gmra.mrb[8].mxu1 %v2653_v43 }
 0x335   : > { %v2642_v27 = vsel %vm675_vm11, %v2629_v46, %v2631_v44 }
 0x336   : > { %v2655_v30 = vmax.f32 %v2610_v35, %v2642_v27  ;;  %3062 = vmatprep.mubr.msk.f32.mxu1 %vm2690_vm13, %v2656_v45 }
 0x337   : > { %v2635_v47 = vpop.permute.xlu0 %2634 }
 0x338   : > { %v2658_v48 = vmax.f32 %v2613_v8, %v2635_v47  ;;  %v2633_v49 = vpop.permute.xlu1 %2632  ;;  %2777 = vmatmul.mubr.f32.gmra.mrb[10].mxu1 %v2655_v30 }
 0x339   : > { %v2643_v50 = vsel %vm675_vm11, %v2633_v49, %v2635_v47 }
 0x33a   : > { %v2657_v51 = vmax.f32 %v2612_v38, %v2643_v50  ;;  %3063 = vmatprep.mubr.msk.f32.mxu1 %vm2690_vm13, %v2658_v48 }
 0x33b   : > { %v2639_v52 = vpop.permute.xlu0 %2638 }
 0x33c   : > { %v2660_v53 = vmax.f32 %v2615_v36, %v2639_v52  ;;  %v2637_v54 = vpop.permute.xlu1 %2636  ;;  %2782 = vmatmul.mubr.f32.gmra.mrb[12].mxu1 %v2657_v51 }
 0x33d   : > { %v2644_v55 = vsel %vm675_vm11, %v2637_v54, %v2639_v52 }
 0x33e   : > { %v2659_v56 = vmax.f32 %v2614_v40, %v2644_v55  ;;  %3064 = vmatprep.mubr.msk.f32.mxu1 %vm2690_vm13, %v2660_v53 }
 0x340   : > { %2787 = vmatmul.mubr.f32.gmra.mrb[14].mxu1 %v2659_v56 }
 0x407   : > { %v2773_v57 = vpop.f32.mrb[8].mxu1 }
 0x408   : > { %2792 = vst [vmem:[%s197_s9] sm:$0xff] %v2773_v57  ;;  %v2775_v58 = vpop.f32.mrb[9].mxu1 }
 0x40b   : > { %v2778_v59 = vpop.f32.mrb[10].mxu1 }
 0x40c   : > { %2793 = vst [vmem:[%s197_s9 + $0x8] sm:$0xff] %v2778_v59  ;;  %v2780_v60 = vpop.f32.mrb[11].mxu1 }
 0x40f   : > { %v2783_v0 = vpop.f32.mrb[12].mxu1 }
 0x410   : > { %2794 = vst [vmem:[%s197_s9 + $0x10] sm:$0xff] %v2783_v0  ;;  %v2785_v61 = vpop.f32.mrb[13].mxu1 }
 0x413   : > { %v2788_v62 = vpop.f32.mrb[14].mxu1 }
 0x414   : > { %2795 = vst [vmem:[%s197_s9 + $0x18] sm:$0xff] %v2788_v62  ;;  %v2790_v63 = vpop.f32.mrb[15].mxu1 }
 0x415 PF: > { %s14_s15 = sadd.s32 1, %s3402_s15  }
 0x416   : > { %p11_p4 = scmp.ge.s32.totalorder %s14_s15, 4  }
 0x418   :  { %13 = sbr.rel (!%p11_p4) target bundleno = 1 (0x1), region = 90 }

// kernel: cnn_forward.3
= control target key start
LH: loop header
LB: loop body
LE: loop exit
PB: predicated region body
PF: predicated region fallthrough
CT: control target
= control target key end

     0   :  { %9 = vsyncpa [#allocation4], 0  ;;  %s8377_s0 = inlined_call_operand.vmem [shape: f32[2,1,1024], index: 0, kind: input, shape index: {}]   ;;  %s8378_s1 = inlined_call_operand.hbm [shape: f32[16,25], index: 1, kind: input, shape index: {}]   ;;  %s8379_s2 = inlined_call_operand.vmem [shape: f32[16,1], index: 2, kind: input, shape index: {}]   ;;  %s8380_s3 = inlined_call_operand.hbm [shape: f32[859,384], index: 3, kind: input, shape index: {}]   ;;  %s8381_s4 = inlined_call_operand.vmem [shape: bf16[2,16,384], index: 4, kind: output, shape index: {}]  }
   0x1   :  { %10 = vsyncpa [#allocation6], 0  ;;  %s5207_s15 = smov 0  }
   0x2 LB: > { %s5130_s16 = smov [#allocation3]   ;;  %s5213_s18 = sadd.s32 4294967295, %s5128_s15   ;;  %s5128_s15 = sphi %s5207_s15, %s16_s15  }
   0x3   : > { %s148_s17 = sshll.u32 %s5130_s16, 4  ;;  %p4336_p0 = scmp.ge.s32.totalorder %s5128_s15, 1  ;;  %s149_s17 = int_to_ptr.vmem [resolvable:$true] %s148_s17 }
   0x4   : > { %p136_p1 = scmp.lt.s32.totalorder %s5128_s15, 3  ;;  %p8382_p3 = scmp.eq.s32.totalorder %s5213_s18, 0 }
   0x5   : > { %s5131_s20 = smov [#allocation5]   ;;  %s5058_s25 = scalar_lea.hbm %s8378_s1, 256 }
   0x6   : > { %p5217_p2 = pnand %p4336_p0, %p136_p1  ;;  %s164_s21 = sshll.u32 %s5131_s20, 4  ;;  %s5230_s21 = int_to_ptr.vmem [resolvable:$true] %s164_s21 }
   0x7   : > { %p5059_p6 = scmp.ne.s32.totalorder %s8378_s1, %s5058_s25  ;;  %p5065_p10 = scmp.lt.u32.totalorder %s5058_s25, %s8378_s1 }
   0x8   : > { %s8601_s19 = scalar_select %p5217_p2, 1, 0 }
   0x9   : > { %p4878_p4 = pneg %p5217_p2 }
   0xb   : > { %p5226_p5 = pnand %p8382_p3, %p4878_p4 }
   0xd   : > { %p5060_p7 = pneg %p5226_p5 }
   0xf   : > { %p5061_p8 = pnand %p5060_p7, %p5059_p6 }
  0x11   : > { %p5062_p9 = pneg %p5061_p8 }
  0x13   : > { %p5067_p11 = pnand %p5065_p10, %p5062_p9 }
  0x15   : > { %5070 = shalt.err (!%p5067_p11)
}
  0x16   : > { %s5071_s30 = scalar_lea.vmem %s149_s17, 256  ;;  %p5079_p1 = scmp.lt.s32.totalorder %s149_s17, %s149_s17 }
  0x17   : > { %p5072_p12 = scmp.ne.s32.totalorder %s149_s17, %s5071_s30  ;;  %p5080_p4 = scmp.lt.s32.totalorder %s5071_s30, %s5071_s30 }
  0x19   : > { %p5074_p13 = pnand %p5072_p12, %p5060_p7  ;;  %p5081_p3 = por %p5080_p4, %p5079_p1 }
  0x1b   : > { %p5075_p0 = pneg %p5074_p13 }
  0x1d   : > { %p5082_p2 = pnand %p5081_p3, %p5075_p0 }
  0x1f   : > { %5085 = shalt.err (!%p5082_p2)
}
  0x20   : > { %s5132_s5 = smov 128   ;;  %s5133_s6 = smov 8  }
  0x21   : > { %4881 = dma.hbm_to_vmem [thread:$0]  (!%p5226_p5), %s8378_s1, 256, %s149_s17, [#allocation4], %s5132_s5, %s5132_s5, %s5133_s6  }
  0x22   : > { %s5086_s11 = scalar_lea.hbm %s8380_s3, 41472 }
  0x23   : > { %p5087_p6 = scmp.ne.s32.totalorder %s8380_s3, %s5086_s11  ;;  %p5093_p8 = scmp.lt.u32.totalorder %s5086_s11, %s8380_s3 }
  0x25   : > { %p5089_p2 = pnand %p5087_p6, %p5060_p7 }
  0x27   : > { %p5090_p3 = pneg %p5089_p2 }
  0x29   : > { %p5095_p9 = pnand %p5093_p8, %p5090_p3 }
  0x2b   : > { %5098 = shalt.err (!%p5095_p9)
}
  0x2c   : > { %s5099_s17 = scalar_lea.vmem %s5230_s21, 41472  ;;  %p5107_p13 = scmp.lt.s32.totalorder %s5230_s21, %s5230_s21 }
  0x2d   : > { %p5100_p10 = scmp.ne.s32.totalorder %s5230_s21, %s5099_s17  ;;  %p5108_p0 = scmp.lt.s32.totalorder %s5099_s17, %s5099_s17 }
  0x2f   : > { %p5102_p11 = pnand %p5100_p10, %p5060_p7  ;;  %p5109_p1 = por %p5108_p0, %p5107_p13 }
  0x31   : > { %p5103_p12 = pneg %p5102_p11 }
  0x33   : > { %p5110_p4 = pnand %p5109_p1, %p5103_p12 }
  0x35   : > { %5113 = shalt.err (!%p5110_p4)
}
  0x36   : > { %s5134_s20 = smov 384   ;;  %s5135_s23 = smov 24  }
  0x37   : > { %4884 = dma.hbm_to_vmem [thread:$0]  (!%p5226_p5), %s8380_s3, 41472, %s5230_s21, [#allocation6], %s5134_s20, %s5134_s20, %s5135_s23  }
  0x38   : > { %p8603_p6 = scmp.ne.s32.totalorder %s8601_s19, 0 }
  0x3a   : > { %187 = sbr.rel (%p8603_p6) target bundleno = 2314 (0x90a), region = 36 }
  0x41   : > { %p8604_p7 = scmp.eq.s32.totalorder %s5213_s18, 0 }
  0x43   : > { %5119 = dma.done.wait (%p8604_p7), [#allocation4], 256   ;;  %p8605_p2 = pmov %p8604_p7 }
  0x45   : > { %5121 = vsyncadd (%p8605_p2), [#allocation4], 4294967040  ;;  %p8606_p3 = pmov %p8605_p2 }
  0x46   : > { %p8607_p8 = pmov %p8605_p2 }
  0x47   : > { %5123 = dma.done.wait (%p8606_p3), [#allocation6], 41472  }
  0x48   : > { %5125 = vsyncadd (%p8607_p8), [#allocation6], 4294925824  ;;  %v5136_v0 = vmov 1   ;;  %v8384_v1 = vmov 0   ;;  %v5290_v2 = vld [vmem:[#allocation3] sm:$0xff]  ;;  %v5294_v3 = vld [vmem:[#allocation3 + $0x8] sm:$0xff]  ;;  %v239_v8 = vlaneseq }
  0x49   : > { %4950 = vset.pattern.permute.xlu1 %v5136_v0  ;;  %4949 = vset.pattern.permute.xlu0 %v8384_v1  ;;  %v5138_v4 = vmov 2   ;;  %v5139_v5 = vmov 3   ;;  %v5140_v6 = vmov 4   ;;  %v5141_v7 = vmov 5   ;;  %p216_p5 = scmp.lt.s32.totalorder %s5213_s18, 1  ;;  %s5142_s27 = smov 127  }
  0x4a   : > { %303 = vperm.xlu1 %4950, %v5290_v2   ;;  %230 = vperm.xlu0 %4949, %v5290_v2   ;;  %v5310_v9 = vshrl.u32 %v239_v8, 7  ;;  %s5143_s28 = smov 126   ;;  %s5144_s29 = smov 125   ;;  %vm366_vm0 = vcmask 1039360   ;;  %vm471_vm1 = vcmask 1031168   ;;  %vm576_vm2 = vcmask 1022976  }
  0x4b   : > { %s9044_s18 = smov (!%p216_p5, %s5213_s18), 1  ;;  %s5145_s30 = smov 124   ;;  %vm718_vm3 = vcmask 1014784   ;;  %vm873_vm4 = vcmask 785408   ;;  %vm988_vm5 = vcmask 777216   ;;  %vm1103_vm6 = vcmask 769024  }
  0x4c   : > { %s4343_s19 = sshll.u32 %s9044_s18, 3  ;;  %v5318_v10 = vsub.s32 1, %v5310_v9  ;;  %v5321_v11 = vsub.s32 0, %v5310_v9  ;;  %v5331_v15 = vsub.s32 3, %v5310_v9  ;;  %v5334_v16 = vsub.s32 2, %v5310_v9  ;;  %s5146_s5 = smov 96  }
  0x4d   : > { %s5315_s26 = scalar_lea.vmem %s8377_s0, %s4343_s19  ;;  %v5337_v18 = vsub.s32 5, %v5310_v9  ;;  %v5340_v19 = vsub.s32 4, %v5310_v9  ;;  %v5353_v24 = vsub.s32 6, %v5310_v9  ;;  %s5149_s6 = smov 95   ;;  %vm1218_vm7 = vcmask 760832  }
  0x4e   : > { %307 = vperm.xlu1 %4950, %v5294_v3   ;;  %235 = vperm.xlu0 %4949, %v5294_v3   ;;  %8608 = vst [vmem:[#allocation9_spill] sm:$0xff] %v5318_v10  ;;  %8609 = vst [vmem:[#allocation10_spill] sm:$0xff] %v5321_v11  ;;  %v225_v12 = vld [vmem:[%s5315_s26] sm:$0x7f]  ;;  %s5151_s7 = smov 94   ;;  %s5153_s8 = smov 93  }
  0x4f   : > { %v5325_v13 = vrot.slane %v225_v12, %v5318_v10  ;;  %v5328_v14 = vrot.slane %v225_v12, %v5321_v11  ;;  %8612 = vst [vmem:[#allocation13_spill] sm:$0xff] %v5331_v15  ;;  %8613 = vst [vmem:[#allocation14_spill] sm:$0xff] %v5334_v16  ;;  %v5345_v22 = vrot.slane %v225_v12, %v5331_v15  ;;  %v5437_v8 = vld [vmem:[%s5315_s26] sm:$0xff]  ;;  %s5156_s9 = smov 92   ;;  %s5170_s10 = smov 64   ;;  %vm1333_vm8 = vcmask 752640  }
  0x50   : > { %8614 = vst [vmem:[#allocation15_spill] sm:$0xff] %v5337_v18  ;;  %8615 = vst [vmem:[#allocation16_spill] sm:$0xff] %v5340_v19  ;;  %v5348_v23 = vrot.slane %v225_v12, %v5334_v16  ;;  %v5358_v27 = vrot.slane %v225_v12, %v5337_v18  ;;  %v5361_v28 = vrot.slane %v225_v12, %v5340_v19  ;;  %s5171_s11 = smov 63   ;;  %s5172_s12 = smov 62   ;;  %vm1448_vm9 = vcmask 523264  }
  0x51   : > { %8610 = vst [vmem:[#allocation11_spill] sm:$0xff] %v5325_v13  ;;  %8611 = vst [vmem:[#allocation12_spill] sm:$0xff] %v5328_v14  ;;  %v5368_v31 = vrot.slane %v225_v12, %v5353_v24  ;;  %s5173_s13 = smov 61   ;;  %s5174_s14 = smov 60   ;;  %vm1563_vm10 = vcmask 515072   ;;  %vm1678_vm11 = vcmask 506880  }
  0x52   : > { %4951 = vset.pattern.permute.xlu0 %v5138_v4  ;;  %4952 = vset.pattern.permute.xlu1 %v5138_v4  ;;  %8616 = vst [vmem:[#allocation17_spill] sm:$0xff] %v5348_v23  ;;  %8617 = vst [vmem:[#allocation18_spill] sm:$0xff] %v5353_v24  ;;  %s5175_s16 = smov 32   ;;  %s5176_s17 = smov 31   ;;  %vm1793_vm12 = vcmask 498688   ;;  %vm1908_vm13 = vcmask 490496  }
  0x53   : > { %408 = vperm.xlu0 %4951, %v5290_v2   ;;  %412 = vperm.xlu1 %4952, %v5294_v3   ;;  %8618 = vst [vmem:[#allocation19_spill] sm:$0xff] %v5358_v27  ;;  %s5177_s20 = smov 30   ;;  %s5178_s23 = smov 29   ;;  %vm2023_vm14 = vcmask 261120   ;;  %vm2138_vm15 = vcmask 252928  }
  0x54   : > { %s5179_s24 = smov 28  }
  0x57   : > { %4953 = vset.pattern.permute.xlu1 %v5139_v5  ;;  %4954 = vset.pattern.permute.xlu0 %v5139_v5 }
  0x58   : > { %513 = vperm.xlu1 %4953, %v5290_v2   ;;  %517 = vperm.xlu0 %4954, %v5294_v3  }
  0x5c   : > { %4955 = vset.pattern.permute.xlu0 %v5140_v6  ;;  %4956 = vset.pattern.permute.xlu1 %v5140_v6 }
  0x5d   : > { %619 = vperm.xlu0 %4955, %v5290_v2   ;;  %623 = vperm.xlu1 %4956, %v5294_v3  }
  0x61   : > { %4957 = vset.pattern.permute.xlu1 %v5141_v7  ;;  %4958 = vset.pattern.permute.xlu0 %v5141_v7 }
  0x62   : > { %761 = vperm.xlu1 %4957, %v5290_v2  }
  0xc9   : > { %v304_v17 = vpop.permute.xlu1 %303  ;;  %v5374_v35 = vpop.permute.xlu0 %230 }
  0xca   : > { %v311_v20 = vmul.f32 %v304_v17, %v5325_v13  ;;  %v310_v21 = vmul.f32 %v304_v17, %v5328_v14  ;;  %v313_v25 = vmul.f32 %v304_v17, %v5345_v22  ;;  %v312_v26 = vmul.f32 %v304_v17, %v5348_v23  ;;  %8619 = vst [vmem:[#allocation20_spill] sm:$0xff] %v5374_v35 }
  0xcb   : > { %v315_v29 = vmul.f32 %v304_v17, %v5358_v27  ;;  %v314_v30 = vmul.f32 %v304_v17, %v5361_v28  ;;  %v316_v34 = vmul.f32 %v304_v17, %v5368_v31 }
  0xcc   : > { %340 = vrot.lane.b32.xlu1 %v311_v20, %s5142_s27  ;;  %338 = vrot.lane.b32.xlu0 %v310_v21, %s5142_s27  ;;  %v5443_v20 = vrot.slane %v5437_v8, %v5318_v10 }
  0xcd   : > { %v308_v32 = vpop.permute.xlu1 %307  ;;  %v5382_v38 = vpop.permute.xlu0 %235 }
  0xce   : > { %v317_v33 = vmul.f32 %v308_v32, %v5328_v14  ;;  %v319_v36 = vmul.f32 %v308_v32, %v5348_v23  ;;  %v318_v37 = vmul.f32 %v308_v32, %v5325_v13  ;;  %v321_v39 = vmul.f32 %v308_v32, %v5361_v28 }
  0xcf   : > { %v320_v40 = vmul.f32 %v308_v32, %v5345_v22  ;;  %v323_v42 = vmul.f32 %v308_v32, %v5368_v31  ;;  %v322_v43 = vmul.f32 %v308_v32, %v5358_v27 }
  0xd0   : > { %344 = vrot.lane.b32.xlu1 %v313_v25, %s5142_s27  ;;  %342 = vrot.lane.b32.xlu0 %v312_v26, %s5142_s27 }
  0xd2   : > { %v409_v41 = vpop.permute.xlu0 %408  ;;  %v413_v48 = vpop.permute.xlu1 %412 }
  0xd3   : > { %v415_v44 = vmul.f32 %v409_v41, %v5328_v14  ;;  %v416_v45 = vmul.f32 %v409_v41, %v5325_v13  ;;  %v417_v46 = vmul.f32 %v409_v41, %v5348_v23  ;;  %v418_v47 = vmul.f32 %v409_v41, %v5345_v22 }
  0xd4   : > { %348 = vrot.lane.b32.xlu1 %v315_v29, %s5142_s27  ;;  %346 = vrot.lane.b32.xlu0 %v314_v30, %s5142_s27  ;;  %v419_v49 = vmul.f32 %v409_v41, %v5361_v28  ;;  %v420_v50 = vmul.f32 %v409_v41, %v5358_v27  ;;  %v422_v51 = vmul.f32 %v413_v48, %v5328_v14 }
  0xd5   : > { %v421_v52 = vmul.f32 %v409_v41, %v5368_v31  ;;  %v423_v53 = vmul.f32 %v413_v48, %v5325_v13  ;;  %v424_v54 = vmul.f32 %v413_v48, %v5348_v23  ;;  %v425_v55 = vmul.f32 %v413_v48, %v5345_v22 }
  0xd6   : > { %v426_v56 = vmul.f32 %v413_v48, %v5361_v28  ;;  %v427_v58 = vmul.f32 %v413_v48, %v5358_v27  ;;  %v428_v59 = vmul.f32 %v413_v48, %v5368_v31  ;;  %v5454_v30 = vrot.slane %v5437_v8, %v5331_v15 }
  0xd7   : > { %v514_v57 = vpop.permute.xlu1 %513  ;;  %v518_v0 = vpop.permute.xlu0 %517 }
  0xd8   : > { %352 = vrot.lane.b32.xlu1 %v317_v33, %s5142_s27  ;;  %350 = vrot.lane.b32.xlu0 %v316_v34, %s5142_s27  ;;  %v520_v60 = vmul.f32 %v514_v57, %v5328_v14  ;;  %v522_v61 = vmul.f32 %v514_v57, %v5348_v23  ;;  %v521_v62 = vmul.f32 %v514_v57, %v5325_v13 }
  0xd9   : > { %v524_v63 = vmul.f32 %v514_v57, %v5361_v28  ;;  %v523_v4 = vmul.f32 %v514_v57, %v5345_v22  ;;  %v526_v5 = vmul.f32 %v514_v57, %v5368_v31  ;;  %v528_v6 = vmul.f32 %v518_v0, %v5325_v13 }
  0xda   : > { %v525_v7 = vmul.f32 %v514_v57, %v5358_v27  ;;  %v527_v12 = vmul.f32 %v518_v0, %v5328_v14  ;;  %v530_v17 = vmul.f32 %v518_v0, %v5345_v22  ;;  %v529_v25 = vmul.f32 %v518_v0, %v5348_v23 }
  0xdb   : > { %v532_v26 = vmul.f32 %v518_v0, %v5358_v27  ;;  %v531_v32 = vmul.f32 %v518_v0, %v5361_v28  ;;  %v5461_v33 = vrot.slane %v5437_v8, %v5321_v11  ;;  %v5465_v34 = vrot.slane %v5437_v8, %v5337_v18 }
  0xdc   : > { %356 = vrot.lane.b32.xlu1 %v319_v36, %s5142_s27  ;;  %354 = vrot.lane.b32.xlu0 %v318_v37, %s5142_s27  ;;  %v620_v21 = vpop.permute.xlu0 %619  ;;  %v533_v36 = vmul.f32 %v518_v0, %v5368_v31 }
  0xdd   : > { %v663_v29 = vmul.f32 %v5443_v20, %v620_v21  ;;  %8620 = vst [vmem:[#allocation21_spill] sm:$0xff] %v5465_v34  ;;  %v665_v37 = vmul.f32 %v5454_v30, %v620_v21  ;;  %v662_v41 = vmul.f32 %v5461_v33, %v620_v21 }
  0xe0   : > { %360 = vrot.lane.b32.xlu1 %v321_v39, %s5142_s27  ;;  %358 = vrot.lane.b32.xlu0 %v320_v40, %s5142_s27  ;;  %v624_v39 = vpop.permute.xlu1 %623  ;;  %v5473_v40 = vrot.slane %v5437_v8, %v5334_v16 }
  0xe2   : > { %v671_v48 = vmul.f32 %v5473_v40, %v624_v39 }
  0xe4   : > { %364 = vrot.lane.b32.xlu1 %v323_v42, %s5142_s27  ;;  %362 = vrot.lane.b32.xlu0 %v322_v43, %s5142_s27  ;;  %v667_v42 = vmul.f32 %v5465_v34, %v620_v21  ;;  %v669_v43 = vmul.f32 %v5461_v33, %v624_v39 }
  0xe8   : > { %443 = vrot.lane.b32.xlu1 %v415_v44, %s5143_s28  ;;  %445 = vrot.lane.b32.xlu0 %v416_v45, %s5143_s28  ;;  %v5482_v44 = vrot.slane %v5437_v8, %v5340_v19  ;;  %v664_v45 = vmul.f32 %v5473_v40, %v620_v21 }
  0xec   : > { %447 = vrot.lane.b32.xlu1 %v417_v46, %s5143_s28  ;;  %449 = vrot.lane.b32.xlu0 %v418_v47, %s5143_s28  ;;  %v5489_v46 = vrot.slane %v5437_v8, %v5353_v24  ;;  %v666_v47 = vmul.f32 %v5482_v44, %v620_v21 }
  0xee   : > { %8621 = vst [vmem:[#allocation22_spill] sm:$0xff] %v5489_v46 }
  0xf0   : > { %451 = vrot.lane.b32.xlu1 %v419_v49, %s5143_s28  ;;  %453 = vrot.lane.b32.xlu0 %v420_v50, %s5143_s28  ;;  %v668_v49 = vmul.f32 %v5489_v46, %v620_v21  ;;  %v673_v50 = vmul.f32 %v5482_v44, %v624_v39 }
  0xf4   : > { %455 = vrot.lane.b32.xlu1 %v421_v52, %s5143_s28  ;;  %457 = vrot.lane.b32.xlu0 %v422_v51, %s5143_s28  ;;  %v670_v51 = vmul.f32 %v5443_v20, %v624_v39  ;;  %v675_v52 = vmul.f32 %v5489_v46, %v624_v39 }
  0xf8   : > { %459 = vrot.lane.b32.xlu1 %v423_v53, %s5143_s28  ;;  %461 = vrot.lane.b32.xlu0 %v424_v54, %s5143_s28  ;;  %v672_v53 = vmul.f32 %v5454_v30, %v624_v39  ;;  %v762_v54 = vpop.permute.xlu1 %761 }
  0xf9   : > { %v809_v57 = vmul.f32 %v5461_v33, %v762_v54  ;;  %v812_v0 = vmul.f32 %v5454_v30, %v762_v54 }
  0xfc   : > { %463 = vrot.lane.b32.xlu1 %v425_v55, %s5143_s28  ;;  %465 = vrot.lane.b32.xlu0 %v426_v56, %s5143_s28  ;;  %v811_v55 = vmul.f32 %v5473_v40, %v762_v54  ;;  %v674_v56 = vmul.f32 %v5465_v34, %v624_v39 }
 0x100   : > { %467 = vrot.lane.b32.xlu1 %v427_v58, %s5143_s28  ;;  %469 = vrot.lane.b32.xlu0 %v428_v59, %s5143_s28  ;;  %v813_v58 = vmul.f32 %v5482_v44, %v762_v54 }
 0x104   : > { %548 = vrot.lane.b32.xlu1 %v520_v60, %s5144_s29  ;;  %552 = vrot.lane.b32.xlu0 %v522_v61, %s5144_s29  ;;  %v810_v60 = vmul.f32 %v5443_v20, %v762_v54  ;;  %v815_v61 = vmul.f32 %v5489_v46, %v762_v54 }
 0x108   : > { %550 = vrot.lane.b32.xlu1 %v521_v62, %s5144_s29  ;;  %556 = vrot.lane.b32.xlu0 %v524_v63, %s5144_s29  ;;  %v799_v63 = vsub.s32 7, %v5310_v9 }
 0x10c   : > { %554 = vrot.lane.b32.xlu1 %v523_v4, %s5144_s29  ;;  %560 = vrot.lane.b32.xlu0 %v526_v5, %s5144_s29  ;;  %v5147_v5 = vmov 6  }
 0x10d   : > { %4960 = vset.pattern.permute.xlu1 %v5147_v5 }
 0x110   : > { %558 = vrot.lane.b32.xlu1 %v525_v7, %s5144_s29  ;;  %564 = vrot.lane.b32.xlu0 %v528_v6, %s5144_s29  ;;  %v5527_v6 = vrot.slane %v5437_v8, %v799_v63  ;;  %v814_v7 = vmul.f32 %v5465_v34, %v762_v54 }
 0x112   : > { %8625 = vst [vmem:[#allocation26_spill] sm:$0xff] %v5527_v6  ;;  %v816_v9 = vmul.f32 %v5527_v6, %v762_v54 }
 0x114   : > { %562 = vrot.lane.b32.xlu1 %v527_v12, %s5144_s29  ;;  %568 = vrot.lane.b32.xlu0 %v530_v17, %s5144_s29 }
 0x118   : > { %566 = vrot.lane.b32.xlu1 %v529_v25, %s5144_s29  ;;  %572 = vrot.lane.b32.xlu0 %v532_v26, %s5144_s29 }
 0x11c   : > { %570 = vrot.lane.b32.xlu1 %v531_v32, %s5144_s29  ;;  %692 = vrot.lane.b32.xlu0 %v663_v29, %s5145_s30 }
 0x120   : > { %574 = vrot.lane.b32.xlu1 %v533_v36, %s5144_s29  ;;  %696 = vrot.lane.b32.xlu0 %v665_v37, %s5145_s30 }
 0x124   : > { %690 = vrot.lane.b32.xlu1 %v662_v41, %s5145_s30  ;;  %700 = vrot.lane.b32.xlu0 %v667_v42, %s5145_s30 }
 0x128   : > { %694 = vrot.lane.b32.xlu1 %v664_v45, %s5145_s30  ;;  %704 = vrot.lane.b32.xlu0 %v669_v43, %s5145_s30 }
 0x12c   : > { %698 = vrot.lane.b32.xlu1 %v666_v47, %s5145_s30  ;;  %708 = vrot.lane.b32.xlu0 %v671_v48, %s5145_s30 }
 0x130   : > { %702 = vrot.lane.b32.xlu1 %v668_v49, %s5145_s30  ;;  %712 = vrot.lane.b32.xlu0 %v673_v50, %s5145_s30 }
 0x134   : > { %706 = vrot.lane.b32.xlu1 %v670_v51, %s5145_s30  ;;  %716 = vrot.lane.b32.xlu0 %v675_v52, %s5145_s30 }
 0x138   : > { %710 = vrot.lane.b32.xlu1 %v672_v53, %s5145_s30  ;;  %765 = vperm.xlu0 %4958, %v5294_v3  }
 0x13c   : > { %714 = vrot.lane.b32.xlu1 %v674_v56, %s5145_s30  ;;  %845 = vrot.lane.b32.xlu0 %v811_v55, %s5146_s5 }
 0x13d   : > { %4959 = vset.pattern.permute.xlu0 %v5147_v5 }
 0x13e   : > { %v5512_v59 = vpop.permute.xlu0 %338  ;;  %v5556_v41 = vpop.permute.xlu1 %340 }
 0x13f   : > { %8622 = vst [vmem:[#allocation23_spill] sm:$0xff] %v5512_v59  ;;  %8630 = vst [vmem:[#allocation31_spill] sm:$0xff] %v5556_v41 }
 0x140   : > { %841 = vrot.lane.b32.xlu1 %v809_v57, %s5146_s5  ;;  %849 = vrot.lane.b32.xlu0 %v813_v58, %s5146_s5 }
 0x142   : > { %v5518_v62 = vpop.permute.xlu0 %342  ;;  %v5562_v45 = vpop.permute.xlu1 %344 }
 0x143   : > { %8623 = vst [vmem:[#allocation24_spill] sm:$0xff] %v5518_v62  ;;  %8633 = vst [vmem:[#allocation34_spill] sm:$0xff] %v5562_v45 }
 0x144   : > { %843 = vrot.lane.b32.xlu1 %v810_v60, %s5146_s5  ;;  %853 = vrot.lane.b32.xlu0 %v815_v61, %s5146_s5 }
 0x146   : > { %v5524_v4 = vpop.permute.xlu0 %346  ;;  %v5566_v48 = vpop.permute.xlu1 %348 }
 0x147   : > { %8624 = vst [vmem:[#allocation25_spill] sm:$0xff] %v5524_v4  ;;  %8634 = vst [vmem:[#allocation35_spill] sm:$0xff] %v5566_v48 }
 0x148   : > { %847 = vrot.lane.b32.xlu1 %v812_v0, %s5146_s5 }
 0x14a   : > { %v5531_v12 = vpop.permute.xlu0 %350  ;;  %v5572_v51 = vpop.permute.xlu1 %352 }
 0x14b   : > { %8626 = vst [vmem:[#allocation27_spill] sm:$0xff] %v5531_v12 }
 0x14c   : > { %851 = vrot.lane.b32.xlu1 %v814_v7, %s5146_s5 }
 0x14e   : > { %v5535_v17 = vpop.permute.xlu0 %354  ;;  %v5576_v53 = vpop.permute.xlu1 %356 }
 0x150   : > { %855 = vrot.lane.b32.xlu1 %v816_v9, %s5146_s5 }
 0x152   : > { %v5538_v21 = vpop.permute.xlu0 %358  ;;  %v5580_v55 = vpop.permute.xlu1 %360 }
 0x156   : > { %v5540_v25 = vpop.permute.xlu0 %362  ;;  %v5584_v57 = vpop.permute.xlu1 %364 }
 0x15a   : > { %v5542_v8 = vpop.permute.xlu0 %445  ;;  %v5588_v60 = vpop.permute.xlu1 %443 }
 0x15b   : > { %8627 = vst [vmem:[#allocation28_spill] sm:$0xff] %v5542_v8  ;;  %8638 = vst [vmem:[#allocation39_spill] sm:$0xff] %v5588_v60 }
 0x15e   : > { %v5544_v26 = vpop.permute.xlu0 %449  ;;  %v5592_v63 = vpop.permute.xlu1 %447 }
 0x15f   : > { %8628 = vst [vmem:[#allocation29_spill] sm:$0xff] %v5544_v26  ;;  %8639 = vst [vmem:[#allocation40_spill] sm:$0xff] %v5592_v63 }
 0x162   : > { %v5546_v29 = vpop.permute.xlu0 %453  ;;  %v5596_v5 = vpop.permute.xlu1 %451 }
 0x163   : > { %8629 = vst [vmem:[#allocation30_spill] sm:$0xff] %v5546_v29  ;;  %8640 = vst [vmem:[#allocation41_spill] sm:$0xff] %v5596_v5 }
 0x166   : > { %v5548_v32 = vpop.permute.xlu0 %457  ;;  %v5600_v9 = vpop.permute.xlu1 %455 }
 0x16a   : > { %v5550_v36 = vpop.permute.xlu0 %461 }
 0x16e   : > { %v5552_v37 = vpop.permute.xlu0 %465 }
 0x172   : > { %v5554_v39 = vpop.permute.xlu0 %469 }
 0x176   : > { %v5558_v42 = vpop.permute.xlu0 %552 }
 0x177   : > { %8631 = vst [vmem:[#allocation32_spill] sm:$0xff] %v5558_v42 }
 0x17a   : > { %v5560_v43 = vpop.permute.xlu0 %556 }
 0x17b   : > { %8632 = vst [vmem:[#allocation33_spill] sm:$0xff] %v5560_v43 }
 0x17e   : > { %v5564_v47 = vpop.permute.xlu0 %560 }
 0x182   : > { %v5568_v49 = vpop.permute.xlu0 %564 }
 0x186   : > { %v5570_v50 = vpop.permute.xlu0 %568 }
 0x18a   : > { %v5574_v52 = vpop.permute.xlu0 %572 }
 0x18e   : > { %v5578_v54 = vpop.permute.xlu0 %692 }
 0x18f   : > { %8635 = vst [vmem:[#allocation36_spill] sm:$0xff] %v5578_v54 }
 0x192   : > { %v5582_v56 = vpop.permute.xlu0 %696 }
 0x193   : > { %8636 = vst [vmem:[#allocation37_spill] sm:$0xff] %v5582_v56  ;;  %v5604_v56 = vpop.permute.xlu1 %459 }
 0x196   : > { %v5586_v58 = vpop.permute.xlu0 %700 }
 0x197   : > { %8637 = vst [vmem:[#allocation38_spill] sm:$0xff] %v5586_v58  ;;  %v5612_v5 = vpop.permute.xlu1 %463 }
 0x19a   : > { %v5590_v61 = vpop.permute.xlu0 %704 }
 0x19e   : > { %v5594_v0 = vpop.permute.xlu0 %708 }
 0x1a2   : > { %v5598_v7 = vpop.permute.xlu0 %712 }
 0x1a6   : > { %v5602_v1 = vpop.permute.xlu0 %716 }
 0x1a7   : > { %8641 = vst [vmem:[#allocation42_spill] sm:$0xff] %v5602_v1 }
 0x1b7   : > { %v766_v54 = vpop.permute.xlu0 %765 }
 0x1b8   : > { %v818_v58 = vmul.f32 %v5443_v20, %v766_v54  ;;  %v817_v43 = vmul.f32 %v5461_v33, %v766_v54  ;;  %v820_v42 = vmul.f32 %v5454_v30, %v766_v54  ;;  %v819_v29 = vmul.f32 %v5473_v40, %v766_v54 }
 0x1b9   : > { %v822_v26 = vmul.f32 %v5465_v34, %v766_v54  ;;  %v821_v63 = vmul.f32 %v5482_v44, %v766_v54  ;;  %v823_v60 = vmul.f32 %v5489_v46, %v766_v54 }
 0x1ba   : > { %859 = vrot.lane.b32.xlu1 %v818_v58, %s5146_s5  ;;  %857 = vrot.lane.b32.xlu0 %v817_v43, %s5146_s5  ;;  %v5620_v58 = vpop.permute.xlu1 %467  ;;  %v824_v43 = vmul.f32 %v5527_v6, %v766_v54  ;;  %v5148_v54 = vmov 7  }
 0x1be   : > { %863 = vrot.lane.b32.xlu1 %v820_v42, %s5146_s5  ;;  %861 = vrot.lane.b32.xlu0 %v819_v29, %s5146_s5  ;;  %v5626_v42 = vpop.permute.xlu1 %548 }
 0x1bf   : > { %8642 = vst [vmem:[#allocation43_spill] sm:$0xff] %v5626_v42 }
 0x1c2   : > { %867 = vrot.lane.b32.xlu1 %v822_v26, %s5146_s5  ;;  %865 = vrot.lane.b32.xlu0 %v821_v63, %s5146_s5  ;;  %v5630_v29 = vpop.permute.xlu1 %550 }
 0x1c3   : > { %8643 = vst [vmem:[#allocation44_spill] sm:$0xff] %v5630_v29 }
 0x1c6   : > { %871 = vrot.lane.b32.xlu1 %v824_v43, %s5146_s5  ;;  %869 = vrot.lane.b32.xlu0 %v823_v60, %s5146_s5  ;;  %v5632_v26 = vpop.permute.xlu1 %554 }
 0x1c7   : > { %8644 = vst [vmem:[#allocation45_spill] sm:$0xff] %v5632_v26 }
 0x1ca   : > { %917 = vperm.xlu0 %4959, %v5290_v2   ;;  %921 = vperm.xlu1 %4960, %v5294_v3   ;;  %v5634_v63 = vpop.permute.xlu1 %558 }
 0x1cb   : > { %8645 = vst [vmem:[#allocation46_spill] sm:$0xff] %v5634_v63 }
 0x1ce   : > { %v5636_v8 = vpop.permute.xlu1 %562  ;;  %4961 = vset.pattern.permute.xlu1 %v5148_v54  ;;  %4962 = vset.pattern.permute.xlu0 %v5148_v54  ;;  %v5660_v54 = vpop.permute.xlu0 %845 }
 0x1cf   : > { %8651 = vst [vmem:[#allocation52_spill] sm:$0xff] %v5660_v54 }
 0x1d2   : > { %v5638_v48 = vpop.permute.xlu1 %566  ;;  %v5664_v11 = vpop.permute.xlu0 %849 }
 0x1d3   : > { %8653 = vst [vmem:[#allocation54_spill] sm:$0xff] %v5664_v11 }
 0x1d6   : > { %v5640_v60 = vpop.permute.xlu1 %570 }
 0x1da   : > { %v5642_v43 = vpop.permute.xlu1 %574 }
 0x1db   : > { %8646 = vst [vmem:[#allocation47_spill] sm:$0xff] %v5642_v43 }
 0x1de   : > { %v5644_v42 = vpop.permute.xlu1 %690 }
 0x1df   : > { %8647 = vst [vmem:[#allocation48_spill] sm:$0xff] %v5644_v42 }
 0x1e2   : > { %v5646_v4 = vpop.permute.xlu1 %694 }
 0x1e3   : > { %8648 = vst [vmem:[#allocation49_spill] sm:$0xff] %v5646_v4  ;;  %v5668_v4 = vpop.permute.xlu0 %853 }
 0x1e6   : > { %v5648_v29 = vpop.permute.xlu1 %698 }
 0x1e7   : > { %8649 = vst [vmem:[#allocation50_spill] sm:$0xff] %v5648_v29 }
 0x1ea   : > { %v5650_v26 = vpop.permute.xlu1 %702 }
 0x1ee   : > { %v5652_v63 = vpop.permute.xlu1 %706 }
 0x1f2   : > { %v5654_v45 = vpop.permute.xlu1 %710 }
 0x1f6   : > { %v5656_v62 = vpop.permute.xlu1 %714 }
 0x1fa   : > { %v5658_v59 = vpop.permute.xlu1 %841 }
 0x1fb   : > { %8650 = vst [vmem:[#allocation51_spill] sm:$0xff] %v5658_v59 }
 0x1fe   : > { %v5662_v41 = vpop.permute.xlu1 %843 }
 0x1ff   : > { %8652 = vst [vmem:[#allocation53_spill] sm:$0xff] %v5662_v41 }
 0x202   : > { %v5666_v42 = vpop.permute.xlu1 %847 }
 0x203   : > { %8654 = vst [vmem:[#allocation55_spill] sm:$0xff] %v5666_v42 }
 0x206   : > { %v5672_v10 = vpop.permute.xlu1 %851 }
 0x207   : > { %8655 = vst [vmem:[#allocation56_spill] sm:$0xff] %v5672_v10 }
 0x20a   : > { %v5676_v18 = vpop.permute.xlu1 %855 }
 0x22c   : > { %v5670_v29 = vpop.permute.xlu0 %857  ;;  %v5678_v24 = vpop.permute.xlu1 %859 }
 0x230   : > { %v5674_v16 = vpop.permute.xlu0 %861  ;;  %v5682_v54 = vpop.permute.xlu1 %863 }
 0x234   : > { %v5680_v59 = vpop.permute.xlu0 %865  ;;  %v5688_v19 = vpop.permute.xlu1 %867 }
 0x235   : > { %8656 = vst [vmem:[#allocation57_spill] sm:$0xff] %v5680_v59  ;;  %8658 = vst [vmem:[#allocation59_spill] sm:$0xff] %v5688_v19 }
 0x238   : > { %v5684_v41 = vpop.permute.xlu0 %869 }
 0x239   : > { %8657 = vst [vmem:[#allocation58_spill] sm:$0xff] %v5684_v41  ;;  %v5696_v41 = vpop.permute.xlu1 %871 }
 0x249   : > { %v918_v11 = vpop.permute.xlu0 %917 }
 0x24a   : > { %v925_v42 = vmul.f32 %v918_v11, %v5443_v20  ;;  %v924_v15 = vmul.f32 %v918_v11, %v5461_v33  ;;  %v927_v10 = vmul.f32 %v918_v11, %v5454_v30  ;;  %v926_v1 = vmul.f32 %v918_v11, %v5473_v40 }
 0x24b   : > { %v929_v59 = vmul.f32 %v918_v11, %v5465_v34  ;;  %v928_v43 = vmul.f32 %v918_v11, %v5482_v44  ;;  %v930_v19 = vmul.f32 %v918_v11, %v5489_v46 }
 0x24c   : > { %958 = vrot.lane.b32.xlu0 %v925_v42, %s5149_s6  ;;  %956 = vrot.lane.b32.xlu1 %v924_v15, %s5149_s6  ;;  %v922_v42 = vpop.permute.xlu1 %921  ;;  %v931_v15 = vmul.f32 %v918_v11, %v5527_v6 }
 0x24d   : > { %v937_v11 = vmul.f32 %v922_v42, %v5465_v34 }
 0x250   : > { %962 = vrot.lane.b32.xlu0 %v927_v10, %s5149_s6  ;;  %960 = vrot.lane.b32.xlu1 %v926_v1, %s5149_s6  ;;  %v933_v1 = vmul.f32 %v922_v42, %v5443_v20  ;;  %v932_v10 = vmul.f32 %v922_v42, %v5461_v33 }
 0x254   : > { %966 = vrot.lane.b32.xlu0 %v929_v59, %s5149_s6  ;;  %964 = vrot.lane.b32.xlu1 %v928_v43, %s5149_s6  ;;  %v935_v59 = vmul.f32 %v922_v42, %v5454_v30  ;;  %v934_v43 = vmul.f32 %v922_v42, %v5473_v40 }
 0x258   : > { %970 = vrot.lane.b32.xlu0 %v931_v15, %s5149_s6  ;;  %968 = vrot.lane.b32.xlu1 %v930_v19, %s5149_s6  ;;  %v936_v19 = vmul.f32 %v922_v42, %v5482_v44  ;;  %v939_v15 = vmul.f32 %v922_v42, %v5527_v6 }
 0x25c   : > { %974 = vrot.lane.b32.xlu0 %v933_v1, %s5149_s6  ;;  %972 = vrot.lane.b32.xlu1 %v932_v10, %s5149_s6  ;;  %v938_v1 = vmul.f32 %v922_v42, %v5489_v46  ;;  %v5150_v10 = vmov 8   ;;  %v282_v42 = vmul.f32 %v5325_v13, %v5382_v38  ;;  %v374_v13 = vsel %vm366_vm0, %v5535_v17, %v5576_v53 }
 0x260   : > { %978 = vrot.lane.b32.xlu0 %v935_v59, %s5149_s6  ;;  %976 = vrot.lane.b32.xlu1 %v934_v43, %s5149_s6 }
 0x264   : > { %982 = vrot.lane.b32.xlu0 %v937_v11, %s5149_s6  ;;  %980 = vrot.lane.b32.xlu1 %v936_v19, %s5149_s6  ;;  %v280_v11 = vmul.f32 %v5368_v31, %v5374_v35  ;;  %v281_v19 = vmul.f32 %v5328_v14, %v5382_v38  ;;  %v285_v14 = vmul.f32 %v5361_v28, %v5382_v38 }
 0x268   : > { %986 = vrot.lane.b32.xlu0 %v939_v15, %s5149_s6  ;;  %984 = vrot.lane.b32.xlu1 %v938_v1, %s5149_s6  ;;  %v283_v15 = vmul.f32 %v5348_v23, %v5382_v38  ;;  %v284_v1 = vmul.f32 %v5345_v22, %v5382_v38 }
 0x26c   : > { %1032 = vperm.xlu1 %4961, %v5290_v2   ;;  %1036 = vperm.xlu0 %4962, %v5294_v3  }
 0x270   : > { %4963 = vset.pattern.permute.xlu0 %v5150_v10  ;;  %4964 = vset.pattern.permute.xlu1 %v5150_v10  ;;  %v287_v10 = vmul.f32 %v5368_v31, %v5382_v38  ;;  %v375_v31 = vsel %vm366_vm0, %v5576_v53, %v5538_v21 }
 0x271   : > { %v402_v53 = vadd.f32 %v375_v31, %v283_v15 }
 0x2be   : > { %v5724_v59 = vpop.permute.xlu0 %958  ;;  %v5726_v43 = vpop.permute.xlu1 %956 }
 0x2bf   : > { %8659 = vst [vmem:[#allocation60_spill] sm:$0xff] %v5724_v59  ;;  %8660 = vst [vmem:[#allocation61_spill] sm:$0xff] %v5726_v43  ;;  %v399_v43 = vadd.f32 %v5531_v12, %v280_v11  ;;  %v373_v59 = vsel %vm366_vm0, %v5572_v51, %v5535_v17  ;;  %v286_v11 = vmul.f32 %v5358_v27, %v5382_v38 }
 0x2c0   : > { %v376_v17 = vsel %vm366_vm0, %v5538_v21, %v5580_v55  ;;  %v401_v12 = vadd.f32 %v374_v13, %v282_v42  ;;  %v478_v38 = vsel %vm471_vm1, %v5548_v32, %v5604_v56  ;;  %v378_v27 = vsel %vm366_vm0, %v5540_v25, %v5584_v57 }
 0x2c1   : > { %v504_v51 = vadd.f32 %v5600_v9, %v399_v43  ;;  %v479_v21 = vsel %vm471_vm1, %v5604_v56, %v5550_v36  ;;  %v480_v32 = vsel %vm471_vm1, %v5550_v36, %v5612_v5  ;;  %v583_v42 = vsel %vm576_vm2, %v5636_v8, %v5568_v49 }
 0x2c2   : > { %v5749_v23 = vpop.permute.xlu0 %962  ;;  %v5751_v35 = vpop.permute.xlu1 %960  ;;  %v406_v56 = vadd.f32 %v5584_v57, %v287_v10  ;;  %v481_v36 = vsel %vm471_vm1, %v5612_v5, %v5552_v37  ;;  %v725_v8 = vsel %vm718_vm3, %v5590_v61, %v5652_v63  ;;  %v482_v61 = vsel %vm471_vm1, %v5552_v37, %v5620_v58 }
 0x2c3   : > { %8661 = vst [vmem:[#allocation62_spill] sm:$0xff] %v5749_v23  ;;  %8662 = vst [vmem:[#allocation63_spill] sm:$0xff] %v5751_v35  ;;  %v400_v23 = vadd.f32 %v373_v59, %v281_v19  ;;  %v377_v35 = vsel %vm366_vm0, %v5580_v55, %v5540_v25  ;;  %v609_v59 = vadd.f32 %v5564_v47, %v504_v51 }
 0x2c4   : > { %v403_v55 = vadd.f32 %v376_v17, %v284_v1  ;;  %v880_v25 = vsel %vm873_vm4, %v5668_v4, %v5676_v18  ;;  %v404_v19 = vadd.f32 %v377_v35, %v285_v14  ;;  %v405_v51 = vadd.f32 %v378_v27, %v286_v11 }
 0x2c5   : > { %v505_v15 = vadd.f32 %v478_v38, %v400_v23  ;;  %v751_v31 = vadd.f32 %v5650_v26, %v609_v59  ;;  %v506_v1 = vadd.f32 %v479_v21, %v401_v12  ;;  %v507_v17 = vadd.f32 %v480_v32, %v402_v53 }
 0x2c6   : > { %v5775_v13 = vpop.permute.xlu0 %966  ;;  %v5777_v43 = vpop.permute.xlu1 %964  ;;  %v584_v14 = vsel %vm576_vm2, %v5568_v49, %v5638_v48  ;;  %v585_v23 = vsel %vm576_vm2, %v5638_v48, %v5570_v50  ;;  %v881_v27 = vsel %vm873_vm4, %v5670_v29, %v5678_v24  ;;  %v508_v12 = vadd.f32 %v481_v36, %v403_v55 }
 0x2c7   : > { %8663 = vst [vmem:[#allocation64_spill] sm:$0xff] %v5775_v13  ;;  %8664 = vst [vmem:[#allocation65_spill] sm:$0xff] %v5777_v43  ;;  %v610_v13 = vadd.f32 %v583_v42, %v505_v15  ;;  %v908_v43 = vadd.f32 %v880_v25, %v751_v31  ;;  %v483_v49 = vsel %vm471_vm1, %v5620_v58, %v5554_v39  ;;  %v8665_v15 = vld [vmem:[#allocation47_spill] sm:$0xff] }
 0x2c8   : > { %v511_v48 = vadd.f32 %v5554_v39, %v406_v56  ;;  %v726_v29 = vsel %vm718_vm3, %v5652_v63, %v5594_v0  ;;  %v727_v11 = vsel %vm718_vm3, %v5594_v0, %v5654_v45  ;;  %v611_v38 = vadd.f32 %v584_v14, %v506_v1 }
 0x2c9   : > { %v752_v5 = vadd.f32 %v725_v8, %v610_v13  ;;  %v612_v53 = vadd.f32 %v585_v23, %v507_v17  ;;  %v586_v37 = vsel %vm576_vm2, %v5570_v50, %v5640_v60  ;;  %v587_v39 = vsel %vm576_vm2, %v5640_v60, %v5574_v52  ;;  %v8666_v8 = vld [vmem:[#allocation57_spill] sm:$0xff]  ;;  %v8667_v17 = vld [vmem:[#allocation59_spill] sm:$0xff] }
 0x2ca   : > { %v971_v18 = vpop.permute.xlu0 %970  ;;  %v5796_v57 = vpop.permute.xlu1 %968  ;;  %v882_v58 = vsel %vm873_vm4, %v5678_v24, %v5674_v16  ;;  %v883_v0 = vsel %vm873_vm4, %v5674_v16, %v5682_v54  ;;  %v753_v55 = vadd.f32 %v726_v29, %v611_v38  ;;  %v510_v42 = vadd.f32 %v483_v49, %v405_v51  ;;  %v8669_v38 = vld [vmem:[#allocation58_spill] sm:$0xff] }
 0x2cb   : > { %v995_v35 = vsel %vm988_vm5, %v5796_v57, %v971_v18  ;;  %v909_v21 = vadd.f32 %v881_v27, %v752_v5  ;;  %v754_v50 = vadd.f32 %v727_v11, %v612_v53  ;;  %v613_v25 = vadd.f32 %v586_v37, %v508_v12 }
 0x2cc   : > { %v5812_v10 = vadd.f32 %v995_v35, %v908_v43  ;;  %v509_v43 = vadd.f32 %v482_v61, %v404_v19  ;;  %v728_v60 = vsel %vm718_vm3, %v5654_v45, %v5598_v7  ;;  %v729_v24 = vsel %vm718_vm3, %v5598_v7, %v5656_v62  ;;  %v8668_v35 = vld [vmem:[#allocation42_spill] sm:$0xff] }
 0x2cd   : > { %v588_v16 = vsel %vm576_vm2, %v5574_v52, %v8665_v15  ;;  %v910_v19 = vadd.f32 %v882_v58, %v753_v55  ;;  %v911_v31 = vadd.f32 %v883_v0, %v754_v50  ;;  %v884_v51 = vsel %vm873_vm4, %v5682_v54, %v8666_v8 }
 0x2ce   : > { %v975_v59 = vpop.permute.xlu0 %974  ;;  %v973_v13 = vpop.permute.xlu1 %972  ;;  %v614_v56 = vadd.f32 %v587_v39, %v509_v43  ;;  %v885_v45 = vsel %vm873_vm4, %v8666_v8, %v8667_v17  ;;  %v755_v14 = vadd.f32 %v728_v60, %v613_v25  ;;  %v730_v12 = vsel %vm718_vm3, %v5656_v62, %v8668_v35 }
 0x2cf   : > { %v996_v63 = vsel %vm988_vm5, %v973_v13, %v975_v59  ;;  %v615_v61 = vadd.f32 %v588_v16, %v510_v42  ;;  %v616_v54 = vadd.f32 %v8665_v15, %v511_v48  ;;  %v886_v53 = vsel %vm873_vm4, %v8667_v17, %v8669_v38 }
 0x2d0   : > { %v5837_v32 = vadd.f32 %v996_v63, %v909_v21  ;;  %v756_v23 = vadd.f32 %v729_v24, %v614_v56  ;;  %v912_v5 = vadd.f32 %v884_v51, %v755_v14  ;;  %v887_v37 = vsel %vm873_vm4, %v8669_v38, %v5696_v41 }
 0x2d1   : > { %v758_v62 = vadd.f32 %v8668_v35, %v616_v54  ;;  %v757_v13 = vadd.f32 %v730_v12, %v615_v61  ;;  %v5152_v35 = vmov 9  }
 0x2d2   : > { %v979_v1 = vpop.permute.xlu0 %978  ;;  %v977_v36 = vpop.permute.xlu1 %976  ;;  %v913_v49 = vadd.f32 %v885_v45, %v756_v23 }
 0x2d3   : > { %v997_v18 = vsel %vm988_vm5, %v975_v59, %v977_v36  ;;  %v998_v7 = vsel %vm988_vm5, %v977_v36, %v979_v1  ;;  %v914_v58 = vadd.f32 %v886_v53, %v757_v13  ;;  %v915_v0 = vadd.f32 %v887_v37, %v758_v62 }
 0x2d4   : > { %v5856_v27 = vadd.f32 %v997_v18, %v910_v19  ;;  %v5858_v52 = vadd.f32 %v998_v7, %v911_v31 }
 0x2d6   : > { %v983_v29 = vpop.permute.xlu0 %982  ;;  %v981_v11 = vpop.permute.xlu1 %980 }
 0x2d7   : > { %v999_v21 = vsel %vm988_vm5, %v979_v1, %v981_v11  ;;  %v1000_v59 = vsel %vm988_vm5, %v981_v11, %v983_v29 }
 0x2d8   : > { %v5873_v48 = vadd.f32 %v999_v21, %v912_v5  ;;  %v5875_v39 = vadd.f32 %v1000_v59, %v913_v49 }
 0x2da   : > { %v987_v63 = vpop.permute.xlu0 %986  ;;  %v985_v43 = vpop.permute.xlu1 %984 }
 0x2db   : > { %v1001_v55 = vsel %vm988_vm5, %v983_v29, %v985_v43  ;;  %v1002_v50 = vsel %vm988_vm5, %v985_v43, %v987_v63 }
 0x2dc   : > { %v5879_v41 = vadd.f32 %v1001_v55, %v914_v58  ;;  %v5881_v42 = vadd.f32 %v1002_v50, %v915_v0 }
 0x2eb   : > { %v1033_v25 = vpop.permute.xlu1 %1032  ;;  %v1037_v16 = vpop.permute.xlu0 %1036 }
 0x2ec   : > { %v1041_v60 = vmul.f32 %v1033_v25, %v5473_v40  ;;  %v1039_v24 = vmul.f32 %v1033_v25, %v5461_v33  ;;  %v1043_v56 = vmul.f32 %v1033_v25, %v5482_v44  ;;  %v1040_v15 = vmul.f32 %v1033_v25, %v5443_v20 }
 0x2ed   : > { %v1045_v19 = vmul.f32 %v1033_v25, %v5489_v46  ;;  %v1042_v31 = vmul.f32 %v1033_v25, %v5454_v30  ;;  %v1047_v1 = vmul.f32 %v1037_v16, %v5461_v33  ;;  %v1044_v36 = vmul.f32 %v1033_v25, %v5465_v34 }
 0x2ee   : > { %1075 = vrot.lane.b32.xlu0 %v1041_v60, %s5151_s7  ;;  %1071 = vrot.lane.b32.xlu1 %v1039_v24, %s5151_s7  ;;  %v1049_v8 = vmul.f32 %v1037_v16, %v5473_v40  ;;  %v1046_v51 = vmul.f32 %v1033_v25, %v5527_v6  ;;  %v1051_v17 = vmul.f32 %v1037_v16, %v5482_v44 }
 0x2ef   : > { %v1048_v45 = vmul.f32 %v1037_v16, %v5443_v20  ;;  %v1053_v18 = vmul.f32 %v1037_v16, %v5489_v46  ;;  %v1050_v7 = vmul.f32 %v1037_v16, %v5454_v30  ;;  %v1052_v14 = vmul.f32 %v1037_v16, %v5465_v34 }
 0x2f0   : > { %v1054_v23 = vmul.f32 %v1037_v16, %v5527_v6 }
 0x2f2   : > { %1079 = vrot.lane.b32.xlu0 %v1043_v56, %s5151_s7  ;;  %1073 = vrot.lane.b32.xlu1 %v1040_v15, %s5151_s7 }
 0x2f6   : > { %1083 = vrot.lane.b32.xlu0 %v1045_v19, %s5151_s7  ;;  %1077 = vrot.lane.b32.xlu1 %v1042_v31, %s5151_s7 }
 0x2fa   : > { %1087 = vrot.lane.b32.xlu0 %v1047_v1, %s5151_s7  ;;  %1081 = vrot.lane.b32.xlu1 %v1044_v36, %s5151_s7 }
 0x2fe   : > { %1091 = vrot.lane.b32.xlu0 %v1049_v8, %s5151_s7  ;;  %1085 = vrot.lane.b32.xlu1 %v1046_v51, %s5151_s7 }
 0x302   : > { %1095 = vrot.lane.b32.xlu0 %v1051_v17, %s5151_s7  ;;  %1089 = vrot.lane.b32.xlu1 %v1048_v45, %s5151_s7 }
 0x306   : > { %1099 = vrot.lane.b32.xlu0 %v1053_v18, %s5151_s7  ;;  %1093 = vrot.lane.b32.xlu1 %v1050_v7, %s5151_s7 }
 0x30a   : > { %1147 = vperm.xlu0 %4963, %v5290_v2   ;;  %1097 = vrot.lane.b32.xlu1 %v1052_v14, %s5151_s7 }
 0x30e   : > { %1101 = vrot.lane.b32.xlu1 %v1054_v23, %s5151_s7  ;;  %4966 = vset.pattern.permute.xlu0 %v5152_v35 }
 0x312   : > { %1151 = vperm.xlu1 %4964, %v5294_v3  }
 0x316   : > { %4965 = vset.pattern.permute.xlu1 %v5152_v35 }
 0x360   : > { %v5917_v12 = vpop.permute.xlu0 %1075  ;;  %v5919_v61 = vpop.permute.xlu1 %1071 }
 0x364   : > { %v5921_v54 = vpop.permute.xlu0 %1079  ;;  %v5923_v5 = vpop.permute.xlu1 %1073 }
 0x368   : > { %v5925_v2 = vpop.permute.xlu0 %1083  ;;  %v5927_v49 = vpop.permute.xlu1 %1077 }
 0x36c   : > { %v1088_v29 = vpop.permute.xlu0 %1087  ;;  %v5929_v11 = vpop.permute.xlu1 %1081 }
 0x370   : > { %v1092_v3 = vpop.permute.xlu0 %1091  ;;  %v1086_v38 = vpop.permute.xlu1 %1085 }
 0x371   : > { %v1110_v53 = vsel %vm1103_vm6, %v5925_v2, %v1086_v38  ;;  %v5999_v38 = vld [vmem:[#allocation3 + $0x8] sm:$0xff] }
 0x372   : > { %v5934_v37 = vadd.f32 %v1110_v53, %v5812_v10  ;;  %v5154_v53 = vmov 10  }
 0x374   : > { %v1090_v21 = vpop.permute.xlu1 %1089  ;;  %v1096_v13 = vpop.permute.xlu0 %1095 }
 0x375   : > { %v1111_v59 = vsel %vm1103_vm6, %v1088_v29, %v1090_v21  ;;  %v1112_v62 = vsel %vm1103_vm6, %v1090_v21, %v1092_v3  ;;  %v5155_v21 = vmov 11  }
 0x376   : > { %v5939_v58 = vadd.f32 %v1111_v59, %v5837_v32  ;;  %v5942_v0 = vadd.f32 %v1112_v62, %v5856_v27 }
 0x378   : > { %v1094_v63 = vpop.permute.xlu1 %1093  ;;  %v1100_v25 = vpop.permute.xlu0 %1099 }
 0x379   : > { %v1113_v43 = vsel %vm1103_vm6, %v1092_v3, %v1094_v63  ;;  %v1114_v55 = vsel %vm1103_vm6, %v1094_v63, %v1096_v13  ;;  %v5996_v3 = vld [vmem:[#allocation3] sm:$0xff] }
 0x37a   : > { %v5947_v10 = vadd.f32 %v1113_v43, %v5858_v52  ;;  %v5950_v50 = vadd.f32 %v1114_v55, %v5873_v48 }
 0x37c   : > { %v1098_v60 = vpop.permute.xlu1 %1097 }
 0x37d   : > { %v1115_v24 = vsel %vm1103_vm6, %v1096_v13, %v1098_v60  ;;  %v1116_v32 = vsel %vm1103_vm6, %v1098_v60, %v1100_v25 }
 0x37e   : > { %v5955_v27 = vadd.f32 %v1115_v24, %v5875_v39  ;;  %v5958_v56 = vadd.f32 %v1116_v32, %v5879_v41 }
 0x380   : > { %v1102_v15 = vpop.permute.xlu1 %1101 }
 0x381   : > { %v1117_v16 = vsel %vm1103_vm6, %v1100_v25, %v1102_v15 }
 0x382   : > { %v5962_v52 = vadd.f32 %v1117_v16, %v5881_v42 }
 0x389   : > { %v1148_v48 = vpop.permute.xlu0 %1147 }
 0x38a   : > { %v1155_v19 = vmul.f32 %v1148_v48, %v5443_v20  ;;  %v1154_v31 = vmul.f32 %v1148_v48, %v5461_v33  ;;  %v1157_v39 = vmul.f32 %v1148_v48, %v5454_v30  ;;  %v1156_v41 = vmul.f32 %v1148_v48, %v5473_v40 }
 0x38b   : > { %v1159_v42 = vmul.f32 %v1148_v48, %v5465_v34  ;;  %v1158_v1 = vmul.f32 %v1148_v48, %v5482_v44  ;;  %v1161_v8 = vmul.f32 %v1148_v48, %v5527_v6  ;;  %v1160_v51 = vmul.f32 %v1148_v48, %v5489_v46 }
 0x38c   : > { %1188 = vrot.lane.b32.xlu0 %v1155_v19, %s5153_s8  ;;  %1186 = vrot.lane.b32.xlu1 %v1154_v31, %s5153_s8 }
 0x390   : > { %1192 = vrot.lane.b32.xlu0 %v1157_v39, %s5153_s8  ;;  %1190 = vrot.lane.b32.xlu1 %v1156_v41, %s5153_s8 }
 0x391   : > { %v1152_v36 = vpop.permute.xlu1 %1151 }
 0x392   : > { %v1163_v17 = vmul.f32 %v1152_v36, %v5443_v20  ;;  %v1162_v45 = vmul.f32 %v1152_v36, %v5461_v33  ;;  %v1165_v18 = vmul.f32 %v1152_v36, %v5454_v30  ;;  %v1164_v7 = vmul.f32 %v1152_v36, %v5473_v40 }
 0x393   : > { %v1167_v14 = vmul.f32 %v1152_v36, %v5465_v34  ;;  %v1166_v23 = vmul.f32 %v1152_v36, %v5482_v44  ;;  %v1169_v35 = vmul.f32 %v1152_v36, %v5527_v6  ;;  %v1168_v29 = vmul.f32 %v1152_v36, %v5489_v46 }
 0x394   : > { %1196 = vrot.lane.b32.xlu0 %v1159_v42, %s5153_s8  ;;  %1194 = vrot.lane.b32.xlu1 %v1158_v1, %s5153_s8 }
 0x398   : > { %1200 = vrot.lane.b32.xlu0 %v1161_v8, %s5153_s8  ;;  %1198 = vrot.lane.b32.xlu1 %v1160_v51, %s5153_s8 }
 0x39c   : > { %1204 = vrot.lane.b32.xlu0 %v1163_v17, %s5153_s8  ;;  %1202 = vrot.lane.b32.xlu1 %v1162_v45, %s5153_s8 }
 0x3a0   : > { %1208 = vrot.lane.b32.xlu0 %v1165_v18, %s5153_s8  ;;  %1206 = vrot.lane.b32.xlu1 %v1164_v7, %s5153_s8 }
 0x3a4   : > { %1212 = vrot.lane.b32.xlu0 %v1167_v14, %s5153_s8  ;;  %1210 = vrot.lane.b32.xlu1 %v1166_v23, %s5153_s8 }
 0x3a8   : > { %1216 = vrot.lane.b32.xlu0 %v1169_v35, %s5153_s8  ;;  %1214 = vrot.lane.b32.xlu1 %v1168_v29, %s5153_s8 }
 0x3ac   : > { %1262 = vperm.xlu1 %4965, %v5996_v3   ;;  %1266 = vperm.xlu0 %4966, %v5999_v38  }
 0x3b0   : > { %4967 = vset.pattern.permute.xlu1 %v5154_v53  ;;  %4968 = vset.pattern.permute.xlu0 %v5155_v21 }
 0x3fe   : > { %v6004_v59 = vpop.permute.xlu0 %1188  ;;  %v6006_v62 = vpop.permute.xlu1 %1186 }
 0x402   : > { %v6008_v13 = vpop.permute.xlu0 %1192  ;;  %v6010_v63 = vpop.permute.xlu1 %1190 }
 0x406   : > { %v6012_v43 = vpop.permute.xlu0 %1196  ;;  %v6014_v55 = vpop.permute.xlu1 %1194 }
 0x40a   : > { %v1201_v25 = vpop.permute.xlu0 %1200  ;;  %v6016_v60 = vpop.permute.xlu1 %1198 }
 0x40b   : > { %v1225_v24 = vsel %vm1218_vm7, %v6016_v60, %v1201_v25 }
 0x40c   : > { %v6021_v32 = vadd.f32 %v1225_v24, %v5934_v37 }
 0x40e   : > { %8670 = vst [vmem:[#allocation47_spill] sm:$0xff] %v6021_v32  ;;  %v1205_v15 = vpop.permute.xlu0 %1204  ;;  %v1203_v16 = vpop.permute.xlu1 %1202 }
 0x40f   : > { %v1226_v48 = vsel %vm1218_vm7, %v1203_v16, %v1205_v15 }
 0x410   : > { %v6025_v19 = vadd.f32 %v1226_v48, %v5939_v58 }
 0x412   : > { %8671 = vst [vmem:[#allocation57_spill] sm:$0xff] %v6025_v19  ;;  %v1209_v31 = vpop.permute.xlu0 %1208  ;;  %v1207_v39 = vpop.permute.xlu1 %1206 }
 0x413   : > { %v1227_v41 = vsel %vm1218_vm7, %v1205_v15, %v1207_v39  ;;  %v1228_v42 = vsel %vm1218_vm7, %v1207_v39, %v1209_v31 }
 0x414   : > { %v6030_v1 = vadd.f32 %v1227_v41, %v5942_v0  ;;  %v6033_v36 = vadd.f32 %v1228_v42, %v5947_v10 }
 0x416   : > { %8672 = vst [vmem:[#allocation59_spill] sm:$0xff] %v6030_v1  ;;  %8673 = vst [vmem:[#allocation42_spill] sm:$0xff] %v6033_v36  ;;  %v1213_v37 = vpop.permute.xlu0 %1212  ;;  %v1211_v8 = vpop.permute.xlu1 %1210 }
 0x417   : > { %v1229_v51 = vsel %vm1218_vm7, %v1209_v31, %v1211_v8  ;;  %v1230_v17 = vsel %vm1218_vm7, %v1211_v8, %v1213_v37 }
 0x418   : > { %v6038_v58 = vadd.f32 %v1229_v51, %v5950_v50  ;;  %v6041_v45 = vadd.f32 %v1230_v17, %v5955_v27  ;;  %v5157_v51 = vmov 14   ;;  %v5158_v17 = vmov 12  }
 0x41a   : > { %8674 = vst [vmem:[#allocation58_spill] sm:$0xff] %v6038_v58  ;;  %8675 = vst [vmem:[#allocation66_spill] sm:$0xff] %v6041_v45  ;;  %v1217_v18 = vpop.permute.xlu0 %1216  ;;  %v1215_v7 = vpop.permute.xlu1 %1214 }
 0x41b   : > { %v1231_v0 = vsel %vm1218_vm7, %v1213_v37, %v1215_v7  ;;  %v1232_v14 = vsel %vm1218_vm7, %v1215_v7, %v1217_v18  ;;  %v5159_v18 = vmov 17   ;;  %v5160_v7 = vmov 13  }
 0x41c   : > { %v6046_v10 = vadd.f32 %v1231_v0, %v5958_v56  ;;  %v6049_v23 = vadd.f32 %v1232_v14, %v5962_v52  ;;  %v5161_v0 = vmov 21   ;;  %v5162_v14 = vmov 15  }
 0x41e   : > { %8676 = vst [vmem:[#allocation67_spill] sm:$0xff] %v6046_v10  ;;  %8677 = vst [vmem:[#allocation68_spill] sm:$0xff] %v6049_v23 }
 0x42b   : > { %v1263_v35 = vpop.permute.xlu1 %1262  ;;  %v6059_v56 = vpop.permute.xlu0 %1266 }
 0x42c   : > { %v1271_v29 = vmul.f32 %v1263_v35, %v5473_v40  ;;  %v1269_v50 = vmul.f32 %v1263_v35, %v5461_v33  ;;  %v1273_v27 = vmul.f32 %v1263_v35, %v5482_v44  ;;  %v1270_v25 = vmul.f32 %v1263_v35, %v5443_v20  ;;  %8678 = vst [vmem:[#allocation69_spill] sm:$0xff] %v6059_v56 }
 0x42d   : > { %v1275_v52 = vmul.f32 %v1263_v35, %v5489_v46  ;;  %v1272_v24 = vmul.f32 %v1263_v35, %v5454_v30  ;;  %v1277_v15 = vmul.f32 %v6059_v56, %v5461_v33  ;;  %v1274_v16 = vmul.f32 %v1263_v35, %v5465_v34 }
 0x42e   : > { %1305 = vrot.lane.b32.xlu0 %v1271_v29, %s5156_s9  ;;  %1301 = vrot.lane.b32.xlu1 %v1269_v50, %s5156_s9  ;;  %v1279_v48 = vmul.f32 %v6059_v56, %v5473_v40  ;;  %v1276_v31 = vmul.f32 %v1263_v35, %v5527_v6  ;;  %v1281_v39 = vmul.f32 %v6059_v56, %v5482_v44  ;;  %v5163_v35 = vmov 24  }
 0x42f   : > { %v1278_v41 = vmul.f32 %v6059_v56, %v5443_v20  ;;  %v1283_v42 = vmul.f32 %v6059_v56, %v5489_v46  ;;  %v1280_v37 = vmul.f32 %v6059_v56, %v5454_v30  ;;  %v1282_v8 = vmul.f32 %v6059_v56, %v5465_v34 }
 0x430   : > { %v5164_v29 = vmov 16   ;;  %v5165_v50 = vmov 18  }
 0x432   : > { %1309 = vrot.lane.b32.xlu0 %v1273_v27, %s5156_s9  ;;  %1303 = vrot.lane.b32.xlu1 %v1270_v25, %s5156_s9  ;;  %v5166_v27 = vmov 19   ;;  %v5167_v25 = vmov 22  }
 0x436   : > { %1313 = vrot.lane.b32.xlu0 %v1275_v52, %s5156_s9  ;;  %1307 = vrot.lane.b32.xlu1 %v1272_v24, %s5156_s9  ;;  %v5168_v52 = vmov 23  }
 0x43a   : > { %1317 = vrot.lane.b32.xlu0 %v1277_v15, %s5156_s9  ;;  %1311 = vrot.lane.b32.xlu1 %v1274_v16, %s5156_s9 }
 0x43e   : > { %1321 = vrot.lane.b32.xlu0 %v1279_v48, %s5156_s9  ;;  %1315 = vrot.lane.b32.xlu1 %v1276_v31, %s5156_s9 }
 0x442   : > { %1325 = vrot.lane.b32.xlu0 %v1281_v39, %s5156_s9  ;;  %1319 = vrot.lane.b32.xlu1 %v1278_v41, %s5156_s9 }
 0x446   : > { %1329 = vrot.lane.b32.xlu0 %v1283_v42, %s5156_s9  ;;  %1323 = vrot.lane.b32.xlu1 %v1280_v37, %s5156_s9 }
 0x44a   : > { %1327 = vrot.lane.b32.xlu1 %v1282_v8, %s5156_s9  ;;  %1492 = vperm.xlu0 %4968, %v5996_v3  }
 0x44e   : > { %1377 = vperm.xlu1 %4967, %v5996_v3   ;;  %4971 = vset.pattern.permute.xlu0 %v5157_v51 }
 0x44f   : > { %1837 = vperm.xlu0 %4971, %v5996_v3  }
 0x452   : > { %4969 = vset.pattern.permute.xlu1 %v5158_v17 }
 0x453   : > { %1607 = vperm.xlu1 %4969, %v5996_v3   ;;  %4974 = vset.pattern.permute.xlu0 %v5159_v18 }
 0x454   : > { %2182 = vperm.xlu0 %4974, %v5996_v3  }
 0x457   : > { %4970 = vset.pattern.permute.xlu1 %v5160_v7 }
 0x458   : > { %1722 = vperm.xlu1 %4970, %v5996_v3   ;;  %4977 = vset.pattern.permute.xlu0 %v5161_v0 }
 0x459   : > { %2600 = vperm.xlu0 %4977, %v5996_v3  }
 0x45c   : > { %4972 = vset.pattern.permute.xlu1 %v5162_v14 }
 0x45d   : > { %1952 = vperm.xlu1 %4972, %v5996_v3   ;;  %4980 = vset.pattern.permute.xlu0 %v5163_v35 }
 0x45e   : > { %2913 = vperm.xlu0 %4980, %v5996_v3  }
 0x461   : > { %4973 = vset.pattern.permute.xlu1 %v5164_v29 }
 0x462   : > { %2067 = vperm.xlu1 %4973, %v5996_v3   ;;  %4983 = vset.pattern.permute.xlu0 %v5158_v17 }
 0x463   : > { %1611 = vperm.xlu0 %4983, %v5999_v38  }
 0x466   : > { %4975 = vset.pattern.permute.xlu1 %v5165_v50 }
 0x467   : > { %2297 = vperm.xlu1 %4975, %v5996_v3   ;;  %4986 = vset.pattern.permute.xlu0 %v5162_v14 }
 0x468   : > { %1956 = vperm.xlu0 %4986, %v5999_v38  }
 0x46b   : > { %4976 = vset.pattern.permute.xlu1 %v5166_v27 }
 0x46c   : > { %2412 = vperm.xlu1 %4976, %v5996_v3   ;;  %4989 = vset.pattern.permute.xlu0 %v5165_v50 }
 0x46d   : > { %2301 = vperm.xlu0 %4989, %v5999_v38  }
 0x470   : > { %4978 = vset.pattern.permute.xlu1 %v5167_v25 }
 0x471   : > { %2704 = vperm.xlu1 %4978, %v5996_v3   ;;  %4992 = vset.pattern.permute.xlu0 %v5167_v25 }
 0x472   : > { %2708 = vperm.xlu0 %4992, %v5999_v38  }
 0x475   : > { %4979 = vset.pattern.permute.xlu1 %v5168_v52 }
 0x476   : > { %2808 = vperm.xlu1 %4979, %v5996_v3  }
 0x47a   : > { %4981 = vset.pattern.permute.xlu1 %v5154_v53  ;;  %v5169_v53 = vmov 20  }
 0x47b   : > { %1381 = vperm.xlu1 %4981, %v5999_v38   ;;  %4997 = vset.pattern.permute.xlu0 %v5169_v53 }
 0x47f   : > { %4982 = vset.pattern.permute.xlu1 %v5155_v21 }
 0x480   : > { %1496 = vperm.xlu1 %4982, %v5999_v38  }
 0x484   : > { %4984 = vset.pattern.permute.xlu1 %v5160_v7 }
 0x485   : > { %1726 = vperm.xlu1 %4984, %v5999_v38  }
 0x489   : > { %4985 = vset.pattern.permute.xlu1 %v5157_v51 }
 0x48a   : > { %1841 = vperm.xlu1 %4985, %v5999_v38  }
 0x48e   : > { %4987 = vset.pattern.permute.xlu1 %v5164_v29 }
 0x48f   : > { %2071 = vperm.xlu1 %4987, %v5999_v38  }
 0x493   : > { %4988 = vset.pattern.permute.xlu1 %v5159_v18 }
 0x494   : > { %2186 = vperm.xlu1 %4988, %v5999_v38  }
 0x498   : > { %4990 = vset.pattern.permute.xlu1 %v5166_v27 }
 0x499   : > { %2416 = vperm.xlu1 %4990, %v5999_v38  }
 0x49d   : > { %4991 = vset.pattern.permute.xlu1 %v5161_v0 }
 0x49e   : > { %2604 = vperm.xlu1 %4991, %v5999_v38  }
 0x4a0   : > { %v6118_v21 = vpop.permute.xlu1 %1301  ;;  %v6124_v15 = vpop.permute.xlu0 %1305 }
 0x4a2   : > { %4993 = vset.pattern.permute.xlu1 %v5168_v52 }
 0x4a3   : > { %2812 = vperm.xlu1 %4993, %v5999_v38  }
 0x4a4   : > { %v6121_v24 = vpop.permute.xlu1 %1303  ;;  %v6128_v48 = vpop.permute.xlu0 %1309 }
 0x4a7   : > { %4994 = vset.pattern.permute.xlu1 %v5163_v35 }
 0x4a8   : > { %2917 = vperm.xlu1 %4994, %v5999_v38   ;;  %v6126_v16 = vpop.permute.xlu1 %1307  ;;  %v6132_v39 = vpop.permute.xlu0 %1313 }
 0x4a9   : > { %8679 = vst [vmem:[#allocation70_spill] sm:$0xff] %v6132_v39 }
 0x4ac   : > { %4995 = vset.pattern.permute.xlu1 %v5169_v53  ;;  %v6130_v31 = vpop.permute.xlu1 %1311  ;;  %v6136_v42 = vpop.permute.xlu0 %1317 }
 0x4ad   : > { %8681 = vst [vmem:[#allocation72_spill] sm:$0xff] %v6136_v42 }
 0x4b0   : > { %v6134_v41 = vpop.permute.xlu1 %1315  ;;  %v6140_v8 = vpop.permute.xlu0 %1321 }
 0x4b1   : > { %8680 = vst [vmem:[#allocation71_spill] sm:$0xff] %v6134_v41  ;;  %8683 = vst [vmem:[#allocation74_spill] sm:$0xff] %v6140_v8 }
 0x4b4   : > { %v6138_v37 = vpop.permute.xlu1 %1319  ;;  %v6144_v51 = vpop.permute.xlu0 %1325 }
 0x4b5   : > { %8682 = vst [vmem:[#allocation73_spill] sm:$0xff] %v6138_v37  ;;  %8685 = vst [vmem:[#allocation76_spill] sm:$0xff] %v6144_v51 }
 0x4b8   : > { %v6142_v38 = vpop.permute.xlu1 %1323  ;;  %v6148_v18 = vpop.permute.xlu0 %1329 }
 0x4b9   : > { %8684 = vst [vmem:[#allocation75_spill] sm:$0xff] %v6142_v38  ;;  %8687 = vst [vmem:[#allocation78_spill] sm:$0xff] %v6148_v18 }
 0x4bc   : > { %v6146_v17 = vpop.permute.xlu1 %1327 }
 0x4bd   : > { %8686 = vst [vmem:[#allocation77_spill] sm:$0xff] %v6146_v17 }
 0x4c9   : > { %v6158_v35 = vpop.permute.xlu0 %1492 }
 0x4ca   : > { %8689 = vst [vmem:[#allocation80_spill] sm:$0xff] %v6158_v35  ;;  %v1502_v27 = vmul.f32 %v6158_v35, %v5454_v30  ;;  %v1504_v52 = vmul.f32 %v6158_v35, %v5465_v34  ;;  %v1503_v53 = vmul.f32 %v6158_v35, %v5482_v44  ;;  %v1499_v8 = vmul.f32 %v6158_v35, %v5461_v33 }
 0x4cd   : > { %v6150_v7 = vpop.permute.xlu1 %1377 }
 0x4ce   : > { %8688 = vst [vmem:[#allocation79_spill] sm:$0xff] %v6150_v7  ;;  %v1388_v0 = vmul.f32 %v6150_v7, %v5482_v44  ;;  %v1387_v14 = vmul.f32 %v6150_v7, %v5454_v30  ;;  %v1390_v29 = vmul.f32 %v6150_v7, %v5489_v46  ;;  %v1389_v50 = vmul.f32 %v6150_v7, %v5465_v34  ;;  %v6218_v32 = vpop.permute.xlu0 %1837 }
 0x4cf   : > { %v1386_v25 = vmul.f32 %v6150_v7, %v5473_v40  ;;  %8695 = vst [vmem:[#allocation86_spill] sm:$0xff] %v6218_v32  ;;  %v1847_v41 = vmul.f32 %v6218_v32, %v5454_v30  ;;  %v1850_v36 = vmul.f32 %v6218_v32, %v5489_v46  ;;  %v1846_v1 = vmul.f32 %v6218_v32, %v5473_v40 }
 0x4d0   : > { %1424 = vrot.lane.b32.xlu1 %v1388_v0, %s5170_s10  ;;  %1422 = vrot.lane.b32.xlu0 %v1387_v14, %s5170_s10  ;;  %v1501_v14 = vmul.f32 %v6158_v35, %v5473_v40 }
 0x4d2   : > { %v6176_v0 = vpop.permute.xlu1 %1607 }
 0x4d3   : > { %8690 = vst [vmem:[#allocation81_spill] sm:$0xff] %v6176_v0  ;;  %v6296_v18 = vpop.permute.xlu0 %2182 }
 0x4d4   : > { %1428 = vrot.lane.b32.xlu1 %v1390_v29, %s5170_s10  ;;  %1426 = vrot.lane.b32.xlu0 %v1389_v50, %s5170_s10  ;;  %v1505_v29 = vmul.f32 %v6158_v35, %v5489_v46  ;;  %8701 = vst [vmem:[#allocation92_spill] sm:$0xff] %v6296_v18  ;;  %v2192_v51 = vmul.f32 %v6296_v18, %v5454_v30 }
 0x4d5   : > { %v2191_v37 = vmul.f32 %v6296_v18, %v5473_v40 }
 0x4d7   : > { %v6184_v50 = vpop.permute.xlu1 %1722 }
 0x4d8   : > { %1537 = vrot.lane.b32.xlu1 %v1502_v27, %s5171_s11  ;;  %1420 = vrot.lane.b32.xlu0 %v1386_v25, %s5170_s10  ;;  %8691 = vst [vmem:[#allocation82_spill] sm:$0xff] %v6184_v50  ;;  %v1618_v27 = vmul.f32 %v6176_v0, %v5482_v44  ;;  %v1617_v25 = vmul.f32 %v6176_v0, %v5454_v30 }
 0x4dc   : > { %1541 = vrot.lane.b32.xlu1 %v1504_v52, %s5171_s11  ;;  %1539 = vrot.lane.b32.xlu0 %v1503_v53, %s5171_s11  ;;  %v6192_v52 = vpop.permute.xlu1 %1952  ;;  %v1620_v53 = vmul.f32 %v6176_v0, %v5489_v46 }
 0x4dd   : > { %8692 = vst [vmem:[#allocation83_spill] sm:$0xff] %v6192_v52 }
 0x4e0   : > { %1535 = vrot.lane.b32.xlu1 %v1501_v14, %s5171_s11  ;;  %1543 = vrot.lane.b32.xlu0 %v1505_v29, %s5171_s11  ;;  %v1619_v14 = vmul.f32 %v6176_v0, %v5465_v34  ;;  %v1732_v29 = vmul.f32 %v6184_v50, %v5454_v30 }
 0x4e1   : > { %v6204_v23 = vpop.permute.xlu1 %2067 }
 0x4e2   : > { %8693 = vst [vmem:[#allocation84_spill] sm:$0xff] %v6204_v23  ;;  %v2080_v45 = vmul.f32 %v6204_v23, %v5489_v46 }
 0x4e4   : > { %1654 = vrot.lane.b32.xlu1 %v1618_v27, %s5172_s12  ;;  %1652 = vrot.lane.b32.xlu0 %v1617_v25, %s5172_s12  ;;  %v1616_v27 = vmul.f32 %v6176_v0, %v5473_v40  ;;  %v1733_v25 = vmul.f32 %v6184_v50, %v5482_v44 }
 0x4e8   : > { %1658 = vrot.lane.b32.xlu1 %v1620_v53, %s5172_s12  ;;  %1656 = vrot.lane.b32.xlu0 %v1619_v14, %s5172_s12  ;;  %v1734_v53 = vmul.f32 %v6184_v50, %v5465_v34  ;;  %v6214_v14 = vpop.permute.xlu1 %2297 }
 0x4e9   : > { %8694 = vst [vmem:[#allocation85_spill] sm:$0xff] %v6214_v14 }
 0x4ec   : > { %1650 = vrot.lane.b32.xlu0 %v1616_v27, %s5172_s12  ;;  %1767 = vrot.lane.b32.xlu1 %v1732_v29, %s5173_s13  ;;  %v1735_v27 = vmul.f32 %v6184_v50, %v5489_v46  ;;  %v1731_v29 = vmul.f32 %v6184_v50, %v5473_v40  ;;  %v6228_v58 = vpop.permute.xlu1 %2412 }
 0x4ed   : > { %8696 = vst [vmem:[#allocation87_spill] sm:$0xff] %v6228_v58 }
 0x4f0   : > { %1769 = vrot.lane.b32.xlu0 %v1733_v25, %s5173_s13  ;;  %1771 = vrot.lane.b32.xlu1 %v1734_v53, %s5173_s13  ;;  %v1385_v25 = vmul.f32 %v6150_v7, %v5443_v20  ;;  %v1848_v53 = vmul.f32 %v6218_v32, %v5482_v44 }
 0x4f4   : > { %1773 = vrot.lane.b32.xlu0 %v1735_v27, %s5173_s13  ;;  %1765 = vrot.lane.b32.xlu1 %v1731_v29, %s5173_s13  ;;  %v1849_v27 = vmul.f32 %v6218_v32, %v5465_v34  ;;  %v6238_v29 = vpop.permute.xlu1 %2704 }
 0x4f8   : > { %1418 = vrot.lane.b32.xlu0 %v1385_v25, %s5170_s10  ;;  %1882 = vrot.lane.b32.xlu1 %v1847_v41, %s5174_s14  ;;  %v1384_v25 = vmul.f32 %v6150_v7, %v5461_v33  ;;  %v6248_v41 = vpop.permute.xlu1 %2808  ;;  %v1844_v7 = vmul.f32 %v6218_v32, %v5461_v33 }
 0x4fc   : > { %1884 = vrot.lane.b32.xlu0 %v1848_v53, %s5174_s14  ;;  %1886 = vrot.lane.b32.xlu1 %v1849_v27, %s5174_s14  ;;  %v1500_v53 = vmul.f32 %v6158_v35, %v5443_v20  ;;  %v1963_v27 = vmul.f32 %v6192_v52, %v5482_v44  ;;  %v6260_v38 = vpop.permute.xlu1 %1381 }
 0x4fd   : > { %8697 = vst [vmem:[#allocation88_spill] sm:$0xff] %v6260_v38 }
 0x500   : > { %1888 = vrot.lane.b32.xlu0 %v1850_v36, %s5174_s14  ;;  %1416 = vrot.lane.b32.xlu1 %v1384_v25, %s5170_s10  ;;  %v1962_v36 = vmul.f32 %v6192_v52, %v5454_v30  ;;  %v1965_v25 = vmul.f32 %v6192_v52, %v5489_v46 }
 0x504   : > { %1880 = vrot.lane.b32.xlu0 %v1846_v1, %s5174_s14  ;;  %1533 = vrot.lane.b32.xlu1 %v1500_v53, %s5171_s11  ;;  %v1964_v1 = vmul.f32 %v6192_v52, %v5465_v34  ;;  %v6270_v53 = vpop.permute.xlu1 %1496 }
 0x505   : > { %8698 = vst [vmem:[#allocation89_spill] sm:$0xff] %v6270_v53 }
 0x508   : > { %1999 = vrot.lane.b32.xlu1 %v1963_v27, %s5175_s16  ;;  %1997 = vrot.lane.b32.xlu0 %v1962_v36, %s5175_s16  ;;  %v1961_v27 = vmul.f32 %v6192_v52, %v5473_v40  ;;  %v1615_v36 = vmul.f32 %v6176_v0, %v5443_v20  ;;  %v6282_v10 = vpop.permute.xlu1 %1726 }
 0x509   : > { %8699 = vst [vmem:[#allocation90_spill] sm:$0xff] %v6282_v10 }
 0x50c   : > { %2003 = vrot.lane.b32.xlu1 %v1965_v25, %s5175_s16  ;;  %2001 = vrot.lane.b32.xlu0 %v1964_v1, %s5175_s16  ;;  %v2077_v25 = vmul.f32 %v6204_v23, %v5454_v30  ;;  %v2078_v1 = vmul.f32 %v6204_v23, %v5482_v44 }
 0x510   : > { %1531 = vrot.lane.b32.xlu0 %v1499_v8, %s5171_s11  ;;  %1995 = vrot.lane.b32.xlu1 %v1961_v27, %s5175_s16  ;;  %v2079_v8 = vmul.f32 %v6204_v23, %v5465_v34  ;;  %v6292_v27 = vpop.permute.xlu1 %1841 }
 0x511   : > { %8700 = vst [vmem:[#allocation91_spill] sm:$0xff] %v6292_v27 }
 0x514   : > { %1648 = vrot.lane.b32.xlu0 %v1615_v36, %s5172_s12  ;;  %2112 = vrot.lane.b32.xlu1 %v2077_v25, %s5176_s17  ;;  %v1614_v36 = vmul.f32 %v6176_v0, %v5461_v33  ;;  %v2076_v25 = vmul.f32 %v6204_v23, %v5473_v40  ;;  %v2308_v0 = vmul.f32 %v6214_v14, %v5482_v44 }
 0x518   : > { %2114 = vrot.lane.b32.xlu0 %v2078_v1, %s5176_s17  ;;  %2116 = vrot.lane.b32.xlu1 %v2079_v8, %s5176_s17  ;;  %v6304_v1 = vpop.permute.xlu0 %2600  ;;  %v6306_v8 = vpop.permute.xlu1 %2071 }
 0x519   : > { %8702 = vst [vmem:[#allocation93_spill] sm:$0xff] %v6306_v8  ;;  %v2305_v8 = vmul.f32 %v6214_v14, %v5443_v20 }
 0x51c   : > { %2118 = vrot.lane.b32.xlu0 %v2080_v45, %s5176_s17  ;;  %2528 = vperm.xlu1 %4995, %v5996_v3   ;;  %v8703_v45 = vmov 0   ;;  %v1730_v3 = vmul.f32 %v6184_v50, %v5443_v20  ;;  %v6317_v17 = vpop.permute.xlu0 %2913  ;;  %v6319_v56 = vpop.permute.xlu1 %2186 }
 0x51d   : > { %8704 = vst [vmem:[#allocation94_spill] sm:$0xff] %v6319_v56 }
 0x520   : > { %1646 = vrot.lane.b32.xlu0 %v1614_v36, %s5172_s12  ;;  %2110 = vrot.lane.b32.xlu1 %v2076_v25, %s5176_s17  ;;  %v2193_v36 = vmul.f32 %v6296_v18, %v5482_v44  ;;  %v2194_v25 = vmul.f32 %v6296_v18, %v5465_v34  ;;  %v6331_v19 = vpop.permute.xlu0 %1611  ;;  %v6333_v42 = vpop.permute.xlu1 %2416 }
 0x521   : > { %4996 = vset.pattern.permute.xlu1 %v8703_v45  ;;  %8705 = vst [vmem:[#allocation95_spill] sm:$0xff] %v6331_v19  ;;  %8706 = vst [vmem:[#allocation96_spill] sm:$0xff] %v6333_v42 }
 0x524   : > { %1763 = vrot.lane.b32.xlu0 %v1730_v3, %s5173_s13  ;;  %2227 = vrot.lane.b32.xlu1 %v2192_v51, %s5177_s20  ;;  %v2195_v3 = vmul.f32 %v6296_v18, %v5489_v46  ;;  %v1729_v51 = vmul.f32 %v6184_v50, %v5461_v33  ;;  %v6345_v50 = vpop.permute.xlu1 %2604 }
 0x525   : > { %8708 = vst [vmem:[#allocation98_spill] sm:$0xff] %v6345_v50  ;;  %v8721_v50 = vld [vmem:[#allocation16_spill] sm:$0xff] }
 0x528   : > { %2229 = vrot.lane.b32.xlu0 %v2193_v36, %s5177_s20  ;;  %2231 = vrot.lane.b32.xlu1 %v2194_v25, %s5177_s20  ;;  %v1845_v36 = vmul.f32 %v6218_v32, %v5443_v20  ;;  %v6343_v25 = vpop.permute.xlu0 %1956  ;;  %v6359_v35 = vpop.permute.xlu1 %2812  ;;  %v2424_v32 = vmul.f32 %v6228_v58, %v5465_v34 }
 0x529   : > { %8707 = vst [vmem:[#allocation97_spill] sm:$0xff] %v6343_v25  ;;  %8710 = vst [vmem:[#allocation100_spill] sm:$0xff] %v6359_v35  ;;  %v1960_v35 = vmul.f32 %v6192_v52, %v5443_v20 }
 0x52c   : > { %2233 = vrot.lane.b32.xlu0 %v2195_v3, %s5177_s20  ;;  %1761 = vrot.lane.b32.xlu1 %v1729_v51, %s5173_s13  ;;  %v2307_v3 = vmul.f32 %v6214_v14, %v5454_v30  ;;  %v2309_v51 = vmul.f32 %v6214_v14, %v5465_v34  ;;  %v6371_v6 = vpop.permute.xlu1 %2917 }
 0x52d   : > { %8712 = vst [vmem:[#allocation102_spill] sm:$0xff] %v6371_v6 }
 0x530   : > { %2225 = vrot.lane.b32.xlu0 %v2191_v37, %s5177_s20  ;;  %1878 = vrot.lane.b32.xlu1 %v1845_v36, %s5174_s14  ;;  %v2310_v37 = vmul.f32 %v6214_v14, %v5489_v46  ;;  %v6357_v36 = vpop.permute.xlu0 %2301 }
 0x531   : > { %8709 = vst [vmem:[#allocation99_spill] sm:$0xff] %v6357_v36 }
 0x534   : > { %2344 = vrot.lane.b32.xlu1 %v2308_v0, %s5178_s23  ;;  %2342 = vrot.lane.b32.xlu0 %v2307_v3, %s5178_s23  ;;  %v2306_v0 = vmul.f32 %v6214_v14, %v5473_v40  ;;  %v6369_v3 = vpop.permute.xlu0 %2708 }
 0x535   : > { %8711 = vst [vmem:[#allocation101_spill] sm:$0xff] %v6369_v3  ;;  %v1959_v3 = vmul.f32 %v6192_v52, %v5461_v33 }
 0x538   : > { %2348 = vrot.lane.b32.xlu1 %v2310_v37, %s5178_s23  ;;  %2346 = vrot.lane.b32.xlu0 %v2309_v51, %s5178_s23  ;;  %v2422_v37 = vmul.f32 %v6228_v58, %v5454_v30 }
 0x53c   : > { %1876 = vrot.lane.b32.xlu0 %v1844_v7, %s5174_s14  ;;  %2340 = vrot.lane.b32.xlu1 %v2306_v0, %s5178_s23  ;;  %v2423_v0 = vmul.f32 %v6228_v58, %v5482_v44 }
 0x540   : > { %1993 = vrot.lane.b32.xlu0 %v1960_v35, %s5175_s16  ;;  %2457 = vrot.lane.b32.xlu1 %v2422_v37, %s5179_s24  ;;  %v2425_v37 = vmul.f32 %v6228_v58, %v5489_v46  ;;  %v6410_v46 = vld [vmem:[%s5315_s26 + $0x1] sm:$0x7f] }
 0x542   : > { %v6379_v51 = vpop.permute.xlu0 %1422  ;;  %v6381_v7 = vpop.permute.xlu1 %1424 }
 0x543   : > { %8713 = vst [vmem:[#allocation103_spill] sm:$0xff] %v6379_v51  ;;  %8714 = vst [vmem:[#allocation104_spill] sm:$0xff] %v6381_v7 }
 0x544   : > { %2459 = vrot.lane.b32.xlu0 %v2423_v0, %s5179_s24  ;;  %2461 = vrot.lane.b32.xlu1 %v2424_v32, %s5179_s24  ;;  %v2075_v32 = vmul.f32 %v6204_v23, %v5443_v20  ;;  %v2421_v0 = vmul.f32 %v6228_v58, %v5473_v40 }
 0x546   : > { %v6389_v6 = vpop.permute.xlu0 %1426  ;;  %v6391_v35 = vpop.permute.xlu1 %1428 }
 0x547   : > { %8715 = vst [vmem:[#allocation105_spill] sm:$0xff] %v6389_v6  ;;  %8716 = vst [vmem:[#allocation106_spill] sm:$0xff] %v6391_v35  ;;  %v8729_v6 = vld [vmem:[#allocation15_spill] sm:$0xff] }
 0x548   : > { %2463 = vrot.lane.b32.xlu0 %v2425_v37, %s5179_s24  ;;  %1991 = vrot.lane.b32.xlu1 %v1959_v3, %s5175_s16  ;;  %v2190_v3 = vmul.f32 %v6296_v18, %v5443_v20  ;;  %v6446_v42 = vrot.slane %v6410_v46, %v8729_v6 }
 0x54a   : > { %v6399_v45 = vpop.permute.xlu0 %1420  ;;  %v6401_v34 = vpop.permute.xlu1 %1537  ;;  %8730 = vst [vmem:[#allocation15_spill] sm:$0xff] %v6446_v42 }
 0x54b   : > { %8717 = vst [vmem:[#allocation107_spill] sm:$0xff] %v6399_v45  ;;  %8718 = vst [vmem:[#allocation108_spill] sm:$0xff] %v6401_v34  ;;  %v2074_v34 = vmul.f32 %v6204_v23, %v5461_v33 }
 0x54c   : > { %2108 = vrot.lane.b32.xlu1 %v2075_v32, %s5176_s17  ;;  %2455 = vrot.lane.b32.xlu0 %v2421_v0, %s5179_s24  ;;  %v6424_v32 = vrot.slane %v6410_v46, %v8721_v50  ;;  %v8723_v0 = vld [vmem:[#allocation13_spill] sm:$0xff] }
 0x54d   : > { %v6428_v45 = vrot.slane %v6410_v46, %v8723_v0 }
 0x54e   : > { %v6412_v52 = vpop.permute.xlu0 %1539  ;;  %v6414_v37 = vpop.permute.xlu1 %1541  ;;  %8722 = vst [vmem:[#allocation16_spill] sm:$0xff] %v6424_v32  ;;  %v2611_v35 = vmul.f32 %v6304_v1, %v6424_v32 }
 0x54f   : > { %8719 = vst [vmem:[#allocation109_spill] sm:$0xff] %v6412_v52  ;;  %8720 = vst [vmem:[#allocation110_spill] sm:$0xff] %v6414_v37 }
 0x550   : > { %2223 = vrot.lane.b32.xlu1 %v2190_v3, %s5177_s20  ;;  %2106 = vrot.lane.b32.xlu0 %v2074_v34, %s5176_s17  ;;  %8724 = vst [vmem:[#allocation13_spill] sm:$0xff] %v6428_v45  ;;  %v2610_v3 = vmul.f32 %v6304_v1, %v6428_v45  ;;  %v8727_v34 = vld [vmem:[#allocation18_spill] sm:$0xff] }
 0x551   : > { %v6442_v23 = vrot.slane %v6410_v46, %v8727_v34 }
 0x552   : > { %v6430_v52 = vpop.permute.xlu0 %1543  ;;  %v6432_v37 = vpop.permute.xlu1 %1535 }
 0x553   : > { %8725 = vst [vmem:[#allocation111_spill] sm:$0xff] %v6430_v52  ;;  %8726 = vst [vmem:[#allocation112_spill] sm:$0xff] %v6432_v37  ;;  %v2613_v51 = vmul.f32 %v6304_v1, %v6442_v23 }
 0x554   : > { %2643 = vrot.lane.b32.xlu1 %v2611_v35, %s5142_s27  ;;  %2641 = vrot.lane.b32.xlu0 %v2610_v3, %s5142_s27  ;;  %8728 = vst [vmem:[#allocation18_spill] sm:$0xff] %v6442_v23  ;;  %v2612_v35 = vmul.f32 %v6304_v1, %v6446_v42  ;;  %v8733_v3 = vld [vmem:[#allocation14_spill] sm:$0xff] }
 0x555   : > { %v6460_v7 = vrot.slane %v6410_v46, %v8733_v3 }
 0x556   : > { %v6448_v52 = vpop.permute.xlu0 %1652  ;;  %v6450_v37 = vpop.permute.xlu1 %1654 }
 0x557   : > { %8731 = vst [vmem:[#allocation113_spill] sm:$0xff] %v6448_v52  ;;  %8732 = vst [vmem:[#allocation114_spill] sm:$0xff] %v6450_v37  ;;  %v2609_v52 = vmul.f32 %v6304_v1, %v6460_v7  ;;  %v2189_v37 = vmul.f32 %v6296_v18, %v5461_v33 }
 0x558   : > { %2647 = vrot.lane.b32.xlu1 %v2613_v51, %s5142_s27  ;;  %2645 = vrot.lane.b32.xlu0 %v2612_v35, %s5142_s27  ;;  %8734 = vst [vmem:[#allocation14_spill] sm:$0xff] %v6460_v7 }
 0x55a   : > { %v6462_v56 = vpop.permute.xlu0 %1656  ;;  %v6464_v36 = vpop.permute.xlu1 %1658 }
 0x55b   : > { %8735 = vst [vmem:[#allocation115_spill] sm:$0xff] %v6462_v56  ;;  %8736 = vst [vmem:[#allocation116_spill] sm:$0xff] %v6464_v36  ;;  %v2714_v36 = vmul.f32 %v6238_v29, %v6428_v45 }
 0x55c   : > { %2639 = vrot.lane.b32.xlu1 %v2609_v52, %s5142_s27  ;;  %2221 = vrot.lane.b32.xlu0 %v2189_v37, %s5177_s20  ;;  %v2715_v52 = vmul.f32 %v6238_v29, %v6424_v32  ;;  %v2716_v37 = vmul.f32 %v6238_v29, %v6446_v42 }
 0x55e   : > { %v6472_v51 = vpop.permute.xlu0 %1650  ;;  %v6474_v35 = vpop.permute.xlu1 %1767 }
 0x55f   : > { %8737 = vst [vmem:[#allocation117_spill] sm:$0xff] %v6472_v51  ;;  %8738 = vst [vmem:[#allocation118_spill] sm:$0xff] %v6474_v35  ;;  %v2713_v51 = vmul.f32 %v6238_v29, %v6460_v7 }
 0x560   : > { %2338 = vrot.lane.b32.xlu0 %v2305_v8, %s5178_s23  ;;  %2745 = vrot.lane.b32.xlu1 %v2714_v36, %s5143_s28  ;;  %v3052_v8 = vld [vmem:[%s8379_s2] sm:$0xff] }
 0x562   : > { %v6482_v56 = vpop.permute.xlu0 %1769  ;;  %v6484_v18 = vpop.permute.xlu1 %1771 }
 0x563   : > { %8739 = vst [vmem:[#allocation119_spill] sm:$0xff] %v6482_v56  ;;  %8740 = vst [vmem:[#allocation120_spill] sm:$0xff] %v6484_v18  ;;  %v2717_v18 = vmul.f32 %v6238_v29, %v6442_v23 }
 0x564   : > { %2747 = vrot.lane.b32.xlu0 %v2715_v52, %s5143_s28  ;;  %2749 = vrot.lane.b32.xlu1 %v2716_v37, %s5143_s28  ;;  %v2304_v37 = vmul.f32 %v6214_v14, %v5461_v33 }
 0x566   : > { %v6495_v35 = vpop.permute.xlu0 %1773  ;;  %v6497_v36 = vpop.permute.xlu1 %1765 }
 0x567   : > { %8741 = vst [vmem:[#allocation121_spill] sm:$0xff] %v6495_v35  ;;  %8742 = vst [vmem:[#allocation122_spill] sm:$0xff] %v6497_v36 }
 0x568   : > { %2751 = vrot.lane.b32.xlu0 %v2717_v18, %s5143_s28  ;;  %3056 = vperm.xlu1 %4996, %v3052_v8   ;;  %v2420_v18 = vmul.f32 %v6228_v58, %v5443_v20  ;;  %v2818_v8 = vmul.f32 %v6248_v41, %v6428_v45 }
 0x56a   : > { %v6502_v56 = vpop.permute.xlu0 %1418  ;;  %v6504_v52 = vpop.permute.xlu1 %1882 }
 0x56b   : > { %8743 = vst [vmem:[#allocation123_spill] sm:$0xff] %v6502_v56  ;;  %8744 = vst [vmem:[#allocation124_spill] sm:$0xff] %v6504_v52  ;;  %v8802_v56 = vld [vmem:[#allocation40_spill] sm:$0xff] }
 0x56c   : > { %2336 = vrot.lane.b32.xlu0 %v2304_v37, %s5178_s23  ;;  %2743 = vrot.lane.b32.xlu1 %v2713_v51, %s5143_s28  ;;  %v2819_v37 = vmul.f32 %v6248_v41, %v6424_v32  ;;  %v2820_v51 = vmul.f32 %v6248_v41, %v6446_v42 }
 0x56e   : > { %v6512_v36 = vpop.permute.xlu0 %1884  ;;  %v6514_v35 = vpop.permute.xlu1 %1886 }
 0x56f   : > { %8745 = vst [vmem:[#allocation125_spill] sm:$0xff] %v6512_v36  ;;  %8746 = vst [vmem:[#allocation126_spill] sm:$0xff] %v6514_v35  ;;  %v6531_v35 = vld [vmem:[%s5315_s26 + $0x1] sm:$0xff]  ;;  %s4869_s26 = smul.u32 24, %s9044_s18 }
 0x570   : > { %2453 = vrot.lane.b32.xlu0 %v2420_v18, %s5179_s24  ;;  %2849 = vrot.lane.b32.xlu1 %v2818_v8, %s5144_s29  ;;  %v2821_v18 = vmul.f32 %v6248_v41, %v6442_v23  ;;  %v2419_v8 = vmul.f32 %v6228_v58, %v5461_v33  ;;  %v6543_v32 = vrot.slane %v6531_v35, %v8723_v0 }
 0x571   : > { %v6557_v58 = vrot.slane %v6531_v35, %v8721_v50  ;;  %v6561_v0 = vrot.slane %v6531_v35, %v8729_v6  ;;  %v6573_v50 = vrot.slane %v6531_v35, %v8727_v34  ;;  %v6577_v6 = vrot.slane %v6531_v35, %v8733_v3  ;;  %v8760_v34 = vld [vmem:[#allocation9_spill] sm:$0xff] }
 0x572   : > { %v6522_v14 = vpop.permute.xlu0 %1888  ;;  %v6528_v52 = vpop.permute.xlu1 %1416  ;;  %8750 = vst [vmem:[#allocation130_spill] sm:$0xff] %v6543_v32  ;;  %v2959_v23 = vmul.f32 %v6543_v32, %v6317_v17  ;;  %v6593_v3 = vrot.slane %v6410_v46, %v8760_v34 }
 0x573   : > { %8747 = vst [vmem:[#allocation127_spill] sm:$0xff] %v6522_v14  ;;  %8748 = vst [vmem:[#allocation128_spill] sm:$0xff] %v6528_v52  ;;  %v2961_v32 = vmul.f32 %v6561_v0, %v6317_v17 }
 0x574   : > { %2851 = vrot.lane.b32.xlu0 %v2819_v37, %s5144_s29  ;;  %2853 = vrot.lane.b32.xlu1 %v2820_v51, %s5144_s29  ;;  %v2817_v51 = vmul.f32 %v6248_v41, %v6460_v7  ;;  %8753 = vst [vmem:[#allocation133_spill] sm:$0xff] %v6557_v58  ;;  %8754 = vst [vmem:[#allocation134_spill] sm:$0xff] %v6561_v0  ;;  %v2958_v0 = vmul.f32 %v6577_v6, %v6317_v17 }
 0x575   : > { %8756 = vst [vmem:[#allocation136_spill] sm:$0xff] %v6573_v50  ;;  %8757 = vst [vmem:[#allocation137_spill] sm:$0xff] %v6577_v6 }
 0x576   : > { %v6535_v36 = vpop.permute.xlu0 %1880  ;;  %v6547_v42 = vpop.permute.xlu1 %1533  ;;  %8761 = vst [vmem:[#allocation9_spill] sm:$0xff] %v6593_v3 }
 0x577   : > { %8749 = vst [vmem:[#allocation129_spill] sm:$0xff] %v6535_v36  ;;  %8751 = vst [vmem:[#allocation131_spill] sm:$0xff] %v6547_v42  ;;  %v8800_v42 = vld [vmem:[#allocation39_spill] sm:$0xff] }
 0x578   : > { %2855 = vrot.lane.b32.xlu0 %v2821_v18, %s5144_s29  ;;  %2451 = vrot.lane.b32.xlu1 %v2419_v8, %s5179_s24  ;;  %v2960_v8 = vmul.f32 %v6557_v58, %v6317_v17  ;;  %v8762_v58 = vld [vmem:[#allocation10_spill] sm:$0xff] }
 0x57a   : > { %v6549_v37 = vpop.permute.xlu0 %1997 }
 0x57b   : > { %8752 = vst [vmem:[#allocation132_spill] sm:$0xff] %v6549_v37  ;;  %v6579_v37 = vpop.permute.xlu1 %1999 }
 0x57c   : > { %2847 = vrot.lane.b32.xlu0 %v2817_v51, %s5144_s29  ;;  %2990 = vrot.lane.b32.xlu1 %v2959_v23, %s5145_s30  ;;  %8758 = vst [vmem:[#allocation138_spill] sm:$0xff] %v6579_v37  ;;  %v2962_v51 = vmul.f32 %v6573_v50, %v6317_v17  ;;  %v2608_v50 = vmul.f32 %v6304_v1, %v6593_v3  ;;  %v8798_v37 = vld [vmem:[#allocation27_spill] sm:$0xff] }
 0x57e   : > { %v6565_v18 = vpop.permute.xlu0 %2001 }
 0x57f   : > { %8755 = vst [vmem:[#allocation135_spill] sm:$0xff] %v6565_v18 }
 0x580   : > { %2992 = vrot.lane.b32.xlu0 %v2960_v8, %s5145_s30  ;;  %2994 = vrot.lane.b32.xlu1 %v2961_v32, %s5145_s30  ;;  %v6597_v8 = vrot.slane %v6410_v46, %v8762_v58  ;;  %v6599_v32 = vpop.permute.xlu1 %2003  ;;  %v2712_v46 = vmul.f32 %v6238_v29, %v6593_v3 }
 0x581   : > { %8764 = vst [vmem:[#allocation140_spill] sm:$0xff] %v6599_v32 }
 0x582   : > { %v6583_v23 = vpop.permute.xlu0 %1531  ;;  %8763 = vst [vmem:[#allocation10_spill] sm:$0xff] %v6597_v8  ;;  %v2711_v6 = vmul.f32 %v6238_v29, %v6597_v8 }
 0x583   : > { %8759 = vst [vmem:[#allocation139_spill] sm:$0xff] %v6583_v23 }
 0x584   : > { %2996 = vrot.lane.b32.xlu0 %v2962_v51, %s5145_s30  ;;  %2988 = vrot.lane.b32.xlu1 %v2958_v0, %s5145_s30  ;;  %v2607_v51 = vmul.f32 %v6304_v1, %v6597_v8  ;;  %v6615_v32 = vpop.permute.xlu1 %1995  ;;  %v2816_v1 = vmul.f32 %v6248_v41, %v6593_v3 }
 0x585   : > { %8767 = vst [vmem:[#allocation143_spill] sm:$0xff] %v6615_v32  ;;  %v8795_v32 = vld [vmem:[#allocation25_spill] sm:$0xff] }
 0x586   : > { %v6601_v23 = vpop.permute.xlu0 %1648 }
 0x587   : > { %8765 = vst [vmem:[#allocation141_spill] sm:$0xff] %v6601_v23 }
 0x588   : > { %2637 = vrot.lane.b32.xlu0 %v2608_v50, %s5142_s27  ;;  %2635 = vrot.lane.b32.xlu1 %v2607_v51, %s5142_s27  ;;  %v2815_v50 = vmul.f32 %v6248_v41, %v6597_v8  ;;  %v6627_v51 = vpop.permute.xlu1 %2112  ;;  %v1395_v41 = vmul.f32 %v6260_v38, %v5454_v30 }
 0x589   : > { %8769 = vst [vmem:[#allocation145_spill] sm:$0xff] %v6627_v51 }
 0x58a   : > { %v6609_v0 = vpop.permute.xlu0 %2114 }
 0x58b   : > { %8766 = vst [vmem:[#allocation142_spill] sm:$0xff] %v6609_v0  ;;  %v8794_v0 = vld [vmem:[#allocation34_spill] sm:$0xff] }
 0x58c   : > { %2741 = vrot.lane.b32.xlu0 %v2712_v46, %s5143_s28  ;;  %2739 = vrot.lane.b32.xlu1 %v2711_v6, %s5143_s28  ;;  %v1393_v46 = vmul.f32 %v6260_v38, %v5443_v20  ;;  %v1394_v6 = vmul.f32 %v6260_v38, %v5473_v40  ;;  %v6647_v8 = vpop.permute.xlu1 %2116 }
 0x58d   : > { %8773 = vst [vmem:[#allocation149_spill] sm:$0xff] %v6647_v8  ;;  %v8793_v8 = vld [vmem:[#allocation24_spill] sm:$0xff] }
 0x58e   : > { %v6619_v23 = vpop.permute.xlu0 %2118 }
 0x58f   : > { %8768 = vst [vmem:[#allocation144_spill] sm:$0xff] %v6619_v23 }
 0x590   : > { %2845 = vrot.lane.b32.xlu0 %v2816_v1, %s5144_s29  ;;  %2843 = vrot.lane.b32.xlu1 %v2815_v50, %s5144_s29  ;;  %v1396_v1 = vmul.f32 %v6260_v38, %v5482_v44  ;;  %v6645_v50 = vrot.slane %v6531_v35, %v8760_v34 }
 0x592   : > { %v6629_v29 = vpop.permute.xlu0 %1646  ;;  %8772 = vst [vmem:[#allocation148_spill] sm:$0xff] %v6645_v50 }
 0x593   : > { %8770 = vst [vmem:[#allocation146_spill] sm:$0xff] %v6629_v29  ;;  %v6659_v29 = vrot.slane %v6531_v35, %v8762_v58  ;;  %v1509_v35 = vmul.f32 %v6270_v53, %v5473_v40 }
 0x594   : > { %1434 = vrot.lane.b32.xlu0 %v1393_v46, %s5170_s10  ;;  %1436 = vrot.lane.b32.xlu1 %v1394_v6, %s5170_s10  ;;  %v2957_v6 = vmul.f32 %v6645_v50, %v6317_v17  ;;  %v1508_v50 = vmul.f32 %v6270_v53, %v5443_v20 }
 0x595   : > { %8775 = vst [vmem:[#allocation151_spill] sm:$0xff] %v6659_v29 }
 0x596   : > { %v6637_v23 = vpop.permute.xlu0 %1763 }
 0x597   : > { %8771 = vst [vmem:[#allocation147_spill] sm:$0xff] %v6637_v23  ;;  %v1392_v23 = vmul.f32 %v6260_v38, %v5461_v33 }
 0x598   : > { %1438 = vrot.lane.b32.xlu0 %v1395_v41, %s5170_s10  ;;  %1440 = vrot.lane.b32.xlu1 %v1396_v1, %s5170_s10  ;;  %v2956_v1 = vmul.f32 %v6659_v29, %v6317_v17 }
 0x59a   : > { %v6651_v46 = vpop.permute.xlu0 %2229 }
 0x59b   : > { %8774 = vst [vmem:[#allocation150_spill] sm:$0xff] %v6651_v46  ;;  %v6661_v34 = vpop.permute.xlu1 %2528 }
 0x59c   : > { %8776 = vst [vmem:[#allocation152_spill] sm:$0xff] %v6661_v34  ;;  %2986 = vrot.lane.b32.xlu0 %v2957_v6, %s5145_s30  ;;  %1432 = vrot.lane.b32.xlu1 %v1392_v23, %s5170_s10  ;;  %v1510_v23 = vmul.f32 %v6270_v53, %v5454_v30  ;;  %v8787_v34 = vld [vmem:[#allocation12_spill] sm:$0xff] }
 0x59e   : > { %v6665_v41 = vpop.permute.xlu0 %2233 }
 0x59f   : > { %8777 = vst [vmem:[#allocation153_spill] sm:$0xff] %v6665_v41  ;;  %v6671_v46 = vpop.permute.xlu1 %2110 }
 0x5a0   : > { %8778 = vst [vmem:[#allocation154_spill] sm:$0xff] %v6671_v46  ;;  %2984 = vrot.lane.b32.xlu0 %v2956_v1, %s5145_s30  ;;  %1549 = vrot.lane.b32.xlu1 %v1508_v50, %s5171_s11  ;;  %v1511_v1 = vmul.f32 %v6270_v53, %v5482_v44  ;;  %v1507_v50 = vmul.f32 %v6270_v53, %v5461_v33 }
 0x5a2   : > { %v6675_v58 = vpop.permute.xlu0 %2225 }
 0x5a3   : > { %8779 = vst [vmem:[#allocation155_spill] sm:$0xff] %v6675_v58  ;;  %v6681_v6 = vpop.permute.xlu1 %2227  ;;  %v8789_v58 = vld [vmem:[#allocation23_spill] sm:$0xff] }
 0x5a4   : > { %8780 = vst [vmem:[#allocation156_spill] sm:$0xff] %v6681_v6  ;;  %1551 = vrot.lane.b32.xlu0 %v1509_v35, %s5171_s11  ;;  %1553 = vrot.lane.b32.xlu1 %v1510_v23, %s5171_s11  ;;  %v1623_v35 = vmul.f32 %v6331_v19, %v5443_v20  ;;  %v1624_v23 = vmul.f32 %v6331_v19, %v5473_v40 }
 0x5a6   : > { %v6685_v17 = vpop.permute.xlu0 %2342 }
 0x5a7   : > { %8781 = vst [vmem:[#allocation157_spill] sm:$0xff] %v6685_v17  ;;  %v6691_v29 = vpop.permute.xlu1 %2231 }
 0x5a8   : > { %8782 = vst [vmem:[#allocation158_spill] sm:$0xff] %v6691_v29  ;;  %1555 = vrot.lane.b32.xlu0 %v1511_v1, %s5171_s11  ;;  %1547 = vrot.lane.b32.xlu1 %v1507_v50, %s5171_s11  ;;  %v1625_v1 = vmul.f32 %v6331_v19, %v5454_v30  ;;  %v1626_v50 = vmul.f32 %v6331_v19, %v5482_v44  ;;  %v8788_v29 = vld [vmem:[#allocation31_spill] sm:$0xff] }
 0x5a9   : > { %v367_v6 = vsel %vm366_vm0, %v8789_v58, %v8788_v29  ;;  %v368_v51 = vsel %vm366_vm0, %v8788_v29, %v8793_v8  ;;  %v370_v58 = vsel %vm366_vm0, %v8794_v0, %v8795_v32 }
 0x5aa   : > { %v6695_v38 = vpop.permute.xlu0 %2346 }
 0x5ab   : > { %8783 = vst [vmem:[#allocation159_spill] sm:$0xff] %v6695_v38  ;;  %v6701_v41 = vpop.permute.xlu1 %1761  ;;  %v8786_v38 = vld [vmem:[#allocation20_spill] sm:$0xff] }
 0x5ac   : > { %8784 = vst [vmem:[#allocation160_spill] sm:$0xff] %v6701_v41  ;;  %1664 = vrot.lane.b32.xlu0 %v1623_v35, %s5172_s12  ;;  %1666 = vrot.lane.b32.xlu1 %v1624_v23, %s5172_s12  ;;  %v274_v17 = vmul.f32 %v8787_v34, %v8786_v38  ;;  %v8790_v41 = vld [vmem:[#allocation11_spill] sm:$0xff]  ;;  %v8791_v23 = vld [vmem:[#allocation17_spill] sm:$0xff]  ;;  %v369_v34 = vsel %vm366_vm0, %v8793_v8, %v8794_v0 }
 0x5ad   : > { %v275_v35 = vmul.f32 %v8790_v41, %v8786_v38  ;;  %v276_v46 = vmul.f32 %v8791_v23, %v8786_v38  ;;  %v277_v41 = vmul.f32 %v5345_v22, %v8786_v38  ;;  %v278_v23 = vmul.f32 %v5361_v28, %v8786_v38  ;;  %v8797_v8 = vld [vmem:[#allocation19_spill] sm:$0xff] }
 0x5ae   : > { %v6705_v53 = vpop.permute.xlu0 %1876  ;;  %v279_v18 = vmul.f32 %v8797_v8, %v8786_v38  ;;  %v1622_v22 = vmul.f32 %v6331_v19, %v5461_v33  ;;  %v1738_v28 = vmul.f32 %v6282_v10, %v5443_v20 }
 0x5af   : > { %8785 = vst [vmem:[#allocation161_spill] sm:$0xff] %v6705_v53  ;;  %v6720_v53 = vpop.permute.xlu1 %1878  ;;  %v394_v52 = vadd.f32 %v368_v51, %v275_v35  ;;  %v395_v14 = vadd.f32 %v369_v34, %v276_v46  ;;  %v396_v38 = vadd.f32 %v370_v58, %v277_v41  ;;  %v8807_v58 = vld [vmem:[#allocation43_spill] sm:$0xff] }
 0x5b0   : > { %8792 = vst [vmem:[#allocation20_spill] sm:$0xff] %v6720_v53  ;;  %1668 = vrot.lane.b32.xlu0 %v1625_v1, %s5172_s12  ;;  %1670 = vrot.lane.b32.xlu1 %v1626_v50, %s5172_s12  ;;  %v8796_v53 = vld [vmem:[#allocation35_spill] sm:$0xff]  ;;  %v8799_v1 = vld [vmem:[#allocation28_spill] sm:$0xff] }
 0x5b1   : > { %v371_v29 = vsel %vm366_vm0, %v8795_v32, %v8796_v53  ;;  %v372_v0 = vsel %vm366_vm0, %v8796_v53, %v8798_v37  ;;  %v472_v50 = vsel %vm471_vm1, %v8800_v42, %v8799_v1  ;;  %v393_v32 = vadd.f32 %v367_v6, %v274_v17  ;;  %v8803_v37 = vld [vmem:[#allocation29_spill] sm:$0xff]  ;;  %v8805_v17 = vld [vmem:[#allocation30_spill] sm:$0xff] }
 0x5b2   : > { %v6748_v36 = vpop.permute.xlu0 %1993  ;;  %v473_v53 = vsel %vm471_vm1, %v8799_v1, %v8802_v56  ;;  %v474_v42 = vsel %vm471_vm1, %v8802_v56, %v8803_v37  ;;  %v397_v51 = vadd.f32 %v371_v29, %v278_v23  ;;  %v398_v46 = vadd.f32 %v372_v0, %v279_v18  ;;  %v8806_v56 = vld [vmem:[#allocation44_spill] sm:$0xff] }
 0x5b3   : > { %8801 = vst [vmem:[#allocation12_spill] sm:$0xff] %v6748_v36  ;;  %v6754_v8 = vpop.permute.xlu1 %2344  ;;  %v8804_v36 = vld [vmem:[#allocation41_spill] sm:$0xff]  ;;  %v498_v6 = vadd.f32 %v472_v50, %v393_v32  ;;  %v477_v34 = vsel %vm471_vm1, %v8805_v17, %v5600_v9  ;;  %v577_v41 = vsel %vm576_vm2, %v8807_v58, %v8806_v56  ;;  %v1740_v18 = vmul.f32 %v6282_v10, %v5454_v30  ;;  %v8812_v58 = vld [vmem:[#allocation46_spill] sm:$0xff] }
 0x5b4   : > { %v475_v19 = vsel %vm471_vm1, %v8803_v37, %v8804_v36  ;;  %1662 = vrot.lane.b32.xlu0 %v1622_v22, %s5172_s12  ;;  %1779 = vrot.lane.b32.xlu1 %v1738_v28, %s5173_s13  ;;  %v476_v35 = vsel %vm471_vm1, %v8804_v36, %v8805_v17  ;;  %v1739_v22 = vmul.f32 %v6282_v10, %v5473_v40  ;;  %v8808_v36 = vld [vmem:[#allocation32_spill] sm:$0xff]  ;;  %v8810_v28 = vld [vmem:[#allocation45_spill] sm:$0xff] }
 0x5b5   : > { %v499_v23 = vadd.f32 %v473_v53, %v394_v52  ;;  %v500_v29 = vadd.f32 %v474_v42, %v395_v14  ;;  %v501_v0 = vadd.f32 %v475_v19, %v396_v38  ;;  %v578_v50 = vsel %vm576_vm2, %v8806_v56, %v8808_v36  ;;  %v8811_v37 = vld [vmem:[#allocation33_spill] sm:$0xff]  ;;  %v8813_v42 = vld [vmem:[#allocation36_spill] sm:$0xff] }
 0x5b6   : > { %v6776_v1 = vpop.permute.xlu0 %2459  ;;  %v579_v32 = vsel %vm576_vm2, %v8808_v36, %v8810_v28  ;;  %v580_v17 = vsel %vm576_vm2, %v8810_v28, %v8811_v37  ;;  %v581_v52 = vsel %vm576_vm2, %v8811_v37, %v8812_v58  ;;  %v502_v19 = vadd.f32 %v476_v35, %v397_v51  ;;  %v8814_v56 = vld [vmem:[#allocation48_spill] sm:$0xff]  ;;  %v8815_v28 = vld [vmem:[#allocation49_spill] sm:$0xff] }
 0x5b7   : > { %v6785_v9 = vpop.permute.xlu1 %2348  ;;  %v503_v14 = vadd.f32 %v477_v34, %v398_v46  ;;  %v603_v38 = vadd.f32 %v577_v41, %v498_v6  ;;  %v582_v53 = vsel %vm576_vm2, %v8812_v58, %v5564_v47  ;;  %v719_v36 = vsel %vm718_vm3, %v8814_v56, %v8813_v42  ;;  %v8817_v41 = vld [vmem:[#allocation37_spill] sm:$0xff]  ;;  %v8818_v58 = vld [vmem:[#allocation50_spill] sm:$0xff] }
 0x5b8   : > { %8809 = vst [vmem:[#allocation31_spill] sm:$0xff] %v6785_v9  ;;  %1781 = vrot.lane.b32.xlu0 %v1739_v22, %s5173_s13  ;;  %1783 = vrot.lane.b32.xlu1 %v1740_v18, %s5173_s13  ;;  %v720_v9 = vsel %vm718_vm3, %v8813_v42, %v8815_v28  ;;  %v1741_v22 = vmul.f32 %v6282_v10, %v5482_v44  ;;  %v8819_v56 = vld [vmem:[#allocation38_spill] sm:$0xff] }
 0x5b9   : > { %v1737_v51 = vmul.f32 %v6282_v10, %v5461_v33  ;;  %v604_v46 = vadd.f32 %v578_v50, %v499_v23  ;;  %v605_v6 = vadd.f32 %v579_v32, %v500_v29  ;;  %v606_v35 = vadd.f32 %v580_v17, %v501_v0  ;;  %v8820_v32 = vld [vmem:[#allocation53_spill] sm:$0xff]  ;;  %v8821_v17 = vld [vmem:[#allocation51_spill] sm:$0xff] }
 0x5ba   : > { %v6807_v37 = vpop.permute.xlu0 %2463  ;;  %v607_v47 = vadd.f32 %v581_v52, %v502_v19  ;;  %v721_v18 = vsel %vm718_vm3, %v8815_v28, %v8817_v41  ;;  %v722_v42 = vsel %vm718_vm3, %v8817_v41, %v8818_v58  ;;  %v608_v23 = vadd.f32 %v582_v53, %v503_v14  ;;  %v8822_v19 = vld [vmem:[#allocation52_spill] sm:$0xff] }
 0x5bb   : > { %8816 = vst [vmem:[#allocation23_spill] sm:$0xff] %v6807_v37  ;;  %v6813_v34 = vpop.permute.xlu1 %2340  ;;  %v723_v37 = vsel %vm718_vm3, %v8818_v58, %v8819_v56  ;;  %v745_v29 = vadd.f32 %v719_v36, %v603_v38  ;;  %v746_v0 = vadd.f32 %v720_v9, %v604_v46  ;;  %v724_v50 = vsel %vm718_vm3, %v8819_v56, %v5650_v26  ;;  %v8823_v26 = vld [vmem:[#allocation55_spill] sm:$0xff]  ;;  %v8824_v46 = vld [vmem:[#allocation54_spill] sm:$0xff]  ;;  %v8825_v56 = vld [vmem:[#allocation56_spill] sm:$0xff] }
 0x5bc   : > { %1785 = vrot.lane.b32.xlu0 %v1741_v22, %s5173_s13  ;;  %1777 = vrot.lane.b32.xlu1 %v1737_v51, %s5173_s13  ;;  %v874_v52 = vsel %vm873_vm4, %v8821_v17, %v8820_v32  ;;  %v875_v28 = vsel %vm873_vm4, %v8820_v32, %v8822_v19  ;;  %v1853_v22 = vmul.f32 %v6292_v27, %v5443_v20 }
 0x5bd   : > { %v1854_v9 = vmul.f32 %v6292_v27, %v5473_v40  ;;  %v747_v14 = vadd.f32 %v721_v18, %v605_v6  ;;  %v748_v38 = vadd.f32 %v722_v42, %v606_v35  ;;  %v749_v53 = vadd.f32 %v723_v37, %v607_v47  ;;  %v8826_v18 = vld [vmem:[#allocation60_spill] sm:$0xff]  ;;  %v8827_v42 = vld [vmem:[#allocation61_spill] sm:$0xff] }
 0x5be   : > { %v6835_v41 = vpop.permute.xlu0 %2455  ;;  %v876_v36 = vsel %vm873_vm4, %v8822_v19, %v8823_v26  ;;  %v877_v58 = vsel %vm873_vm4, %v8823_v26, %v8824_v46  ;;  %v878_v32 = vsel %vm873_vm4, %v8824_v46, %v8825_v56  ;;  %v879_v6 = vsel %vm873_vm4, %v8825_v56, %v5668_v4  ;;  %v8828_v19 = vld [vmem:[#allocation63_spill] sm:$0xff]  ;;  %v8829_v46 = vld [vmem:[#allocation62_spill] sm:$0xff] }
 0x5bf   : > { %v6844_v51 = vpop.permute.xlu1 %2457  ;;  %v750_v37 = vadd.f32 %v724_v50, %v608_v23  ;;  %v902_v35 = vadd.f32 %v874_v52, %v745_v29  ;;  %v903_v47 = vadd.f32 %v875_v28, %v746_v0  ;;  %v989_v17 = vsel %vm988_vm5, %v8827_v42, %v8826_v18 }
 0x5c0   : > { %1894 = vrot.lane.b32.xlu0 %v1853_v22, %s5174_s14  ;;  %1896 = vrot.lane.b32.xlu1 %v1854_v9, %s5174_s14  ;;  %v990_v26 = vsel %vm988_vm5, %v8826_v18, %v8828_v19  ;;  %v991_v10 = vsel %vm988_vm5, %v8828_v19, %v8829_v46  ;;  %v1855_v22 = vmul.f32 %v6292_v27, %v5454_v30  ;;  %v8830_v9 = vld [vmem:[#allocation65_spill] sm:$0xff]  ;;  %v8831_v18 = vld [vmem:[#allocation64_spill] sm:$0xff] }
 0x5c1   : > { %v1856_v23 = vmul.f32 %v6292_v27, %v5482_v44  ;;  %v904_v29 = vadd.f32 %v876_v36, %v747_v14  ;;  %v905_v0 = vadd.f32 %v877_v58, %v748_v38  ;;  %v906_v50 = vadd.f32 %v878_v32, %v749_v53 }
 0x5c2   : > { %v6866_v4 = vpop.permute.xlu0 %2106  ;;  %v907_v52 = vadd.f32 %v879_v6, %v750_v37  ;;  %v992_v56 = vsel %vm988_vm5, %v8829_v46, %v8830_v9  ;;  %v993_v42 = vsel %vm988_vm5, %v8830_v9, %v8831_v18  ;;  %v994_v19 = vsel %vm988_vm5, %v8831_v18, %v5796_v57 }
 0x5c3   : > { %v6872_v28 = vpop.permute.xlu1 %2461  ;;  %v1017_v14 = vadd.f32 %v989_v17, %v902_v35  ;;  %v1018_v38 = vadd.f32 %v990_v26, %v903_v47  ;;  %v1019_v53 = vadd.f32 %v991_v10, %v904_v29  ;;  %v1104_v36 = vsel %vm1103_vm6, %v5919_v61, %v5923_v5 }
 0x5c4   : > { %1898 = vrot.lane.b32.xlu0 %v1855_v22, %s5174_s14  ;;  %1900 = vrot.lane.b32.xlu1 %v1856_v23, %s5174_s14  ;;  %v1105_v58 = vsel %vm1103_vm6, %v5923_v5, %v5917_v12  ;;  %v1106_v32 = vsel %vm1103_vm6, %v5917_v12, %v5927_v49  ;;  %v1852_v6 = vmul.f32 %v6292_v27, %v5461_v33  ;;  %vm2253_vm5 = vcmask 244736  }
 0x5c5   : > { %v1968_v10 = vmul.f32 %v6343_v25, %v5443_v20  ;;  %v1020_v37 = vadd.f32 %v992_v56, %v905_v0  ;;  %v1021_v35 = vadd.f32 %v993_v42, %v906_v50  ;;  %v1022_v47 = vadd.f32 %v994_v19, %v907_v52 }
 0x5c6   : > { %v6894_v57 = vpop.permute.xlu0 %2641  ;;  %v1107_v61 = vsel %vm1103_vm6, %v5927_v49, %v5921_v54  ;;  %v1108_v12 = vsel %vm1103_vm6, %v5921_v54, %v5929_v11  ;;  %v1109_v17 = vsel %vm1103_vm6, %v5929_v11, %v5925_v2  ;;  %v1219_v26 = vsel %vm1218_vm7, %v6006_v62, %v6004_v59 }
 0x5c7   : > { %v6903_v5 = vpop.permute.xlu1 %1991  ;;  %v1132_v46 = vadd.f32 %v1104_v36, %v1017_v14  ;;  %v1133_v49 = vadd.f32 %v1105_v58, %v1018_v38  ;;  %v1134_v22 = vadd.f32 %v1106_v32, %v1019_v53  ;;  %v1220_v23 = vsel %vm1218_vm7, %v6004_v59, %v6010_v63 }
 0x5c8   : > { %1892 = vrot.lane.b32.xlu0 %v1852_v6, %s5174_s14  ;;  %2009 = vrot.lane.b32.xlu1 %v1968_v10, %s5175_s16  ;;  %v1135_v54 = vadd.f32 %v1107_v61, %v1020_v37  ;;  %v1969_v2 = vmul.f32 %v6343_v25, %v5473_v40  ;;  %v1970_v11 = vmul.f32 %v6343_v25, %v5454_v30  ;;  %vm2368_vm6 = vcmask 236544  }
 0x5c9   : > { %v1136_v62 = vadd.f32 %v1108_v12, %v1021_v35  ;;  %v1137_v0 = vadd.f32 %v1109_v17, %v1022_v47  ;;  %v1247_v50 = vadd.f32 %v1219_v26, %v1132_v46  ;;  %v1221_v52 = vsel %vm1218_vm7, %v6010_v63, %v6008_v13  ;;  %v8835_v17 = vld [vmem:[#allocation99_spill] sm:$0xff] }
 0x5ca   : > { %v6919_v29 = vpop.permute.xlu0 %2645  ;;  %v1248_v59 = vadd.f32 %v1220_v23, %v1133_v49  ;;  %v1222_v56 = vsel %vm1218_vm7, %v6008_v13, %v6014_v55  ;;  %v1223_v18 = vsel %vm1218_vm7, %v6014_v55, %v6012_v43  ;;  %v1224_v42 = vsel %vm1218_vm7, %v6012_v43, %v6016_v60 }
 0x5cb   : > { %v6928_v9 = vpop.permute.xlu1 %2108  ;;  %v1334_v63 = vsel %vm1333_vm8, %v6118_v21, %v6121_v24  ;;  %v1335_v13 = vsel %vm1333_vm8, %v6121_v24, %v6124_v15  ;;  %v1336_v55 = vsel %vm1333_vm8, %v6124_v15, %v6126_v16  ;;  %v1337_v19 = vsel %vm1333_vm8, %v6126_v16, %v6128_v48 }
 0x5cc   : > { %2011 = vrot.lane.b32.xlu0 %v1969_v2, %s5175_s16  ;;  %2013 = vrot.lane.b32.xlu1 %v1970_v11, %s5175_s16  ;;  %v1338_v43 = vsel %vm1333_vm8, %v6128_v48, %v6130_v31  ;;  %v1971_v21 = vmul.f32 %v6343_v25, %v5482_v44  ;;  %v1967_v24 = vmul.f32 %v6343_v25, %v5461_v33  ;;  %v8854_v25 = vld [vmem:[#allocation113_spill] sm:$0xff]  ;;  %vm2483_vm7 = vcmask 228352  }
 0x5cd   : > { %v1249_v14 = vadd.f32 %v1221_v52, %v1134_v22  ;;  %v1250_v38 = vadd.f32 %v1222_v56, %v1135_v54  ;;  %v1251_v53 = vadd.f32 %v1223_v18, %v1136_v62  ;;  %v1339_v15 = vsel %vm1333_vm8, %v6130_v31, %v6132_v39  ;;  %v8834_v31 = vld [vmem:[#allocation93_spill] sm:$0xff]  ;;  %v8836_v62 = vld [vmem:[#allocation94_spill] sm:$0xff]  ;;  %v8838_v52 = vld [vmem:[#allocation103_spill] sm:$0xff] }
 0x5ce   : > { %v6956_v60 = vpop.permute.xlu0 %2221  ;;  %v1252_v36 = vadd.f32 %v1224_v42, %v1137_v0  ;;  %v6967_v58 = vadd.f32 %v1334_v63, %v1247_v50  ;;  %v6971_v48 = vadd.f32 %v1335_v13, %v1248_v59  ;;  %v2083_v47 = vmul.f32 %v8834_v31, %v5443_v20  ;;  %v8837_v50 = vld [vmem:[#allocation104_spill] sm:$0xff] }
 0x5cf   : > { %8832 = vst [vmem:[#allocation11_spill] sm:$0xff] %v6956_v60  ;;  %v6965_v16 = vpop.permute.xlu1 %2223  ;;  %v1364_v32 = vadd.f32 %v1336_v55, %v1249_v14  ;;  %v1365_v6 = vadd.f32 %v1337_v19, %v1250_v38  ;;  %v1366_v10 = vadd.f32 %v1338_v43, %v1251_v53  ;;  %v2084_v61 = vmul.f32 %v8834_v31, %v5473_v40  ;;  %v8840_v19 = vld [vmem:[#allocation96_spill] sm:$0xff]  ;;  %v8841_v14 = vld [vmem:[#allocation105_spill] sm:$0xff]  ;;  %v8842_v53 = vld [vmem:[#allocation106_spill] sm:$0xff] }
 0x5d0   : > { %2015 = vrot.lane.b32.xlu0 %v1971_v21, %s5175_s16  ;;  %2007 = vrot.lane.b32.xlu1 %v1967_v24, %s5175_s16  ;;  %v1367_v37 = vadd.f32 %v1339_v15, %v1252_v36  ;;  %v6983_v26 = vmul.f32 %v8835_v17, %v5443_v20  ;;  %v6987_v46 = vmul.f32 %v8835_v17, %v5454_v30  ;;  %v8843_v36 = vld [vmem:[#allocation107_spill] sm:$0xff] }
 0x5d1   : > { %v6993_v49 = vmul.f32 %v8835_v17, %v5473_v40  ;;  %v6997_v22 = vmul.f32 %v8835_v17, %v5461_v33  ;;  %v7001_v23 = vmul.f32 %v8835_v17, %v5482_v44  ;;  %v2085_v54 = vmul.f32 %v8834_v31, %v5454_v30  ;;  %v8859_v60 = vld [vmem:[#allocation119_spill] sm:$0xff] }
 0x5d2   : > { %v6973_v35 = vpop.permute.xlu0 %2338  ;;  %v2086_v2 = vmul.f32 %v8834_v31, %v5482_v44  ;;  %v2082_v11 = vmul.f32 %v8834_v31, %v5461_v33  ;;  %v2199_v0 = vmul.f32 %v8836_v62, %v5473_v40  ;;  %v1452_v59 = vsel %vm1448_vm9, %v8838_v52, %v8837_v50  ;;  %v8853_v31 = vld [vmem:[#allocation114_spill] sm:$0xff] }
 0x5d3   : > { %8833 = vst [vmem:[#allocation17_spill] sm:$0xff] %v6973_v35  ;;  %v6979_v12 = vpop.permute.xlu1 %2643  ;;  %v2198_v18 = vmul.f32 %v8836_v62, %v5443_v20  ;;  %v7020_v42 = vmul.f32 %v8836_v62, %v5482_v44  ;;  %v7024_v63 = vmul.f32 %v8836_v62, %v5454_v30  ;;  %v7030_v55 = vmul.f32 %v8836_v62, %v5461_v33 }
 0x5d4   : > { %2124 = vrot.lane.b32.xlu0 %v2083_v47, %s5176_s17  ;;  %2126 = vrot.lane.b32.xlu1 %v2084_v61, %s5176_s17  ;;  %v7034_v43 = vmul.f32 %v8840_v19, %v5473_v40  ;;  %v7038_v21 = vmul.f32 %v8840_v19, %v5443_v20  ;;  %v7042_v24 = vmul.f32 %v8840_v19, %v5482_v44  ;;  %v8844_v47 = vld [vmem:[#allocation98_spill] sm:$0xff] }
 0x5d5   : > { %v1453_v38 = vsel %vm1448_vm9, %v8837_v50, %v8841_v14  ;;  %v1454_v15 = vsel %vm1448_vm9, %v8841_v14, %v8842_v53  ;;  %v1451_v40 = vsel %vm1448_vm9, %v8843_v36, %v8838_v52  ;;  %v1480_v20 = vadd.f32 %v1452_v59, %v1365_v6  ;;  %v8847_v14 = vld [vmem:[#allocation109_spill] sm:$0xff]  ;;  %v8848_v52 = vld [vmem:[#allocation108_spill] sm:$0xff] }
 0x5d6   : > { %v7014_v56 = vpop.permute.xlu0 %2747  ;;  %v7057_v44 = vmul.f32 %v8840_v19, %v5454_v30  ;;  %v7061_v61 = vmul.f32 %v8844_v47, %v6593_v3  ;;  %v7065_v50 = vmul.f32 %v8840_v19, %v5461_v33  ;;  %v1567_v53 = vsel %vm1563_vm10, %v8848_v52, %v8847_v14  ;;  %v8851_v59 = vld [vmem:[#allocation112_spill] sm:$0xff] }
 0x5d7   : > { %v7026_v13 = vpop.permute.xlu1 %2647  ;;  %v1566_v39 = vsel %vm1563_vm10, %v8851_v59, %v8848_v52  ;;  %v1481_v33 = vadd.f32 %v1453_v38, %v1366_v10  ;;  %v1482_v19 = vadd.f32 %v1454_v15, %v1367_v37  ;;  %v1479_v62 = vadd.f32 %v1451_v40, %v1364_v32  ;;  %v8858_v52 = vld [vmem:[#allocation117_spill] sm:$0xff]  ;;  %v5051_v32 = vld [vmem:[#allocation3 + $0x8] sm:$0xff] }
 0x5d8   : > { %8839 = vst [vmem:[#allocation24_spill] sm:$0xff] %v7026_v13  ;;  %2128 = vrot.lane.b32.xlu0 %v2085_v54, %s5176_s17  ;;  %2130 = vrot.lane.b32.xlu1 %v2086_v2, %s5176_s17  ;;  %8845 = vst [vmem:[#allocation34_spill] sm:$0xff] %v7061_v61  ;;  %v8849_v54 = vld [vmem:[#allocation110_spill] sm:$0xff]  ;;  %v8850_v2 = vld [vmem:[#allocation111_spill] sm:$0xff]  ;;  %v1682_v27 = vsel %vm1678_vm11, %v8854_v25, %v8853_v31  ;;  %v1681_v10 = vsel %vm1678_vm11, %v8858_v52, %v8854_v25 }
 0x5d9   : > { %8846 = vst [vmem:[#allocation25_spill] sm:$0xff] %v7065_v50  ;;  %v1568_v6 = vsel %vm1563_vm10, %v8847_v14, %v8849_v54  ;;  %v1569_v30 = vsel %vm1563_vm10, %v8849_v54, %v8850_v2  ;;  %v8856_v14 = vld [vmem:[#allocation115_spill] sm:$0xff]  ;;  %v8857_v54 = vld [vmem:[#allocation116_spill] sm:$0xff]  ;;  %v1595_v37 = vadd.f32 %v1567_v53, %v1480_v20  ;;  %v1594_v40 = vadd.f32 %v1566_v39, %v1479_v62  ;;  %v8860_v50 = vld [vmem:[#allocation118_spill] sm:$0xff] }
 0x5da   : > { %v7079_v17 = vpop.permute.xlu0 %2751  ;;  %v1683_v35 = vsel %vm1678_vm11, %v8853_v31, %v8856_v14  ;;  %v1684_v2 = vsel %vm1678_vm11, %v8856_v14, %v8857_v54  ;;  %v1596_v38 = vadd.f32 %v1568_v6, %v1481_v33  ;;  %v1597_v15 = vadd.f32 %v1569_v30, %v1482_v19  ;;  %v8861_v61 = vld [vmem:[#allocation120_spill] sm:$0xff]  ;;  %v8865_v6 = vld [vmem:[#allocation121_spill] sm:$0xff]  ;;  %v8866_v30 = vld [vmem:[#allocation122_spill] sm:$0xff] }
 0x5db   : > { %8852 = vst [vmem:[#allocation35_spill] sm:$0xff] %v7079_v17  ;;  %v7084_v3 = vpop.permute.xlu1 %2639  ;;  %v1797_v31 = vsel %vm1793_vm12, %v8860_v50, %v8859_v60  ;;  %v1798_v14 = vsel %vm1793_vm12, %v8859_v60, %v8861_v61  ;;  %v7106_v25 = vmul.f32 %v8844_v47, %v6428_v45  ;;  %v1710_v19 = vadd.f32 %v1682_v27, %v1595_v37 }
 0x5dc   : > { %8855 = vst [vmem:[#allocation19_spill] sm:$0xff] %v7084_v3  ;;  %2532 = vperm.xlu0 %4997, %v5051_v32   ;;  %2122 = vrot.lane.b32.xlu1 %v2082_v11, %s5176_s17  ;;  %v7110_v11 = vmul.f32 %v8844_v47, %v6460_v7  ;;  %v1711_v39 = vadd.f32 %v1683_v35, %v1596_v38  ;;  %v8867_v32 = vld [vmem:[#allocation123_spill] sm:$0xff] }
 0x5dd   : > { %8863 = vst [vmem:[#allocation28_spill] sm:$0xff] %v7106_v25  ;;  %v1712_v62 = vadd.f32 %v1684_v2, %v1597_v15  ;;  %v1709_v53 = vadd.f32 %v1681_v10, %v1594_v40  ;;  %v1799_v60 = vsel %vm1793_vm12, %v8861_v61, %v8865_v6  ;;  %v1796_v33 = vsel %vm1793_vm12, %v8866_v30, %v8860_v50  ;;  %v8868_v2 = vld [vmem:[#allocation125_spill] sm:$0xff]  ;;  %v8869_v10 = vld [vmem:[#allocation124_spill] sm:$0xff]  ;;  %v8870_v61 = vld [vmem:[#allocation126_spill] sm:$0xff] }
 0x5de   : > { %v7102_v54 = vpop.permute.xlu0 %2336  ;;  %8864 = vst [vmem:[#allocation39_spill] sm:$0xff] %v7110_v11  ;;  %v1825_v27 = vadd.f32 %v1797_v31, %v1710_v19  ;;  %v1826_v35 = vadd.f32 %v1798_v14, %v1711_v39  ;;  %v1912_v37 = vsel %vm1908_vm13, %v8869_v10, %v8868_v2  ;;  %v1913_v38 = vsel %vm1908_vm13, %v8868_v2, %v8870_v61  ;;  %v8872_v15 = vld [vmem:[#allocation127_spill] sm:$0xff]  ;;  %v8874_v40 = vld [vmem:[#allocation129_spill] sm:$0xff]  ;;  %v8891_v25 = vld [vmem:[#allocation154_spill] sm:$0xff] }
 0x5df   : > { %8862 = vst [vmem:[#allocation27_spill] sm:$0xff] %v7102_v54  ;;  %v7112_v20 = vpop.permute.xlu1 %2745  ;;  %v1450_v54 = vsel %vm1448_vm9, %v8867_v32, %v8843_v36  ;;  %v8871_v50 = vmov 0   ;;  %v1914_v36 = vsel %vm1908_vm13, %v8870_v61, %v8872_v15  ;;  %v1911_v31 = vsel %vm1908_vm13, %v8874_v40, %v8869_v10  ;;  %v8875_v14 = vld [vmem:[#allocation131_spill] sm:$0xff]  ;;  %v8882_v10 = vld [vmem:[#allocation141_spill] sm:$0xff] }
 0x5e0   : > { %2241 = vrot.lane.b32.xlu0 %v2199_v0, %s5177_s20  ;;  %2239 = vrot.lane.b32.xlu1 %v2198_v18, %s5177_s20  ;;  %v8873_v0 = vld [vmem:[#allocation128_spill] sm:$0xff]  ;;  %v1565_v19 = vsel %vm1563_vm10, %v8875_v14, %v8851_v59  ;;  %v1827_v2 = vadd.f32 %v1799_v60, %v1712_v62  ;;  %v1478_v6 = vadd.f32 %v1450_v54, %v6971_v48 }
 0x5e1   : > { %5048 = vset.pattern.permute.xlu0 %v8871_v50  ;;  %v1449_v18 = vsel %vm1448_vm9, %v8873_v0, %v8867_v32  ;;  %v1824_v50 = vadd.f32 %v1796_v33, %v1709_v53  ;;  %v1940_v15 = vadd.f32 %v1912_v37, %v1825_v27  ;;  %v1941_v47 = vadd.f32 %v1913_v38, %v1826_v35  ;;  %v8877_v32 = vld [vmem:[#allocation138_spill] sm:$0xff]  ;;  %v8878_v0 = vld [vmem:[#allocation132_spill] sm:$0xff]  ;;  %v8879_v53 = vld [vmem:[#allocation135_spill] sm:$0xff] }
 0x5e2   : > { %v7144_v39 = vpop.permute.xlu0 %2453  ;;  %v2027_v11 = vsel %vm2023_vm14, %v8878_v0, %v8877_v32  ;;  %v1942_v59 = vadd.f32 %v1914_v36, %v1827_v2  ;;  %v1477_v62 = vadd.f32 %v1449_v18, %v6967_v58  ;;  %v1593_v54 = vadd.f32 %v1565_v19, %v1478_v6  ;;  %v8880_v33 = vld [vmem:[#allocation140_spill] sm:$0xff]  ;;  %v8881_v35 = vld [vmem:[#allocation139_spill] sm:$0xff]  ;;  %v8884_v36 = vld [vmem:[#allocation142_spill] sm:$0xff] }
 0x5e3   : > { %8876 = vst [vmem:[#allocation40_spill] sm:$0xff] %v7144_v39  ;;  %v7147_v61 = vpop.permute.xlu1 %2749  ;;  %v1939_v48 = vadd.f32 %v1911_v31, %v1824_v50  ;;  %v2028_v60 = vsel %vm2023_vm14, %v8877_v32, %v8879_v53  ;;  %v2029_v27 = vsel %vm2023_vm14, %v8879_v53, %v8880_v33  ;;  %v2055_v58 = vadd.f32 %v2027_v11, %v1940_v15  ;;  %v8883_v6 = vld [vmem:[#allocation143_spill] sm:$0xff]  ;;  %v8885_v18 = vld [vmem:[#allocation145_spill] sm:$0xff]  ;;  %v8888_v50 = vld [vmem:[#allocation144_spill] sm:$0xff] }
 0x5e4   : > { %2245 = vrot.lane.b32.xlu0 %v7020_v42, %s5177_s20  ;;  %2243 = vrot.lane.b32.xlu1 %v7024_v63, %s5177_s20  ;;  %v1564_v42 = vsel %vm1563_vm10, %v8881_v35, %v8875_v14  ;;  %v1680_v63 = vsel %vm1678_vm11, %v8882_v10, %v8858_v52  ;;  %v2026_v38 = vsel %vm2023_vm14, %v8883_v6, %v8878_v0  ;;  %v8886_v19 = vld [vmem:[#allocation149_spill] sm:$0xff]  ;;  %v8889_v11 = vld [vmem:[#allocation146_spill] sm:$0xff]  ;;  %v8890_v32 = vld [vmem:[#allocation147_spill] sm:$0xff] }
 0x5e5   : > { %v2142_v31 = vsel %vm2138_vm15, %v8885_v18, %v8884_v36  ;;  %v2143_v2 = vsel %vm2138_vm15, %v8884_v36, %v8886_v19  ;;  %v2144_v52 = vsel %vm2138_vm15, %v8886_v19, %v8888_v50  ;;  %v1679_v15 = vsel %vm1678_vm11, %v8889_v11, %v8882_v10  ;;  %v8892_v11 = vld [vmem:[#allocation150_spill] sm:$0xff] }
 0x5e6   : > { %v7169_v37 = vpop.permute.xlu0 %2851  ;;  %v1795_v0 = vsel %vm1793_vm12, %v8890_v32, %v8866_v30  ;;  %v2056_v53 = vadd.f32 %v2028_v60, %v1941_v47  ;;  %v2057_v35 = vadd.f32 %v2029_v27, %v1942_v59  ;;  %v1592_v36 = vadd.f32 %v1564_v42, %v1477_v62  ;;  %v8895_v59 = vld [vmem:[#allocation155_spill] sm:$0xff]  ;;  %v8897_v60 = vld [vmem:[#allocation157_spill] sm:$0xff] }
 0x5e7   : > { %v7180_v14 = vpop.permute.xlu1 %3056  ;;  %v1708_v33 = vadd.f32 %v1680_v63, %v1593_v54  ;;  %v2054_v19 = vadd.f32 %v2026_v38, %v1939_v48  ;;  %v2170_v50 = vadd.f32 %v2142_v31, %v2055_v58  ;;  %v2141_v10 = vsel %vm2138_vm15, %v8891_v25, %v8885_v18  ;;  %v8896_v48 = vld [vmem:[#allocation158_spill] sm:$0xff]  ;;  %v8898_v63 = vld [vmem:[#allocation152_spill] sm:$0xff]  ;;  %v8900_v31 = vld [vmem:[#allocation153_spill] sm:$0xff] }
 0x5e8   : > { %8887 = vst [vmem:[#allocation29_spill] sm:$0xff] %v7180_v14  ;;  %2354 = vrot.lane.b32.xlu0 %v6983_v26, %s5178_s23  ;;  %2237 = vrot.lane.b32.xlu1 %v7030_v55, %s5177_s20  ;;  %v8893_v14 = vld [vmem:[#allocation156_spill] sm:$0xff]  ;;  %v2171_v26 = vadd.f32 %v2143_v2, %v2056_v53  ;;  %v2172_v3 = vadd.f32 %v2144_v52, %v2057_v35 }
 0x5e9   : > { %v2257_v30 = vsel %vm2253_vm5, %v8893_v14, %v8892_v11  ;;  %v1707_v17 = vadd.f32 %v1679_v15, %v1592_v36  ;;  %v1823_v55 = vadd.f32 %v1795_v0, %v1708_v33  ;;  %v2256_v62 = vsel %vm2253_vm5, %v8895_v59, %v8893_v14  ;;  %v8899_v38 = vld [vmem:[#allocation16_spill] sm:$0xff] }
 0x5ea   : > { %v7201_v39 = vpop.permute.xlu0 %2855  ;;  %v2258_v54 = vsel %vm2253_vm5, %v8892_v11, %v8896_v48  ;;  %v2372_v27 = vsel %vm2368_vm6, %v8897_v60, %v6754_v8  ;;  %v2169_v33 = vadd.f32 %v2141_v10, %v2054_v19  ;;  %v2285_v42 = vadd.f32 %v2257_v30, %v2170_v50  ;;  %v8901_v14 = vld [vmem:[#allocation160_spill] sm:$0xff]  ;;  %v8904_v11 = vld [vmem:[#allocation31_spill] sm:$0xff] }
 0x5eb   : > { %8894 = vst [vmem:[#allocation41_spill] sm:$0xff] %v7201_v39  ;;  %v7203_v47 = vpop.permute.xlu1 %2743  ;;  %v2574_v58 = vmul.f32 %v6428_v45, %v8898_v63  ;;  %v2575_v18 = vmul.f32 %v8899_v38, %v8898_v63  ;;  %v2259_v2 = vsel %vm2253_vm5, %v8896_v48, %v8900_v31  ;;  %v1794_v52 = vsel %vm1793_vm12, %v8901_v14, %v8890_v32  ;;  %v8902_v53 = vld [vmem:[#allocation20_spill] sm:$0xff]  ;;  %v8903_v32 = vld [vmem:[#allocation159_spill] sm:$0xff] }
 0x5ec   : > { %2358 = vrot.lane.b32.xlu0 %v6987_v46, %s5178_s23  ;;  %2356 = vrot.lane.b32.xlu1 %v6993_v49, %s5178_s23  ;;  %v2371_v46 = vsel %vm2368_vm6, %v6813_v34, %v8897_v60  ;;  %v2487_v49 = vsel %vm2483_vm7, %v6844_v51, %v6776_v1  ;;  %v2284_v15 = vadd.f32 %v2256_v62, %v2169_v33 }
 0x5ed   : > { %v2286_v0 = vadd.f32 %v2258_v54, %v2171_v26  ;;  %v1910_v35 = vsel %vm1908_vm13, %v8902_v53, %v8874_v40  ;;  %v2400_v36 = vadd.f32 %v2372_v27, %v2285_v42  ;;  %v2373_v10 = vsel %vm2368_vm6, %v6754_v8, %v8903_v32  ;;  %v8905_v8 = vld [vmem:[#allocation161_spill] sm:$0xff] }
 0x5ee   : > { %v7234_v50 = vpop.permute.xlu0 %2847  ;;  %v2374_v30 = vsel %vm2368_vm6, %v8903_v32, %v8904_v11  ;;  %v2486_v62 = vsel %vm2483_vm7, %v6835_v41, %v6844_v51  ;;  %v2287_v40 = vadd.f32 %v2259_v2, %v2172_v3  ;;  %v1822_v26 = vadd.f32 %v1794_v52, %v1707_v17  ;;  %v8906_v51 = vld [vmem:[#allocation23_spill] sm:$0xff]  ;;  %v8907_v3 = vld [vmem:[#allocation12_spill] sm:$0xff] }
 0x5ef   : > { %v7239_v19 = vpop.permute.xlu1 %2849  ;;  %v2399_v48 = vadd.f32 %v2371_v46, %v2284_v15  ;;  %v2515_v54 = vadd.f32 %v2487_v49, %v2400_v36  ;;  %v1909_v60 = vsel %vm1908_vm13, %v8905_v8, %v8902_v53  ;;  %v1938_v27 = vadd.f32 %v1910_v35, %v1823_v55  ;;  %v8908_v53 = vld [vmem:[#allocation15_spill] sm:$0xff] }
 0x5f0   : > { %2352 = vrot.lane.b32.xlu0 %v6997_v22, %s5178_s23  ;;  %2360 = vrot.lane.b32.xlu1 %v7001_v23, %s5178_s23  ;;  %v2488_v33 = vsel %vm2483_vm7, %v6776_v1, %v6872_v28  ;;  %v2489_v22 = vsel %vm2483_vm7, %v6872_v28, %v8906_v51  ;;  %v2025_v17 = vsel %vm2023_vm14, %v8907_v3, %v8883_v6  ;;  %v8910_v8 = vld [vmem:[#allocation35_spill] sm:$0xff] }
 0x5f1   : > { %v2401_v23 = vadd.f32 %v2373_v10, %v2286_v0  ;;  %v2402_v2 = vadd.f32 %v2374_v30, %v2287_v40  ;;  %v2514_v14 = vadd.f32 %v2486_v62, %v2399_v48  ;;  %v2024_v55 = vsel %vm2023_vm14, %v6903_v5, %v8907_v3 }
 0x5f2   : > { %v7263_v42 = vpop.permute.xlu0 %2992  ;;  %v2666_v1 = vsel %vm366_vm0, %v6894_v57, %v6979_v12  ;;  %v2573_v28 = vmul.f32 %v6460_v7, %v8898_v63  ;;  %v1937_v6 = vadd.f32 %v1909_v60, %v1822_v26  ;;  %v2588_v15 = vadd.f32 %v2574_v58, %v2515_v54 }
 0x5f3   : > { %v2854_v52 = vpop.permute.xlu1 %2853  ;;  %v2516_v46 = vadd.f32 %v2488_v33, %v2401_v23  ;;  %v2517_v49 = vadd.f32 %v2489_v22, %v2402_v2  ;;  %v2053_v0 = vadd.f32 %v2025_v17, %v1938_v27  ;;  %v2139_v5 = vsel %vm2138_vm15, %v6866_v4, %v6928_v9  ;;  %v8913_v23 = vld [vmem:[#allocation25_spill] sm:$0xff]  ;;  %v8914_v2 = vld [vmem:[#allocation11_spill] sm:$0xff] }
 0x5f4   : > { %2471 = vrot.lane.b32.xlu0 %v7034_v43, %s5179_s24  ;;  %2469 = vrot.lane.b32.xlu1 %v7038_v21, %s5179_s24  ;;  %v2576_v35 = vmul.f32 %v8908_v53, %v8898_v63  ;;  %v2770_v36 = vsel %vm471_vm1, %v7112_v20, %v7014_v56  ;;  %v2052_v32 = vadd.f32 %v2024_v55, %v1937_v6 }
 0x5f5   : > { %v2140_v21 = vsel %vm2138_vm15, %v6928_v9, %v8891_v25  ;;  %v2692_v58 = vadd.f32 %v2666_v1, %v2588_v15  ;;  %v2587_v10 = vadd.f32 %v2573_v28, %v2514_v14  ;;  %v2667_v4 = vsel %vm366_vm0, %v6979_v12, %v6919_v29  ;;  %v8915_v28 = vld [vmem:[#allocation17_spill] sm:$0xff]  ;;  %v8916_v15 = vld [vmem:[#allocation40_spill] sm:$0xff] }
 0x5f6   : > { %v7288_v43 = vpop.permute.xlu0 %2996  ;;  %v2668_v62 = vsel %vm366_vm0, %v6919_v29, %v7026_v13  ;;  %v2874_v40 = vsel %vm576_vm2, %v7239_v19, %v7169_v37  ;;  %v2167_v9 = vadd.f32 %v2139_v5, %v2052_v32  ;;  %v2589_v25 = vadd.f32 %v2575_v18, %v2516_v46  ;;  %v8911_v18 = vld [vmem:[#allocation19_spill] sm:$0xff] }
 0x5f7   : > { %8909 = vst [vmem:[#allocation30_spill] sm:$0xff] %v7288_v43  ;;  %v2452_v30 = vpop.permute.xlu1 %2451  ;;  %v2590_v26 = vadd.f32 %v2576_v35, %v2517_v49  ;;  %v2796_v48 = vadd.f32 %v2770_v36, %v2692_v58  ;;  %v2168_v54 = vadd.f32 %v2140_v21, %v2053_v0  ;;  %v2255_v12 = vsel %vm2253_vm5, %v6965_v16, %v8895_v59  ;;  %v8917_v35 = vld [vmem:[#allocation29_spill] sm:$0xff]  ;;  %v8918_v58 = vld [vmem:[#allocation28_spill] sm:$0xff] }
 0x5f8   : > { %2475 = vrot.lane.b32.xlu0 %v7042_v24, %s5179_s24  ;;  %2473 = vrot.lane.b32.xlu1 %v7057_v44, %s5179_s24  ;;  %v2771_v29 = vsel %vm471_vm1, %v7014_v56, %v7147_v61  ;;  %v2772_v24 = vsel %vm471_vm1, %v7147_v61, %v8910_v8  ;;  %v2693_v44 = vadd.f32 %v2667_v4, %v2589_v25  ;;  %v8912_v61 = vld [vmem:[#allocation34_spill] sm:$0xff] }
 0x5f9   : > { %v2694_v27 = vadd.f32 %v2668_v62, %v2590_v26  ;;  %v2665_v33 = vsel %vm366_vm0, %v8911_v18, %v6894_v57  ;;  %v2900_v22 = vadd.f32 %v2874_v40, %v2796_v48  ;;  %v2875_v59 = vsel %vm576_vm2, %v7169_v37, %v2854_v52  ;;  %v8921_v48 = vld [vmem:[#allocation10_spill] sm:$0xff] }
 0x5fa   : > { %v7315_v60 = vpop.permute.xlu0 %2637  ;;  %v2876_v56 = vsel %vm576_vm2, %v2854_v52, %v7201_v39  ;;  %v2254_v57 = vsel %vm2253_vm5, %v8914_v2, %v6965_v16  ;;  %v2797_v14 = vadd.f32 %v2771_v29, %v2693_v44  ;;  %v2283_v37 = vadd.f32 %v2255_v12, %v2168_v54  ;;  %v8922_v54 = vld [vmem:[#allocation98_spill] sm:$0xff]  ;;  %v8949_v39 = vld [vmem:[#allocation83_spill] sm:$0xff] }
 0x5fb   : > { %v2991_v3 = vpop.permute.xlu1 %2990  ;;  %v2798_v55 = vadd.f32 %v2772_v24, %v2694_v27  ;;  %v2370_v52 = vsel %vm2368_vm6, %v8915_v28, %v6813_v34  ;;  %v2691_v6 = vadd.f32 %v2665_v33, %v2587_v10  ;;  %v2769_v46 = vsel %vm471_vm1, %v7203_v47, %v7112_v20 }
 0x5fc   : > { %v3015_v17 = vsel %vm718_vm3, %v2991_v3, %v7263_v42  ;;  %2651 = vrot.lane.b32.xlu0 %v8912_v61, %s5142_s27  ;;  %2467 = vrot.lane.b32.xlu1 %v8913_v23, %s5179_s24  ;;  %v2485_v0 = vsel %vm2483_vm7, %v8916_v15, %v6835_v41  ;;  %v2901_v5 = vadd.f32 %v2875_v59, %v2797_v14  ;;  %v8919_v41 = vld [vmem:[#allocation39_spill] sm:$0xff] }
 0x5fd   : > { %v3041_v1 = vadd.f32 %v3015_v17, %v2900_v22  ;;  %v2902_v16 = vadd.f32 %v2876_v56, %v2798_v55  ;;  %v2873_v34 = vsel %vm576_vm2, %v7234_v50, %v7239_v19  ;;  %v2795_v10 = vadd.f32 %v2769_v46, %v2691_v6  ;;  %v8920_v19 = vld [vmem:[#allocation27_spill] sm:$0xff] }
 0x5fe   : > { %v2742_v49 = vpop.permute.xlu0 %2741  ;;  %v2398_v25 = vadd.f32 %v2370_v52, %v2283_v37  ;;  %v2369_v26 = vsel %vm2368_vm6, %v8920_v19, %v8915_v28  ;;  %v2614_v12 = vmul.f32 %v8922_v54, %v8921_v48  ;;  %v2618_v29 = vmul.f32 %v8922_v54, %v8899_v38  ;;  %v8925_v37 = vld [vmem:[#allocation88_spill] sm:$0xff]  ;;  %v8926_v28 = vld [vmem:[#allocation21_spill] sm:$0xff] }
 0x5ff   : > { %v7343_v36 = vadd.f32 %v8917_v35, %v3041_v1  ;;  %v2995_v32 = vpop.permute.xlu1 %2994  ;;  %v2282_v24 = vadd.f32 %v2254_v57, %v2167_v9  ;;  %v2899_v44 = vadd.f32 %v2873_v34, %v2795_v10  ;;  %v2484_v56 = vsel %vm2483_vm7, %v2452_v30, %v8916_v15  ;;  %v8923_v57 = vld [vmem:[#allocation9_spill] sm:$0xff]  ;;  %v8924_v1 = vld [vmem:[#allocation22_spill] sm:$0xff] }
 0x600   : > { %v3016_v21 = vsel %vm718_vm3, %v7263_v42, %v2995_v32  ;;  %v3017_v20 = vsel %vm718_vm3, %v2995_v32, %v7288_v43  ;;  %2655 = vrot.lane.b32.xlu0 %v8918_v58, %s5142_s27  ;;  %2653 = vrot.lane.b32.xlu1 %v8919_v41, %s5142_s27  ;;  %v2513_v59 = vadd.f32 %v2485_v0, %v2398_v25 }
 0x601   : > { %v8567_v4 = vmax.f32 %v7343_v36, 0.0  ;;  %v3042_v62 = vadd.f32 %v3016_v21, %v2901_v5  ;;  %v3043_v40 = vadd.f32 %v3017_v20, %v2902_v16  ;;  %v2397_v9 = vadd.f32 %v2369_v26, %v2282_v24  ;;  %v8927_v20 = vld [vmem:[#allocation101_spill] sm:$0xff] }
 0x602   : > { %v2846_v42 = vpop.permute.xlu0 %2845  ;;  %v2572_v14 = vmul.f32 %v8923_v57, %v8898_v63  ;;  %v1398_v30 = vmul.f32 %v8925_v37, %v8924_v1  ;;  %v2664_v6 = vsel %vm366_vm0, %v7315_v60, %v8911_v18  ;;  %v2768_v5 = vsel %vm471_vm1, %v2742_v49, %v7203_v47 }
 0x603   : > { %3095 = vst [vmem:[#allocation2 + $0x18] sm:$0xff] %v8567_v4  ;;  %v7367_v27 = vadd.f32 %v8917_v35, %v3042_v62  ;;  %v7370_v33 = vadd.f32 %v8917_v35, %v3043_v40  ;;  %v2989_v22 = vpop.permute.xlu1 %2988  ;;  %v2512_v52 = vadd.f32 %v2484_v56, %v2397_v9  ;;  %v2571_v16 = vmul.f32 %v8921_v48, %v8898_v63  ;;  %v8953_v63 = vld [vmem:[#allocation99_spill] sm:$0xff] }
 0x604   : > { %v3014_v17 = vsel %vm718_vm3, %v2989_v22, %v2991_v3  ;;  %2649 = vrot.lane.b32.xlu0 %v2614_v12, %s5142_s27  ;;  %2657 = vrot.lane.b32.xlu1 %v2618_v29, %s5142_s27  ;;  %v1397_v3 = vmul.f32 %v8925_v37, %v8926_v28  ;;  %v2586_v0 = vadd.f32 %v2572_v14, %v2513_v59 }
 0x605   : > { %v8566_v61 = vmax.f32 %v7367_v27, 0.0  ;;  %v8569_v23 = vmax.f32 %v7370_v33, 0.0  ;;  %v3040_v2 = vadd.f32 %v3014_v17, %v2899_v44  ;;  %v2720_v58 = vmul.f32 %v8927_v20, %v6460_v7  ;;  %v3053_v17 = vld [vmem:[%s8379_s2 + $0x8] sm:$0xff] }
 0x606   : > { %v7381_v55 = vpop.permute.xlu0 %1434  ;;  %v2690_v32 = vadd.f32 %v2664_v6, %v2586_v0  ;;  %v2719_v41 = vmul.f32 %v8927_v20, %v8923_v57  ;;  %v2872_v47 = vsel %vm576_vm2, %v2846_v42, %v7234_v50  ;;  %v2585_v10 = vadd.f32 %v2571_v16, %v2512_v52 }
 0x607   : > { %3096 = vst [vmem:[#allocation2 + $0x20] sm:$0xff] %v8566_v61  ;;  %3097 = vst [vmem:[#allocation2 + $0x28] sm:$0xff] %v8569_v23  ;;  %v7395_v46 = vadd.f32 %v8917_v35, %v3040_v2  ;;  %v2636_v15 = vpop.permute.xlu1 %2635  ;;  %v2722_v12 = vmul.f32 %v8927_v20, %v8899_v38  ;;  %v2721_v50 = vmul.f32 %v8927_v20, %v6428_v45  ;;  %v8944_v61 = vld [vmem:[#allocation82_spill] sm:$0xff] }
 0x608   : > { %1444 = vrot.lane.b32.xlu0 %v1398_v30, %s5170_s10  ;;  %1442 = vrot.lane.b32.xlu1 %v1397_v3, %s5170_s10  ;;  %v2663_v34 = vsel %vm366_vm0, %v2636_v15, %v7315_v60  ;;  %v2794_v40 = vadd.f32 %v2768_v5, %v2690_v32  ;;  %v8928_v15 = vld [vmem:[#allocation89_spill] sm:$0xff]  ;;  %v2317_v11 = vmul.f32 %v8953_v63, %v8926_v28 }
 0x609   : > { %v8568_v18 = vmax.f32 %v7395_v46, 0.0  ;;  %v2689_v60 = vadd.f32 %v2663_v34, %v2585_v10  ;;  %v1513_v0 = vmul.f32 %v8928_v15, %v8924_v1  ;;  %v1512_v5 = vmul.f32 %v8928_v15, %v8926_v28 }
 0x60a   : > { %v7406_v21 = vpop.permute.xlu0 %1438  ;;  %v2898_v19 = vadd.f32 %v2872_v47, %v2794_v40 }
 0x60b   : > { %3094 = vst [vmem:[#allocation2 + $0x10] sm:$0xff] %v8568_v18  ;;  %v2740_v62 = vpop.permute.xlu1 %2739 }
 0x60c   : > { %v2767_v25 = vsel %vm471_vm1, %v2740_v62, %v2742_v49  ;;  %2757 = vrot.lane.b32.xlu0 %v2720_v58, %s5143_s28  ;;  %2755 = vrot.lane.b32.xlu1 %v2719_v41, %s5143_s28  ;;  %v8929_v58 = vld [vmem:[#allocation100_spill] sm:$0xff] }
 0x60d   : > { %v2793_v29 = vadd.f32 %v2767_v25, %v2689_v60  ;;  %v2824_v41 = vmul.f32 %v8929_v58, %v6460_v7  ;;  %v2823_v47 = vmul.f32 %v8929_v58, %v8923_v57  ;;  %v2826_v40 = vmul.f32 %v8929_v58, %v8899_v38  ;;  %v8959_v57 = vld [vmem:[#allocation73_spill] sm:$0xff] }
 0x60e   : > { %v2987_v26 = vpop.permute.xlu0 %2986  ;;  %v2825_v25 = vmul.f32 %v8929_v58, %v6428_v45 }
 0x60f   : > { %v3013_v24 = vsel %vm718_vm3, %v2987_v26, %v2989_v22  ;;  %v2844_v44 = vpop.permute.xlu1 %2843  ;;  %v2718_v22 = vmul.f32 %v8927_v20, %v8921_v48 }
 0x610   : > { %v3039_v59 = vadd.f32 %v3013_v24, %v2898_v19  ;;  %v2871_v49 = vsel %vm576_vm2, %v2844_v44, %v2846_v42  ;;  %2761 = vrot.lane.b32.xlu0 %v2722_v12, %s5143_s28  ;;  %2759 = vrot.lane.b32.xlu1 %v2721_v50, %s5143_s28  ;;  %v8931_v12 = vld [vmem:[#allocation79_spill] sm:$0xff] }
 0x611   : > { %v2897_v56 = vadd.f32 %v2871_v49, %v2793_v29  ;;  %v2822_v29 = vmul.f32 %v8929_v58, %v8921_v48  ;;  %v8956_v48 = vld [vmem:[#allocation92_spill] sm:$0xff] }
 0x612   : > { %v7431_v9 = vadd.f32 %v8917_v35, %v3039_v59  ;;  %v2985_v2 = vpop.permute.xlu0 %2984  ;;  %v8932_v59 = vld [vmem:[#allocation95_spill] sm:$0xff] }
 0x613   : > { %v3012_v14 = vsel %vm718_vm3, %v2985_v2, %v2987_v26  ;;  %v7436_v30 = vpop.permute.xlu1 %1436  ;;  %v8930_v26 = vld [vmem:[#allocation26_spill] sm:$0xff]  ;;  %v1628_v49 = vmul.f32 %v8932_v59, %v8924_v1 }
 0x614   : > { %v8565_v42 = vmax.f32 %v7431_v9, 0.0  ;;  %v3038_v3 = vadd.f32 %v3012_v14, %v2897_v56  ;;  %2753 = vrot.lane.b32.xlu0 %v2718_v22, %s5143_s28  ;;  %3061 = vperm.xlu1 %4996, %v3053_v17   ;;  %v1391_v50 = vmul.f32 %v8931_v12, %v8930_v26  ;;  %v1627_v56 = vmul.f32 %v8932_v59, %v8926_v28  ;;  %v8933_v22 = vld [vmem:[#allocation102_spill] sm:$0xff]  ;;  %v8934_v14 = vld [vmem:[#allocation137_spill] sm:$0xff] }
 0x615   : > { %v8937_v12 = vld [vmem:[#allocation130_spill] sm:$0xff]  ;;  %v1736_v4 = vmul.f32 %v8944_v61, %v8930_v26  ;;  %v1966_v8 = vmul.f32 %v8949_v39, %v8930_v26  ;;  %v2196_v45 = vmul.f32 %v8956_v48, %v8930_v26 }
 0x616   : > { %3093 = vst [vmem:[#allocation2 + $0x8] sm:$0xff] %v8565_v42  ;;  %v7443_v52 = vadd.f32 %v8917_v35, %v3038_v3  ;;  %v7445_v6 = vpop.permute.xlu0 %1551  ;;  %v2965_v3 = vmul.f32 %v8934_v14, %v8933_v22  ;;  %v8939_v14 = vld [vmem:[#allocation151_spill] sm:$0xff]  ;;  %v8947_v35 = vld [vmem:[#allocation93_spill] sm:$0xff] }
 0x617   : > { %v7451_v16 = vpop.permute.xlu1 %1440  ;;  %v2087_v43 = vmul.f32 %v8947_v35, %v8926_v28 }
 0x618   : > { %v8564_v32 = vmax.f32 %v7443_v52, 0.0  ;;  %1559 = vrot.lane.b32.xlu0 %v1513_v0, %s5171_s11  ;;  %1557 = vrot.lane.b32.xlu1 %v1512_v5, %s5171_s11  ;;  %v8935_v0 = vld [vmem:[#allocation148_spill] sm:$0xff] }
 0x619   : > { %v2964_v5 = vmul.f32 %v8935_v0, %v8933_v22 }
 0x61a   : > { %3092 = vst [vmem:[#allocation2] sm:$0xff] %v8564_v32  ;;  %v7458_v34 = vpop.permute.xlu0 %1555 }
 0x61b   : > { %v7464_v10 = vpop.permute.xlu1 %1432 }
 0x61c   : > { %2861 = vrot.lane.b32.xlu0 %v2824_v41, %s5144_s29  ;;  %2859 = vrot.lane.b32.xlu1 %v2823_v47, %s5144_s29 }
 0x61e   : > { %v7468_v62 = vpop.permute.xlu0 %1664 }
 0x61f   : > { %v7474_v60 = vpop.permute.xlu1 %1549 }
 0x620   : > { %2865 = vrot.lane.b32.xlu0 %v2826_v40, %s5144_s29  ;;  %2863 = vrot.lane.b32.xlu1 %v2825_v25, %s5144_s29  ;;  %v8936_v40 = vld [vmem:[#allocation133_spill] sm:$0xff] }
 0x621   : > { %v2967_v25 = vmul.f32 %v8936_v40, %v8933_v22  ;;  %v8940_v40 = vld [vmem:[#allocation90_spill] sm:$0xff] }
 0x622   : > { %v7478_v19 = vpop.permute.xlu0 %1668 }
 0x623   : > { %v7484_v24 = vpop.permute.xlu1 %1553 }
 0x624   : > { %1430 = vrot.lane.b32.xlu0 %v1391_v50, %s5170_s10  ;;  %2857 = vrot.lane.b32.xlu1 %v2822_v29, %s5144_s29  ;;  %v2966_v50 = vmul.f32 %v8937_v12, %v8933_v22  ;;  %v1743_v12 = vmul.f32 %v8940_v40, %v8924_v1 }
 0x626   : > { %v7488_v44 = vpop.permute.xlu0 %1662 }
 0x627   : > { %v7494_v17 = vpop.permute.xlu1 %1547 }
 0x628   : > { %1674 = vrot.lane.b32.xlu0 %v1628_v49, %s5172_s12  ;;  %1672 = vrot.lane.b32.xlu1 %v1627_v56, %s5172_s12  ;;  %v8938_v49 = vld [vmem:[#allocation80_spill] sm:$0xff] }
 0x629   : > { %v1506_v56 = vmul.f32 %v8938_v49, %v8930_v26 }
 0x62a   : > { %v7498_v2 = vpop.permute.xlu0 %1781 }
 0x62b   : > { %v7504_v41 = vpop.permute.xlu1 %1666 }
 0x62c   : > { %3002 = vrot.lane.b32.xlu0 %v2965_v3, %s5145_s30  ;;  %3000 = vrot.lane.b32.xlu1 %v2964_v5, %s5145_s30  ;;  %v2963_v3 = vmul.f32 %v8939_v14, %v8933_v22  ;;  %v8942_v14 = vld [vmem:[#allocation91_spill] sm:$0xff] }
 0x62d   : > { %v1857_v32 = vmul.f32 %v8942_v14, %v8926_v28 }
 0x62e   : > { %v7508_v47 = vpop.permute.xlu0 %1785 }
 0x62f   : > { %v7514_v29 = vpop.permute.xlu1 %1670 }
 0x630   : > { %3006 = vrot.lane.b32.xlu0 %v2967_v25, %s5145_s30  ;;  %3004 = vrot.lane.b32.xlu1 %v2966_v50, %s5145_s30  ;;  %v1742_v25 = vmul.f32 %v8940_v40, %v8926_v28 }
 0x632   : > { %v7522_v0 = vpop.permute.xlu0 %1894 }
 0x633   : > { %v7524_v5 = vpop.permute.xlu1 %1779 }
 0x634   : > { %1545 = vrot.lane.b32.xlu0 %v1506_v56, %s5171_s11  ;;  %2998 = vrot.lane.b32.xlu1 %v2963_v3, %s5145_s30  ;;  %v8943_v56 = vld [vmem:[#allocation81_spill] sm:$0xff] }
 0x635   : > { %v1621_v3 = vmul.f32 %v8943_v56, %v8930_v26  ;;  %v8945_v56 = vld [vmem:[#allocation97_spill] sm:$0xff] }
 0x636   : > { %v7536_v49 = vpop.permute.xlu0 %1898  ;;  %v1973_v23 = vmul.f32 %v8945_v56, %v8924_v1 }
 0x637   : > { %v7532_v50 = vpop.permute.xlu1 %1783  ;;  %8941 = vst [vmem:[#allocation44_spill] sm:$0xff] %v7536_v49 }
 0x638   : > { %1789 = vrot.lane.b32.xlu0 %v1743_v12, %s5173_s13  ;;  %1787 = vrot.lane.b32.xlu1 %v1742_v25, %s5173_s13  ;;  %v1858_v12 = vmul.f32 %v8942_v14, %v8924_v1 }
 0x63a   : > { %v7550_v25 = vpop.permute.xlu0 %1892 }
 0x63b   : > { %v7542_v42 = vpop.permute.xlu1 %1777 }
 0x63c   : > { %1902 = vrot.lane.b32.xlu0 %v1857_v32, %s5174_s14  ;;  %1660 = vrot.lane.b32.xlu1 %v1621_v3, %s5172_s12  ;;  %v1972_v32 = vmul.f32 %v8945_v56, %v8926_v28 }
 0x63e   : > { %v7564_v61 = vpop.permute.xlu0 %2011 }
 0x63f   : > { %v7552_v18 = vpop.permute.xlu1 %1896 }
 0x640   : > { %1775 = vrot.lane.b32.xlu0 %v1736_v4, %s5173_s13  ;;  %1904 = vrot.lane.b32.xlu1 %v1858_v12, %s5174_s14  ;;  %v8948_v4 = vld [vmem:[#allocation86_spill] sm:$0xff] }
 0x641   : > { %v1851_v12 = vmul.f32 %v8948_v4, %v8930_v26  ;;  %v8952_v4 = vld [vmem:[#allocation94_spill] sm:$0xff] }
 0x642   : > { %v2203_v51 = vmul.f32 %v8952_v4, %v8924_v1 }
 0x643   : > { %v7560_v3 = vpop.permute.xlu1 %1900 }
 0x644   : > { %8946 = vst [vmem:[#allocation43_spill] sm:$0xff] %v7560_v3  ;;  %2019 = vrot.lane.b32.xlu0 %v1973_v23, %s5175_s16  ;;  %2017 = vrot.lane.b32.xlu1 %v1972_v32, %s5175_s16  ;;  %v2088_v23 = vmul.f32 %v8947_v35, %v8924_v1  ;;  %v7578_v32 = vpop.permute.xlu0 %2015 }
 0x645   : > { %8950 = vst [vmem:[#allocation32_spill] sm:$0xff] %v7578_v32  ;;  %v8960_v32 = vld [vmem:[#allocation72_spill] sm:$0xff] }
 0x647   : > { %v7570_v38 = vpop.permute.xlu1 %2009 }
 0x648   : > { %2132 = vrot.lane.b32.xlu0 %v2087_v43, %s5176_s17  ;;  %1890 = vrot.lane.b32.xlu1 %v1851_v12, %s5174_s14  ;;  %v2202_v43 = vmul.f32 %v8952_v4, %v8926_v28  ;;  %v7590_v39 = vpop.permute.xlu0 %2124 }
 0x64b   : > { %v7580_v13 = vpop.permute.xlu1 %2013 }
 0x64c   : > { %8951 = vst [vmem:[#allocation45_spill] sm:$0xff] %v7580_v13  ;;  %2005 = vrot.lane.b32.xlu0 %v1966_v8, %s5175_s16  ;;  %2134 = vrot.lane.b32.xlu1 %v2088_v23, %s5176_s17  ;;  %v8954_v8 = vld [vmem:[#allocation84_spill] sm:$0xff]  ;;  %v8962_v13 = vld [vmem:[#allocation57_spill] sm:$0xff] }
 0x64d   : > { %v2081_v31 = vmul.f32 %v8954_v8, %v8930_v26  ;;  %v1341_v8 = vsel %vm1333_vm8, %v8960_v32, %v8959_v57  ;;  %v8964_v32 = vld [vmem:[#allocation69_spill] sm:$0xff] }
 0x64f   : > { %v2008_v12 = vpop.permute.xlu1 %2007 }
 0x650   : > { %2249 = vrot.lane.b32.xlu0 %v2203_v51, %s5177_s20  ;;  %2247 = vrot.lane.b32.xlu1 %v2202_v43, %s5177_s20  ;;  %v2318_v51 = vmul.f32 %v8953_v63, %v8924_v1  ;;  %v7604_v43 = vpop.permute.xlu0 %2128 }
 0x651   : > { %8957 = vst [vmem:[#allocation46_spill] sm:$0xff] %v7604_v43 }
 0x653   : > { %v7596_v23 = vpop.permute.xlu1 %2126 }
 0x654   : > { %8955 = vst [vmem:[#allocation33_spill] sm:$0xff] %v7596_v23  ;;  %2362 = vrot.lane.b32.xlu0 %v2317_v11, %s5178_s23  ;;  %2120 = vrot.lane.b32.xlu1 %v2081_v31, %s5176_s17  ;;  %v1456_v31 = vsel %vm1448_vm9, %v7464_v10, %v7381_v55  ;;  %v8961_v11 = vld [vmem:[#allocation96_spill] sm:$0xff] }
 0x655   : > { %v2433_v48 = vmul.f32 %v8961_v11, %v8924_v1  ;;  %v2432_v43 = vmul.f32 %v8961_v11, %v8926_v28  ;;  %v1284_v1 = vmul.f32 %v8964_v32, %v8930_v26 }
 0x657   : > { %v7606_v7 = vpop.permute.xlu1 %2130 }
 0x658   : > { %8958 = vst [vmem:[#allocation36_spill] sm:$0xff] %v7606_v7  ;;  %2235 = vrot.lane.b32.xlu0 %v2196_v45, %s5177_s20  ;;  %2364 = vrot.lane.b32.xlu1 %v2318_v51, %s5178_s23  ;;  %v1369_v7 = vadd.f32 %v1341_v8, %v8962_v13  ;;  %v1571_v45 = vsel %vm1563_vm10, %v7494_v17, %v7474_v60  ;;  %v8965_v51 = vld [vmem:[#allocation85_spill] sm:$0xff] }
 0x659   : > { %v2311_v28 = vmul.f32 %v8965_v51, %v8930_v26  ;;  %v1686_v17 = vsel %vm1678_vm11, %v7488_v44, %v7468_v62 }
 0x65a   : > { %v1484_v10 = vadd.f32 %v1456_v31, %v1369_v7  ;;  %v1801_v7 = vsel %vm1793_vm12, %v7542_v42, %v7524_v5  ;;  %v8966_v31 = vld [vmem:[#allocation87_spill] sm:$0xff]  ;;  %v8967_v42 = vld [vmem:[#allocation18_spill] sm:$0xff] }
 0x65b   : > { %v7621_v23 = vpop.permute.xlu0 %2532  ;;  %v2123_v3 = vpop.permute.xlu1 %2122  ;;  %v2620_v51 = vmul.f32 %v8922_v54, %v8967_v42 }
 0x65c   : > { %8963 = vst [vmem:[#allocation48_spill] sm:$0xff] %v7621_v23  ;;  %2479 = vrot.lane.b32.xlu0 %v2433_v48, %s5179_s24  ;;  %2477 = vrot.lane.b32.xlu1 %v2432_v43, %s5179_s24  ;;  %v1599_v49 = vadd.f32 %v1571_v45, %v1484_v10  ;;  %v2619_v43 = vmul.f32 %v8922_v54, %v8908_v53 }
 0x65d   : > { %v2426_v48 = vmul.f32 %v8966_v31, %v8930_v26  ;;  %v2724_v54 = vmul.f32 %v8927_v20, %v8967_v42 }
 0x65e   : > { %v1714_v45 = vadd.f32 %v1686_v17, %v1599_v49  ;;  %v1916_v49 = vsel %vm1908_vm13, %v7550_v25, %v7522_v0  ;;  %v2031_v17 = vsel %vm2023_vm14, %v2008_v12, %v7570_v38 }
 0x65f   : > { %v7632_v13 = vpop.permute.xlu0 %2241  ;;  %v7634_v8 = vpop.permute.xlu1 %2239 }
 0x660   : > { %1331 = vrot.lane.b32.xlu0 %v1284_v1, %s5156_s9  ;;  %2350 = vrot.lane.b32.xlu1 %v2311_v28, %s5178_s23  ;;  %v1829_v44 = vadd.f32 %v1801_v7, %v1714_v45  ;;  %v1399_v1 = vmul.f32 %v8925_v37, %v8930_v26  ;;  %v2146_v37 = vsel %vm2138_vm15, %v2123_v3, %v7590_v39 }
 0x661   : > { %v2827_v3 = vmul.f32 %v8929_v58, %v8908_v53 }
 0x662   : > { %v1944_v7 = vadd.f32 %v1916_v49, %v1829_v44  ;;  %v1514_v44 = vmul.f32 %v8928_v15, %v8930_v26 }
 0x663   : > { %v7648_v10 = vpop.permute.xlu0 %2245  ;;  %v7650_v32 = vpop.permute.xlu1 %2243 }
 0x664   : > { %2659 = vrot.lane.b32.xlu0 %v2619_v43, %s5142_s27  ;;  %2465 = vrot.lane.b32.xlu1 %v2426_v48, %s5179_s24  ;;  %v2723_v43 = vmul.f32 %v8927_v20, %v8908_v53  ;;  %v2059_v31 = vadd.f32 %v2031_v17, %v1944_v7  ;;  %v1629_v17 = vmul.f32 %v8932_v59, %v8930_v26  ;;  %v8980_v53 = vld [vmem:[#allocation66_spill] sm:$0xff] }
 0x665   : > { %v2828_v7 = vmul.f32 %v8929_v58, %v8967_v42  ;;  %v1859_v58 = vmul.f32 %v8942_v14, %v8930_v26 }
 0x666   : > { %v2174_v45 = vadd.f32 %v2146_v37, %v2059_v31  ;;  %v8970_v31 = vld [vmem:[#allocation134_spill] sm:$0xff] }
 0x667   : > { %v7658_v28 = vpop.permute.xlu0 %2354  ;;  %v2238_v23 = vpop.permute.xlu1 %2237 }
 0x668   : > { %1446 = vrot.lane.b32.xlu0 %v1399_v1, %s5170_s10  ;;  %2661 = vrot.lane.b32.xlu1 %v2620_v51, %s5142_s27  ;;  %v2261_v12 = vsel %vm2253_vm5, %v2238_v23, %v7634_v8 }
 0x669   : > { %v2289_v20 = vadd.f32 %v2261_v12, %v2174_v45  ;;  %v2968_v12 = vmul.f32 %v8970_v31, %v8933_v22  ;;  %v8975_v31 = vld [vmem:[#allocation78_spill] sm:$0xff] }
 0x66b   : > { %v7673_v48 = vpop.permute.xlu0 %2358  ;;  %v7675_v25 = vpop.permute.xlu1 %2356 }
 0x66c   : > { %2765 = vrot.lane.b32.xlu0 %v2724_v54, %s5143_s28  ;;  %2763 = vrot.lane.b32.xlu1 %v2723_v43, %s5143_s28  ;;  %v8969_v54 = vld [vmem:[#allocation136_spill] sm:$0xff] }
 0x66d   : > { %v2969_v43 = vmul.f32 %v8969_v54, %v8933_v22  ;;  %v2089_v22 = vmul.f32 %v8947_v35, %v8930_v26  ;;  %v8973_v54 = vld [vmem:[#allocation77_spill] sm:$0xff] }
 0x66f   : > { %v2353_v1 = vpop.permute.xlu0 %2352  ;;  %v7685_v51 = vpop.permute.xlu1 %2360 }
 0x670   : > { %v2376_v49 = vsel %vm2368_vm6, %v2353_v1, %v7658_v28  ;;  %2867 = vrot.lane.b32.xlu0 %v2827_v3, %s5144_s29  ;;  %1561 = vrot.lane.b32.xlu1 %v1514_v44, %s5171_s11  ;;  %v1744_v3 = vmul.f32 %v8940_v40, %v8930_v26  ;;  %v1974_v1 = vmul.f32 %v8945_v56, %v8930_v26  ;;  %v8974_v56 = vld [vmem:[#allocation76_spill] sm:$0xff] }
 0x671   : > { %v7691_v23 = vadd.f32 %v2376_v49, %v2289_v20  ;;  %v2319_v40 = vmul.f32 %v8953_v63, %v8930_v26  ;;  %v8976_v63 = vmax.f32 %v7370_v33, 0.0 }
 0x673   : > { %8968 = vst [vmem:[#allocation49_spill] sm:$0xff] %v7691_v23  ;;  %v7697_v15 = vpop.permute.xlu0 %2471  ;;  %v7699_v37 = vpop.permute.xlu1 %2469 }
 0x674   : > { %1676 = vrot.lane.b32.xlu0 %v1629_v17, %s5172_s12  ;;  %2869 = vrot.lane.b32.xlu1 %v2828_v7, %s5144_s29  ;;  %v2204_v17 = vmul.f32 %v8952_v4, %v8930_v26  ;;  %v8977_v4 = vmax.f32 %v7395_v46, 0.0  ;;  %v8982_v46 = vld [vmem:[#allocation74_spill] sm:$0xff]  ;;  %s224_s29 = scalar_lea.vmem %s8381_s4, %s4869_s26 }
 0x677   : > { %v7707_v45 = vpop.permute.xlu0 %2475  ;;  %v7709_v59 = vpop.permute.xlu1 %2473 }
 0x678   : > { %3010 = vrot.lane.b32.xlu0 %v2969_v43, %s5145_s30  ;;  %3008 = vrot.lane.b32.xlu1 %v2968_v12, %s5145_s30  ;;  %v1345_v43 = vsel %vm1333_vm8, %v8974_v56, %v8973_v54  ;;  %v1346_v12 = vsel %vm1333_vm8, %v8973_v54, %v8975_v31 }
 0x679   : > { %v1373_v42 = vadd.f32 %v1345_v43, %v8980_v53  ;;  %v1342_v53 = vsel %vm1333_vm8, %v8959_v57, %v8982_v46  ;;  %v8984_v43 = vmax.f32 %v7443_v52, 0.0  ;;  %v1457_v57 = vsel %vm1448_vm9, %v7381_v55, %v7436_v30 }
 0x67b   : > { %v7717_v44 = vpop.permute.xlu0 %2651  ;;  %v7719_v20 = vpop.permute.xlu1 %2467 }
 0x67c   : > { %1906 = vrot.lane.b32.xlu0 %v1859_v58, %s5174_s14  ;;  %1791 = vrot.lane.b32.xlu1 %v1744_v3, %s5173_s13  ;;  %v5003_v58 = vpack.i.bf16 %v8977_v4, %v8976_v63  ;;  %v8978_v3 = vmax.f32 %v7343_v36, 0.0 }
 0x67f   : > { %v7727_v49 = vpop.permute.xlu0 %2655  ;;  %v7729_v14 = vpop.permute.xlu1 %2653 }
 0x680   : > { %2136 = vrot.lane.b32.xlu0 %v2089_v22, %s5176_s17  ;;  %2021 = vrot.lane.b32.xlu1 %v1974_v1, %s5175_s16  ;;  %v8979_v22 = vmax.f32 %v7367_v27, 0.0 }
 0x682   : > { %v4998_v1 = vpack.i.bf16 %v8979_v22, %v8978_v3  ;;  %v8987_v3 = vld [vmem:[#allocation42_spill] sm:$0xff] }
 0x683   : > { %v7737_v7 = vpop.permute.xlu0 %2649  ;;  %v7739_v35 = vpop.permute.xlu1 %2657 }
 0x684   : > { %8971 = vst [vmem:[#allocation37_spill] sm:$0xff] %v7737_v7  ;;  %8972 = vst [vmem:[#allocation50_spill] sm:$0xff] %v7739_v35  ;;  %2366 = vrot.lane.b32.xlu0 %v2319_v40, %s5178_s23  ;;  %2251 = vrot.lane.b32.xlu1 %v2204_v17, %s5177_s20  ;;  %v8981_v7 = vld [vmem:[#allocation67_spill] sm:$0xff]  ;;  %v2434_v17 = vmul.f32 %v8961_v11, %v8930_v26  ;;  %v1458_v11 = vsel %vm1448_vm9, %v7436_v30, %v7406_v21 }
 0x685   : > { %v1374_v23 = vadd.f32 %v1346_v12, %v8981_v7  ;;  %v8983_v7 = vmax.f32 %v7431_v9, 0.0  ;;  %v8986_v9 = vld [vmem:[#allocation59_spill] sm:$0xff]  ;;  %v1687_v30 = vsel %vm1678_vm11, %v7468_v62, %v7504_v41 }
 0x686   : > { %v1370_v26 = vadd.f32 %v1342_v53, %v8986_v9  ;;  %v1804_v9 = vsel %vm1793_vm12, %v7532_v50, %v7508_v47 }
 0x687   : > { %v7759_v35 = vpop.permute.xlu0 %1444  ;;  %v1443_v54 = vpop.permute.xlu1 %1442  ;;  %v5008_v12 = vpack.i.bf16 %v8984_v43, %v8983_v7 }
 0x688   : > { %v1460_v40 = vsel %vm1448_vm9, %v7451_v16, %v1443_v54  ;;  %v1461_v33 = vsel %vm1448_vm9, %v1443_v54, %v7759_v35  ;;  %5004 = vrot.lane.b32.xlu0 %v5003_v58, %s5142_s27  ;;  %4999 = vrot.lane.b32.xlu1 %v4998_v1, %s5142_s27  ;;  %v8985_v58 = vld [vmem:[#allocation75_spill] sm:$0xff]  ;;  %v1485_v22 = vadd.f32 %v1457_v57, %v1370_v26 }
 0x689   : > { %v1488_v36 = vadd.f32 %v1460_v40, %v1373_v42  ;;  %v1489_v27 = vadd.f32 %v1461_v33, %v1374_v23  ;;  %v1343_v42 = vsel %vm1333_vm8, %v8982_v46, %v8985_v58  ;;  %v1344_v52 = vsel %vm1333_vm8, %v8985_v58, %v8974_v56 }
 0x68a   : > { %v1572_v23 = vsel %vm1563_vm10, %v7474_v60, %v7445_v6  ;;  %v1371_v55 = vadd.f32 %v1343_v42, %v8987_v3  ;;  %v1459_v40 = vsel %vm1448_vm9, %v7406_v21, %v7451_v16  ;;  %v1573_v56 = vsel %vm1563_vm10, %v7445_v6, %v7484_v24  ;;  %v8988_v60 = vld [vmem:[#allocation58_spill] sm:$0xff] }
 0x68b   : > { %v7776_v63 = vpop.permute.xlu0 %2757  ;;  %v7778_v4 = vpop.permute.xlu1 %2755  ;;  %v1372_v33 = vadd.f32 %v1344_v52, %v8988_v60  ;;  %v1600_v53 = vadd.f32 %v1572_v23, %v1485_v22  ;;  %v1688_v21 = vsel %vm1678_vm11, %v7504_v41, %v7478_v19  ;;  %v1802_v6 = vsel %vm1793_vm12, %v7524_v5, %v7498_v2 }
 0x68c   : > { %2481 = vrot.lane.b32.xlu1 %v2434_v17, %s5179_s24  ;;  %5009 = vrot.lane.b32.xlu0 %v5008_v12, %s5142_s27  ;;  %v1486_v46 = vadd.f32 %v1458_v11, %v1371_v55  ;;  %v1574_v17 = vsel %vm1563_vm10, %v7484_v24, %v7458_v34  ;;  %v1689_v58 = vsel %vm1678_vm11, %v7478_v19, %v7514_v29  ;;  %v8990_v11 = vld [vmem:[#allocation44_spill] sm:$0xff]  ;;  %v8991_v55 = vld [vmem:[#allocation43_spill] sm:$0xff] }
 0x68d   : > { %v1487_v16 = vadd.f32 %v1459_v40, %v1372_v33  ;;  %v1715_v43 = vadd.f32 %v1687_v30, %v1600_v53  ;;  %v1803_v24 = vsel %vm1793_vm12, %v7498_v2, %v7532_v50  ;;  %v1917_v41 = vsel %vm1908_vm13, %v7522_v0, %v7552_v18  ;;  %v8992_v40 = vld [vmem:[#allocation33_spill] sm:$0xff] }
 0x68e   : > { %v1601_v7 = vadd.f32 %v1573_v56, %v1486_v46  ;;  %v2032_v26 = vsel %vm2023_vm14, %v7570_v38, %v7564_v61  ;;  %v1918_v2 = vsel %vm1908_vm13, %v7552_v18, %v8990_v11  ;;  %v1919_v22 = vsel %vm1908_vm13, %v8990_v11, %v8991_v55  ;;  %v8993_v46 = vld [vmem:[#allocation45_spill] sm:$0xff] }
 0x68f   : > { %v7799_v1 = vpop.permute.xlu0 %2761  ;;  %v7801_v54 = vpop.permute.xlu1 %2759  ;;  %v1602_v5 = vadd.f32 %v1574_v17, %v1487_v16  ;;  %v1830_v57 = vadd.f32 %v1802_v6, %v1715_v43  ;;  %v2147_v50 = vsel %vm2138_vm15, %v7590_v39, %v8992_v40  ;;  %v2033_v53 = vsel %vm2023_vm14, %v7564_v61, %v8993_v46  ;;  %v8994_v17 = vld [vmem:[#allocation32_spill] sm:$0xff] }
 0x690   : > { %v1716_v42 = vadd.f32 %v1688_v21, %v1601_v7  ;;  %v2034_v39 = vsel %vm2023_vm14, %v8993_v46, %v8994_v17 }
 0x691   : > { %v1717_v19 = vadd.f32 %v1689_v58, %v1602_v5  ;;  %v1945_v23 = vadd.f32 %v1917_v41, %v1830_v57  ;;  %v8996_v58 = vld [vmem:[#allocation36_spill] sm:$0xff]  ;;  %v2264_v57 = vsel %vm2253_vm5, %v7650_v32, %v7648_v10 }
 0x692   : > { %v1831_v52 = vadd.f32 %v1803_v24, %v1716_v42  ;;  %v2377_v24 = vsel %vm2368_vm6, %v7658_v28, %v7675_v25  ;;  %v2263_v42 = vsel %vm2253_vm5, %v7632_v13, %v7650_v32 }
 0x693   : > { %v7822_v62 = vpop.permute.xlu0 %2753  ;;  %v7824_v12 = vpop.permute.xlu1 %3061  ;;  %v1832_v30 = vadd.f32 %v1804_v9, %v1717_v19  ;;  %v2060_v18 = vadd.f32 %v2032_v26, %v1945_v23  ;;  %v2492_v9 = vsel %vm2483_vm7, %v7699_v37, %v7697_v15 }
 0x694   : > { %8989 = vst [vmem:[#allocation38_spill] sm:$0xff] %v7824_v12  ;;  %v1946_v21 = vadd.f32 %v1918_v2, %v1831_v52  ;;  %v2378_v2 = vsel %vm2368_vm6, %v7675_v25, %v7673_v48 }
 0x695   : > { %v1947_v6 = vadd.f32 %v1919_v22, %v1832_v30  ;;  %v2175_v16 = vadd.f32 %v2147_v50, %v2060_v18  ;;  %v2493_v22 = vsel %vm2483_vm7, %v7697_v15, %v7709_v59  ;;  %v8998_v30 = vld [vmem:[#allocation9_spill] sm:$0xff]  ;;  %v2491_v15 = vsel %vm2483_vm7, %v7719_v20, %v7699_v37  ;;  %v9001_v37 = vld [vmem:[#allocation50_spill] sm:$0xff] }
 0x696   : > { %v2061_v41 = vadd.f32 %v2033_v53, %v1946_v21  ;;  %v8999_v21 = vld [vmem:[#allocation14_spill] sm:$0xff]  ;;  %v2672_v20 = vsel %vm366_vm0, %v7727_v49, %v9001_v37 }
 0x697   : > { %v7844_v3 = vpop.permute.xlu0 %1559  ;;  %v1558_v0 = vpop.permute.xlu1 %1557 }
 0x698   : > { %v1575_v38 = vsel %vm1563_vm10, %v7458_v34, %v1558_v0  ;;  %v1576_v56 = vsel %vm1563_vm10, %v1558_v0, %v7844_v3  ;;  %v2262_v34 = vsel %vm2253_vm5, %v7634_v8, %v7632_v13  ;;  %v2062_v8 = vadd.f32 %v2034_v39, %v1947_v6 }
 0x699   : > { %v7856_v60 = vadd.f32 %v1575_v38, %v1488_v36  ;;  %v7858_v33 = vadd.f32 %v1576_v56, %v1489_v27  ;;  %v8995_v27 = vld [vmem:[#allocation46_spill] sm:$0xff]  ;;  %v2290_v5 = vadd.f32 %v2262_v34, %v2175_v16  ;;  %v2379_v13 = vsel %vm2368_vm6, %v7673_v48, %v7685_v51  ;;  %v8997_v56 = vld [vmem:[#allocation48_spill] sm:$0xff] }
 0x69a   : > { %v2148_v43 = vsel %vm2138_vm15, %v8992_v40, %v8995_v27  ;;  %v2149_v61 = vsel %vm2138_vm15, %v8995_v27, %v8996_v58  ;;  %v2494_v40 = vsel %vm2483_vm7, %v7709_v59, %v7707_v45  ;;  %v2579_v25 = vmul.f32 %v8998_v30, %v8997_v56  ;;  %v9000_v27 = vld [vmem:[#allocation13_spill] sm:$0xff] }
 0x69b   : > { %v2862_v7 = vpop.permute.xlu0 %2861  ;;  %v7869_v36 = vpop.permute.xlu1 %2859  ;;  %v2176_v26 = vadd.f32 %v2148_v43, %v2061_v41  ;;  %v2177_v19 = vadd.f32 %v2149_v61, %v2062_v8  ;;  %v2405_v52 = vadd.f32 %v2377_v24, %v2290_v5  ;;  %v2670_v48 = vsel %vm366_vm0, %v7717_v44, %v7729_v14  ;;  %v9002_v5 = vld [vmem:[#allocation49_spill] sm:$0xff] }
 0x69c   : > { %v2774_v59 = vsel %vm471_vm1, %v7778_v4, %v7776_v63  ;;  %v2580_v6 = vmul.f32 %v8999_v21, %v8997_v56  ;;  %v2581_v43 = vmul.f32 %v9000_v27, %v8997_v56  ;;  %v2671_v41 = vsel %vm366_vm0, %v7729_v14, %v7727_v49 }
 0x69d   : > { %v2291_v23 = vadd.f32 %v2263_v42, %v2176_v26  ;;  %v2292_v32 = vadd.f32 %v2264_v57, %v2177_v19  ;;  %v2520_v0 = vadd.f32 %v2492_v9, %v2405_v52  ;;  %v2878_v8 = vsel %vm576_vm2, %v7869_v36, %v2862_v7 }
 0x69e   : > { %v2519_v42 = vadd.f32 %v2491_v15, %v9002_v5  ;;  %v2775_v19 = vsel %vm471_vm1, %v7776_v63, %v7801_v54  ;;  %v2776_v14 = vsel %vm471_vm1, %v7801_v54, %v7799_v1 }
 0x69f   : > { %v7889_v11 = vpop.permute.xlu0 %2865  ;;  %v2864_v28 = vpop.permute.xlu1 %2863  ;;  %v2406_v50 = vadd.f32 %v2378_v2, %v2291_v23  ;;  %v2407_v38 = vadd.f32 %v2379_v13, %v2292_v32  ;;  %v2593_v34 = vadd.f32 %v2579_v25, %v2520_v0  ;;  %v9003_v2 = vld [vmem:[#allocation10_spill] sm:$0xff] }
 0x6a0   : > { %v2578_v49 = vmul.f32 %v9003_v2, %v8997_v56  ;;  %v2880_v63 = vsel %vm576_vm2, %v2864_v28, %v7889_v11  ;;  %v3384_v2 = vld [vmem:[#allocation5 + $0x320] sm:$0xff] }
 0x6a1   : > { %v2521_v53 = vadd.f32 %v2493_v22, %v2406_v50  ;;  %v2522_v39 = vadd.f32 %v2494_v40, %v2407_v38  ;;  %v2697_v16 = vadd.f32 %v2670_v48, %v2593_v34  ;;  %v9004_v22 = vld [vmem:[#allocation37_spill] sm:$0xff]  ;;  %v2879_v50 = vsel %vm576_vm2, %v2862_v7, %v2864_v28 }
 0x6a2   : > { %v2669_v40 = vsel %vm366_vm0, %v9004_v22, %v7717_v44  ;;  %v2592_v54 = vadd.f32 %v2578_v49, %v2519_v42  ;;  %v3380_v49 = vld [vmem:[#allocation5 + $0x300] sm:$0xff] }
 0x6a3   : > { %v7905_v18 = vpop.permute.xlu0 %1430  ;;  %v2858_v46 = vpop.permute.xlu1 %2857  ;;  %v2594_v57 = vadd.f32 %v2580_v6, %v2521_v53  ;;  %v2595_v9 = vadd.f32 %v2581_v43, %v2522_v39  ;;  %v2801_v26 = vadd.f32 %v2774_v59, %v2697_v16  ;;  %v2773_v53 = vsel %vm471_vm1, %v7822_v62, %v7778_v4 }
 0x6a4   : > { %v2696_v39 = vadd.f32 %v2669_v40, %v2592_v54  ;;  %v2877_v28 = vsel %vm576_vm2, %v2858_v46, %v7869_v36 }
 0x6a5   : > { %v2698_v52 = vadd.f32 %v2671_v41, %v2594_v57  ;;  %v2699_v13 = vadd.f32 %v2672_v20, %v2595_v9  ;;  %v2905_v23 = vadd.f32 %v2878_v8, %v2801_v26 }
 0x6a6   : > { %v2800_v16 = vadd.f32 %v2773_v53, %v2696_v39  ;;  %v3389_v53 = vld [vmem:[#allocation5 + $0x348] sm:$0xff] }
 0x6a7   : > { %v7920_v61 = vpop.permute.xlu0 %1674  ;;  %v7922_v24 = vpop.permute.xlu1 %1672  ;;  %v2802_v30 = vadd.f32 %v2775_v19, %v2698_v52  ;;  %v2803_v25 = vadd.f32 %v2776_v14, %v2699_v13  ;;  %v3381_v52 = vld [vmem:[#allocation5 + $0x308] sm:$0xff] }
 0x6a8   : > { %v2904_v43 = vadd.f32 %v2877_v28, %v2800_v16  ;;  %v4581_v13 = vpack.c.bf16 %v3384_v2, %v3381_v52  ;;  %v3393_v16 = vld [vmem:[#allocation5 + $0x368] sm:$0xff] }
 0x6a9   : > { %v2906_v34 = vadd.f32 %v2879_v50, %v2802_v30  ;;  %v2907_v15 = vadd.f32 %v2880_v63, %v2803_v25  ;;  %v3387_v50 = vld [vmem:[#allocation5 + $0x338] sm:$0xff]  ;;  %v3390_v63 = vld [vmem:[#allocation5 + $0x350] sm:$0xff]  ;;  %v3297_v52 = vld [vmem:[#allocation5 + $0x68] sm:$0xff] }
 0x6aa   : > { %4582 = vmatprep.subr.bf16.mxu0 %v4581_v13  ;;  %v4585_v30 = vpack.c.bf16 %v3390_v63, %v3387_v50  ;;  %v3287_v25 = vld [vmem:[#allocation5 + $0x18] sm:$0xff]  ;;  %v3296_v63 = vld [vmem:[#allocation5 + $0x60] sm:$0xff] }
 0x6ab   : > { %v3003_v32 = vpop.permute.xlu0 %3002  ;;  %v3001_v0 = vpop.permute.xlu1 %3000  ;;  %v3399_v13 = vld [vmem:[#allocation5 + $0x398] sm:$0xff] }
 0x6ac   : > { %v3019_v38 = vsel %vm718_vm3, %v3001_v0, %v3003_v32 }
 0x6ad   : > { %v3046_v48 = vadd.f32 %v3019_v38, %v2905_v23  ;;  %v3383_v23 = vld [vmem:[#allocation5 + $0x318] sm:$0xff]  ;;  %v3284_v38 = vld [vmem:[#allocation5] sm:$0xff] }
 0x6ae   : > { %v4583_v40 = vpack.c.bf16 %v3383_v23, %v3380_v49  ;;  %v3300_v49 = vld [vmem:[#allocation5 + $0x80] sm:$0xff]  ;;  %v3402_v23 = vld [vmem:[#allocation5 + $0x3b0] sm:$0xff] }
 0x6af   : > { %v7952_v44 = vadd.f32 %v7824_v12, %v3046_v48  ;;  %v7954_v7 = vpop.permute.xlu0 %3006  ;;  %v3005_v59 = vpop.permute.xlu1 %3004  ;;  %v3386_v48 = vld [vmem:[#allocation5 + $0x330] sm:$0xff]  ;;  %v4525_v50 = vpack.c.bf16 %v3300_v49, %v3297_v52  ;;  %v3407_v52 = vld [vmem:[#allocation5 + $0x3d8] sm:$0xff] }
 0x6b0   : > { %v3020_v21 = vsel %vm718_vm3, %v3003_v32, %v3005_v59  ;;  %v3021_v6 = vsel %vm718_vm3, %v3005_v59, %v7954_v7  ;;  %v3285_v32 = vld [vmem:[#allocation5 + $0x8] sm:$0xff]  ;;  %4584 = vmatpush1.bf16.msra.mxu0 %v4583_v40  ;;  %v4519_v59 = vpack.c.bf16 %v3287_v25, %v3284_v38  ;;  %v4587_v28 = vpack.c.bf16 %v3389_v53, %v3386_v48  ;;  %v3299_v38 = vld [vmem:[#allocation5 + $0x78] sm:$0xff]  ;;  %v3306_v53 = vld [vmem:[#allocation5 + $0xb0] sm:$0xff] }
 0x6b1   : > { %9005 = vst [vmem:[#allocation53_spill] sm:$0xff] %v7952_v44  ;;  %v8594_v4 = vmax.f32 %v7952_v44, 0.0  ;;  %v3047_v62 = vadd.f32 %v3020_v21, %v2906_v34  ;;  %v3048_v27 = vadd.f32 %v3021_v6, %v2907_v15  ;;  %v3291_v21 = vld [vmem:[#allocation5 + $0x38] sm:$0xff]  ;;  %v3294_v6 = vld [vmem:[#allocation5 + $0x50] sm:$0xff]  ;;  %4586 = vmatprep.subr.bf16.mxu0 %v4585_v30  ;;  %v4593_v30 = vpack.c.bf16 %v3402_v23, %v3399_v13  ;;  %v3401_v25 = vld [vmem:[#allocation5 + $0x3a8] sm:$0xff] }
 0x6b2   : > { %v3303_v48 = vld [vmem:[#allocation5 + $0x98] sm:$0xff]  ;;  %v3414_v13 = vld [vmem:[#allocation5 + $0x410] sm:$0xff] }
 0x6b3   : > { %v7963_v41 = vadd.f32 %v7824_v12, %v3047_v62  ;;  %v7966_v20 = vadd.f32 %v7824_v12, %v3048_v27  ;;  %v7968_v8 = vpop.permute.xlu0 %1545  ;;  %v2999_v36 = vpop.permute.xlu1 %2998  ;;  %v4521_v62 = vpack.c.bf16 %v3294_v6, %v3291_v21  ;;  %v3396_v27 = vld [vmem:[#allocation5 + $0x380] sm:$0xff]  ;;  %v4529_v6 = vpack.c.bf16 %v3306_v53, %v3303_v48  ;;  %v3411_v49 = vld [vmem:[#allocation5 + $0x3f8] sm:$0xff]  ;;  %v3410_v53 = vld [vmem:[#allocation5 + $0x3f0] sm:$0xff] }
 0x6b4   : > { %v3018_v46 = vsel %vm718_vm3, %v2999_v36, %v3001_v0  ;;  %v3288_v0 = vld [vmem:[#allocation5 + $0x20] sm:$0xff]  ;;  %v3293_v36 = vld [vmem:[#allocation5 + $0x48] sm:$0xff]  ;;  %4588 = vmatpush1.bf16.msra.mxu0 %v4587_v28 }
 0x6b5   : > { %9006 = vst [vmem:[#allocation51_spill] sm:$0xff] %v7963_v41  ;;  %9007 = vst [vmem:[#allocation52_spill] sm:$0xff] %v7966_v20  ;;  %v8592_v5 = vmax.f32 %v7963_v41, 0.0  ;;  %v8591_v42 = vmax.f32 %v7966_v20, 0.0  ;;  %v3045_v57 = vadd.f32 %v3018_v46, %v2904_v43  ;;  %v4517_v54 = vpack.c.bf16 %v3288_v0, %v3285_v32  ;;  %v3290_v43 = vld [vmem:[#allocation5 + $0x30] sm:$0xff]  ;;  %v3408_v21 = vld [vmem:[#allocation5 + $0x3e0] sm:$0xff] }
 0x6b6   : > { %v4589_v46 = vpack.c.bf16 %v3396_v27, %v3393_v16  ;;  %v4523_v2 = vpack.c.bf16 %v3293_v36, %v3290_v43  ;;  %v3302_v16 = vld [vmem:[#allocation5 + $0x90] sm:$0xff]  ;;  %v3309_v36 = vld [vmem:[#allocation5 + $0xc8] sm:$0xff]  ;;  %v3432_v20 = vld [vmem:[#allocation5 + $0x4a0] sm:$0xff] }
 0x6b7   : > { %v7974_v9 = vadd.f32 %v7824_v12, %v3045_v57  ;;  %v7976_v26 = vpop.permute.xlu0 %1789  ;;  %v7978_v19 = vpop.permute.xlu1 %1787  ;;  %v5013_v14 = vpack.i.bf16 %v8592_v5, %v8594_v4  ;;  %4518 = vmatprep.subr.bf16.mxu1 %v4517_v54  ;;  %v3392_v57 = vld [vmem:[#allocation5 + $0x360] sm:$0xff]  ;;  %v3398_v54 = vld [vmem:[#allocation5 + $0x390] sm:$0xff]  ;;  %v3323_v4 = vld [vmem:[#allocation5 + $0x138] sm:$0xff] }
 0x6b8   : > { %4520 = vmatpush1.bf16.msra.mxu1 %v4519_v59  ;;  %4590 = vmatprep.subr.bf16.mxu0 %v4589_v46  ;;  %v3405_v59 = vld [vmem:[#allocation5 + $0x3c8] sm:$0xff]  ;;  %v4595_v43 = vpack.c.bf16 %v3401_v25, %v3398_v54  ;;  %v3312_v46 = vld [vmem:[#allocation5 + $0xe0] sm:$0xff]  ;;  %v3315_v54 = vld [vmem:[#allocation5 + $0xf8] sm:$0xff] }
 0x6b9   : > { %9008 = vst [vmem:[#allocation55_spill] sm:$0xff] %v7974_v9  ;;  %v8593_v22 = vmax.f32 %v7974_v9, 0.0  ;;  %5014 = vrot.lane.b32.xlu1 %v5013_v14, %s5142_s27  ;;  %v3395_v14 = vld [vmem:[#allocation5 + $0x378] sm:$0xff]  ;;  %4522 = vmatprep.subr.bf16.mxu1 %v4521_v62  ;;  %v3305_v62 = vld [vmem:[#allocation5 + $0xa8] sm:$0xff]  ;;  %v4533_v23 = vpack.c.bf16 %v3312_v46, %v3309_v36  ;;  %v3318_v25 = vld [vmem:[#allocation5 + $0x110] sm:$0xff] }
 0x6ba   : > { %v4591_v40 = vpack.c.bf16 %v3395_v14, %v3392_v57  ;;  %v4597_v57 = vpack.c.bf16 %v3408_v21, %v3405_v59  ;;  %v3404_v14 = vld [vmem:[#allocation5 + $0x3c0] sm:$0xff]  ;;  %v3413_v59 = vld [vmem:[#allocation5 + $0x408] sm:$0xff]  ;;  %v9013_v41 = vld [vmem:[#allocation111_spill] sm:$0xff] }
 0x6bb   : > { %v7986_v39 = vpop.permute.xlu0 %1902  ;;  %v7988_v34 = vpop.permute.xlu1 %1660  ;;  %v5018_v15 = vpack.i.bf16 %v8593_v22, %v8591_v42  ;;  %v3417_v21 = vld [vmem:[#allocation5 + $0x428] sm:$0xff]  ;;  %v3320_v22 = vld [vmem:[#allocation5 + $0x120] sm:$0xff] }
 0x6bc   : > { %4524 = vmatpush1.bf16.msra.mxu1 %v4523_v2  ;;  %4592 = vmatpush1.bf16.msra.mxu0 %v4591_v40  ;;  %v4531_v2 = vpack.c.bf16 %v3305_v62, %v3302_v16  ;;  %v4599_v40 = vpack.c.bf16 %v3407_v52, %v3404_v14  ;;  %v3420_v16 = vld [vmem:[#allocation5 + $0x440] sm:$0xff]  ;;  %v3314_v62 = vld [vmem:[#allocation5 + $0xf0] sm:$0xff]  ;;  %v3317_v36 = vld [vmem:[#allocation5 + $0x108] sm:$0xff] }
 0x6bd   : > { %5019 = vrot.lane.b32.xlu0 %v5018_v15, %s5142_s27  ;;  %v4527_v15 = vpack.c.bf16 %v3299_v38, %v3296_v63  ;;  %4526 = vmatprep.subr.bf16.mxu1 %v4525_v50  ;;  %v3308_v50 = vld [vmem:[#allocation5 + $0xc0] sm:$0xff]  ;;  %v3311_v63 = vld [vmem:[#allocation5 + $0xd8] sm:$0xff]  ;;  %v3321_v14 = vld [vmem:[#allocation5 + $0x128] sm:$0xff] }
 0x6be   : > { %4594 = vmatprep.subr.bf16.mxu0 %v4593_v30  ;;  %v4601_v30 = vpack.c.bf16 %v3414_v13, %v3411_v49  ;;  %v3324_v52 = vld [vmem:[#allocation5 + $0x140] sm:$0xff]  ;;  %v3419_v13 = vld [vmem:[#allocation5 + $0x438] sm:$0xff]  ;;  %v3329_v9 = vld [vmem:[#allocation5 + $0x168] sm:$0xff] }
 0x6bf   : > { %v7995_v32 = vpop.permute.xlu0 %1775  ;;  %v7997_v0 = vpop.permute.xlu1 %1904  ;;  %v3416_v49 = vld [vmem:[#allocation5 + $0x420] sm:$0xff]  ;;  %v4541_v5 = vpack.c.bf16 %v3324_v52, %v3321_v14  ;;  %v4543_v52 = vpack.c.bf16 %v3323_v4, %v3320_v22  ;;  %v9014_v4 = vld [vmem:[#allocation116_spill] sm:$0xff] }
 0x6c0   : > { %4528 = vmatpush1.bf16.msra.mxu1 %v4527_v15  ;;  %4596 = vmatpush1.bf16.msra.mxu0 %v4595_v43  ;;  %v4535_v15 = vpack.c.bf16 %v3311_v63, %v3308_v50  ;;  %v4603_v43 = vpack.c.bf16 %v3413_v59, %v3410_v53  ;;  %v3423_v50 = vld [vmem:[#allocation5 + $0x458] sm:$0xff]  ;;  %v3426_v63 = vld [vmem:[#allocation5 + $0x470] sm:$0xff]  ;;  %v1685_v22 = vsel %vm1678_vm11, %v9014_v4, %v7988_v34 }
 0x6c1   : > { %4530 = vmatprep.subr.bf16.mxu1 %v4529_v6  ;;  %4598 = vmatprep.subr.bf16.mxu0 %v4597_v57  ;;  %v4537_v6 = vpack.c.bf16 %v3318_v25, %v3315_v54  ;;  %v4605_v57 = vpack.c.bf16 %v3420_v16, %v3417_v21  ;;  %v9010_v54 = vld [vmem:[#allocation70_spill] sm:$0xff]  ;;  %v3327_v59 = vld [vmem:[#allocation5 + $0x158] sm:$0xff]  ;;  %v3330_v21 = vld [vmem:[#allocation5 + $0x170] sm:$0xff] }
 0x6c2   : > { %v9017_v4 = vld [vmem:[#allocation140_spill] sm:$0xff] }
 0x6c3   : > { %v7999_v27 = vpop.permute.xlu0 %2019  ;;  %v8001_v28 = vpop.permute.xlu1 %2017 }
 0x6c4   : > { %4532 = vmatpush1.bf16.msra.mxu1 %v4531_v2  ;;  %4600 = vmatpush1.bf16.msra.mxu0 %v4599_v40  ;;  %v4539_v2 = vpack.c.bf16 %v3317_v36, %v3314_v62  ;;  %v4609_v62 = vpack.c.bf16 %v3426_v63, %v3423_v50  ;;  %v3422_v36 = vld [vmem:[#allocation5 + $0x450] sm:$0xff]  ;;  %v3333_v63 = vld [vmem:[#allocation5 + $0x188] sm:$0xff] }
 0x6c5   : > { %4534 = vmatprep.subr.bf16.mxu1 %v4533_v23  ;;  %4602 = vmatprep.subr.bf16.mxu0 %v4601_v30  ;;  %v9009_v23 = vld [vmem:[#allocation71_spill] sm:$0xff]  ;;  %v4607_v30 = vpack.c.bf16 %v3419_v13, %v3416_v49  ;;  %v4545_v49 = vpack.c.bf16 %v3330_v21, %v3327_v59  ;;  %v3435_v59 = vld [vmem:[#allocation5 + $0x4b8] sm:$0xff] }
 0x6c6   : > { %v1340_v25 = vsel %vm1333_vm8, %v9010_v54, %v9009_v23  ;;  %v3425_v23 = vld [vmem:[#allocation5 + $0x468] sm:$0xff]  ;;  %v3326_v13 = vld [vmem:[#allocation5 + $0x150] sm:$0xff] }
 0x6c7   : > { %v8003_v38 = vpop.permute.xlu0 %2132  ;;  %v8005_v48 = vpop.permute.xlu1 %1890  ;;  %v3429_v54 = vld [vmem:[#allocation5 + $0x488] sm:$0xff]  ;;  %v4611_v50 = vpack.c.bf16 %v3425_v23, %v3422_v36  ;;  %v3438_v21 = vld [vmem:[#allocation5 + $0x4d0] sm:$0xff]  ;;  %v3332_v23 = vld [vmem:[#allocation5 + $0x180] sm:$0xff] }
 0x6c8   : > { %4536 = vmatpush1.bf16.msra.mxu1 %v4535_v15  ;;  %4604 = vmatpush1.bf16.msra.mxu0 %v4603_v43  ;;  %v9011_v15 = vld [vmem:[#allocation106_spill] sm:$0xff]  ;;  %v1570_v43 = vsel %vm1563_vm10, %v9013_v41, %v7968_v8  ;;  %v3431_v41 = vld [vmem:[#allocation5 + $0x498] sm:$0xff] }
 0x6c9   : > { %4538 = vmatprep.subr.bf16.mxu1 %v4537_v6  ;;  %v1455_v16 = vsel %vm1448_vm9, %v9011_v15, %v7905_v18  ;;  %4606 = vmatprep.subr.bf16.mxu0 %v4605_v57  ;;  %v9012_v6 = vld [vmem:[#allocation47_spill] sm:$0xff]  ;;  %v3428_v15 = vld [vmem:[#allocation5 + $0x480] sm:$0xff] }
 0x6ca   : > { %v1368_v14 = vadd.f32 %v1340_v25, %v9012_v6  ;;  %v3336_v25 = vld [vmem:[#allocation5 + $0x1a0] sm:$0xff]  ;;  %v3335_v6 = vld [vmem:[#allocation5 + $0x198] sm:$0xff] }
 0x6cb   : > { %v8007_v46 = vpop.permute.xlu0 %2005  ;;  %v8009_v42 = vpop.permute.xlu1 %2134  ;;  %v4549_v36 = vpack.c.bf16 %v3336_v25, %v3333_v63  ;;  %v3441_v63 = vld [vmem:[#allocation5 + $0x4e8] sm:$0xff]  ;;  %v3444_v25 = vld [vmem:[#allocation5 + $0x500] sm:$0xff] }
 0x6cc   : > { %4540 = vmatpush1.bf16.msra.mxu1 %v4539_v2  ;;  %v1483_v44 = vadd.f32 %v1455_v16, %v1368_v14  ;;  %4608 = vmatpush1.bf16.msra.mxu0 %v4607_v30  ;;  %v4613_v2 = vpack.c.bf16 %v3432_v20, %v3429_v54  ;;  %v9015_v16 = vld [vmem:[#allocation121_spill] sm:$0xff]  ;;  %v4615_v20 = vpack.c.bf16 %v3431_v41, %v3428_v15  ;;  %v3338_v15 = vld [vmem:[#allocation5 + $0x1b0] sm:$0xff]  ;;  %v3341_v41 = vld [vmem:[#allocation5 + $0x1c8] sm:$0xff] }
 0x6cd   : > { %4542 = vmatprep.subr.bf16.mxu1 %v4541_v5  ;;  %4610 = vmatprep.subr.bf16.mxu0 %v4609_v62  ;;  %v4547_v5 = vpack.c.bf16 %v3329_v9, %v3326_v13  ;;  %v1800_v30 = vsel %vm1793_vm12, %v9015_v16, %v7995_v32  ;;  %v3339_v62 = vld [vmem:[#allocation5 + $0x1b8] sm:$0xff]  ;;  %v9016_v9 = vld [vmem:[#allocation127_spill] sm:$0xff]  ;;  %v4617_v54 = vpack.c.bf16 %v3438_v21, %v3435_v59  ;;  %v3437_v32 = vld [vmem:[#allocation5 + $0x4c8] sm:$0xff] }
 0x6ce   : > { %v1598_v8 = vadd.f32 %v1570_v43, %v1483_v44  ;;  %v3342_v44 = vld [vmem:[#allocation5 + $0x1d0] sm:$0xff]  ;;  %v4551_v13 = vpack.c.bf16 %v3335_v6, %v3332_v23  ;;  %v3345_v59 = vld [vmem:[#allocation5 + $0x1e8] sm:$0xff]  ;;  %v1690_v21 = vsel %vm1678_vm11, %v7514_v29, %v7922_v24  ;;  %v4621_v23 = vpack.c.bf16 %v3444_v25, %v3441_v63  ;;  %v3440_v6 = vld [vmem:[#allocation5 + $0x4e0] sm:$0xff] }
 0x6cf   : > { %v8014_v40 = vpop.permute.xlu0 %2249  ;;  %v8016_v53 = vpop.permute.xlu1 %2247  ;;  %v3434_v43 = vld [vmem:[#allocation5 + $0x4b0] sm:$0xff]  ;;  %v1805_v29 = vsel %vm1793_vm12, %v7508_v47, %v7978_v19 }
 0x6d0   : > { %4544 = vmatpush1.bf16.msra.mxu1 %v4543_v52  ;;  %v1713_v14 = vadd.f32 %v1685_v22, %v1598_v8  ;;  %4612 = vmatpush1.bf16.msra.mxu0 %v4611_v50  ;;  %v1915_v52 = vsel %vm1908_vm13, %v9016_v9, %v8005_v48  ;;  %v2030_v50 = vsel %vm2023_vm14, %v9017_v4, %v8007_v46  ;;  %v3450_v9 = vld [vmem:[#allocation5 + $0x530] sm:$0xff] }
 0x6d1   : > { %4546 = vmatprep.subr.bf16.mxu1 %v4545_v49  ;;  %4614 = vmatprep.subr.bf16.mxu0 %v4613_v2  ;;  %v4553_v22 = vpack.c.bf16 %v3342_v44, %v3339_v62  ;;  %v4619_v2 = vpack.c.bf16 %v3437_v32, %v3434_v43  ;;  %v1691_v46 = vsel %vm1678_vm11, %v7922_v24, %v7920_v61  ;;  %v3447_v44 = vld [vmem:[#allocation5 + $0x518] sm:$0xff]  ;;  %v3344_v43 = vld [vmem:[#allocation5 + $0x1e0] sm:$0xff] }
 0x6d2   : > { %v1828_v49 = vadd.f32 %v1800_v30, %v1713_v14  ;;  %v9018_v30 = vld [vmem:[#allocation144_spill] sm:$0xff]  ;;  %v1806_v24 = vsel %vm1793_vm12, %v7978_v19, %v7976_v26  ;;  %v1921_v19 = vsel %vm1908_vm13, %v7986_v39, %v7997_v0 }
 0x6d3   : > { %v8025_v18 = vpop.permute.xlu0 %2362  ;;  %v2121_v57 = vpop.permute.xlu1 %2120  ;;  %v3443_v14 = vld [vmem:[#allocation5 + $0x4f8] sm:$0xff] }
 0x6d4   : > { %4548 = vmatpush1.bf16.msra.mxu1 %v4547_v5  ;;  %v1943_v8 = vadd.f32 %v1915_v52, %v1828_v49  ;;  %4616 = vmatpush1.bf16.msra.mxu0 %v4615_v20  ;;  %v3348_v5 = vld [vmem:[#allocation5 + $0x200] sm:$0xff]  ;;  %v4555_v20 = vpack.c.bf16 %v3341_v41, %v3338_v15  ;;  %v3347_v32 = vld [vmem:[#allocation5 + $0x1f8] sm:$0xff]  ;;  %v1718_v49 = vadd.f32 %v1690_v21, %v7856_v60  ;;  %v3354_v15 = vld [vmem:[#allocation5 + $0x230] sm:$0xff] }
 0x6d5   : > { %4550 = vmatprep.subr.bf16.mxu1 %v4549_v36  ;;  %v2145_v36 = vsel %vm2138_vm15, %v9018_v30, %v2121_v57  ;;  %4618 = vmatprep.subr.bf16.mxu0 %v4617_v54  ;;  %v9019_v52 = vld [vmem:[#allocation153_spill] sm:$0xff]  ;;  %v4557_v54 = vpack.c.bf16 %v3348_v5, %v3345_v59  ;;  %v4623_v47 = vpack.c.bf16 %v3443_v14, %v3440_v6  ;;  %v3446_v41 = vld [vmem:[#allocation5 + $0x510] sm:$0xff] }
 0x6d6   : > { %v2058_v62 = vadd.f32 %v2030_v50, %v1943_v8  ;;  %v3351_v50 = vld [vmem:[#allocation5 + $0x218] sm:$0xff]  ;;  %v3449_v8 = vld [vmem:[#allocation5 + $0x528] sm:$0xff]  ;;  %v1833_v59 = vadd.f32 %v1805_v29, %v1718_v49  ;;  %v4559_v21 = vpack.c.bf16 %v3347_v32, %v3344_v43  ;;  %v3456_v30 = vld [vmem:[#allocation5 + $0x560] sm:$0xff] }
 0x6d7   : > { %v2236_v12 = vpop.permute.xlu0 %2235  ;;  %v8033_v34 = vpop.permute.xlu1 %2364  ;;  %v4561_v14 = vpack.c.bf16 %v3354_v15, %v3351_v50  ;;  %v9023_v43 = vld [vmem:[#allocation23_spill] sm:$0xff]  ;;  %v3452_v49 = vld [vmem:[#allocation5 + $0x540] sm:$0xff] }
 0x6d8   : > { %4552 = vmatpush1.bf16.msra.mxu1 %v4551_v13  ;;  %v2260_v57 = vsel %vm2253_vm5, %v9019_v52, %v2236_v12  ;;  %v1719_v13 = vadd.f32 %v1691_v46, %v7858_v33  ;;  %v2173_v63 = vadd.f32 %v2145_v36, %v2058_v62  ;;  %4620 = vmatpush1.bf16.msra.mxu0 %v4619_v2  ;;  %v3453_v46 = vld [vmem:[#allocation5 + $0x548] sm:$0xff]  ;;  %v9021_v36 = vld [vmem:[#allocation152_spill] sm:$0xff]  ;;  %v3350_v62 = vld [vmem:[#allocation5 + $0x210] sm:$0xff] }
 0x6d9   : > { %4554 = vmatprep.subr.bf16.mxu1 %v4553_v22  ;;  %v1920_v12 = vsel %vm1908_vm13, %v8991_v55, %v7986_v39  ;;  %v9020_v22 = vld [vmem:[#allocation31_spill] sm:$0xff]  ;;  %4622 = vmatprep.subr.bf16.mxu0 %v4621_v23  ;;  %v4625_v33 = vpack.c.bf16 %v3450_v9, %v3447_v44  ;;  %v2035_v55 = vsel %vm2023_vm14, %v8994_v17, %v8001_v28  ;;  %v9022_v23 = vld [vmem:[#allocation18_spill] sm:$0xff] }
 0x6da   : > { %v1834_v2 = vadd.f32 %v1806_v24, %v1719_v13  ;;  %v2288_v5 = vadd.f32 %v2260_v57, %v2173_v63  ;;  %v2036_v39 = vsel %vm2023_vm14, %v8001_v28, %v7999_v27  ;;  %v2577_v6 = vmul.f32 %v9022_v23, %v9021_v36  ;;  %v3353_v44 = vld [vmem:[#allocation5 + $0x228] sm:$0xff]  ;;  %v3455_v13 = vld [vmem:[#allocation5 + $0x558] sm:$0xff] }
 0x6db   : > { %v8041_v16 = vpop.permute.xlu0 %2479  ;;  %v8043_v48 = vpop.permute.xlu1 %2477  ;;  %v1948_v9 = vadd.f32 %v1920_v12, %v1833_v59  ;;  %v4627_v57 = vpack.c.bf16 %v3449_v8, %v3446_v41  ;;  %v2150_v17 = vsel %vm2138_vm15, %v8996_v58, %v8003_v38  ;;  %v2151_v28 = vsel %vm2138_vm15, %v8003_v38, %v8009_v42  ;;  %v9024_v59 = vld [vmem:[#allocation24_spill] sm:$0xff] }
 0x6dc   : > { %4556 = vmatpush1.bf16.msra.mxu1 %v4555_v20  ;;  %v1949_v20 = vadd.f32 %v1921_v19, %v1834_v2  ;;  %4624 = vmatpush1.bf16.msra.mxu0 %v4623_v47  ;;  %v4629_v32 = vpack.c.bf16 %v3456_v30, %v3453_v46  ;;  %v4563_v47 = vpack.c.bf16 %v3353_v44, %v3350_v62  ;;  %v9025_v30 = vld [vmem:[#allocation35_spill] sm:$0xff]  ;;  %v9027_v44 = vld [vmem:[#allocation16_spill] sm:$0xff] }
 0x6dd   : > { %4558 = vmatprep.subr.bf16.mxu1 %v4557_v54  ;;  %4626 = vmatprep.subr.bf16.mxu0 %v4625_v33  ;;  %v2063_v63 = vadd.f32 %v2035_v55, %v1948_v9  ;;  %v2265_v58 = vsel %vm2253_vm5, %v7648_v10, %v8016_v53  ;;  %v2266_v38 = vsel %vm2253_vm5, %v8016_v53, %v8014_v40 }
 0x6de   : > { %v4631_v33 = vpack.c.bf16 %v3455_v13, %v3452_v49  ;;  %v2380_v41 = vsel %vm2368_vm6, %v7685_v51, %v8025_v18  ;;  %v2381_v10 = vsel %vm2368_vm6, %v8025_v18, %v8033_v34  ;;  %v2582_v9 = vmul.f32 %v9027_v44, %v8997_v56  ;;  %v3461_v44 = vld [vmem:[#allocation5 + $0x588] sm:$0xff] }
 0x6df   : > { %v8063_v25 = vpop.permute.xlu0 %1331  ;;  %v2351_v4 = vpop.permute.xlu1 %2350  ;;  %v2178_v15 = vadd.f32 %v2150_v17, %v2063_v63 }
 0x6e0   : > { %v2375_v60 = vsel %vm2368_vm6, %v9020_v22, %v2351_v4  ;;  %v2064_v4 = vadd.f32 %v2036_v39, %v1949_v20  ;;  %4560 = vmatpush1.bf16.msra.mxu1 %v4559_v21  ;;  %4628 = vmatpush1.bf16.msra.mxu0 %v4627_v57  ;;  %v2496_v21 = vsel %vm2483_vm7, %v8043_v48, %v8041_v16 }
 0x6e1   : > { %v2403_v29 = vadd.f32 %v2375_v60, %v2288_v5  ;;  %4562 = vmatprep.subr.bf16.mxu1 %v4561_v14  ;;  %4630 = vmatprep.subr.bf16.mxu0 %v4629_v32  ;;  %v2293_v8 = vadd.f32 %v2265_v58, %v2178_v15  ;;  %v2495_v5 = vsel %vm2483_vm7, %v7707_v45, %v8043_v48  ;;  %v9026_v14 = vld [vmem:[#allocation41_spill] sm:$0xff]  ;;  %v9028_v45 = vld [vmem:[#allocation30_spill] sm:$0xff] }
 0x6e2   : > { %v2179_v12 = vadd.f32 %v2151_v28, %v2064_v4  ;;  %v1347_v17 = vsel %vm1333_vm8, %v8975_v31, %v8063_v25  ;;  %v9030_v32 = vld [vmem:[#allocation29_spill] sm:$0xff]  ;;  %v9031_v31 = vld [vmem:[#allocation68_spill] sm:$0xff] }
 0x6e3   : > { %v2660_v24 = vpop.permute.xlu0 %2659  ;;  %v2466_v52 = vpop.permute.xlu1 %2465  ;;  %v2408_v46 = vadd.f32 %v2380_v41, %v2293_v8  ;;  %v1375_v25 = vadd.f32 %v1347_v17, %v9031_v31 }
 0x6e4   : > { %v2490_v54 = vsel %vm2483_vm7, %v9023_v43, %v2466_v52  ;;  %v2294_v53 = vadd.f32 %v2266_v38, %v2179_v12  ;;  %4564 = vmatpush1.bf16.msra.mxu1 %v4563_v47  ;;  %4632 = vmatpush1.bf16.msra.mxu0 %v4631_v33  ;;  %v2673_v28 = vsel %vm366_vm0, %v9001_v37, %v2660_v24 }
 0x6e5   : > { %v2518_v50 = vadd.f32 %v2490_v54, %v2403_v29  ;;  %v2523_v36 = vadd.f32 %v2495_v5, %v2408_v46  ;;  %v9029_v29 = vld [vmem:[#allocation15_spill] sm:$0xff] }
 0x6e6   : > { %v2409_v51 = vadd.f32 %v2381_v10, %v2294_v53  ;;  %v2583_v48 = vmul.f32 %v9029_v29, %v8997_v56 }
 0x6e7   : > { %v2591_v19 = vadd.f32 %v2577_v6, %v2518_v50  ;;  %v1447_v22 = vpop.permute.xlu0 %1446  ;;  %v8095_v60 = vpop.permute.xlu1 %2661  ;;  %v2596_v54 = vadd.f32 %v2582_v9, %v2523_v36 }
 0x6e8   : > { %v2524_v6 = vadd.f32 %v2496_v21, %v2409_v51  ;;  %v2674_v43 = vsel %vm366_vm0, %v2660_v24, %v8095_v60  ;;  %v1462_v63 = vsel %vm1448_vm9, %v7759_v35, %v1447_v22  ;;  %v3462_v51 = vld [vmem:[#allocation5 + $0x590] sm:$0xff] }
 0x6e9   : > { %v2695_v2 = vadd.f32 %v9024_v59, %v2591_v19  ;;  %v2700_v47 = vadd.f32 %v2673_v28, %v2596_v54  ;;  %v1490_v12 = vadd.f32 %v1462_v63, %v1375_v25  ;;  %v3357_v59 = vld [vmem:[#allocation5 + $0x248] sm:$0xff]  ;;  %v3363_v63 = vld [vmem:[#allocation5 + $0x278] sm:$0xff]  ;;  %v3468_v25 = vld [vmem:[#allocation5 + $0x5c0] sm:$0xff] }
 0x6ea   : > { %v2597_v13 = vadd.f32 %v2583_v48, %v2524_v6 }
 0x6eb   : > { %v2799_v55 = vadd.f32 %v9025_v30, %v2695_v2  ;;  %v8111_v39 = vpop.permute.xlu0 %2765  ;;  %v2764_v18 = vpop.permute.xlu1 %2763  ;;  %v3360_v2 = vld [vmem:[#allocation5 + $0x260] sm:$0xff] }
 0x6ec   : > { %v2777_v4 = vsel %vm471_vm1, %v7799_v1, %v2764_v18  ;;  %v2778_v50 = vsel %vm471_vm1, %v2764_v18, %v8111_v39  ;;  %v2701_v58 = vadd.f32 %v2674_v43, %v2597_v13  ;;  %v4565_v46 = vpack.c.bf16 %v3360_v2, %v3357_v59  ;;  %v3356_v30 = vld [vmem:[#allocation5 + $0x240] sm:$0xff]  ;;  %v3474_v59 = vld [vmem:[#allocation5 + $0x5f0] sm:$0xff] }
 0x6ed   : > { %v2903_v62 = vadd.f32 %v9026_v14, %v2799_v55  ;;  %v2804_v19 = vadd.f32 %v2777_v4, %v2700_v47  ;;  %v3359_v55 = vld [vmem:[#allocation5 + $0x258] sm:$0xff]  ;;  %v3366_v4 = vld [vmem:[#allocation5 + $0x290] sm:$0xff]  ;;  %v3368_v2 = vld [vmem:[#allocation5 + $0x2a0] sm:$0xff]  ;;  %vm5180_vm1 = vmmov 1  }
 0x6ee   : > { %v2805_v22 = vadd.f32 %v2778_v50, %v2701_v58  ;;  %v4567_v14 = vpack.c.bf16 %v3359_v55, %v3356_v30  ;;  %4566 = vmatprep.subr.bf16.mxu1 %v4565_v46  ;;  %v4569_v31 = vpack.c.bf16 %v3366_v4, %v3363_v63  ;;  %v3362_v47 = vld [vmem:[#allocation5 + $0x270] sm:$0xff]  ;;  %v3473_v46 = vld [vmem:[#allocation5 + $0x5e8] sm:$0xff]  ;;  %v5054_v4 = vld [vmem:[#allocation2 + $0x18] sm:$0xff] }
 0x6ef   : > { %v3044_v20 = vadd.f32 %v9028_v45, %v2903_v62  ;;  %v2868_v52 = vpop.permute.xlu0 %2867  ;;  %v1562_v57 = vpop.permute.xlu1 %1561  ;;  %v3458_v62 = vld [vmem:[#allocation5 + $0x570] sm:$0xff] }
 0x6f0   : > { %v2881_v15 = vsel %vm576_vm2, %v7889_v11, %v2868_v52  ;;  %v1577_v35 = vsel %vm1563_vm10, %v7844_v3, %v1562_v57  ;;  %v3459_v11 = vld [vmem:[#allocation5 + $0x578] sm:$0xff]  ;;  %v4635_v9 = vpack.c.bf16 %v3461_v44, %v3458_v62  ;;  %4568 = vmatpush1.bf16.msra.mxu1 %v4567_v14 }
 0x6f1   : > { %v3070_v49 = vadd.f32 %v9030_v32, %v3044_v20  ;;  %v2908_v33 = vadd.f32 %v2881_v15, %v2804_v19  ;;  %v1605_v41 = vadd.f32 %v1577_v35, %v1490_v12  ;;  %v4633_v6 = vpack.c.bf16 %v3462_v51, %v3459_v11  ;;  %v3464_v15 = vld [vmem:[#allocation5 + $0x5a0] sm:$0xff]  ;;  %v3467_v35 = vld [vmem:[#allocation5 + $0x5b8] sm:$0xff]  ;;  %4570 = vmatprep.subr.bf16.mxu1 %v4569_v31  ;;  %v3369_v19 = vld [vmem:[#allocation5 + $0x2a8] sm:$0xff] }
 0x6f2   : > { %v4639_v12 = vpack.c.bf16 %v3467_v35, %v3464_v15  ;;  %v3371_v11 = vld [vmem:[#allocation5 + $0x2b8] sm:$0xff] }
 0x6f3   : > { %v3084_v37 = vmax.f32 %v3070_v49, 0.0  ;;  %v1677_v38 = vpop.permute.xlu0 %1676  ;;  %v8134_v24 = vpop.permute.xlu1 %2869  ;;  %4634 = vmatprep.subr.bf16.mxu0 %v4633_v6  ;;  %v3378_v6 = vld [vmem:[#allocation5 + $0x2f0] sm:$0xff] }
 0x6f4   : > { %v2882_v1 = vsel %vm576_vm2, %v2868_v52, %v8134_v24  ;;  %v1692_v3 = vsel %vm1678_vm11, %v7920_v61, %v1677_v38  ;;  %v9032_v61 = vld [vmem:[#allocation38_spill] sm:$0xff]  ;;  %4636 = vmatpush1.bf16.msra.mxu0 %v4635_v9  ;;  %v3374_v9 = vld [vmem:[#allocation5 + $0x2d0] sm:$0xff] }
 0x6f5   : > { %3098 = vst.msk [vmem:[#allocation2 + $0x30] sm:$0xff] %vm718_vm3, %v3084_v37  ;;  %v2909_v10 = vadd.f32 %v2882_v1, %v2805_v22  ;;  %v1720_v45 = vadd.f32 %v1692_v3, %v1605_v41  ;;  %v3365_v37 = vld [vmem:[#allocation5 + $0x288] sm:$0xff]  ;;  %v3372_v22 = vld [vmem:[#allocation5 + $0x2c0] sm:$0xff] }
 0x6f6   : > { %v4571_v38 = vpack.c.bf16 %v3365_v37, %v3362_v47 }
 0x6f7   : > { %v8143_v8 = vpop.permute.xlu0 %3010  ;;  %v3009_v53 = vpop.permute.xlu1 %3008 }
 0x6f8   : > { %v3022_v5 = vsel %vm718_vm3, %v7954_v7, %v3009_v53  ;;  %v3023_v21 = vsel %vm718_vm3, %v3009_v53, %v8143_v8  ;;  %4572 = vmatpush1.bf16.msra.mxu1 %v4571_v38  ;;  %v4573_v53 = vpack.c.bf16 %v3372_v22, %v3369_v19  ;;  %v5056_v19 = vld [vmem:[#allocation2 + $0x8] sm:$0xff] }
 0x6f9   : > { %v3049_v18 = vadd.f32 %v3022_v5, %v2908_v33  ;;  %v3050_v36 = vadd.f32 %v3023_v21, %v2909_v10  ;;  %v3471_v33 = vld [vmem:[#allocation5 + $0x5d8] sm:$0xff]  ;;  %v3470_v21 = vld [vmem:[#allocation5 + $0x5d0] sm:$0xff] }
 0x6fa   : > { %v4641_v5 = vpack.c.bf16 %v3474_v59, %v3471_v33  ;;  %4574 = vmatprep.subr.bf16.mxu1 %v4573_v53  ;;  %v4643_v51 = vpack.c.bf16 %v3473_v46, %v3470_v21 }
 0x6fb   : > { %v8152_v20 = vadd.f32 %v9032_v61, %v3049_v18  ;;  %v8155_v7 = vadd.f32 %v9032_v61, %v3050_v36  ;;  %v1907_v29 = vpop.permute.xlu0 %1906  ;;  %v1792_v48 = vpop.permute.xlu1 %1791  ;;  %v3375_v36 = vld [vmem:[#allocation5 + $0x2d8] sm:$0xff] }
 0x6fc   : > { %v1807_v52 = vsel %vm1793_vm12, %v7976_v26, %v1792_v48  ;;  %v1922_v43 = vsel %vm1908_vm13, %v7997_v0, %v1907_v29  ;;  %v3465_v26 = vld [vmem:[#allocation5 + $0x5a8] sm:$0xff]  ;;  %v4577_v29 = vpack.c.bf16 %v3378_v6, %v3375_v36  ;;  %v8209_v33 = vld [vmem:[#allocation2 + $0x30] sm:$0xff] }
 0x6fd   : > { %v3089_v57 = vmax.f32 %v8152_v20, 0.0  ;;  %v3090_v17 = vmax.f32 %v8155_v7, 0.0  ;;  %v1835_v28 = vadd.f32 %v1807_v52, %v1720_v45  ;;  %v4637_v0 = vpack.c.bf16 %v3468_v25, %v3465_v26  ;;  %v3377_v45 = vld [vmem:[#allocation5 + $0x2e8] sm:$0xff]  ;;  %v9035_v6 = vld [vmem:[#allocation55_spill] sm:$0xff] }
 0x6fe   : > { %v4579_v48 = vpack.c.bf16 %v3377_v45, %v3374_v9  ;;  %v3373_v7 = vld [vmem:[#allocation5 + $0x2c8] sm:$0xff] }
 0x6ff   : > { %v2137_v54 = vpop.permute.xlu0 %2136  ;;  %v1950_v32 = vadd.f32 %v1922_v43, %v1835_v28  ;;  %v2022_v49 = vpop.permute.xlu1 %2021  ;;  %v5023_v13 = vpack.i.bf16 %v3090_v17, %v3089_v57  ;;  %4638 = vmatprep.subr.bf16.mxu0 %v4637_v0 }
 0x700   : > { %v2037_v50 = vsel %vm2023_vm14, %v7999_v27, %v2022_v49  ;;  %v2152_v1 = vsel %vm2138_vm15, %v8009_v42, %v2137_v54  ;;  %4640 = vmatpush1.bf16.msra.mxu0 %v4639_v12  ;;  %v4575_v42 = vpack.c.bf16 %v3371_v11, %v3368_v2  ;;  %v5055_v12 = vld [vmem:[#allocation2] sm:$0xff] }
 0x701   : > { %v2065_v58 = vadd.f32 %v2037_v50, %v1950_v32  ;;  %5024 = vrot.lane.b32.xlu1 %v5023_v13, %s5142_s27  ;;  %4642 = vmatprep.subr.bf16.mxu0 %v4641_v5  ;;  %v5052_v32 = vld [vmem:[#allocation2 + $0x20] sm:$0xff]  ;;  %v5053_v13 = vld [vmem:[#allocation2 + $0x10] sm:$0xff] }
 0x702   : > { %4576 = vmatpush1.bf16.msra.mxu1 %v4575_v42 }
 0x703   : > { %v2367_v27 = vpop.permute.xlu0 %2366  ;;  %v2180_v41 = vadd.f32 %v2152_v1, %v2065_v58  ;;  %v2252_v10 = vpop.permute.xlu1 %2251  ;;  %4578 = vmatprep.subr.bf16.mxu1 %v4577_v29  ;;  %v2584_v58 = vmul.f32 %v9022_v23, %v8997_v56 }
 0x704   : > { %v2267_v3 = vsel %vm2253_vm5, %v8014_v40, %v2252_v10  ;;  %4644 = vmatpush1.bf16.msra.mxu0 %v4643_v51  ;;  %v2382_v52 = vsel %vm2368_vm6, %v8033_v34, %v2367_v27  ;;  %v3337_v10 = vld [vmem:[#allocation5 + $0x1a8] sm:$0xff] }
 0x705   : > { %v2295_v30 = vadd.f32 %v2267_v3, %v2180_v41  ;;  %v3334_v41 = vld [vmem:[#allocation5 + $0x190] sm:$0xff] }
 0x706   : > { %4580 = vmatpush1.bf16.msra.mxu1 %v4579_v48  ;;  %v4735_v53 = vpack.c.bf16 %v3337_v10, %v3334_v41  ;;  %v3477_v48 = vld [vmem:[#allocation5 + $0x608] sm:$0xff]  ;;  %v3286_v41 = vld [vmem:[#allocation5 + $0x10] sm:$0xff] }
 0x707   : > { %v8174_v55 = vpop.permute.xlu0 %5004  ;;  %v5000_v18 = vpop.permute.xlu1 %4999  ;;  %v2410_v50 = vadd.f32 %v2382_v52, %v2295_v30  ;;  %v9033_v30 = vld [vmem:[#allocation53_spill] sm:$0xff]  ;;  %v3289_v10 = vld [vmem:[#allocation5 + $0x28] sm:$0xff] }
 0x708   : > { %v5007_v14 = vunpack.i.h.bf16 %v8174_v55  ;;  %v5006_v62 = vunpack.i.l.bf16 %v8174_v55  ;;  %v5002_v40 = vunpack.i.h.bf16 %v5000_v18  ;;  %v5001_v44 = vunpack.i.l.bf16 %v5000_v18  ;;  %4736 = vmatprep.subr.bf16.mxu1 %v4735_v53  ;;  %v3480_v52 = vld [vmem:[#allocation5 + $0x620] sm:$0xff] }
 0x709   : > { %v9034_v18 = vmax.f32 %v9033_v30, 0.0  ;;  %v3292_v30 = vld [vmem:[#allocation5 + $0x40] sm:$0xff] }
 0x70a   : > { %v3166_v28 = vsel %vm366_vm0, %v5002_v40, %v5006_v62  ;;  %v3164_v43 = vsel %vm366_vm0, %v5007_v14, %v5001_v44  ;;  %v3165_v54 = vsel %vm366_vm0, %v5001_v44, %v5002_v40  ;;  %v9037_v44 = vld [vmem:[#allocation51_spill] sm:$0xff] }
 0x70b   : > { %v8185_v49 = vmax.f32 %v5052_v32, %v3166_v28  ;;  %v8187_v63 = vmax.f32 %v5053_v13, %v3164_v43  ;;  %v8189_v26 = vmax.f32 %v5054_v4, %v3165_v54  ;;  %v2482_v31 = vpop.permute.xlu1 %2481  ;;  %v5010_v34 = vpop.permute.xlu0 %5009  ;;  %v9038_v9 = vmax.f32 %v9037_v44, 0.0  ;;  %v3346_v44 = vld [vmem:[#allocation5 + $0x1f0] sm:$0xff] }
 0x70c   : > { %v2497_v25 = vsel %vm2483_vm7, %v8041_v16, %v2482_v31  ;;  %v5012_v47 = vunpack.i.h.bf16 %v5010_v34  ;;  %v5011_v37 = vunpack.i.l.bf16 %v5010_v34  ;;  %v4645_v28 = vpack.c.bf16 %v3480_v52, %v3477_v48  ;;  %v3491_v48 = vld [vmem:[#allocation5 + $0x678] sm:$0xff]  ;;  %v3349_v52 = vld [vmem:[#allocation5 + $0x208] sm:$0xff] }
 0x70d   : > { %v2525_v0 = vadd.f32 %v2497_v25, %v2410_v50  ;;  %3220 = vrot.lane.b32.xlu1 %v8187_v63, %s5146_s5  ;;  %v5028_v38 = vpack.i.bf16 %v8185_v49, %v8189_v26  ;;  %v9039_v50 = vld [vmem:[#allocation52_spill] sm:$0xff] }
 0x70e   : > { %v3162_v15 = vsel %vm366_vm0, %v5012_v47, %v5011_v37  ;;  %v3163_v35 = vsel %vm366_vm0, %v5011_v37, %v5007_v14  ;;  %v9036_v14 = vmax.f32 %v9035_v6, 0.0  ;;  %4646 = vmatprep.subr.bf16.mxu0 %v4645_v28  ;;  %v9040_v31 = vmax.f32 %v9039_v50, 0.0  ;;  %v3495_v28 = vld [vmem:[#allocation5 + $0x698] sm:$0xff] }
 0x70f   : > { %v2598_v1 = vadd.f32 %v2584_v58, %v2525_v0  ;;  %v8201_v16 = vmax.f32 %v5055_v12, %v3162_v15  ;;  %v8203_v22 = vmax.f32 %v5056_v19, %v3163_v35  ;;  %5029 = vrot.lane.b32.xlu0 %v5028_v38, %s5146_s5  ;;  %v3476_v0 = vld [vmem:[#allocation5 + $0x600] sm:$0xff]  ;;  %v3479_v35 = vld [vmem:[#allocation5 + $0x618] sm:$0xff]  ;;  %v3486_v12 = vld [vmem:[#allocation5 + $0x650] sm:$0xff]  ;;  %v4743_v50 = vpack.c.bf16 %v3349_v52, %v3346_v44 }
 0x710   : > { %v4647_v53 = vpack.c.bf16 %v3479_v35, %v3476_v0  ;;  %v3497_v0 = vld [vmem:[#allocation5 + $0x6a8] sm:$0xff]  ;;  %v3319_v52 = vld [vmem:[#allocation5 + $0x118] sm:$0xff] }
 0x711   : > { %v2702_v56 = vadd.f32 %v8095_v60, %v2598_v1  ;;  %v5033_v23 = vpack.i.bf16 %v8201_v16, %v8203_v22  ;;  %v3483_v1 = vld [vmem:[#allocation5 + $0x638] sm:$0xff]  ;;  %v3501_v35 = vld [vmem:[#allocation5 + $0x6c8] sm:$0xff] }
 0x713   : > { %v2806_v27 = vadd.f32 %v8111_v39, %v2702_v56  ;;  %3146 = vrot.lane.b32.xlu0 %v8209_v33, %s5142_s27  ;;  %5034 = vrot.lane.b32.xlu1 %v5033_v23, %s5146_s5 }
 0x715   : > { %v2910_v59 = vadd.f32 %v8134_v24, %v2806_v27 }
 0x717   : > { %v3051_v60 = vadd.f32 %v8143_v8, %v2910_v59  ;;  %v4649_v59 = vpack.c.bf16 %v3486_v12, %v3483_v1  ;;  %v3504_v1 = vld [vmem:[#allocation5 + $0x6e0] sm:$0xff] }
 0x719   : > { %v3077_v2 = vadd.f32 %v9032_v61, %v3051_v60 }
 0x71b   : > { %v3091_v11 = vmax.f32 %v3077_v2, 0.0 }
 0x71d   : > { %3105 = vst.msk [vmem:[#allocation2 + $0x68] sm:$0xff] %vm718_vm3, %v3091_v11  ;;  %vm3608_vm3 = vcmask 744448  }
 0x724   : > { %v8219_v3 = vld [vmem:[#allocation2 + $0x68] sm:$0xff] }
 0x725   : > { %3160 = vrot.lane.b32.xlu0 %v8219_v3, %s5142_s27 }
 0x72b   : > { %v5015_v39 = vpop.permute.xlu1 %5014 }
 0x72c   : > { %v5017_v5 = vunpack.i.h.bf16 %v5015_v39  ;;  %v5016_v42 = vunpack.i.l.bf16 %v5015_v39 }
 0x72e   : > { %v3169_v46 = vsel %vm366_vm0, %v5016_v42, %v5017_v5 }
 0x72f   : > { %v5020_v21 = vpop.permute.xlu0 %5019  ;;  %v8228_v36 = vmax.f32 %v9034_v18, %v3169_v46  ;;  %v3295_v18 = vld [vmem:[#allocation5 + $0x58] sm:$0xff] }
 0x730   : > { %v5022_v24 = vunpack.i.h.bf16 %v5020_v21  ;;  %v5021_v51 = vunpack.i.l.bf16 %v5020_v21  ;;  %v5057_v21 = vld [vmem:[#allocation2 + $0x28] sm:$0xff] }
 0x732   : > { %v3168_v8 = vsel %vm366_vm0, %v5022_v24, %v5016_v42  ;;  %v3170_v61 = vsel %vm366_vm0, %v5017_v5, %v5021_v51  ;;  %v3340_v5 = vld [vmem:[#allocation5 + $0x1c0] sm:$0xff]  ;;  %v3482_v42 = vld [vmem:[#allocation5 + $0x630] sm:$0xff]  ;;  %v3489_v24 = vld [vmem:[#allocation5 + $0x668] sm:$0xff] }
 0x733   : > { %v8232_v40 = vmax.f32 %v9036_v14, %v3168_v8  ;;  %v8236_v45 = vmax.f32 %v9038_v9, %v3170_v61 }
 0x735   : > { %3230 = vrot.lane.b32.xlu0 %v8232_v40, %s5146_s5  ;;  %v5038_v29 = vpack.i.bf16 %v8236_v45, %v8228_v36 }
 0x737   : > { %5039 = vrot.lane.b32.xlu1 %v5038_v29, %s5146_s5  ;;  %v3488_v29 = vld [vmem:[#allocation5 + $0x660] sm:$0xff] }
 0x773   : > { %v8243_v43 = vpop.permute.xlu1 %5024 }
 0x774   : > { %v5027_v54 = vunpack.i.h.bf16 %v8243_v43  ;;  %v5026_v32 = vunpack.i.l.bf16 %v8243_v43 }
 0x776   : > { %v3171_v13 = vsel %vm366_vm0, %v5021_v51, %v5026_v32  ;;  %v3172_v4 = vsel %vm366_vm0, %v5026_v32, %v5027_v54  ;;  %v3492_v51 = vld [vmem:[#allocation5 + $0x680] sm:$0xff]  ;;  %v3498_v32 = vld [vmem:[#allocation5 + $0x6b0] sm:$0xff] }
 0x777   : > { %v8253_v34 = vmax.f32 %v9040_v31, %v3171_v13  ;;  %v8257_v25 = vmax.f32 %v3089_v57, %v3172_v4  ;;  %v4653_v9 = vpack.c.bf16 %v3492_v51, %v3489_v24  ;;  %v3301_v13 = vld [vmem:[#allocation5 + $0x88] sm:$0xff]  ;;  %v4655_v4 = vpack.c.bf16 %v3491_v48, %v3488_v29  ;;  %v3352_v31 = vld [vmem:[#allocation5 + $0x220] sm:$0xff]  ;;  %v3506_v51 = vld [vmem:[#allocation5 + $0x6f0] sm:$0xff] }
 0x778   : > { %v3364_v24 = vld [vmem:[#allocation5 + $0x280] sm:$0xff] }
 0x779   : > { %v5043_v47 = vpack.i.bf16 %v8257_v25, %v8253_v34  ;;  %v3316_v48 = vld [vmem:[#allocation5 + $0x100] sm:$0xff] }
 0x77b   : > { %5044 = vrot.lane.b32.xlu1 %v5043_v47, %s5146_s5  ;;  %v4657_v47 = vpack.c.bf16 %v3498_v32, %v3495_v28  ;;  %v3370_v32 = vld [vmem:[#allocation5 + $0x2b0] sm:$0xff] }
 0x77f   : > { %v3221_v37 = vpop.permute.xlu1 %3220 }
 0x781   : > { %v8262_v58 = vpop.permute.xlu0 %5029 }
 0x782   : > { %v5032_v38 = vunpack.i.h.bf16 %v8262_v58  ;;  %v5031_v15 = vunpack.i.l.bf16 %v8262_v58 }
 0x784   : > { %v3247_v20 = vsel %vm873_vm4, %v5031_v15, %v5032_v38  ;;  %v3246_v57 = vsel %vm873_vm4, %v3221_v37, %v5031_v15  ;;  %v3355_v15 = vld [vmem:[#allocation5 + $0x238] sm:$0xff] }
 0x785   : > { %v3147_v19 = vpop.permute.xlu0 %3146  ;;  %v5035_v56 = vpop.permute.xlu1 %5034  ;;  %v8271_v23 = vmax.f32 %v8189_v26, %v3247_v20  ;;  %v8274_v27 = vmax.f32 %v8187_v63, %v3246_v57  ;;  %v3485_v26 = vld [vmem:[#allocation5 + $0x648] sm:$0xff]  ;;  %v3343_v63 = vld [vmem:[#allocation5 + $0x1d8] sm:$0xff]  ;;  %v3304_v20 = vld [vmem:[#allocation5 + $0xa0] sm:$0xff] }
 0x786   : > { %v3167_v60 = vsel %vm366_vm0, %v5006_v62, %v3147_v19  ;;  %v8280_v2 = vmax.f32 %v8209_v33, %v3147_v19  ;;  %v5037_v11 = vunpack.i.h.bf16 %v5035_v56  ;;  %v5036_v39 = vunpack.i.l.bf16 %v5035_v56  ;;  %v3307_v56 = vld [vmem:[#allocation5 + $0xb8] sm:$0xff] }
 0x787   : > { %v8282_v46 = vmax.f32 %v5057_v21, %v3167_v60  ;;  %3766 = vmatprep.mubr.f32.mxu0 %v8271_v23  ;;  %v4737_v33 = vpack.c.bf16 %v3289_v10, %v3286_v41  ;;  %v4651_v6 = vpack.c.bf16 %v3485_v26, %v3482_v42  ;;  %v4739_v14 = vpack.c.bf16 %v3343_v63, %v3340_v5  ;;  %v3500_v10 = vld [vmem:[#allocation5 + $0x6c0] sm:$0xff]  ;;  %v3361_v60 = vld [vmem:[#allocation5 + $0x268] sm:$0xff]  ;;  %v3310_v42 = vld [vmem:[#allocation5 + $0xd0] sm:$0xff] }
 0x788   : > { %3767 = vmatmul.mubr.f32.vlgmr.msra.gmra.mrb[0].mxu0 %v8274_v27  ;;  %3228 = vrot.lane.b32.xlu1 %v8280_v2, %s5146_s5  ;;  %v3245_v55 = vsel %vm873_vm4, %v5036_v39, %v3221_v37  ;;  %v3244_v62 = vsel %vm873_vm4, %v5037_v11, %v5036_v39  ;;  %v3494_v37 = vld [vmem:[#allocation5 + $0x690] sm:$0xff]  ;;  %v4747_v19 = vpack.c.bf16 %v3355_v15, %v3352_v31  ;;  %v3507_v11 = vld [vmem:[#allocation5 + $0x6f8] sm:$0xff]  ;;  %v3313_v26 = vld [vmem:[#allocation5 + $0xe8] sm:$0xff] }
 0x789   : > { %3226 = vrot.lane.b32.xlu0 %v8282_v46, %s5146_s5  ;;  %v8293_v8 = vmax.f32 %v8203_v22, %v3245_v55  ;;  %v8296_v61 = vmax.f32 %v8201_v16, %v3244_v62  ;;  %4648 = vmatpush1.bf16.msra.mxu0 %v4647_v53  ;;  %v4741_v16 = vpack.c.bf16 %v3295_v18, %v3292_v30  ;;  %v3298_v22 = vld [vmem:[#allocation5 + $0x70] sm:$0xff]  ;;  %v3503_v53 = vld [vmem:[#allocation5 + $0x6d8] sm:$0xff]  ;;  %v3509_v55 = vld [vmem:[#allocation5 + $0x708] sm:$0xff] }
 0x78a   : > { %4650 = vmatprep.subr.bf16.mxu0 %v4649_v59  ;;  %v4745_v12 = vpack.c.bf16 %v3301_v13, %v3298_v22  ;;  %v4659_v57 = vpack.c.bf16 %v3497_v0, %v3494_v37  ;;  %v4661_v41 = vpack.c.bf16 %v3504_v1, %v3501_v35  ;;  %v3358_v59 = vld [vmem:[#allocation5 + $0x250] sm:$0xff]  ;;  %v4749_v5 = vpack.c.bf16 %v3307_v56, %v3304_v20  ;;  %v3513_v18 = vld [vmem:[#allocation5 + $0x728] sm:$0xff]  ;;  %v3376_v37 = vld [vmem:[#allocation5 + $0x2e0] sm:$0xff] }
 0x78b   : > { %3689 = vmatprep.mubr.f32.mxu1 %v8293_v8  ;;  %v3510_v39 = vld [vmem:[#allocation5 + $0x710] sm:$0xff]  ;;  %v4663_v21 = vpack.c.bf16 %v3503_v53, %v3500_v10  ;;  %v4751_v63 = vpack.c.bf16 %v3361_v60, %v3358_v59  ;;  %v4753_v29 = vpack.c.bf16 %v3313_v26, %v3310_v42  ;;  %v4667_v28 = vpack.c.bf16 %v3509_v55, %v3506_v51  ;;  %v3521_v35 = vld [vmem:[#allocation5 + $0x768] sm:$0xff]  ;;  %v3379_v1 = vld [vmem:[#allocation5 + $0x2f8] sm:$0xff] }
 0x78c   : > { %3690 = vmatmul.mubr.f32.vlgmr.msra.gmra.mrb[0].mxu1 %v8296_v61  ;;  %v4665_v30 = vpack.c.bf16 %v3510_v39, %v3507_v11  ;;  %v3522_v22 = vld [vmem:[#allocation5 + $0x770] sm:$0xff]  ;;  %v4757_v13 = vpack.c.bf16 %v3319_v52, %v3316_v48  ;;  %v3528_v20 = vld [vmem:[#allocation5 + $0x7a0] sm:$0xff]  ;;  %v3331_v56 = vld [vmem:[#allocation5 + $0x178] sm:$0xff]  ;;  %v4763_v10 = vpack.c.bf16 %v3379_v1, %v3376_v37 }
 0x78d   : > { %4738 = vmatpush3.bf16.msra.mxu1 %v4737_v33  ;;  %4652 = vmatpush1.bf16.msra.mxu0 %v4651_v6  ;;  %v3367_v33 = vld [vmem:[#allocation5 + $0x298] sm:$0xff]  ;;  %v3516_v6 = vld [vmem:[#allocation5 + $0x740] sm:$0xff]  ;;  %v3518_v15 = vld [vmem:[#allocation5 + $0x750] sm:$0xff] }
 0x78e   : > { %4740 = vmatprep.subr.bf16.mxu1 %v4739_v14  ;;  %4654 = vmatprep.subr.bf16.mxu0 %v4653_v9  ;;  %v4755_v43 = vpack.c.bf16 %v3367_v33, %v3364_v24  ;;  %v3430_v53 = vld [vmem:[#allocation5 + $0x490] sm:$0xff]  ;;  %v3524_v60 = vld [vmem:[#allocation5 + $0x780] sm:$0xff]  ;;  %v3527_v11 = vld [vmem:[#allocation5 + $0x798] sm:$0xff] }
 0x78f   : > { %v3433_v39 = vld [vmem:[#allocation5 + $0x4a8] sm:$0xff]  ;;  %v3534_v42 = vld [vmem:[#allocation5 + $0x7d0] sm:$0xff]  ;;  %v3540_v33 = vld [vmem:[#allocation5 + $0x800] sm:$0xff] }
 0x790   : > { %v3530_v51 = vld [vmem:[#allocation5 + $0x7b0] sm:$0xff]  ;;  %v3533_v55 = vld [vmem:[#allocation5 + $0x7c8] sm:$0xff]  ;;  %v3536_v48 = vld [vmem:[#allocation5 + $0x7e0] sm:$0xff] }
 0x791   : > { %4742 = vmatpush3.bf16.msra.mxu1 %v4741_v16  ;;  %4656 = vmatpush1.bf16.msra.mxu0 %v4655_v4  ;;  %v3512_v16 = vld [vmem:[#allocation5 + $0x720] sm:$0xff]  ;;  %v3322_v4 = vld [vmem:[#allocation5 + $0x130] sm:$0xff]  ;;  %v3539_v52 = vld [vmem:[#allocation5 + $0x7f8] sm:$0xff] }
 0x792   : > { %4744 = vmatprep.subr.bf16.mxu1 %v4743_v50  ;;  %4658 = vmatprep.subr.bf16.mxu0 %v4657_v47  ;;  %v3325_v50 = vld [vmem:[#allocation5 + $0x148] sm:$0xff]  ;;  %v4759_v47 = vpack.c.bf16 %v3373_v7, %v3370_v32  ;;  %v3546_v32 = vld [vmem:[#allocation5 + $0x830] sm:$0xff]  ;;  %v3391_v1 = vld [vmem:[#allocation5 + $0x358] sm:$0xff] }
 0x793   : > { %v3545_v37 = vld [vmem:[#allocation5 + $0x828] sm:$0xff] }
 0x795   : > { %4746 = vmatpush3.bf16.msra.mxu1 %v4745_v12  ;;  %4660 = vmatpush1.bf16.msra.mxu0 %v4659_v57  ;;  %v3525_v12 = vld [vmem:[#allocation5 + $0x788] sm:$0xff]  ;;  %v4761_v57 = vpack.c.bf16 %v3325_v50, %v3322_v4  ;;  %v3436_v4 = vld [vmem:[#allocation5 + $0x4c0] sm:$0xff] }
 0x796   : > { %4748 = vmatprep.subr.bf16.mxu1 %v4747_v19  ;;  %4662 = vmatprep.subr.bf16.mxu0 %v4661_v41  ;;  %v3328_v19 = vld [vmem:[#allocation5 + $0x160] sm:$0xff]  ;;  %v4675_v41 = vpack.c.bf16 %v3521_v35, %v3518_v15  ;;  %v4677_v59 = vpack.c.bf16 %v3528_v20, %v3525_v12  ;;  %v3442_v12 = vld [vmem:[#allocation5 + $0x4f0] sm:$0xff] }
 0x797   : > { %v3161_v62 = vpop.permute.xlu0 %3160  ;;  %v4765_v26 = vpack.c.bf16 %v3331_v56, %v3328_v19  ;;  %v3552_v15 = vld [vmem:[#allocation5 + $0x860] sm:$0xff] }
 0x798   : > { %v3173_v14 = vsel %vm366_vm0, %v5027_v54, %v3161_v62  ;;  %v8304_v44 = vmax.f32 %v8219_v3, %v3161_v62  ;;  %v4669_v54 = vpack.c.bf16 %v3516_v6, %v3513_v18  ;;  %v3515_v3 = vld [vmem:[#allocation5 + $0x738] sm:$0xff]  ;;  %v3537_v62 = vld [vmem:[#allocation5 + $0x7e8] sm:$0xff]  ;;  %v4683_v18 = vpack.c.bf16 %v3533_v55, %v3530_v51  ;;  %v3548_v56 = vld [vmem:[#allocation5 + $0x840] sm:$0xff] }
 0x799   : > { %v8308_v9 = vmax.f32 %v3090_v17, %v3173_v14  ;;  %4750 = vmatpush3.bf16.msra.mxu1 %v4749_v5  ;;  %4664 = vmatpush1.bf16.msra.mxu0 %v4663_v21  ;;  %v3519_v17 = vld [vmem:[#allocation5 + $0x758] sm:$0xff]  ;;  %v4671_v31 = vpack.c.bf16 %v3515_v3, %v3512_v16  ;;  %v4679_v21 = vpack.c.bf16 %v3527_v11, %v3524_v60  ;;  %v3394_v60 = vld [vmem:[#allocation5 + $0x370] sm:$0xff]  ;;  %v3397_v11 = vld [vmem:[#allocation5 + $0x388] sm:$0xff]  ;;  %vm3615_vm0 = vcmask 1042432  }
 0x79a   : > { %3242 = vrot.lane.b32.xlu1 %v8304_v44, %s5146_s5  ;;  %4752 = vmatprep.subr.bf16.mxu1 %v4751_v63  ;;  %v4673_v0 = vpack.c.bf16 %v3522_v22, %v3519_v17  ;;  %v3531_v5 = vld [vmem:[#allocation5 + $0x7b8] sm:$0xff]  ;;  %v4767_v63 = vpack.c.bf16 %v3433_v39, %v3430_v53  ;;  %v4687_v17 = vpack.c.bf16 %v3539_v52, %v3536_v48  ;;  %v3382_v22 = vld [vmem:[#allocation5 + $0x310] sm:$0xff]  ;;  %v3448_v39 = vld [vmem:[#allocation5 + $0x520] sm:$0xff] }
 0x79b   : > { %3240 = vrot.lane.b32.xlu0 %v8308_v9, %s5146_s5  ;;  %4666 = vmatprep.subr.bf16.mxu0 %v4665_v30  ;;  %v4681_v24 = vpack.c.bf16 %v3534_v42, %v3531_v5  ;;  %v3558_v53 = vld [vmem:[#allocation5 + $0x890] sm:$0xff]  ;;  %v3451_v42 = vld [vmem:[#allocation5 + $0x538] sm:$0xff]  ;;  %v4777_v51 = vpack.c.bf16 %v3397_v11, %v3394_v60  ;;  %v3560_v52 = vld [vmem:[#allocation5 + $0x8a0] sm:$0xff] }
 0x79c   : > { %v4779_v55 = vpack.c.bf16 %v3451_v42, %v3448_v39  ;;  %v3427_v60 = vld [vmem:[#allocation5 + $0x478] sm:$0xff]  ;;  %v3526_v11 = vld [vmem:[#allocation5 + $0x790] sm:$0xff]  ;;  %v3529_v39 = vld [vmem:[#allocation5 + $0x7a8] sm:$0xff] }
 0x79d   : > { %4754 = vmatpush3.bf16.msra.mxu1 %v4753_v29  ;;  %4668 = vmatpush1.bf16.msra.mxu0 %v4667_v28  ;;  %v4685_v29 = vpack.c.bf16 %v3540_v33, %v3537_v62  ;;  %v3400_v62 = vld [vmem:[#allocation5 + $0x3a0] sm:$0xff]  ;;  %v3403_v33 = vld [vmem:[#allocation5 + $0x3b8] sm:$0xff]  ;;  %v4799_v42 = vpack.c.bf16 %v3529_v39, %v3526_v11  ;;  %vm8351_vm2 = vmpackc.low %vm3615_vm0, %vm5180_vm1 }
 0x79e   : > { %4756 = vmatprep.subr.bf16.mxu1 %v4755_v43  ;;  %4670 = vmatprep.subr.bf16.mxu0 %v4669_v54  ;;  %v3543_v43 = vld [vmem:[#allocation5 + $0x818] sm:$0xff] }
 0x79f   : > { %v4689_v50 = vpack.c.bf16 %v3546_v32, %v3543_v43  ;;  %v3567_v43 = vld [vmem:[#allocation5 + $0x8d8] sm:$0xff]  ;;  %v3570_v32 = vld [vmem:[#allocation5 + $0x8f0] sm:$0xff] }
 0x7a1   : > { %4758 = vmatpush3.bf16.msra.mxu1 %v4757_v13  ;;  %4672 = vmatpush1.bf16.msra.mxu0 %v4671_v31  ;;  %v3385_v13 = vld [vmem:[#allocation5 + $0x328] sm:$0xff]  ;;  %v3439_v31 = vld [vmem:[#allocation5 + $0x4d8] sm:$0xff] }
 0x7a2   : > { %4760 = vmatprep.subr.bf16.mxu1 %v4759_v47  ;;  %4674 = vmatprep.subr.bf16.mxu0 %v4673_v0  ;;  %v3542_v47 = vld [vmem:[#allocation5 + $0x810] sm:$0xff]  ;;  %v3549_v0 = vld [vmem:[#allocation5 + $0x848] sm:$0xff]  ;;  %v4769_v35 = vpack.c.bf16 %v3385_v13, %v3382_v22  ;;  %v3463_v22 = vld [vmem:[#allocation5 + $0x598] sm:$0xff]  ;;  %v4705_v13 = vpack.c.bf16 %v3570_v32, %v3567_v43 }
 0x7a3   : > { %v4691_v20 = vpack.c.bf16 %v3545_v37, %v3542_v47  ;;  %v4693_v19 = vpack.c.bf16 %v3552_v15, %v3549_v0  ;;  %v3576_v47 = vld [vmem:[#allocation5 + $0x920] sm:$0xff]  ;;  %v3547_v43 = vld [vmem:[#allocation5 + $0x838] sm:$0xff] }
 0x7a4   : > { %v3412_v15 = vld [vmem:[#allocation5 + $0x400] sm:$0xff] }
 0x7a5   : > { %4762 = vmatpush3.bf16.msra.mxu1 %v4761_v57  ;;  %4676 = vmatpush1.bf16.msra.mxu0 %v4675_v41  ;;  %v3445_v57 = vld [vmem:[#allocation5 + $0x508] sm:$0xff]  ;;  %v3551_v41 = vld [vmem:[#allocation5 + $0x858] sm:$0xff] }
 0x7a6   : > { %4764 = vmatprep.subr.bf16.mxu1 %v4763_v10  ;;  %4678 = vmatprep.subr.bf16.mxu0 %v4677_v59  ;;  %v3555_v10 = vld [vmem:[#allocation5 + $0x878] sm:$0xff]  ;;  %v4695_v5 = vpack.c.bf16 %v3551_v41, %v3548_v56  ;;  %v3421_v56 = vld [vmem:[#allocation5 + $0x448] sm:$0xff]  ;;  %v3472_v41 = vld [vmem:[#allocation5 + $0x5e0] sm:$0xff] }
 0x7a7   : > { %v3231_v28 = vpop.permute.xlu0 %3230 }
 0x7a9   : > { %v8314_v30 = vpop.permute.xlu1 %5039  ;;  %4766 = vmatpush3.bf16.msra.mxu1 %v4765_v26  ;;  %4680 = vmatpush1.bf16.msra.mxu0 %v4679_v21  ;;  %v4697_v26 = vpack.c.bf16 %v3558_v53, %v3555_v10  ;;  %v3554_v21 = vld [vmem:[#allocation5 + $0x870] sm:$0xff]  ;;  %v3475_v10 = vld [vmem:[#allocation5 + $0x5f8] sm:$0xff] }
 0x7aa   : > { %v5042_v6 = vunpack.i.h.bf16 %v8314_v30  ;;  %v5041_v14 = vunpack.i.l.bf16 %v8314_v30  ;;  %4768 = vmatprep.subr.bf16.mxu1 %v4767_v63  ;;  %4682 = vmatprep.subr.bf16.mxu0 %v4681_v24  ;;  %v3557_v63 = vld [vmem:[#allocation5 + $0x888] sm:$0xff] }
 0x7ab   : > { %v3561_v24 = vld [vmem:[#allocation5 + $0x8a8] sm:$0xff] }
 0x7ac   : > { %v3251_v54 = vsel %vm873_vm4, %v5041_v14, %v5042_v6  ;;  %v3250_v16 = vsel %vm873_vm4, %v3231_v28, %v5041_v14  ;;  %v4699_v14 = vpack.c.bf16 %v3557_v63, %v3554_v21  ;;  %v3563_v28 = vld [vmem:[#allocation5 + $0x8b8] sm:$0xff]  ;;  %v3481_v21 = vld [vmem:[#allocation5 + $0x628] sm:$0xff]  ;;  %v3532_v63 = vld [vmem:[#allocation5 + $0x7c0] sm:$0xff] }
 0x7ad   : > { %v3278_v3 = vmax.f32 %v8228_v36, %v3251_v54  ;;  %v3277_v7 = vmax.f32 %v8232_v40, %v3250_v16  ;;  %4684 = vmatpush1.bf16.msra.mxu0 %v4683_v18  ;;  %v4771_v36 = vpack.c.bf16 %v3439_v31, %v3436_v4  ;;  %v3388_v40 = vld [vmem:[#allocation5 + $0x340] sm:$0xff]  ;;  %v3454_v18 = vld [vmem:[#allocation5 + $0x550] sm:$0xff]  ;;  %v4781_v54 = vpack.c.bf16 %v3403_v33, %v3400_v62  ;;  %v3573_v31 = vld [vmem:[#allocation5 + $0x908] sm:$0xff] }
 0x7ae   : > { %4686 = vmatprep.subr.bf16.mxu0 %v4685_v29  ;;  %v4773_v59 = vpack.c.bf16 %v3391_v1, %v3388_v40  ;;  %v3457_v29 = vld [vmem:[#allocation5 + $0x568] sm:$0xff]  ;;  %v3566_v4 = vld [vmem:[#allocation5 + $0x8d0] sm:$0xff]  ;;  %v3487_v62 = vld [vmem:[#allocation5 + $0x658] sm:$0xff] }
 0x7af   : > { %3695 = vmatprep.mubr.f32.mxu1 %v3278_v3  ;;  %v4783_v16 = vpack.c.bf16 %v3457_v29, %v3454_v18  ;;  %v3466_v40 = vld [vmem:[#allocation5 + $0x5b0] sm:$0xff]  ;;  %v3469_v1 = vld [vmem:[#allocation5 + $0x5c8] sm:$0xff] }
 0x7b0   : > { %3696 = vmatmul.mubr.f32.gmra.mrb[2].mxu1 %v3277_v7  ;;  %v3538_v33 = vld [vmem:[#allocation5 + $0x7f0] sm:$0xff]  ;;  %v3541_v18 = vld [vmem:[#allocation5 + $0x808] sm:$0xff] }
 0x7b1   : > { %3997 = vmatprep.mubr.f32.mxu1 %v8293_v8  ;;  %4688 = vmatpush1.bf16.msra.mxu0 %v4687_v17  ;;  %v4775_v8 = vpack.c.bf16 %v3445_v57, %v3442_v12  ;;  %v4703_v17 = vpack.c.bf16 %v3563_v28, %v3560_v52  ;;  %v4709_v12 = vpack.c.bf16 %v3576_v47, %v3573_v31  ;;  %v3493_v52 = vld [vmem:[#allocation5 + $0x688] sm:$0xff]  ;;  %v3544_v28 = vld [vmem:[#allocation5 + $0x820] sm:$0xff] }
 0x7b2   : > { %4690 = vmatprep.subr.bf16.mxu0 %v4689_v50  ;;  %v3569_v50 = vld [vmem:[#allocation5 + $0x8e8] sm:$0xff]  ;;  %v4791_v57 = vpack.c.bf16 %v3469_v1, %v3466_v40  ;;  %v4807_v29 = vpack.c.bf16 %v3541_v18, %v3538_v33  ;;  %v3514_v1 = vld [vmem:[#allocation5 + $0x730] sm:$0xff] }
 0x7b3   : > { %v3578_v33 = vld [vmem:[#allocation5 + $0x930] sm:$0xff]  ;;  %v3581_v18 = vld [vmem:[#allocation5 + $0x948] sm:$0xff] }
 0x7b4   : > { %3998 = vmatmul.mubr.f32.vlgmr.msra.gmra.mrb[4].mxu1 %v8296_v61  ;;  %v3564_v61 = vld [vmem:[#allocation5 + $0x8c0] sm:$0xff]  ;;  %v4715_v58 = vpack.c.bf16 %v3581_v18, %v3578_v33 }
 0x7b5   : > { %4770 = vmatpush3.bf16.msra.mxu1 %v4769_v35  ;;  %4002 = vmatprep.mubr.f32.mxu1 %v3278_v3  ;;  %v4701_v48 = vpack.c.bf16 %v3564_v61, %v3561_v24  ;;  %v3409_v3 = vld [vmem:[#allocation5 + $0x3e8] sm:$0xff]  ;;  %v3415_v35 = vld [vmem:[#allocation5 + $0x418] sm:$0xff] }
 0x7b6   : > { %4772 = vmatprep.subr.bf16.mxu1 %v4771_v36  ;;  %4692 = vmatpush1.bf16.msra.mxu0 %v4691_v20  ;;  %v4707_v36 = vpack.c.bf16 %v3569_v50, %v3566_v4  ;;  %v4789_v20 = vpack.c.bf16 %v3415_v35, %v3412_v15  ;;  %v3535_v24 = vld [vmem:[#allocation5 + $0x7d8] sm:$0xff]  ;;  %v3556_v4 = vld [vmem:[#allocation5 + $0x880] sm:$0xff]  ;;  %v3562_v15 = vld [vmem:[#allocation5 + $0x8b0] sm:$0xff] }
 0x7b7   : > { %4694 = vmatprep.subr.bf16.mxu0 %v4693_v19  ;;  %v3418_v19 = vld [vmem:[#allocation5 + $0x430] sm:$0xff]  ;;  %v3559_v50 = vld [vmem:[#allocation5 + $0x898] sm:$0xff]  ;;  %v3565_v35 = vld [vmem:[#allocation5 + $0x8c8] sm:$0xff] }
 0x7b8   : > { %4003 = vmatmul.mubr.f32.gmra.mrb[6].mxu1 %v3277_v7  ;;  %v3460_v7 = vld [vmem:[#allocation5 + $0x580] sm:$0xff]  ;;  %v4793_v53 = vpack.c.bf16 %v3421_v56, %v3418_v19  ;;  %v4819_v47 = vpack.c.bf16 %v3559_v50, %v3556_v4  ;;  %v4823_v40 = vpack.c.bf16 %v3565_v35, %v3562_v15  ;;  %v3606_v4 = vld [vmem:[#allocation5 + $0xa10] sm:$0x7]  ;;  %v3605_v15 = vld [vmem:[#allocation5 + $0xa08] sm:$0x7] }
 0x7b9   : > { %4774 = vmatpush3.bf16.msra.mxu1 %v4773_v59  ;;  %4072 = vmatprep.mubr.f32.mxu1 %v8271_v23  ;;  %v3406_v23 = vld [vmem:[#allocation5 + $0x3d0] sm:$0xff]  ;;  %v4787_v0 = vpack.c.bf16 %v3463_v22, %v3460_v7  ;;  %v4795_v59 = vpack.c.bf16 %v3475_v10, %v3472_v41  ;;  %v3553_v7 = vld [vmem:[#allocation5 + $0x868] sm:$0xff]  ;;  %v3520_v41 = vld [vmem:[#allocation5 + $0x760] sm:$0xff] }
 0x7ba   : > { %4776 = vmatprep.subr.bf16.mxu1 %v4775_v8  ;;  %4696 = vmatpush1.bf16.msra.mxu0 %v4695_v5  ;;  %v4785_v37 = vpack.c.bf16 %v3409_v3, %v3406_v23  ;;  %v3424_v8 = vld [vmem:[#allocation5 + $0x460] sm:$0xff]  ;;  %v3499_v23 = vld [vmem:[#allocation5 + $0x6b8] sm:$0xff]  ;;  %v3550_v3 = vld [vmem:[#allocation5 + $0x850] sm:$0xff] }
 0x7bb   : > { %4698 = vmatprep.subr.bf16.mxu0 %v4697_v26  ;;  %v4797_v5 = vpack.c.bf16 %v3427_v60, %v3424_v8  ;;  %v3478_v26 = vld [vmem:[#allocation5 + $0x610] sm:$0xff]  ;;  %v3523_v10 = vld [vmem:[#allocation5 + $0x778] sm:$0xff] }
 0x7bc   : > { %v4801_v61 = vpack.c.bf16 %v3481_v21, %v3478_v26  ;;  %v3502_v22 = vld [vmem:[#allocation5 + $0x6d0] sm:$0xff]  ;;  %v3572_v21 = vld [vmem:[#allocation5 + $0x900] sm:$0xff] }
 0x7bd   : > { %4778 = vmatpush3.bf16.msra.mxu1 %v4777_v51  ;;  %v4803_v51 = vpack.c.bf16 %v3535_v24, %v3532_v63  ;;  %v3575_v63 = vld [vmem:[#allocation5 + $0x918] sm:$0xff] }
 0x7be   : > { %4780 = vmatprep.subr.bf16.mxu1 %v4779_v55  ;;  %4700 = vmatpush1.bf16.msra.mxu0 %v4699_v14  ;;  %v3484_v55 = vld [vmem:[#allocation5 + $0x640] sm:$0xff] }
 0x7bf   : > { %4702 = vmatprep.subr.bf16.mxu0 %v4701_v48  ;;  %v4805_v14 = vpack.c.bf16 %v3487_v62, %v3484_v55  ;;  %v3490_v48 = vld [vmem:[#allocation5 + $0x670] sm:$0xff]  ;;  %v4711_v55 = vpack.c.bf16 %v3575_v63, %v3572_v21  ;;  %v3604_v21 = vld [vmem:[#allocation5 + $0xa00] sm:$0xff]  ;;  %v3607_v63 = vld [vmem:[#allocation5 + $0xa18] sm:$0x7] }
 0x7c0   : > { %v4809_v32 = vpack.c.bf16 %v3493_v52, %v3490_v48  ;;  %v3584_v48 = vld [vmem:[#allocation5 + $0x960] sm:$0xff]  ;;  %v3587_v52 = vld [vmem:[#allocation5 + $0x978] sm:$0xff] }
 0x7c1   : > { %4782 = vmatpush3.bf16.msra.mxu1 %v4781_v54  ;;  %v4811_v54 = vpack.c.bf16 %v3547_v43, %v3544_v28  ;;  %v3591_v28 = vld [vmem:[#allocation5 + $0x998] sm:$0xff] }
 0x7c2   : > { %4784 = vmatprep.subr.bf16.mxu1 %v4783_v16  ;;  %4704 = vmatpush1.bf16.msra.mxu0 %v4703_v17  ;;  %v3496_v16 = vld [vmem:[#allocation5 + $0x6a0] sm:$0xff] }
 0x7c3   : > { %4706 = vmatprep.subr.bf16.mxu0 %v4705_v13  ;;  %v4813_v17 = vpack.c.bf16 %v3499_v23, %v3496_v16  ;;  %v3505_v13 = vld [vmem:[#allocation5 + $0x6e8] sm:$0xff]  ;;  %v3600_v23 = vld [vmem:[#allocation5 + $0x9e0] sm:$0xff] }
 0x7c4   : > { %v4817_v31 = vpack.c.bf16 %v3505_v13, %v3502_v22  ;;  %v3597_v16 = vld [vmem:[#allocation5 + $0x9c8] sm:$0xff]  ;;  %v3603_v13 = vld [vmem:[#allocation5 + $0x9f8] sm:$0xff] }
 0x7c5   : > { %4786 = vmatpush3.bf16.msra.mxu1 %v4785_v37  ;;  %v3508_v37 = vld [vmem:[#allocation5 + $0x700] sm:$0xff] }
 0x7c6   : > { %4788 = vmatprep.subr.bf16.mxu1 %v4787_v0  ;;  %4708 = vmatpush1.bf16.msra.mxu0 %v4707_v36  ;;  %v3511_v0 = vld [vmem:[#allocation5 + $0x718] sm:$0xff] }
 0x7c7   : > { %4710 = vmatprep.subr.bf16.mxu0 %v4709_v12  ;;  %v4821_v36 = vpack.c.bf16 %v3511_v0, %v3508_v37  ;;  %v3517_v12 = vld [vmem:[#allocation5 + $0x748] sm:$0xff]  ;;  %v3602_v0 = vld [vmem:[#allocation5 + $0x9f0] sm:$0xff] }
 0x7c8   : > { %v4825_v19 = vpack.c.bf16 %v3517_v12, %v3514_v1  ;;  %v3574_v1 = vld [vmem:[#allocation5 + $0x910] sm:$0xff]  ;;  %v3577_v12 = vld [vmem:[#allocation5 + $0x928] sm:$0xff] }
 0x7c9   : > { %4790 = vmatpush3.bf16.msra.mxu1 %v4789_v20  ;;  %v3568_v20 = vld [vmem:[#allocation5 + $0x8e0] sm:$0xff] }
 0x7ca   : > { %4792 = vmatprep.subr.bf16.mxu1 %v4791_v57  ;;  %v3571_v57 = vld [vmem:[#allocation5 + $0x8f8] sm:$0xff] }
 0x7cb   : > { %v4827_v56 = vpack.c.bf16 %v3571_v57, %v3568_v20  ;;  %v4732_v57 = vpack.c.bf16 %v3605_v15, %v3602_v0 }
 0x7cd   : > { %4794 = vmatpush3.bf16.msra.mxu1 %v4793_v53 }
 0x7ce   : > { %4796 = vmatprep.subr.bf16.mxu1 %v4795_v59  ;;  %v4829_v59 = vpack.c.bf16 %v3523_v10, %v3520_v41 }
 0x7d1   : > { %4798 = vmatpush3.bf16.msra.mxu1 %v4797_v5 }
 0x7d2   : > { %4800 = vmatprep.subr.bf16.mxu1 %v4799_v42 }
 0x7d4   : > { %4073 = vmatmul.mubr.f32.vlgmr.msra.gmra.mrb[8].mxu1 %v8274_v27  ;;  %v4815_v27 = vpack.c.bf16 %v3553_v7, %v3550_v3  ;;  %v4725_v7 = vpack.c.bf16 %v3600_v23, %v3597_v16 }
 0x7d5   : > { %4802 = vmatpush3.bf16.msra.mxu1 %v4801_v61  ;;  %v3579_v61 = vld [vmem:[#allocation5 + $0x938] sm:$0xff] }
 0x7d6   : > { %4804 = vmatprep.subr.bf16.mxu1 %v4803_v51  ;;  %v3582_v51 = vld [vmem:[#allocation5 + $0x950] sm:$0xff] }
 0x7d7   : > { %v4713_v62 = vpack.c.bf16 %v3582_v51, %v3579_v61 }
 0x7d9   : > { %4806 = vmatpush3.bf16.msra.mxu1 %v4805_v14  ;;  %v3585_v14 = vld [vmem:[#allocation5 + $0x968] sm:$0xff] }
 0x7da   : > { %4808 = vmatprep.subr.bf16.mxu1 %v4807_v29  ;;  %v3588_v29 = vld [vmem:[#allocation5 + $0x980] sm:$0xff] }
 0x7dd   : > { %4810 = vmatpush3.bf16.msra.mxu1 %v4809_v32  ;;  %v3590_v32 = vld [vmem:[#allocation5 + $0x990] sm:$0xff] }
 0x7de   : > { %4812 = vmatprep.subr.bf16.mxu1 %v4811_v54  ;;  %v3593_v54 = vld [vmem:[#allocation5 + $0x9a8] sm:$0xff] }
 0x7df   : > { %v4723_v3 = vpack.c.bf16 %v3593_v54, %v3590_v32 }
 0x7e1   : > { %4814 = vmatpush3.bf16.msra.mxu1 %v4813_v17  ;;  %v3596_v17 = vld [vmem:[#allocation5 + $0x9c0] sm:$0xff] }
 0x7e2   : > { %4816 = vmatprep.subr.bf16.mxu1 %v4815_v27  ;;  %v3599_v27 = vld [vmem:[#allocation5 + $0x9d8] sm:$0xff] }
 0x7e5   : > { %4818 = vmatpush3.bf16.msra.mxu1 %v4817_v31  ;;  %v4727_v31 = vpack.c.bf16 %v3599_v27, %v3596_v17 }
 0x7e6   : > { %4820 = vmatprep.subr.bf16.mxu1 %v4819_v47 }
 0x7e9   : > { %4822 = vmatpush3.bf16.msra.mxu1 %v4821_v36 }
 0x7ea   : > { %4824 = vmatprep.subr.bf16.mxu1 %v4823_v40  ;;  %v4729_v40 = vpack.c.bf16 %v3606_v4, %v3603_v13 }
 0x7ed   : > { %v8328_v53 = vpop.permute.xlu1 %5044  ;;  %4826 = vmatpush3.bf16.msra.mxu1 %v4825_v19  ;;  %v4831_v19 = vpack.c.bf16 %v3577_v12, %v3574_v1 }
 0x7ee   : > { %v5047_v8 = vunpack.i.h.bf16 %v8328_v53  ;;  %v5046_v60 = vunpack.i.l.bf16 %v8328_v53  ;;  %4828 = vmatprep.subr.bf16.mxu1 %v4827_v56  ;;  %v5181_v56 = vmov 0.0   ;;  %v3586_v53 = vld [vmem:[#allocation5 + $0x970] sm:$0xff] }
 0x7f0   : > { %v3253_v11 = vsel %vm873_vm4, %v5046_v60, %v5047_v8  ;;  %v3252_v39 = vsel %vm873_vm4, %v5042_v6, %v5046_v60 }
 0x7f1   : > { %v3280_v5 = vmax.f32 %v8253_v34, %v3253_v11  ;;  %v3279_v42 = vmax.f32 %v8236_v45, %v3252_v39  ;;  %4830 = vmatpush3.bf16.msra.mxu1 %v4829_v59  ;;  %v3589_v59 = vld [vmem:[#allocation5 + $0x988] sm:$0xff]  ;;  %v3592_v11 = vld [vmem:[#allocation5 + $0x9a0] sm:$0xff]  ;;  %v3595_v39 = vld [vmem:[#allocation5 + $0x9b8] sm:$0xff] }
 0x7f2   : > { %v4839_v60 = vpack.c.bf16 %v3589_v59, %v3586_v53 }
 0x7f3   : > { %3772 = vmatprep.mubr.f32.mxu0 %v3280_v5  ;;  %4077 = vmatprep.mubr.f32.mxu1 %v3280_v5  ;;  %v3598_v5 = vld [vmem:[#allocation5 + $0x9d0] sm:$0xff] }
 0x7f4   : > { %3773 = vmatmul.mubr.f32.gmra.mrb[2].mxu0 %v3279_v42  ;;  %4078 = vmatmul.mubr.f32.gmra.mrb[10].mxu1 %v3279_v42  ;;  %v3601_v42 = vld [vmem:[#allocation5 + $0x9e8] sm:$0xff] }
 0x7fa   : > { %v8338_v26 = vpop.permute.xlu1 %3228 }
 0x7fb   : > { %v3227_v24 = vpop.permute.xlu0 %3226  ;;  %v3276_v41 = vmax.f32 %v8280_v2, %v8338_v26  ;;  %v4843_v2 = vpack.c.bf16 %v3595_v39, %v3592_v11 }
 0x7fc   : > { %v3248_v30 = vsel %vm873_vm4, %v5032_v38, %v3227_v24  ;;  %v3249_v34 = vsel %vm873_vm4, %v3227_v24, %v8338_v26  ;;  %v4717_v38 = vpack.c.bf16 %v3588_v29, %v3585_v14  ;;  %v4847_v26 = vpack.c.bf16 %v3601_v42, %v3598_v5 }
 0x7fd   : > { %v3274_v45 = vmax.f32 %v8185_v49, %v3248_v30  ;;  %v3275_v6 = vmax.f32 %v8282_v46, %v3249_v34  ;;  %v3594_v49 = vld [vmem:[#allocation5 + $0x9b0] sm:$0xff]  ;;  %v4719_v46 = vpack.c.bf16 %v3587_v52, %v3584_v48 }
 0x7fe   : > { %v4721_v43 = vpack.c.bf16 %v3594_v49, %v3591_v28 }
 0x7ff   : > { %3843 = vmatprep.mubr.f32.mxu0 %v3275_v6  ;;  %4147 = vmatprep.mubr.f32.mxu1 %v3275_v6 }
 0x800   : > { %3844 = vmatmul.mubr.f32.vlgmr.msra.gmra.mrb[0].mxu0 %v3274_v45  ;;  %4148 = vmatmul.mubr.f32.vlgmr.msra.gmra.mrb[12].mxu1 %v3274_v45 }
 0x801   : > { %4712 = vmatpush1.bf16.msra.mxu0 %v4711_v55 }
 0x802   : > { %4714 = vmatprep.subr.bf16.mxu0 %v4713_v62 }
 0x805   : > { %4716 = vmatpush1.bf16.msra.mxu0 %v4715_v58 }
 0x806   : > { %4718 = vmatprep.subr.bf16.mxu0 %v4717_v38 }
 0x809   : > { %4720 = vmatpush1.bf16.msra.mxu0 %v4719_v46 }
 0x80a   : > { %4722 = vmatprep.subr.bf16.mxu0 %v4721_v43 }
 0x80c   : > { %v3243_v22 = vpop.permute.xlu1 %3242 }
 0x80d   : > { %4724 = vmatpush1.bf16.msra.mxu0 %v4723_v3  ;;  %v3241_v50 = vpop.permute.xlu0 %3240 }
 0x80e   : > { %v3254_v47 = vsel %vm873_vm4, %v5047_v8, %v3241_v50  ;;  %v3255_v37 = vsel %vm873_vm4, %v3241_v50, %v3243_v22  ;;  %4726 = vmatprep.subr.bf16.mxu0 %v4725_v7  ;;  %v3283_v8 = vmax.f32 %v8304_v44, %v3243_v22  ;;  %v4851_v44 = vpack.c.bf16 %v3607_v63, %v3604_v21 }
 0x80f   : > { %v3281_v35 = vmax.f32 %v8257_v25, %v3254_v47  ;;  %v3282_v36 = vmax.f32 %v8308_v9, %v3255_v37  ;;  %v3580_v25 = vld [vmem:[#allocation5 + $0x940] sm:$0xff]  ;;  %v3583_v9 = vld [vmem:[#allocation5 + $0x958] sm:$0xff] }
 0x810   : > { %v4835_v10 = vpack.c.bf16 %v3583_v9, %v3580_v25 }
 0x811   : > { %4728 = vmatpush1.bf16.msra.mxu0 %v4727_v31  ;;  %3849 = vmatprep.mubr.f32.mxu0 %v3282_v36 }
 0x812   : > { %4152 = vmatprep.mubr.f32.mxu1 %v3282_v36  ;;  %3850 = vmatmul.mubr.f32.gmra.mrb[2].mxu0 %v3281_v35 }
 0x813   : > { %4153 = vmatmul.mubr.f32.gmra.mrb[14].mxu1 %v3281_v35  ;;  %4731 = vmatprep.subr.msk.bf16.mxu0 %vm8351_vm2, %v4729_v40 }
 0x814   : > { %3920 = vmatprep.mubr.f32.mxu0 %v5181_v56 }
 0x815   : > { %4734 = vmatpush1.bf16.msk.msra.mxu0 %vm8351_vm2, %v4732_v57 }
 0x816   : > { %4832 = vmatprep.subr.bf16.mxu0 %v4831_v19 }
 0x818   : > { %4347 = vmatmul.mubr.msk.f32.vlgmr.msra.gmra.mrb[0].mxu0 %vm3608_vm3, %v3276_v41 }
 0x819   : > { %4834 = vmatpush3.bf16.msra.mxu0 %v4831_v19  ;;  %3926 = vmatprep.mubr.f32.mxu0 %v5181_v56 }
 0x81a   : > { %4836 = vmatprep.subr.bf16.mxu0 %v4835_v10 }
 0x81c   : > { %4348 = vmatmul.mubr.msk.f32.gmra.mrb[2].mxu0 %vm3608_vm3, %v3283_v8 }
 0x81d   : > { %4838 = vmatpush3.bf16.msra.mxu0 %v4835_v10  ;;  %4514 = vmatprep.mubr.msk.f32.mxu0 %vm3608_vm3, %v3276_v41 }
 0x81e   : > { %4840 = vmatprep.subr.bf16.mxu0 %v4839_v60 }
 0x821   : > { %4842 = vmatpush3.bf16.msra.mxu0 %v4839_v60 }
 0x822   : > { %4844 = vmatprep.subr.bf16.mxu0 %v4843_v2 }
 0x825   : > { %4846 = vmatpush3.bf16.msra.mxu0 %v4843_v2 }
 0x826   : > { %4848 = vmatprep.subr.bf16.mxu0 %v4847_v26 }
 0x829   : > { %4850 = vmatpush3.bf16.msra.mxu0 %v4847_v26 }
 0x82a   : > { %4853 = vmatprep.subr.msk.bf16.mxu0 %vm8351_vm2, %v4851_v44 }
 0x82d   : > { %4856 = vmatpush3.bf16.msk.msra.mxu0 %vm8351_vm2, %v4851_v44 }
 0x830   : > { %4515 = vmatmul.mubr.msk.f32.vlgmr.msra.gmra.mrb[4].mxu0 %vm3608_vm3, %v3283_v8 }
 0x85f   : > { %v3691_v24 = vpop.f32.mrb[0].mxu1 }
 0x860   : > { %v3693_v61 = vpop.f32.mrb[1].mxu1 }
 0x883   : > { %v3697_v51 = vpop.f32.mrb[2].mxu1 }
 0x884   : > { %v3699_v30 = vpop.f32.mrb[3].mxu1 }
 0x887   : > { %v4394_v34 = vpop.f32.mrb[4].mxu1 }
 0x888   : > { %v4395_v45 = vpop.f32.mrb[5].mxu1 }
 0x889   : > { %v4396_v6 = vadd.f32 %v4395_v45, %v4394_v34 }
 0x88b   : > { %v4397_v55 = vpop.f32.mrb[6].mxu1 }
 0x88c   : > { %v4398_v62 = vpop.f32.mrb[7].mxu1 }
 0x88d   : > { %v4399_v33 = vadd.f32 %v4398_v62, %v4397_v55 }
 0x8a7   : > { %v4432_v18 = vpop.f32.mrb[8].mxu1 }
 0x8a8   : > { %v4433_v14 = vpop.f32.mrb[9].mxu1 }
 0x8a9   : > { %v4434_v29 = vadd.f32 %v4433_v14, %v4432_v18 }
 0x8ab   : > { %v4075_v58 = vadd.f32 %v4434_v29, %v4396_v6 }
 0x8c7   : > { %v4435_v38 = vpop.f32.mrb[10].mxu1 }
 0x8c8   : > { %v4436_v48 = vpop.f32.mrb[11].mxu1 }
 0x8c9   : > { %v4437_v52 = vadd.f32 %v4436_v48, %v4435_v38 }
 0x8cb   : > { %v4080_v28 = vadd.f32 %v4437_v52, %v4399_v33 }
 0x8d3   : > { %v4470_v49 = vpop.f32.mrb[12].mxu1 }
 0x8d4   : > { %v4471_v46 = vpop.f32.mrb[13].mxu1 }
 0x8d5   : > { %v4472_v43 = vadd.f32 %v4471_v46, %v4470_v49 }
 0x8d7   : > { %v4150_v32 = vadd.f32 %v4472_v43, %v4075_v58 }
 0x8e6   : > { %v4473_v54 = vpop.f32.mrb[14].mxu1 }
 0x8e7   : > { %v4474_v16 = vpop.f32.mrb[15].mxu1 }
 0x8e8   : > { %v4475_v23 = vadd.f32 %v4474_v16, %v4473_v54 }
 0x8ea   : > { %v4155_v3 = vadd.f32 %v4475_v23, %v4080_v28 }
 0x8eb   : > { %v3922_v7 = vpop.f32.mrb[0].mxu0 }
 0x8ec   : > { %v4857_v17 = vadd.f32 %v3922_v7, %v3691_v24  ;;  %v3924_v27 = vpop.f32.mrb[1].mxu0 }
 0x8ed   : > { %v4858_v22 = vadd.f32 %v3924_v27, %v3693_v61 }
 0x8ef   : > { %v4358_v13 = vpack.c.bf16 %v4858_v22, %v4857_v17  ;;  %v3928_v4 = vpop.f32.mrb[2].mxu0 }
 0x8f0   : > { %v4859_v50 = vadd.f32 %v3928_v4, %v3697_v51  ;;  %v3930_v31 = vpop.f32.mrb[3].mxu0 }
 0x8f1   : > { %4253 = vst [vmem:[%s224_s29] sm:$0xff] %v4358_v13  ;;  %v4860_v47 = vadd.f32 %v3930_v31, %v3699_v30 }
 0x8f3   : > { %v4360_v37 = vpack.c.bf16 %v4860_v47, %v4859_v50 }
 0x8f5   : > { %4255 = vst [vmem:[%s224_s29 + $0xc] sm:$0xff] %v4360_v37 }
 0x903   : > { %v4516_v0 = vpop.f32.mrb[4].mxu0 }
 0x904   : > { %v4230_v15 = vadd.f32 %v4516_v0, %v4155_v3  ;;  %v4224_v35 = vpop.f32.mrb[5].mxu0 }
 0x905   : > { %v4225_v36 = vadd.f32 %v4224_v35, %v4150_v32 }
 0x906   : > { %v4361_v40 = vpack.c.bf16 %v4230_v15, %v4230_v15 }
 0x907   : > { %v4359_v1 = vpack.c.bf16 %v4225_v36, %v4225_v36 }
 0x908   : > { %4256 = vst [vmem:[%s224_s29 + $0x14] sm:$0xf] %v4361_v40 }
 0x909   : > { %4254 = vst [vmem:[%s224_s29 + $0x8] sm:$0xf] %v4359_v1 }
 0x90a PF: > { %s16_s15 = sadd.s32 1, %s5128_s15  }
 0x90b   : > { %p13_p9 = scmp.ge.s32.totalorder %s16_s15, 4  }
 0x90d   :  { %15 = sbr.rel (!%p13_p9) target bundleno = 2 (0x2), region = 75 }
 0x914   :  { %4278 = vsyncpa [#allocation4], 1 }
 0x915   :  { %4280 = vsyncpa [#allocation4 + $0x1], 1 }
 0x916   :  { %4281 = vsyncpa [#allocation6], 1 }

</bundles_post_ra>
